<compile_context>
chip_gen: v5e
topology: v5e:2x2
jax: 0.10.0
libtpu: 0.0.40
codegen_flags: <defaults>
</compile_context>

<pallas_src>
import functools

import jax
import jax.numpy as jnp
import numpy as np
from jax.experimental import pallas as pl
from jax.experimental.pallas import tpu as pltpu


# ----------------------------------------------------------------------------
# Fused trunk kernel: conv1 + ReLU -> conv2 + ReLU -> global average pool
# ----------------------------------------------------------------------------
def _trunk_kernel(x_ref, w1_ref, b1_ref, w2_ref, b2_ref, mask_ref, out_ref,
                  p1_ref, p2_ref, *, img_w):
    """One grid step = one group of images, fully processed in VMEM.

      x_ref    : (per, Cin, H*W)   raw channels-major images (lane axis = H*W)
      w1_ref   : (C1, 9*Cin)       conv1 weights [out, tap*in]
      b1_ref   : (C1, 1)
      w2_ref   : (C2, 9*C1)        conv2 weights [out, tap*in]
      b2_ref   : (C2, 1)
      mask_ref : (9, 1, H*W)       1.0 where a tap reads a valid (non-pad) pixel
      out_ref  : (per, C2, 1)      pooled embeddings
      p1_ref   : VMEM (9*Cin, H*W) conv1 tap stack (scratch)
      p2_ref   : VMEM (9*C1, H*W)  conv2 tap stack (scratch)
    """
    per, cin, hw = x_ref.shape
    c1 = w1_ref.shape[0]

    # Flat spatial offset of each 3x3 tap (tap order matches mask/weight prep).
    offs = [(kh - 1) * img_w + (kw - 1) for kh in range(3) for kw in range(3)]

    for img in range(per):                       # static -> fully unrolled
        x = x_ref[img]                           # (Cin, hw)

        # ---- conv1: stack 9 rolled+masked taps -> ONE K=9*Cin matmul -------
        # roll(x, (-d) % hw)[:, p] == x[:, (p + d) % hw]; out-of-image reads
        # (including wrap-around) are zeroed by the precomputed mask.
        for t, d in enumerate(offs):
            tap = x if d == 0 else pltpu.roll(x, (-d) % hw, 1) * mask_ref[t]
            p1_ref[pl.ds(t * cin, cin), :] = tap
        a1 = jnp.dot(w1_ref[...], p1_ref[...],
                     preferred_element_type=jnp.float32)
        a1 = jnp.maximum(a1 + b1_ref[...], 0.0)  # (C1, hw)

        # ---- conv2: stack 9 rolled+masked taps -> ONE K=9*C1 matmul --------
        for t, d in enumerate(offs):
            tap = a1 if d == 0 else pltpu.roll(a1, (-d) % hw, 1) * mask_ref[t]
            p2_ref[pl.ds(t * c1, c1), :] = tap
        a2 = jnp.dot(w2_ref[...], p2_ref[...],
                     preferred_element_type=jnp.float32)
        a2 = jnp.maximum(a2 + b2_ref[...], 0.0)  # (C2, hw)

        # ---- global average pool (cross-lane reduce) -----------------------
        out_ref[img] = jnp.mean(a2, axis=1, keepdims=True)  # (C2, 1)


# ----------------------------------------------------------------------------
# Wrapper: whole backbone over a (possibly stacked) batch in one pallas_call
# ----------------------------------------------------------------------------
def siamese_trunk(x_nchw, prepped, *, groups=1):
    """Backbone for a batch of images.  x_nchw: (B, Cin, H, W) -> (B, C2, 1, 1).

    groups=1 -> single grid step (best on single-TC v5e/v6e).
    groups=2 -> one step per TensorCore on v7x (dimension_semantics=parallel).
    """
    B, cin, H, W = x_nchw.shape
    hw = H * W
    assert B % groups == 0, "batch must divide evenly into groups"
    per = B // groups

    w1p, b1p = prepped["w1p"], prepped["b1p"]
    w2p, b2p = prepped["w2p"], prepped["b2p"]
    c1, c2 = w1p.shape[0], w2p.shape[0]
    k1, k2 = w1p.shape[1], w2p.shape[1]

    # Free reshape: (B, Cin, H, W) -> (B, Cin, H*W); each image is a contiguous
    # H*W-lane block (required for the tiled boundary masks to be correct).
    x_flat = x_nchw.reshape(B, cin, hw)

    # Trace-time constant: per-tap validity masks for 'same' zero padding.
    p = np.arange(hw)
    hh, ww = p // W, p % W
    masks = np.stack([
        (((hh + kh - 1) >= 0) & ((hh + kh - 1) < H)
         & ((ww + kw - 1) >= 0) & ((ww + kw - 1) < W)).astype(np.float32)
        for kh in range(3) for kw in range(3)
    ]).reshape(9, 1, hw)
    masks = jnp.asarray(masks)

    pooled = pl.pallas_call(
        functools.partial(_trunk_kernel, img_w=W),
        out_shape=jax.ShapeDtypeStruct((B, c2, 1), jnp.float32),
        grid=(groups,),
        in_specs=[
            pl.BlockSpec((per, cin, hw), lambda g: (g, 0, 0)),
            # Grid-invariant operands: full-array blocks, constant index_map.
            pl.BlockSpec((c1, k1), lambda g: (0, 0)),
            pl.BlockSpec((c1, 1), lambda g: (0, 0)),
            pl.BlockSpec((c2, k2), lambda g: (0, 0)),
            pl.BlockSpec((c2, 1), lambda g: (0, 0)),
            pl.BlockSpec((9, 1, hw), lambda g: (0, 0, 0)),
        ],
        out_specs=pl.BlockSpec((per, c2, 1), lambda g: (g, 0, 0)),
        scratch_shapes=[
            pltpu.VMEM((9 * cin, hw), jnp.float32),   # conv1 tap stack
            pltpu.VMEM((9 * c1, hw), jnp.float32),    # conv2 tap stack
        ],
        compiler_params=pltpu.CompilerParams(
            dimension_semantics=("parallel",)),
    )(x_flat, w1p, b1p, w2p, b2p, masks)

    return pooled.reshape(B, c2, 1, 1)


# ----------------------------------------------------------------------------
# Siamese network
# ----------------------------------------------------------------------------
def init_params(cin=4, c1=32, c2=64, seed=42):
    """Deterministic synthetic HWIO weights standing in for the pretrained trunk."""
    # TODO(synk): loading real pretrained resnet50 weights from disk has no
    # in-script equivalent; the trunk structure (conv/relu/avgpool) is kept.
    key = jax.random.PRNGKey(seed)
    ka, kb, kc, kd = jax.random.split(key, 4)
    return {
        "w1": jax.random.normal(ka, (3, 3, cin, c1), jnp.float32) * 0.1,
        "b1": jax.random.normal(kb, (c1,), jnp.float32) * 0.01,
        "w2": jax.random.normal(kc, (3, 3, c1, c2), jnp.float32) * 0.1,
        "b2": jax.random.normal(kd, (c2,), jnp.float32) * 0.01,
    }


def prepare_params(params):
    """One-time weight re-layout (hoisted out of the per-forward path)."""
    w1, b1, w2, b2 = params["w1"], params["b1"], params["w2"], params["b2"]
    cin, c1 = w1.shape[2], w1.shape[3]
    c2 = w2.shape[3]
    return {
        "w1p": jnp.transpose(w1, (3, 0, 1, 2)).reshape(c1, 9 * cin),
        "b1p": b1.reshape(c1, 1),
        "w2p": jnp.transpose(w2, (3, 0, 1, 2)).reshape(c2, 9 * c1),
        "b2p": b2.reshape(c2, 1),
    }


def forward_once(prepped, x_nchw, *, groups=1):
    """cnn_no_fc applied to one input batch. Returns (N, C, 1, 1)."""
    return siamese_trunk(x_nchw, prepped, groups=groups)


def siamese_forward(prepped, input1, input2, *, groups=1):
    """Both branches share weights -> stack on the batch axis and run through a
    single fused pallas_call."""
    n = input1.shape[0]
    emb = siamese_trunk(jnp.concatenate([input1, input2], axis=0), prepped,
                        groups=groups)
    return emb[:n], emb[n:]
# TODO(synk): save_model_weights (torch.save of the state dict) has no kernel
# equivalent and is intentionally omitted.


# ----------------------------------------------------------------------------
# Pure-JAX reference (validates roll shift sign & boundary masks)
# ----------------------------------------------------------------------------
def _reference_trunk(params, x_nchw):
    dn = ("NCHW", "HWIO", "NCHW")
    hi = jax.lax.Precision.HIGHEST
    y = jax.lax.conv_general_dilated(x_nchw, params["w1"], (1, 1), "SAME",
                                     dimension_numbers=dn, precision=hi)
    y = jnp.maximum(y + params["b1"][None, :, None, None], 0.0)
    y = jax.lax.conv_general_dilated(y, params["w2"], (1, 1), "SAME",
                                     dimension_numbers=dn, precision=hi)
    y = jnp.maximum(y + params["b2"][None, :, None, None], 0.0)
    return jnp.mean(y, axis=(2, 3), keepdims=True)  # (N, C2, 1, 1)


if __name__ == "__main__":
    N, C, H, W = 2, 4, 16, 16
    key = jax.random.PRNGKey(0)
    kx1, kx2 = jax.random.split(key)
    input1 = jax.random.normal(kx1, (N, C, H, W), jnp.float32)
    input2 = jax.random.normal(kx2, (N, C, H, W), jnp.float32)

    params = init_params(cin=C, c1=32, c2=64)
    prepped = prepare_params(params)                       # one-time layout prep

    out1, out2 = jax.jit(siamese_forward)(prepped, input1, input2)
    jax.block_until_ready((out1, out2))

    assert out1.shape == (N, 64, 1, 1), out1.shape
    assert out2.shape == (N, 64, 1, 1), out2.shape

    # Numeric check against the plain-JAX conv reference.
    ref1 = _reference_trunk(params, input1)
    ref2 = _reference_trunk(params, input2)
    np.testing.assert_allclose(np.asarray(out1), np.asarray(ref1),
                               rtol=5e-3, atol=5e-3)
    np.testing.assert_allclose(np.asarray(out2), np.asarray(ref2),
                               rtol=5e-3, atol=5e-3)

    print("KERNEL_OK")
</pallas_src>

<mosaic_0001>
module attributes {stable_mosaic.version = 11 : i64} {
  func.func @_trunk_kernel(%arg0: i32, %arg1: memref<4x4x256xf32, #tpu.memory_space<vmem>>, %arg2: memref<32x36xf32, #tpu.memory_space<vmem>>, %arg3: memref<32x1xf32, #tpu.memory_space<vmem>>, %arg4: memref<64x288xf32, #tpu.memory_space<vmem>>, %arg5: memref<64x1xf32, #tpu.memory_space<vmem>>, %arg6: memref<9x1x256xf32, #tpu.memory_space<vmem>>, %arg7: memref<4x64x1xf32, #tpu.memory_space<vmem>>, %arg8: memref<36x256xf32, #tpu.memory_space<vmem>>, %arg9: memref<288x256xf32, #tpu.memory_space<vmem>>) attributes {dimension_semantics = [#tpu.dimension_semantics<parallel>], iteration_bounds = array<i64: 1>, scalar_prefetch = 0 : i64, scratch_operands = 2 : i64, tpu.core_type = #tpu.core_type<tc>, window_params = [{transform_indices = @transform_0, window_bounds = array<i64: 4, 4, 256>}, {pipeline_mode = #tpu.pipeline_mode<synchronous>, transform_indices = @transform_1, window_bounds = array<i64: 32, 36>}, {pipeline_mode = #tpu.pipeline_mode<synchronous>, transform_indices = @transform_2, window_bounds = array<i64: 32, 1>}, {pipeline_mode = #tpu.pipeline_mode<synchronous>, transform_indices = @transform_3, window_bounds = array<i64: 64, 288>}, {pipeline_mode = #tpu.pipeline_mode<synchronous>, transform_indices = @transform_4, window_bounds = array<i64: 64, 1>}, {pipeline_mode = #tpu.pipeline_mode<synchronous>, transform_indices = @transform_5, window_bounds = array<i64: 9, 1, 256>}, {transform_indices = @transform_6, window_bounds = array<i64: 4, 64, 1>}]} {
    %c0 = arith.constant 0 : index
    %c0_0 = arith.constant 0 : index
    %c0_1 = arith.constant 0 : index
    %0 = vector.load %arg1[%c0, %c0_0, %c0_1] : memref<4x4x256xf32, #tpu.memory_space<vmem>>, vector<1x4x256xf32>
    %1 = vector.shape_cast %0 : vector<1x4x256xf32> to vector<4x256xf32>
    %c17_i32 = arith.constant 17 : i32
    %2 = tpu.dynamic_rotate %1 by %c17_i32 dim 1 : vector<4x256xf32>, i32 -> vector<4x256xf32>
    %c0_2 = arith.constant 0 : index
    %c0_3 = arith.constant 0 : index
    %c0_4 = arith.constant 0 : index
    %3 = vector.load %arg6[%c0_2, %c0_3, %c0_4] : memref<9x1x256xf32, #tpu.memory_space<vmem>>, vector<1x1x256xf32>
    %4 = vector.shape_cast %3 : vector<1x1x256xf32> to vector<1x256xf32>
    %5 = vector.broadcast %4 : vector<1x256xf32> to vector<4x256xf32>
    %6 = arith.mulf %2, %5 : vector<4x256xf32>
    %c0_5 = arith.constant 0 : index
    %c0_6 = arith.constant 0 : index
    %7 = vector.load %arg8[%c0_5, %c0_6] : memref<36x256xf32, #tpu.memory_space<vmem>>, vector<4x256xf32>
    tpu.vector_store %arg8[%c0_5, %c0_6], %6 {strides = array<i32>} : memref<36x256xf32, #tpu.memory_space<vmem>>, vector<4x256xf32>,
    %c16_i32 = arith.constant 16 : i32
    %8 = tpu.dynamic_rotate %1 by %c16_i32 dim 1 : vector<4x256xf32>, i32 -> vector<4x256xf32>
    %c1 = arith.constant 1 : index
    %c0_7 = arith.constant 0 : index
    %c0_8 = arith.constant 0 : index
    %9 = vector.load %arg6[%c1, %c0_7, %c0_8] : memref<9x1x256xf32, #tpu.memory_space<vmem>>, vector<1x1x256xf32>
    %10 = vector.shape_cast %9 : vector<1x1x256xf32> to vector<1x256xf32>
    %11 = vector.broadcast %10 : vector<1x256xf32> to vector<4x256xf32>
    %12 = arith.mulf %8, %11 : vector<4x256xf32>
    %c4 = arith.constant 4 : index
    %c0_9 = arith.constant 0 : index
    %13 = vector.load %arg8[%c4, %c0_9] : memref<36x256xf32, #tpu.memory_space<vmem>>, vector<4x256xf32>
    tpu.vector_store %arg8[%c4, %c0_9], %12 {strides = array<i32>} : memref<36x256xf32, #tpu.memory_space<vmem>>, vector<4x256xf32>,
    %c15_i32 = arith.constant 15 : i32
    %14 = tpu.dynamic_rotate %1 by %c15_i32 dim 1 : vector<4x256xf32>, i32 -> vector<4x256xf32>
    %c2 = arith.constant 2 : index
    %c0_10 = arith.constant 0 : index
    %c0_11 = arith.constant 0 : index
    %15 = vector.load %arg6[%c2, %c0_10, %c0_11] : memref<9x1x256xf32, #tpu.memory_space<vmem>>, vector<1x1x256xf32>
    %16 = vector.shape_cast %15 : vector<1x1x256xf32> to vector<1x256xf32>
    %17 = vector.broadcast %16 : vector<1x256xf32> to vector<4x256xf32>
    %18 = arith.mulf %14, %17 : vector<4x256xf32>
    %c8 = arith.constant 8 : index
    %c0_12 = arith.constant 0 : index
    %19 = vector.load %arg8[%c8, %c0_12] : memref<36x256xf32, #tpu.memory_space<vmem>>, vector<4x256xf32>
    tpu.vector_store %arg8[%c8, %c0_12], %18 {strides = array<i32>} : memref<36x256xf32, #tpu.memory_space<vmem>>, vector<4x256xf32>,
    %c1_i32 = arith.constant 1 : i32
    %20 = tpu.dynamic_rotate %1 by %c1_i32 dim 1 : vector<4x256xf32>, i32 -> vector<4x256xf32>
    %c3 = arith.constant 3 : index
    %c0_13 = arith.constant 0 : index
    %c0_14 = arith.constant 0 : index
    %21 = vector.load %arg6[%c3, %c0_13, %c0_14] : memref<9x1x256xf32, #tpu.memory_space<vmem>>, vector<1x1x256xf32>
    %22 = vector.shape_cast %21 : vector<1x1x256xf32> to vector<1x256xf32>
    %23 = vector.broadcast %22 : vector<1x256xf32> to vector<4x256xf32>
    %24 = arith.mulf %20, %23 : vector<4x256xf32>
    %c12 = arith.constant 12 : index
    %c0_15 = arith.constant 0 : index
    %25 = vector.load %arg8[%c12, %c0_15] : memref<36x256xf32, #tpu.memory_space<vmem>>, vector<4x256xf32>
    tpu.vector_store %arg8[%c12, %c0_15], %24 {strides = array<i32>} : memref<36x256xf32, #tpu.memory_space<vmem>>, vector<4x256xf32>,
    %c16 = arith.constant 16 : index
    %c0_16 = arith.constant 0 : index
    %26 = vector.load %arg8[%c16, %c0_16] : memref<36x256xf32, #tpu.memory_space<vmem>>, vector<4x256xf32>
    tpu.vector_store %arg8[%c16, %c0_16], %1 {strides = array<i32>} : memref<36x256xf32, #tpu.memory_space<vmem>>, vector<4x256xf32>,
    %c255_i32 = arith.constant 255 : i32
    %27 = tpu.dynamic_rotate %1 by %c255_i32 dim 1 : vector<4x256xf32>, i32 -> vector<4x256xf32>
    %c5 = arith.constant 5 : index
    %c0_17 = arith.constant 0 : index
    %c0_18 = arith.constant 0 : index
    %28 = vector.load %arg6[%c5, %c0_17, %c0_18] : memref<9x1x256xf32, #tpu.memory_space<vmem>>, vector<1x1x256xf32>
    %29 = vector.shape_cast %28 : vector<1x1x256xf32> to vector<1x256xf32>
    %30 = vector.broadcast %29 : vector<1x256xf32> to vector<4x256xf32>
    %31 = arith.mulf %27, %30 : vector<4x256xf32>
    %c20 = arith.constant 20 : index
    %c0_19 = arith.constant 0 : index
    %32 = vector.load %arg8[%c20, %c0_19] : memref<36x256xf32, #tpu.memory_space<vmem>>, vector<4x256xf32>
    tpu.vector_store %arg8[%c20, %c0_19], %31 {strides = array<i32>} : memref<36x256xf32, #tpu.memory_space<vmem>>, vector<4x256xf32>,
    %c241_i32 = arith.constant 241 : i32
    %33 = tpu.dynamic_rotate %1 by %c241_i32 dim 1 : vector<4x256xf32>, i32 -> vector<4x256xf32>
    %c6 = arith.constant 6 : index
    %c0_20 = arith.constant 0 : index
    %c0_21 = arith.constant 0 : index
    %34 = vector.load %arg6[%c6, %c0_20, %c0_21] : memref<9x1x256xf32, #tpu.memory_space<vmem>>, vector<1x1x256xf32>
    %35 = vector.shape_cast %34 : vector<1x1x256xf32> to vector<1x256xf32>
    %36 = vector.broadcast %35 : vector<1x256xf32> to vector<4x256xf32>
    %37 = arith.mulf %33, %36 : vector<4x256xf32>
    %c24 = arith.constant 24 : index
    %c0_22 = arith.constant 0 : index
    %38 = vector.load %arg8[%c24, %c0_22] : memref<36x256xf32, #tpu.memory_space<vmem>>, vector<4x256xf32>
    tpu.vector_store %arg8[%c24, %c0_22], %37 {strides = array<i32>} : memref<36x256xf32, #tpu.memory_space<vmem>>, vector<4x256xf32>,
    %c240_i32 = arith.constant 240 : i32
    %39 = tpu.dynamic_rotate %1 by %c240_i32 dim 1 : vector<4x256xf32>, i32 -> vector<4x256xf32>
    %c7 = arith.constant 7 : index
    %c0_23 = arith.constant 0 : index
    %c0_24 = arith.constant 0 : index
    %40 = vector.load %arg6[%c7, %c0_23, %c0_24] : memref<9x1x256xf32, #tpu.memory_space<vmem>>, vector<1x1x256xf32>
    %41 = vector.shape_cast %40 : vector<1x1x256xf32> to vector<1x256xf32>
    %42 = vector.broadcast %41 : vector<1x256xf32> to vector<4x256xf32>
    %43 = arith.mulf %39, %42 : vector<4x256xf32>
    %c28 = arith.constant 28 : index
    %c0_25 = arith.constant 0 : index
    %44 = vector.load %arg8[%c28, %c0_25] : memref<36x256xf32, #tpu.memory_space<vmem>>, vector<4x256xf32>
    tpu.vector_store %arg8[%c28, %c0_25], %43 {strides = array<i32>} : memref<36x256xf32, #tpu.memory_space<vmem>>, vector<4x256xf32>,
    %c239_i32 = arith.constant 239 : i32
    %45 = tpu.dynamic_rotate %1 by %c239_i32 dim 1 : vector<4x256xf32>, i32 -> vector<4x256xf32>
    %c8_26 = arith.constant 8 : index
    %c0_27 = arith.constant 0 : index
    %c0_28 = arith.constant 0 : index
    %46 = vector.load %arg6[%c8_26, %c0_27, %c0_28] : memref<9x1x256xf32, #tpu.memory_space<vmem>>, vector<1x1x256xf32>
    %47 = vector.shape_cast %46 : vector<1x1x256xf32> to vector<1x256xf32>
    %48 = vector.broadcast %47 : vector<1x256xf32> to vector<4x256xf32>
    %49 = arith.mulf %45, %48 : vector<4x256xf32>
    %c32 = arith.constant 32 : index
    %c0_29 = arith.constant 0 : index
    %50 = vector.load %arg8[%c32, %c0_29] : memref<36x256xf32, #tpu.memory_space<vmem>>, vector<4x256xf32>
    tpu.vector_store %arg8[%c32, %c0_29], %49 {strides = array<i32>} : memref<36x256xf32, #tpu.memory_space<vmem>>, vector<4x256xf32>,
    %c0_30 = arith.constant 0 : index
    %c0_31 = arith.constant 0 : index
    %51 = vector.load %arg2[%c0_30, %c0_31] : memref<32x36xf32, #tpu.memory_space<vmem>>, vector<32x36xf32>
    %c0_32 = arith.constant 0 : index
    %c0_33 = arith.constant 0 : index
    %52 = vector.load %arg8[%c0_32, %c0_33] : memref<36x256xf32, #tpu.memory_space<vmem>>, vector<36x256xf32>
    %cst = arith.constant dense<0.000000e+00> : vector<32x256xf32>
    %53 = tpu.matmul %51, %52, %cst {dimension_numbers = #tpu.dot_dimension_numbers<[1], [0], [0], [1], [0, 0, 1, 1], [], []>} : vector<32x36xf32>, vector<36x256xf32>, vector<32x256xf32> -> vector<32x256xf32>
    %c0_34 = arith.constant 0 : index
    %c0_35 = arith.constant 0 : index
    %54 = vector.load %arg3[%c0_34, %c0_35] : memref<32x1xf32, #tpu.memory_space<vmem>>, vector<32x1xf32>
    %55 = vector.broadcast %54 : vector<32x1xf32> to vector<32x256xf32>
    %56 = arith.addf %53, %55 : vector<32x256xf32>
    %cst_36 = arith.constant 0.000000e+00 : f32
    %57 = vector.broadcast %cst_36 : f32 to vector<32x256xf32>
    %58 = arith.maximumf %56, %57 : vector<32x256xf32>
    %c17_i32_37 = arith.constant 17 : i32
    %59 = tpu.dynamic_rotate %58 by %c17_i32_37 dim 1 : vector<32x256xf32>, i32 -> vector<32x256xf32>
    %c0_38 = arith.constant 0 : index
    %c0_39 = arith.constant 0 : index
    %c0_40 = arith.constant 0 : index
    %60 = vector.load %arg6[%c0_38, %c0_39, %c0_40] : memref<9x1x256xf32, #tpu.memory_space<vmem>>, vector<1x1x256xf32>
    %61 = vector.shape_cast %60 : vector<1x1x256xf32> to vector<1x256xf32>
    %62 = vector.broadcast %61 : vector<1x256xf32> to vector<32x256xf32>
    %63 = arith.mulf %59, %62 : vector<32x256xf32>
    %c0_41 = arith.constant 0 : index
    %c0_42 = arith.constant 0 : index
    %64 = vector.load %arg9[%c0_41, %c0_42] : memref<288x256xf32, #tpu.memory_space<vmem>>, vector<32x256xf32>
    tpu.vector_store %arg9[%c0_41, %c0_42], %63 {strides = array<i32>} : memref<288x256xf32, #tpu.memory_space<vmem>>, vector<32x256xf32>,
    %c16_i32_43 = arith.constant 16 : i32
    %65 = tpu.dynamic_rotate %58 by %c16_i32_43 dim 1 : vector<32x256xf32>, i32 -> vector<32x256xf32>
    %c1_44 = arith.constant 1 : index
    %c0_45 = arith.constant 0 : index
    %c0_46 = arith.constant 0 : index
    %66 = vector.load %arg6[%c1_44, %c0_45, %c0_46] : memref<9x1x256xf32, #tpu.memory_space<vmem>>, vector<1x1x256xf32>
    %67 = vector.shape_cast %66 : vector<1x1x256xf32> to vector<1x256xf32>
    %68 = vector.broadcast %67 : vector<1x256xf32> to vector<32x256xf32>
    %69 = arith.mulf %65, %68 : vector<32x256xf32>
    %c32_47 = arith.constant 32 : index
    %c0_48 = arith.constant 0 : index
    %70 = vector.load %arg9[%c32_47, %c0_48] : memref<288x256xf32, #tpu.memory_space<vmem>>, vector<32x256xf32>
    tpu.vector_store %arg9[%c32_47, %c0_48], %69 {strides = array<i32>} : memref<288x256xf32, #tpu.memory_space<vmem>>, vector<32x256xf32>,
    %c15_i32_49 = arith.constant 15 : i32
    %71 = tpu.dynamic_rotate %58 by %c15_i32_49 dim 1 : vector<32x256xf32>, i32 -> vector<32x256xf32>
    %c2_50 = arith.constant 2 : index
    %c0_51 = arith.constant 0 : index
    %c0_52 = arith.constant 0 : index
    %72 = vector.load %arg6[%c2_50, %c0_51, %c0_52] : memref<9x1x256xf32, #tpu.memory_space<vmem>>, vector<1x1x256xf32>
    %73 = vector.shape_cast %72 : vector<1x1x256xf32> to vector<1x256xf32>
    %74 = vector.broadcast %73 : vector<1x256xf32> to vector<32x256xf32>
    %75 = arith.mulf %71, %74 : vector<32x256xf32>
    %c64 = arith.constant 64 : index
    %c0_53 = arith.constant 0 : index
    %76 = vector.load %arg9[%c64, %c0_53] : memref<288x256xf32, #tpu.memory_space<vmem>>, vector<32x256xf32>
    tpu.vector_store %arg9[%c64, %c0_53], %75 {strides = array<i32>} : memref<288x256xf32, #tpu.memory_space<vmem>>, vector<32x256xf32>,
    %c1_i32_54 = arith.constant 1 : i32
    %77 = tpu.dynamic_rotate %58 by %c1_i32_54 dim 1 : vector<32x256xf32>, i32 -> vector<32x256xf32>
    %c3_55 = arith.constant 3 : index
    %c0_56 = arith.constant 0 : index
    %c0_57 = arith.constant 0 : index
    %78 = vector.load %arg6[%c3_55, %c0_56, %c0_57] : memref<9x1x256xf32, #tpu.memory_space<vmem>>, vector<1x1x256xf32>
    %79 = vector.shape_cast %78 : vector<1x1x256xf32> to vector<1x256xf32>
    %80 = vector.broadcast %79 : vector<1x256xf32> to vector<32x256xf32>
    %81 = arith.mulf %77, %80 : vector<32x256xf32>
    %c96 = arith.constant 96 : index
    %c0_58 = arith.constant 0 : index
    %82 = vector.load %arg9[%c96, %c0_58] : memref<288x256xf32, #tpu.memory_space<vmem>>, vector<32x256xf32>
    tpu.vector_store %arg9[%c96, %c0_58], %81 {strides = array<i32>} : memref<288x256xf32, #tpu.memory_space<vmem>>, vector<32x256xf32>,
    %c128 = arith.constant 128 : index
    %c0_59 = arith.constant 0 : index
    %83 = vector.load %arg9[%c128, %c0_59] : memref<288x256xf32, #tpu.memory_space<vmem>>, vector<32x256xf32>
    tpu.vector_store %arg9[%c128, %c0_59], %58 {strides = array<i32>} : memref<288x256xf32, #tpu.memory_space<vmem>>, vector<32x256xf32>,
    %c255_i32_60 = arith.constant 255 : i32
    %84 = tpu.dynamic_rotate %58 by %c255_i32_60 dim 1 : vector<32x256xf32>, i32 -> vector<32x256xf32>
    %c5_61 = arith.constant 5 : index
    %c0_62 = arith.constant 0 : index
    %c0_63 = arith.constant 0 : index
    %85 = vector.load %arg6[%c5_61, %c0_62, %c0_63] : memref<9x1x256xf32, #tpu.memory_space<vmem>>, vector<1x1x256xf32>
    %86 = vector.shape_cast %85 : vector<1x1x256xf32> to vector<1x256xf32>
    %87 = vector.broadcast %86 : vector<1x256xf32> to vector<32x256xf32>
    %88 = arith.mulf %84, %87 : vector<32x256xf32>
    %c160 = arith.constant 160 : index
    %c0_64 = arith.constant 0 : index
    %89 = vector.load %arg9[%c160, %c0_64] : memref<288x256xf32, #tpu.memory_space<vmem>>, vector<32x256xf32>
    tpu.vector_store %arg9[%c160, %c0_64], %88 {strides = array<i32>} : memref<288x256xf32, #tpu.memory_space<vmem>>, vector<32x256xf32>,
    %c241_i32_65 = arith.constant 241 : i32
    %90 = tpu.dynamic_rotate %58 by %c241_i32_65 dim 1 : vector<32x256xf32>, i32 -> vector<32x256xf32>
    %c6_66 = arith.constant 6 : index
    %c0_67 = arith.constant 0 : index
    %c0_68 = arith.constant 0 : index
    %91 = vector.load %arg6[%c6_66, %c0_67, %c0_68] : memref<9x1x256xf32, #tpu.memory_space<vmem>>, vector<1x1x256xf32>
    %92 = vector.shape_cast %91 : vector<1x1x256xf32> to vector<1x256xf32>
    %93 = vector.broadcast %92 : vector<1x256xf32> to vector<32x256xf32>
    %94 = arith.mulf %90, %93 : vector<32x256xf32>
    %c192 = arith.constant 192 : index
    %c0_69 = arith.constant 0 : index
    %95 = vector.load %arg9[%c192, %c0_69] : memref<288x256xf32, #tpu.memory_space<vmem>>, vector<32x256xf32>
    tpu.vector_store %arg9[%c192, %c0_69], %94 {strides = array<i32>} : memref<288x256xf32, #tpu.memory_space<vmem>>, vector<32x256xf32>,
    %c240_i32_70 = arith.constant 240 : i32
    %96 = tpu.dynamic_rotate %58 by %c240_i32_70 dim 1 : vector<32x256xf32>, i32 -> vector<32x256xf32>
    %c7_71 = arith.constant 7 : index
    %c0_72 = arith.constant 0 : index
    %c0_73 = arith.constant 0 : index
    %97 = vector.load %arg6[%c7_71, %c0_72, %c0_73] : memref<9x1x256xf32, #tpu.memory_space<vmem>>, vector<1x1x256xf32>
    %98 = vector.shape_cast %97 : vector<1x1x256xf32> to vector<1x256xf32>
    %99 = vector.broadcast %98 : vector<1x256xf32> to vector<32x256xf32>
    %100 = arith.mulf %96, %99 : vector<32x256xf32>
    %c224 = arith.constant 224 : index
    %c0_74 = arith.constant 0 : index
    %101 = vector.load %arg9[%c224, %c0_74] : memref<288x256xf32, #tpu.memory_space<vmem>>, vector<32x256xf32>
    tpu.vector_store %arg9[%c224, %c0_74], %100 {strides = array<i32>} : memref<288x256xf32, #tpu.memory_space<vmem>>, vector<32x256xf32>,
    %c239_i32_75 = arith.constant 239 : i32
    %102 = tpu.dynamic_rotate %58 by %c239_i32_75 dim 1 : vector<32x256xf32>, i32 -> vector<32x256xf32>
    %c8_76 = arith.constant 8 : index
    %c0_77 = arith.constant 0 : index
    %c0_78 = arith.constant 0 : index
    %103 = vector.load %arg6[%c8_76, %c0_77, %c0_78] : memref<9x1x256xf32, #tpu.memory_space<vmem>>, vector<1x1x256xf32>
    %104 = vector.shape_cast %103 : vector<1x1x256xf32> to vector<1x256xf32>
    %105 = vector.broadcast %104 : vector<1x256xf32> to vector<32x256xf32>
    %106 = arith.mulf %102, %105 : vector<32x256xf32>
    %c256 = arith.constant 256 : index
    %c0_79 = arith.constant 0 : index
    %107 = vector.load %arg9[%c256, %c0_79] : memref<288x256xf32, #tpu.memory_space<vmem>>, vector<32x256xf32>
    tpu.vector_store %arg9[%c256, %c0_79], %106 {strides = array<i32>} : memref<288x256xf32, #tpu.memory_space<vmem>>, vector<32x256xf32>,
    %c0_80 = arith.constant 0 : index
    %c0_81 = arith.constant 0 : index
    %108 = vector.load %arg4[%c0_80, %c0_81] : memref<64x288xf32, #tpu.memory_space<vmem>>, vector<64x288xf32>
    %c0_82 = arith.constant 0 : index
    %c0_83 = arith.constant 0 : index
    %109 = vector.load %arg9[%c0_82, %c0_83] : memref<288x256xf32, #tpu.memory_space<vmem>>, vector<288x256xf32>
    %cst_84 = arith.constant dense<0.000000e+00> : vector<64x256xf32>
    %110 = tpu.matmul %108, %109, %cst_84 {dimension_numbers = #tpu.dot_dimension_numbers<[1], [0], [0], [1], [0, 0, 1, 1], [], []>} : vector<64x288xf32>, vector<288x256xf32>, vector<64x256xf32> -> vector<64x256xf32>
    %c0_85 = arith.constant 0 : index
    %c0_86 = arith.constant 0 : index
    %111 = vector.load %arg5[%c0_85, %c0_86] : memref<64x1xf32, #tpu.memory_space<vmem>>, vector<64x1xf32>
    %112 = vector.broadcast %111 : vector<64x1xf32> to vector<64x256xf32>
    %113 = arith.addf %110, %112 : vector<64x256xf32>
    %cst_87 = arith.constant 0.000000e+00 : f32
    %114 = vector.broadcast %cst_87 : f32 to vector<64x256xf32>
    %115 = arith.maximumf %113, %114 : vector<64x256xf32>
    %cst_88 = arith.constant dense<0.000000e+00> : vector<64xf32>
    %116 = vector.multi_reduction <add>, %115, %cst_88 [1] : vector<64x256xf32> to vector<64xf32>
    %117 = vector.shape_cast %116 : vector<64xf32> to vector<64x1xf32>
    %cst_89 = arith.constant 2.560000e+02 : f32
    %118 = vector.broadcast %cst_89 : f32 to vector<64x1xf32>
    %119 = arith.divf %117, %118 : vector<64x1xf32>
    %c0_90 = arith.constant 0 : index
    %c0_91 = arith.constant 0 : index
    %c0_92 = arith.constant 0 : index
    %120 = vector.load %arg7[%c0_90, %c0_91, %c0_92] : memref<4x64x1xf32, #tpu.memory_space<vmem>>, vector<1x64x1xf32>
    %121 = vector.shape_cast %120 : vector<1x64x1xf32> to vector<64x1xf32>
    %122 = vector.shape_cast %119 : vector<64x1xf32> to vector<1x64x1xf32>
    tpu.vector_store %arg7[%c0_90, %c0_91, %c0_92], %122 {strides = array<i32>} : memref<4x64x1xf32, #tpu.memory_space<vmem>>, vector<1x64x1xf32>,
    %c1_93 = arith.constant 1 : index
    %c0_94 = arith.constant 0 : index
    %c0_95 = arith.constant 0 : index
    %123 = vector.load %arg1[%c1_93, %c0_94, %c0_95] : memref<4x4x256xf32, #tpu.memory_space<vmem>>, vector<1x4x256xf32>
    %124 = vector.shape_cast %123 : vector<1x4x256xf32> to vector<4x256xf32>
    %c17_i32_96 = arith.constant 17 : i32
    %125 = tpu.dynamic_rotate %124 by %c17_i32_96 dim 1 : vector<4x256xf32>, i32 -> vector<4x256xf32>
    %c0_97 = arith.constant 0 : index
    %c0_98 = arith.constant 0 : index
    %c0_99 = arith.constant 0 : index
    %126 = vector.load %arg6[%c0_97, %c0_98, %c0_99] : memref<9x1x256xf32, #tpu.memory_space<vmem>>, vector<1x1x256xf32>
    %127 = vector.shape_cast %126 : vector<1x1x256xf32> to vector<1x256xf32>
    %128 = vector.broadcast %127 : vector<1x256xf32> to vector<4x256xf32>
    %129 = arith.mulf %125, %128 : vector<4x256xf32>
    %c0_100 = arith.constant 0 : index
    %c0_101 = arith.constant 0 : index
    %130 = vector.load %arg8[%c0_100, %c0_101] : memref<36x256xf32, #tpu.memory_space<vmem>>, vector<4x256xf32>
    tpu.vector_store %arg8[%c0_100, %c0_101], %129 {strides = array<i32>} : memref<36x256xf32, #tpu.memory_space<vmem>>, vector<4x256xf32>,
    %c16_i32_102 = arith.constant 16 : i32
    %131 = tpu.dynamic_rotate %124 by %c16_i32_102 dim 1 : vector<4x256xf32>, i32 -> vector<4x256xf32>
    %c1_103 = arith.constant 1 : index
    %c0_104 = arith.constant 0 : index
    %c0_105 = arith.constant 0 : index
    %132 = vector.load %arg6[%c1_103, %c0_104, %c0_105] : memref<9x1x256xf32, #tpu.memory_space<vmem>>, vector<1x1x256xf32>
    %133 = vector.shape_cast %132 : vector<1x1x256xf32> to vector<1x256xf32>
    %134 = vector.broadcast %133 : vector<1x256xf32> to vector<4x256xf32>
    %135 = arith.mulf %131, %134 : vector<4x256xf32>
    %c4_106 = arith.constant 4 : index
    %c0_107 = arith.constant 0 : index
    %136 = vector.load %arg8[%c4_106, %c0_107] : memref<36x256xf32, #tpu.memory_space<vmem>>, vector<4x256xf32>
    tpu.vector_store %arg8[%c4_106, %c0_107], %135 {strides = array<i32>} : memref<36x256xf32, #tpu.memory_space<vmem>>, vector<4x256xf32>,
    %c15_i32_108 = arith.constant 15 : i32
    %137 = tpu.dynamic_rotate %124 by %c15_i32_108 dim 1 : vector<4x256xf32>, i32 -> vector<4x256xf32>
    %c2_109 = arith.constant 2 : index
    %c0_110 = arith.constant 0 : index
    %c0_111 = arith.constant 0 : index
    %138 = vector.load %arg6[%c2_109, %c0_110, %c0_111] : memref<9x1x256xf32, #tpu.memory_space<vmem>>, vector<1x1x256xf32>
    %139 = vector.shape_cast %138 : vector<1x1x256xf32> to vector<1x256xf32>
    %140 = vector.broadcast %139 : vector<1x256xf32> to vector<4x256xf32>
    %141 = arith.mulf %137, %140 : vector<4x256xf32>
    %c8_112 = arith.constant 8 : index
    %c0_113 = arith.constant 0 : index
    %142 = vector.load %arg8[%c8_112, %c0_113] : memref<36x256xf32, #tpu.memory_space<vmem>>, vector<4x256xf32>
    tpu.vector_store %arg8[%c8_112, %c0_113], %141 {strides = array<i32>} : memref<36x256xf32, #tpu.memory_space<vmem>>, vector<4x256xf32>,
    %c1_i32_114 = arith.constant 1 : i32
    %143 = tpu.dynamic_rotate %124 by %c1_i32_114 dim 1 : vector<4x256xf32>, i32 -> vector<4x256xf32>
    %c3_115 = arith.constant 3 : index
    %c0_116 = arith.constant 0 : index
    %c0_117 = arith.constant 0 : index
    %144 = vector.load %arg6[%c3_115, %c0_116, %c0_117] : memref<9x1x256xf32, #tpu.memory_space<vmem>>, vector<1x1x256xf32>
    %145 = vector.shape_cast %144 : vector<1x1x256xf32> to vector<1x256xf32>
    %146 = vector.broadcast %145 : vector<1x256xf32> to vector<4x256xf32>
    %147 = arith.mulf %143, %146 : vector<4x256xf32>
    %c12_118 = arith.constant 12 : index
    %c0_119 = arith.constant 0 : index
    %148 = vector.load %arg8[%c12_118, %c0_119] : memref<36x256xf32, #tpu.memory_space<vmem>>, vector<4x256xf32>
    tpu.vector_store %arg8[%c12_118, %c0_119], %147 {strides = array<i32>} : memref<36x256xf32, #tpu.memory_space<vmem>>, vector<4x256xf32>,
    %c16_120 = arith.constant 16 : index
    %c0_121 = arith.constant 0 : index
    %149 = vector.load %arg8[%c16_120, %c0_121] : memref<36x256xf32, #tpu.memory_space<vmem>>, vector<4x256xf32>
    tpu.vector_store %arg8[%c16_120, %c0_121], %124 {strides = array<i32>} : memref<36x256xf32, #tpu.memory_space<vmem>>, vector<4x256xf32>,
    %c255_i32_122 = arith.constant 255 : i32
    %150 = tpu.dynamic_rotate %124 by %c255_i32_122 dim 1 : vector<4x256xf32>, i32 -> vector<4x256xf32>
    %c5_123 = arith.constant 5 : index
    %c0_124 = arith.constant 0 : index
    %c0_125 = arith.constant 0 : index
    %151 = vector.load %arg6[%c5_123, %c0_124, %c0_125] : memref<9x1x256xf32, #tpu.memory_space<vmem>>, vector<1x1x256xf32>
    %152 = vector.shape_cast %151 : vector<1x1x256xf32> to vector<1x256xf32>
    %153 = vector.broadcast %152 : vector<1x256xf32> to vector<4x256xf32>
    %154 = arith.mulf %150, %153 : vector<4x256xf32>
    %c20_126 = arith.constant 20 : index
    %c0_127 = arith.constant 0 : index
    %155 = vector.load %arg8[%c20_126, %c0_127] : memref<36x256xf32, #tpu.memory_space<vmem>>, vector<4x256xf32>
    tpu.vector_store %arg8[%c20_126, %c0_127], %154 {strides = array<i32>} : memref<36x256xf32, #tpu.memory_space<vmem>>, vector<4x256xf32>,
    %c241_i32_128 = arith.constant 241 : i32
    %156 = tpu.dynamic_rotate %124 by %c241_i32_128 dim 1 : vector<4x256xf32>, i32 -> vector<4x256xf32>
    %c6_129 = arith.constant 6 : index
    %c0_130 = arith.constant 0 : index
    %c0_131 = arith.constant 0 : index
    %157 = vector.load %arg6[%c6_129, %c0_130, %c0_131] : memref<9x1x256xf32, #tpu.memory_space<vmem>>, vector<1x1x256xf32>
    %158 = vector.shape_cast %157 : vector<1x1x256xf32> to vector<1x256xf32>
    %159 = vector.broadcast %158 : vector<1x256xf32> to vector<4x256xf32>
    %160 = arith.mulf %156, %159 : vector<4x256xf32>
    %c24_132 = arith.constant 24 : index
    %c0_133 = arith.constant 0 : index
    %161 = vector.load %arg8[%c24_132, %c0_133] : memref<36x256xf32, #tpu.memory_space<vmem>>, vector<4x256xf32>
    tpu.vector_store %arg8[%c24_132, %c0_133], %160 {strides = array<i32>} : memref<36x256xf32, #tpu.memory_space<vmem>>, vector<4x256xf32>,
    %c240_i32_134 = arith.constant 240 : i32
    %162 = tpu.dynamic_rotate %124 by %c240_i32_134 dim 1 : vector<4x256xf32>, i32 -> vector<4x256xf32>
    %c7_135 = arith.constant 7 : index
    %c0_136 = arith.constant 0 : index
    %c0_137 = arith.constant 0 : index
    %163 = vector.load %arg6[%c7_135, %c0_136, %c0_137] : memref<9x1x256xf32, #tpu.memory_space<vmem>>, vector<1x1x256xf32>
    %164 = vector.shape_cast %163 : vector<1x1x256xf32> to vector<1x256xf32>
    %165 = vector.broadcast %164 : vector<1x256xf32> to vector<4x256xf32>
    %166 = arith.mulf %162, %165 : vector<4x256xf32>
    %c28_138 = arith.constant 28 : index
    %c0_139 = arith.constant 0 : index
    %167 = vector.load %arg8[%c28_138, %c0_139] : memref<36x256xf32, #tpu.memory_space<vmem>>, vector<4x256xf32>
    tpu.vector_store %arg8[%c28_138, %c0_139], %166 {strides = array<i32>} : memref<36x256xf32, #tpu.memory_space<vmem>>, vector<4x256xf32>,
    %c239_i32_140 = arith.constant 239 : i32
    %168 = tpu.dynamic_rotate %124 by %c239_i32_140 dim 1 : vector<4x256xf32>, i32 -> vector<4x256xf32>
    %c8_141 = arith.constant 8 : index
    %c0_142 = arith.constant 0 : index
    %c0_143 = arith.constant 0 : index
    %169 = vector.load %arg6[%c8_141, %c0_142, %c0_143] : memref<9x1x256xf32, #tpu.memory_space<vmem>>, vector<1x1x256xf32>
    %170 = vector.shape_cast %169 : vector<1x1x256xf32> to vector<1x256xf32>
    %171 = vector.broadcast %170 : vector<1x256xf32> to vector<4x256xf32>
    %172 = arith.mulf %168, %171 : vector<4x256xf32>
    %c32_144 = arith.constant 32 : index
    %c0_145 = arith.constant 0 : index
    %173 = vector.load %arg8[%c32_144, %c0_145] : memref<36x256xf32, #tpu.memory_space<vmem>>, vector<4x256xf32>
    tpu.vector_store %arg8[%c32_144, %c0_145], %172 {strides = array<i32>} : memref<36x256xf32, #tpu.memory_space<vmem>>, vector<4x256xf32>,
    %c0_146 = arith.constant 0 : index
    %c0_147 = arith.constant 0 : index
    %174 = vector.load %arg2[%c0_146, %c0_147] : memref<32x36xf32, #tpu.memory_space<vmem>>, vector<32x36xf32>
    %c0_148 = arith.constant 0 : index
    %c0_149 = arith.constant 0 : index
    %175 = vector.load %arg8[%c0_148, %c0_149] : memref<36x256xf32, #tpu.memory_space<vmem>>, vector<36x256xf32>
    %cst_150 = arith.constant dense<0.000000e+00> : vector<32x256xf32>
    %176 = tpu.matmul %174, %175, %cst_150 {dimension_numbers = #tpu.dot_dimension_numbers<[1], [0], [0], [1], [0, 0, 1, 1], [], []>} : vector<32x36xf32>, vector<36x256xf32>, vector<32x256xf32> -> vector<32x256xf32>
    %c0_151 = arith.constant 0 : index
    %c0_152 = arith.constant 0 : index
    %177 = vector.load %arg3[%c0_151, %c0_152] : memref<32x1xf32, #tpu.memory_space<vmem>>, vector<32x1xf32>
    %178 = vector.broadcast %177 : vector<32x1xf32> to vector<32x256xf32>
    %179 = arith.addf %176, %178 : vector<32x256xf32>
    %cst_153 = arith.constant 0.000000e+00 : f32
    %180 = vector.broadcast %cst_153 : f32 to vector<32x256xf32>
    %181 = arith.maximumf %179, %180 : vector<32x256xf32>
    %c17_i32_154 = arith.constant 17 : i32
    %182 = tpu.dynamic_rotate %181 by %c17_i32_154 dim 1 : vector<32x256xf32>, i32 -> vector<32x256xf32>
    %c0_155 = arith.constant 0 : index
    %c0_156 = arith.constant 0 : index
    %c0_157 = arith.constant 0 : index
    %183 = vector.load %arg6[%c0_155, %c0_156, %c0_157] : memref<9x1x256xf32, #tpu.memory_space<vmem>>, vector<1x1x256xf32>
    %184 = vector.shape_cast %183 : vector<1x1x256xf32> to vector<1x256xf32>
    %185 = vector.broadcast %184 : vector<1x256xf32> to vector<32x256xf32>
    %186 = arith.mulf %182, %185 : vector<32x256xf32>
    %c0_158 = arith.constant 0 : index
    %c0_159 = arith.constant 0 : index
    %187 = vector.load %arg9[%c0_158, %c0_159] : memref<288x256xf32, #tpu.memory_space<vmem>>, vector<32x256xf32>
    tpu.vector_store %arg9[%c0_158, %c0_159], %186 {strides = array<i32>} : memref<288x256xf32, #tpu.memory_space<vmem>>, vector<32x256xf32>,
    %c16_i32_160 = arith.constant 16 : i32
    %188 = tpu.dynamic_rotate %181 by %c16_i32_160 dim 1 : vector<32x256xf32>, i32 -> vector<32x256xf32>
    %c1_161 = arith.constant 1 : index
    %c0_162 = arith.constant 0 : index
    %c0_163 = arith.constant 0 : index
    %189 = vector.load %arg6[%c1_161, %c0_162, %c0_163] : memref<9x1x256xf32, #tpu.memory_space<vmem>>, vector<1x1x256xf32>
    %190 = vector.shape_cast %189 : vector<1x1x256xf32> to vector<1x256xf32>
    %191 = vector.broadcast %190 : vector<1x256xf32> to vector<32x256xf32>
    %192 = arith.mulf %188, %191 : vector<32x256xf32>
    %c32_164 = arith.constant 32 : index
    %c0_165 = arith.constant 0 : index
    %193 = vector.load %arg9[%c32_164, %c0_165] : memref<288x256xf32, #tpu.memory_space<vmem>>, vector<32x256xf32>
    tpu.vector_store %arg9[%c32_164, %c0_165], %192 {strides = array<i32>} : memref<288x256xf32, #tpu.memory_space<vmem>>, vector<32x256xf32>,
    %c15_i32_166 = arith.constant 15 : i32
    %194 = tpu.dynamic_rotate %181 by %c15_i32_166 dim 1 : vector<32x256xf32>, i32 -> vector<32x256xf32>
    %c2_167 = arith.constant 2 : index
    %c0_168 = arith.constant 0 : index
    %c0_169 = arith.constant 0 : index
    %195 = vector.load %arg6[%c2_167, %c0_168, %c0_169] : memref<9x1x256xf32, #tpu.memory_space<vmem>>, vector<1x1x256xf32>
    %196 = vector.shape_cast %195 : vector<1x1x256xf32> to vector<1x256xf32>
    %197 = vector.broadcast %196 : vector<1x256xf32> to vector<32x256xf32>
    %198 = arith.mulf %194, %197 : vector<32x256xf32>
    %c64_170 = arith.constant 64 : index
    %c0_171 = arith.constant 0 : index
    %199 = vector.load %arg9[%c64_170, %c0_171] : memref<288x256xf32, #tpu.memory_space<vmem>>, vector<32x256xf32>
    tpu.vector_store %arg9[%c64_170, %c0_171], %198 {strides = array<i32>} : memref<288x256xf32, #tpu.memory_space<vmem>>, vector<32x256xf32>,
    %c1_i32_172 = arith.constant 1 : i32
    %200 = tpu.dynamic_rotate %181 by %c1_i32_172 dim 1 : vector<32x256xf32>, i32 -> vector<32x256xf32>
    %c3_173 = arith.constant 3 : index
    %c0_174 = arith.constant 0 : index
    %c0_175 = arith.constant 0 : index
    %201 = vector.load %arg6[%c3_173, %c0_174, %c0_175] : memref<9x1x256xf32, #tpu.memory_space<vmem>>, vector<1x1x256xf32>
    %202 = vector.shape_cast %201 : vector<1x1x256xf32> to vector<1x256xf32>
    %203 = vector.broadcast %202 : vector<1x256xf32> to vector<32x256xf32>
    %204 = arith.mulf %200, %203 : vector<32x256xf32>
    %c96_176 = arith.constant 96 : index
    %c0_177 = arith.constant 0 : index
    %205 = vector.load %arg9[%c96_176, %c0_177] : memref<288x256xf32, #tpu.memory_space<vmem>>, vector<32x256xf32>
    tpu.vector_store %arg9[%c96_176, %c0_177], %204 {strides = array<i32>} : memref<288x256xf32, #tpu.memory_space<vmem>>, vector<32x256xf32>,
    %c128_178 = arith.constant 128 : index
    %c0_179 = arith.constant 0 : index
    %206 = vector.load %arg9[%c128_178, %c0_179] : memref<288x256xf32, #tpu.memory_space<vmem>>, vector<32x256xf32>
    tpu.vector_store %arg9[%c128_178, %c0_179], %181 {strides = array<i32>} : memref<288x256xf32, #tpu.memory_space<vmem>>, vector<32x256xf32>,
    %c255_i32_180 = arith.constant 255 : i32
    %207 = tpu.dynamic_rotate %181 by %c255_i32_180 dim 1 : vector<32x256xf32>, i32 -> vector<32x256xf32>
    %c5_181 = arith.constant 5 : index
    %c0_182 = arith.constant 0 : index
    %c0_183 = arith.constant 0 : index
    %208 = vector.load %arg6[%c5_181, %c0_182, %c0_183] : memref<9x1x256xf32, #tpu.memory_space<vmem>>, vector<1x1x256xf32>
    %209 = vector.shape_cast %208 : vector<1x1x256xf32> to vector<1x256xf32>
    %210 = vector.broadcast %209 : vector<1x256xf32> to vector<32x256xf32>
    %211 = arith.mulf %207, %210 : vector<32x256xf32>
    %c160_184 = arith.constant 160 : index
    %c0_185 = arith.constant 0 : index
    %212 = vector.load %arg9[%c160_184, %c0_185] : memref<288x256xf32, #tpu.memory_space<vmem>>, vector<32x256xf32>
    tpu.vector_store %arg9[%c160_184, %c0_185], %211 {strides = array<i32>} : memref<288x256xf32, #tpu.memory_space<vmem>>, vector<32x256xf32>,
    %c241_i32_186 = arith.constant 241 : i32
    %213 = tpu.dynamic_rotate %181 by %c241_i32_186 dim 1 : vector<32x256xf32>, i32 -> vector<32x256xf32>
    %c6_187 = arith.constant 6 : index
    %c0_188 = arith.constant 0 : index
    %c0_189 = arith.constant 0 : index
    %214 = vector.load %arg6[%c6_187, %c0_188, %c0_189] : memref<9x1x256xf32, #tpu.memory_space<vmem>>, vector<1x1x256xf32>
    %215 = vector.shape_cast %214 : vector<1x1x256xf32> to vector<1x256xf32>
    %216 = vector.broadcast %215 : vector<1x256xf32> to vector<32x256xf32>
    %217 = arith.mulf %213, %216 : vector<32x256xf32>
    %c192_190 = arith.constant 192 : index
    %c0_191 = arith.constant 0 : index
    %218 = vector.load %arg9[%c192_190, %c0_191] : memref<288x256xf32, #tpu.memory_space<vmem>>, vector<32x256xf32>
    tpu.vector_store %arg9[%c192_190, %c0_191], %217 {strides = array<i32>} : memref<288x256xf32, #tpu.memory_space<vmem>>, vector<32x256xf32>,
    %c240_i32_192 = arith.constant 240 : i32
    %219 = tpu.dynamic_rotate %181 by %c240_i32_192 dim 1 : vector<32x256xf32>, i32 -> vector<32x256xf32>
    %c7_193 = arith.constant 7 : index
    %c0_194 = arith.constant 0 : index
    %c0_195 = arith.constant 0 : index
    %220 = vector.load %arg6[%c7_193, %c0_194, %c0_195] : memref<9x1x256xf32, #tpu.memory_space<vmem>>, vector<1x1x256xf32>
    %221 = vector.shape_cast %220 : vector<1x1x256xf32> to vector<1x256xf32>
    %222 = vector.broadcast %221 : vector<1x256xf32> to vector<32x256xf32>
    %223 = arith.mulf %219, %222 : vector<32x256xf32>
    %c224_196 = arith.constant 224 : index
    %c0_197 = arith.constant 0 : index
    %224 = vector.load %arg9[%c224_196, %c0_197] : memref<288x256xf32, #tpu.memory_space<vmem>>, vector<32x256xf32>
    tpu.vector_store %arg9[%c224_196, %c0_197], %223 {strides = array<i32>} : memref<288x256xf32, #tpu.memory_space<vmem>>, vector<32x256xf32>,
    %c239_i32_198 = arith.constant 239 : i32
    %225 = tpu.dynamic_rotate %181 by %c239_i32_198 dim 1 : vector<32x256xf32>, i32 -> vector<32x256xf32>
    %c8_199 = arith.constant 8 : index
    %c0_200 = arith.constant 0 : index
    %c0_201 = arith.constant 0 : index
    %226 = vector.load %arg6[%c8_199, %c0_200, %c0_201] : memref<9x1x256xf32, #tpu.memory_space<vmem>>, vector<1x1x256xf32>
    %227 = vector.shape_cast %226 : vector<1x1x256xf32> to vector<1x256xf32>
    %228 = vector.broadcast %227 : vector<1x256xf32> to vector<32x256xf32>
    %229 = arith.mulf %225, %228 : vector<32x256xf32>
    %c256_202 = arith.constant 256 : index
    %c0_203 = arith.constant 0 : index
    %230 = vector.load %arg9[%c256_202, %c0_203] : memref<288x256xf32, #tpu.memory_space<vmem>>, vector<32x256xf32>
    tpu.vector_store %arg9[%c256_202, %c0_203], %229 {strides = array<i32>} : memref<288x256xf32, #tpu.memory_space<vmem>>, vector<32x256xf32>,
    %c0_204 = arith.constant 0 : index
    %c0_205 = arith.constant 0 : index
    %231 = vector.load %arg4[%c0_204, %c0_205] : memref<64x288xf32, #tpu.memory_space<vmem>>, vector<64x288xf32>
    %c0_206 = arith.constant 0 : index
    %c0_207 = arith.constant 0 : index
    %232 = vector.load %arg9[%c0_206, %c0_207] : memref<288x256xf32, #tpu.memory_space<vmem>>, vector<288x256xf32>
    %cst_208 = arith.constant dense<0.000000e+00> : vector<64x256xf32>
    %233 = tpu.matmul %231, %232, %cst_208 {dimension_numbers = #tpu.dot_dimension_numbers<[1], [0], [0], [1], [0, 0, 1, 1], [], []>} : vector<64x288xf32>, vector<288x256xf32>, vector<64x256xf32> -> vector<64x256xf32>
    %c0_209 = arith.constant 0 : index
    %c0_210 = arith.constant 0 : index
    %234 = vector.load %arg5[%c0_209, %c0_210] : memref<64x1xf32, #tpu.memory_space<vmem>>, vector<64x1xf32>
    %235 = vector.broadcast %234 : vector<64x1xf32> to vector<64x256xf32>
    %236 = arith.addf %233, %235 : vector<64x256xf32>
    %cst_211 = arith.constant 0.000000e+00 : f32
    %237 = vector.broadcast %cst_211 : f32 to vector<64x256xf32>
    %238 = arith.maximumf %236, %237 : vector<64x256xf32>
    %cst_212 = arith.constant dense<0.000000e+00> : vector<64xf32>
    %239 = vector.multi_reduction <add>, %238, %cst_212 [1] : vector<64x256xf32> to vector<64xf32>
    %240 = vector.shape_cast %239 : vector<64xf32> to vector<64x1xf32>
    %cst_213 = arith.constant 2.560000e+02 : f32
    %241 = vector.broadcast %cst_213 : f32 to vector<64x1xf32>
    %242 = arith.divf %240, %241 : vector<64x1xf32>
    %c1_214 = arith.constant 1 : index
    %c0_215 = arith.constant 0 : index
    %c0_216 = arith.constant 0 : index
    %243 = vector.load %arg7[%c1_214, %c0_215, %c0_216] : memref<4x64x1xf32, #tpu.memory_space<vmem>>, vector<1x64x1xf32>
    %244 = vector.shape_cast %243 : vector<1x64x1xf32> to vector<64x1xf32>
    %245 = vector.shape_cast %242 : vector<64x1xf32> to vector<1x64x1xf32>
    tpu.vector_store %arg7[%c1_214, %c0_215, %c0_216], %245 {strides = array<i32>} : memref<4x64x1xf32, #tpu.memory_space<vmem>>, vector<1x64x1xf32>,
    %c2_217 = arith.constant 2 : index
    %c0_218 = arith.constant 0 : index
    %c0_219 = arith.constant 0 : index
    %246 = vector.load %arg1[%c2_217, %c0_218, %c0_219] : memref<4x4x256xf32, #tpu.memory_space<vmem>>, vector<1x4x256xf32>
    %247 = vector.shape_cast %246 : vector<1x4x256xf32> to vector<4x256xf32>
    %c17_i32_220 = arith.constant 17 : i32
    %248 = tpu.dynamic_rotate %247 by %c17_i32_220 dim 1 : vector<4x256xf32>, i32 -> vector<4x256xf32>
    %c0_221 = arith.constant 0 : index
    %c0_222 = arith.constant 0 : index
    %c0_223 = arith.constant 0 : index
    %249 = vector.load %arg6[%c0_221, %c0_222, %c0_223] : memref<9x1x256xf32, #tpu.memory_space<vmem>>, vector<1x1x256xf32>
    %250 = vector.shape_cast %249 : vector<1x1x256xf32> to vector<1x256xf32>
    %251 = vector.broadcast %250 : vector<1x256xf32> to vector<4x256xf32>
    %252 = arith.mulf %248, %251 : vector<4x256xf32>
    %c0_224 = arith.constant 0 : index
    %c0_225 = arith.constant 0 : index
    %253 = vector.load %arg8[%c0_224, %c0_225] : memref<36x256xf32, #tpu.memory_space<vmem>>, vector<4x256xf32>
    tpu.vector_store %arg8[%c0_224, %c0_225], %252 {strides = array<i32>} : memref<36x256xf32, #tpu.memory_space<vmem>>, vector<4x256xf32>,
    %c16_i32_226 = arith.constant 16 : i32
    %254 = tpu.dynamic_rotate %247 by %c16_i32_226 dim 1 : vector<4x256xf32>, i32 -> vector<4x256xf32>
    %c1_227 = arith.constant 1 : index
    %c0_228 = arith.constant 0 : index
    %c0_229 = arith.constant 0 : index
    %255 = vector.load %arg6[%c1_227, %c0_228, %c0_229] : memref<9x1x256xf32, #tpu.memory_space<vmem>>, vector<1x1x256xf32>
    %256 = vector.shape_cast %255 : vector<1x1x256xf32> to vector<1x256xf32>
    %257 = vector.broadcast %256 : vector<1x256xf32> to vector<4x256xf32>
    %258 = arith.mulf %254, %257 : vector<4x256xf32>
    %c4_230 = arith.constant 4 : index
    %c0_231 = arith.constant 0 : index
    %259 = vector.load %arg8[%c4_230, %c0_231] : memref<36x256xf32, #tpu.memory_space<vmem>>, vector<4x256xf32>
    tpu.vector_store %arg8[%c4_230, %c0_231], %258 {strides = array<i32>} : memref<36x256xf32, #tpu.memory_space<vmem>>, vector<4x256xf32>,
    %c15_i32_232 = arith.constant 15 : i32
    %260 = tpu.dynamic_rotate %247 by %c15_i32_232 dim 1 : vector<4x256xf32>, i32 -> vector<4x256xf32>
    %c2_233 = arith.constant 2 : index
    %c0_234 = arith.constant 0 : index
    %c0_235 = arith.constant 0 : index
    %261 = vector.load %arg6[%c2_233, %c0_234, %c0_235] : memref<9x1x256xf32, #tpu.memory_space<vmem>>, vector<1x1x256xf32>
    %262 = vector.shape_cast %261 : vector<1x1x256xf32> to vector<1x256xf32>
    %263 = vector.broadcast %262 : vector<1x256xf32> to vector<4x256xf32>
    %264 = arith.mulf %260, %263 : vector<4x256xf32>
    %c8_236 = arith.constant 8 : index
    %c0_237 = arith.constant 0 : index
    %265 = vector.load %arg8[%c8_236, %c0_237] : memref<36x256xf32, #tpu.memory_space<vmem>>, vector<4x256xf32>
    tpu.vector_store %arg8[%c8_236, %c0_237], %264 {strides = array<i32>} : memref<36x256xf32, #tpu.memory_space<vmem>>, vector<4x256xf32>,
    %c1_i32_238 = arith.constant 1 : i32
    %266 = tpu.dynamic_rotate %247 by %c1_i32_238 dim 1 : vector<4x256xf32>, i32 -> vector<4x256xf32>
    %c3_239 = arith.constant 3 : index
    %c0_240 = arith.constant 0 : index
    %c0_241 = arith.constant 0 : index
    %267 = vector.load %arg6[%c3_239, %c0_240, %c0_241] : memref<9x1x256xf32, #tpu.memory_space<vmem>>, vector<1x1x256xf32>
    %268 = vector.shape_cast %267 : vector<1x1x256xf32> to vector<1x256xf32>
    %269 = vector.broadcast %268 : vector<1x256xf32> to vector<4x256xf32>
    %270 = arith.mulf %266, %269 : vector<4x256xf32>
    %c12_242 = arith.constant 12 : index
    %c0_243 = arith.constant 0 : index
    %271 = vector.load %arg8[%c12_242, %c0_243] : memref<36x256xf32, #tpu.memory_space<vmem>>, vector<4x256xf32>
    tpu.vector_store %arg8[%c12_242, %c0_243], %270 {strides = array<i32>} : memref<36x256xf32, #tpu.memory_space<vmem>>, vector<4x256xf32>,
    %c16_244 = arith.constant 16 : index
    %c0_245 = arith.constant 0 : index
    %272 = vector.load %arg8[%c16_244, %c0_245] : memref<36x256xf32, #tpu.memory_space<vmem>>, vector<4x256xf32>
    tpu.vector_store %arg8[%c16_244, %c0_245], %247 {strides = array<i32>} : memref<36x256xf32, #tpu.memory_space<vmem>>, vector<4x256xf32>,
    %c255_i32_246 = arith.constant 255 : i32
    %273 = tpu.dynamic_rotate %247 by %c255_i32_246 dim 1 : vector<4x256xf32>, i32 -> vector<4x256xf32>
    %c5_247 = arith.constant 5 : index
    %c0_248 = arith.constant 0 : index
    %c0_249 = arith.constant 0 : index
    %274 = vector.load %arg6[%c5_247, %c0_248, %c0_249] : memref<9x1x256xf32, #tpu.memory_space<vmem>>, vector<1x1x256xf32>
    %275 = vector.shape_cast %274 : vector<1x1x256xf32> to vector<1x256xf32>
    %276 = vector.broadcast %275 : vector<1x256xf32> to vector<4x256xf32>
    %277 = arith.mulf %273, %276 : vector<4x256xf32>
    %c20_250 = arith.constant 20 : index
    %c0_251 = arith.constant 0 : index
    %278 = vector.load %arg8[%c20_250, %c0_251] : memref<36x256xf32, #tpu.memory_space<vmem>>, vector<4x256xf32>
    tpu.vector_store %arg8[%c20_250, %c0_251], %277 {strides = array<i32>} : memref<36x256xf32, #tpu.memory_space<vmem>>, vector<4x256xf32>,
    %c241_i32_252 = arith.constant 241 : i32
    %279 = tpu.dynamic_rotate %247 by %c241_i32_252 dim 1 : vector<4x256xf32>, i32 -> vector<4x256xf32>
    %c6_253 = arith.constant 6 : index
    %c0_254 = arith.constant 0 : index
    %c0_255 = arith.constant 0 : index
    %280 = vector.load %arg6[%c6_253, %c0_254, %c0_255] : memref<9x1x256xf32, #tpu.memory_space<vmem>>, vector<1x1x256xf32>
    %281 = vector.shape_cast %280 : vector<1x1x256xf32> to vector<1x256xf32>
    %282 = vector.broadcast %281 : vector<1x256xf32> to vector<4x256xf32>
    %283 = arith.mulf %279, %282 : vector<4x256xf32>
    %c24_256 = arith.constant 24 : index
    %c0_257 = arith.constant 0 : index
    %284 = vector.load %arg8[%c24_256, %c0_257] : memref<36x256xf32, #tpu.memory_space<vmem>>, vector<4x256xf32>
    tpu.vector_store %arg8[%c24_256, %c0_257], %283 {strides = array<i32>} : memref<36x256xf32, #tpu.memory_space<vmem>>, vector<4x256xf32>,
    %c240_i32_258 = arith.constant 240 : i32
    %285 = tpu.dynamic_rotate %247 by %c240_i32_258 dim 1 : vector<4x256xf32>, i32 -> vector<4x256xf32>
    %c7_259 = arith.constant 7 : index
    %c0_260 = arith.constant 0 : index
    %c0_261 = arith.constant 0 : index
    %286 = vector.load %arg6[%c7_259, %c0_260, %c0_261] : memref<9x1x256xf32, #tpu.memory_space<vmem>>, vector<1x1x256xf32>
    %287 = vector.shape_cast %286 : vector<1x1x256xf32> to vector<1x256xf32>
    %288 = vector.broadcast %287 : vector<1x256xf32> to vector<4x256xf32>
    %289 = arith.mulf %285, %288 : vector<4x256xf32>
    %c28_262 = arith.constant 28 : index
    %c0_263 = arith.constant 0 : index
    %290 = vector.load %arg8[%c28_262, %c0_263] : memref<36x256xf32, #tpu.memory_space<vmem>>, vector<4x256xf32>
    tpu.vector_store %arg8[%c28_262, %c0_263], %289 {strides = array<i32>} : memref<36x256xf32, #tpu.memory_space<vmem>>, vector<4x256xf32>,
    %c239_i32_264 = arith.constant 239 : i32
    %291 = tpu.dynamic_rotate %247 by %c239_i32_264 dim 1 : vector<4x256xf32>, i32 -> vector<4x256xf32>
    %c8_265 = arith.constant 8 : index
    %c0_266 = arith.constant 0 : index
    %c0_267 = arith.constant 0 : index
    %292 = vector.load %arg6[%c8_265, %c0_266, %c0_267] : memref<9x1x256xf32, #tpu.memory_space<vmem>>, vector<1x1x256xf32>
    %293 = vector.shape_cast %292 : vector<1x1x256xf32> to vector<1x256xf32>
    %294 = vector.broadcast %293 : vector<1x256xf32> to vector<4x256xf32>
    %295 = arith.mulf %291, %294 : vector<4x256xf32>
    %c32_268 = arith.constant 32 : index
    %c0_269 = arith.constant 0 : index
    %296 = vector.load %arg8[%c32_268, %c0_269] : memref<36x256xf32, #tpu.memory_space<vmem>>, vector<4x256xf32>
    tpu.vector_store %arg8[%c32_268, %c0_269], %295 {strides = array<i32>} : memref<36x256xf32, #tpu.memory_space<vmem>>, vector<4x256xf32>,
    %c0_270 = arith.constant 0 : index
    %c0_271 = arith.constant 0 : index
    %297 = vector.load %arg2[%c0_270, %c0_271] : memref<32x36xf32, #tpu.memory_space<vmem>>, vector<32x36xf32>
    %c0_272 = arith.constant 0 : index
    %c0_273 = arith.constant 0 : index
    %298 = vector.load %arg8[%c0_272, %c0_273] : memref<36x256xf32, #tpu.memory_space<vmem>>, vector<36x256xf32>
    %cst_274 = arith.constant dense<0.000000e+00> : vector<32x256xf32>
    %299 = tpu.matmul %297, %298, %cst_274 {dimension_numbers = #tpu.dot_dimension_numbers<[1], [0], [0], [1], [0, 0, 1, 1], [], []>} : vector<32x36xf32>, vector<36x256xf32>, vector<32x256xf32> -> vector<32x256xf32>
    %c0_275 = arith.constant 0 : index
    %c0_276 = arith.constant 0 : index
    %300 = vector.load %arg3[%c0_275, %c0_276] : memref<32x1xf32, #tpu.memory_space<vmem>>, vector<32x1xf32>
    %301 = vector.broadcast %300 : vector<32x1xf32> to vector<32x256xf32>
    %302 = arith.addf %299, %301 : vector<32x256xf32>
    %cst_277 = arith.constant 0.000000e+00 : f32
    %303 = vector.broadcast %cst_277 : f32 to vector<32x256xf32>
    %304 = arith.maximumf %302, %303 : vector<32x256xf32>
    %c17_i32_278 = arith.constant 17 : i32
    %305 = tpu.dynamic_rotate %304 by %c17_i32_278 dim 1 : vector<32x256xf32>, i32 -> vector<32x256xf32>
    %c0_279 = arith.constant 0 : index
    %c0_280 = arith.constant 0 : index
    %c0_281 = arith.constant 0 : index
    %306 = vector.load %arg6[%c0_279, %c0_280, %c0_281] : memref<9x1x256xf32, #tpu.memory_space<vmem>>, vector<1x1x256xf32>
    %307 = vector.shape_cast %306 : vector<1x1x256xf32> to vector<1x256xf32>
    %308 = vector.broadcast %307 : vector<1x256xf32> to vector<32x256xf32>
    %309 = arith.mulf %305, %308 : vector<32x256xf32>
    %c0_282 = arith.constant 0 : index
    %c0_283 = arith.constant 0 : index
    %310 = vector.load %arg9[%c0_282, %c0_283] : memref<288x256xf32, #tpu.memory_space<vmem>>, vector<32x256xf32>
    tpu.vector_store %arg9[%c0_282, %c0_283], %309 {strides = array<i32>} : memref<288x256xf32, #tpu.memory_space<vmem>>, vector<32x256xf32>,
    %c16_i32_284 = arith.constant 16 : i32
    %311 = tpu.dynamic_rotate %304 by %c16_i32_284 dim 1 : vector<32x256xf32>, i32 -> vector<32x256xf32>
    %c1_285 = arith.constant 1 : index
    %c0_286 = arith.constant 0 : index
    %c0_287 = arith.constant 0 : index
    %312 = vector.load %arg6[%c1_285, %c0_286, %c0_287] : memref<9x1x256xf32, #tpu.memory_space<vmem>>, vector<1x1x256xf32>
    %313 = vector.shape_cast %312 : vector<1x1x256xf32> to vector<1x256xf32>
    %314 = vector.broadcast %313 : vector<1x256xf32> to vector<32x256xf32>
    %315 = arith.mulf %311, %314 : vector<32x256xf32>
    %c32_288 = arith.constant 32 : index
    %c0_289 = arith.constant 0 : index
    %316 = vector.load %arg9[%c32_288, %c0_289] : memref<288x256xf32, #tpu.memory_space<vmem>>, vector<32x256xf32>
    tpu.vector_store %arg9[%c32_288, %c0_289], %315 {strides = array<i32>} : memref<288x256xf32, #tpu.memory_space<vmem>>, vector<32x256xf32>,
    %c15_i32_290 = arith.constant 15 : i32
    %317 = tpu.dynamic_rotate %304 by %c15_i32_290 dim 1 : vector<32x256xf32>, i32 -> vector<32x256xf32>
    %c2_291 = arith.constant 2 : index
    %c0_292 = arith.constant 0 : index
    %c0_293 = arith.constant 0 : index
    %318 = vector.load %arg6[%c2_291, %c0_292, %c0_293] : memref<9x1x256xf32, #tpu.memory_space<vmem>>, vector<1x1x256xf32>
    %319 = vector.shape_cast %318 : vector<1x1x256xf32> to vector<1x256xf32>
    %320 = vector.broadcast %319 : vector<1x256xf32> to vector<32x256xf32>
    %321 = arith.mulf %317, %320 : vector<32x256xf32>
    %c64_294 = arith.constant 64 : index
    %c0_295 = arith.constant 0 : index
    %322 = vector.load %arg9[%c64_294, %c0_295] : memref<288x256xf32, #tpu.memory_space<vmem>>, vector<32x256xf32>
    tpu.vector_store %arg9[%c64_294, %c0_295], %321 {strides = array<i32>} : memref<288x256xf32, #tpu.memory_space<vmem>>, vector<32x256xf32>,
    %c1_i32_296 = arith.constant 1 : i32
    %323 = tpu.dynamic_rotate %304 by %c1_i32_296 dim 1 : vector<32x256xf32>, i32 -> vector<32x256xf32>
    %c3_297 = arith.constant 3 : index
    %c0_298 = arith.constant 0 : index
    %c0_299 = arith.constant 0 : index
    %324 = vector.load %arg6[%c3_297, %c0_298, %c0_299] : memref<9x1x256xf32, #tpu.memory_space<vmem>>, vector<1x1x256xf32>
    %325 = vector.shape_cast %324 : vector<1x1x256xf32> to vector<1x256xf32>
    %326 = vector.broadcast %325 : vector<1x256xf32> to vector<32x256xf32>
    %327 = arith.mulf %323, %326 : vector<32x256xf32>
    %c96_300 = arith.constant 96 : index
    %c0_301 = arith.constant 0 : index
    %328 = vector.load %arg9[%c96_300, %c0_301] : memref<288x256xf32, #tpu.memory_space<vmem>>, vector<32x256xf32>
    tpu.vector_store %arg9[%c96_300, %c0_301], %327 {strides = array<i32>} : memref<288x256xf32, #tpu.memory_space<vmem>>, vector<32x256xf32>,
    %c128_302 = arith.constant 128 : index
    %c0_303 = arith.constant 0 : index
    %329 = vector.load %arg9[%c128_302, %c0_303] : memref<288x256xf32, #tpu.memory_space<vmem>>, vector<32x256xf32>
    tpu.vector_store %arg9[%c128_302, %c0_303], %304 {strides = array<i32>} : memref<288x256xf32, #tpu.memory_space<vmem>>, vector<32x256xf32>,
    %c255_i32_304 = arith.constant 255 : i32
    %330 = tpu.dynamic_rotate %304 by %c255_i32_304 dim 1 : vector<32x256xf32>, i32 -> vector<32x256xf32>
    %c5_305 = arith.constant 5 : index
    %c0_306 = arith.constant 0 : index
    %c0_307 = arith.constant 0 : index
    %331 = vector.load %arg6[%c5_305, %c0_306, %c0_307] : memref<9x1x256xf32, #tpu.memory_space<vmem>>, vector<1x1x256xf32>
    %332 = vector.shape_cast %331 : vector<1x1x256xf32> to vector<1x256xf32>
    %333 = vector.broadcast %332 : vector<1x256xf32> to vector<32x256xf32>
    %334 = arith.mulf %330, %333 : vector<32x256xf32>
    %c160_308 = arith.constant 160 : index
    %c0_309 = arith.constant 0 : index
    %335 = vector.load %arg9[%c160_308, %c0_309] : memref<288x256xf32, #tpu.memory_space<vmem>>, vector<32x256xf32>
    tpu.vector_store %arg9[%c160_308, %c0_309], %334 {strides = array<i32>} : memref<288x256xf32, #tpu.memory_space<vmem>>, vector<32x256xf32>,
    %c241_i32_310 = arith.constant 241 : i32
    %336 = tpu.dynamic_rotate %304 by %c241_i32_310 dim 1 : vector<32x256xf32>, i32 -> vector<32x256xf32>
    %c6_311 = arith.constant 6 : index
    %c0_312 = arith.constant 0 : index
    %c0_313 = arith.constant 0 : index
    %337 = vector.load %arg6[%c6_311, %c0_312, %c0_313] : memref<9x1x256xf32, #tpu.memory_space<vmem>>, vector<1x1x256xf32>
    %338 = vector.shape_cast %337 : vector<1x1x256xf32> to vector<1x256xf32>
    %339 = vector.broadcast %338 : vector<1x256xf32> to vector<32x256xf32>
    %340 = arith.mulf %336, %339 : vector<32x256xf32>
    %c192_314 = arith.constant 192 : index
    %c0_315 = arith.constant 0 : index
    %341 = vector.load %arg9[%c192_314, %c0_315] : memref<288x256xf32, #tpu.memory_space<vmem>>, vector<32x256xf32>
    tpu.vector_store %arg9[%c192_314, %c0_315], %340 {strides = array<i32>} : memref<288x256xf32, #tpu.memory_space<vmem>>, vector<32x256xf32>,
    %c240_i32_316 = arith.constant 240 : i32
    %342 = tpu.dynamic_rotate %304 by %c240_i32_316 dim 1 : vector<32x256xf32>, i32 -> vector<32x256xf32>
    %c7_317 = arith.constant 7 : index
    %c0_318 = arith.constant 0 : index
    %c0_319 = arith.constant 0 : index
    %343 = vector.load %arg6[%c7_317, %c0_318, %c0_319] : memref<9x1x256xf32, #tpu.memory_space<vmem>>, vector<1x1x256xf32>
    %344 = vector.shape_cast %343 : vector<1x1x256xf32> to vector<1x256xf32>
    %345 = vector.broadcast %344 : vector<1x256xf32> to vector<32x256xf32>
    %346 = arith.mulf %342, %345 : vector<32x256xf32>
    %c224_320 = arith.constant 224 : index
    %c0_321 = arith.constant 0 : index
    %347 = vector.load %arg9[%c224_320, %c0_321] : memref<288x256xf32, #tpu.memory_space<vmem>>, vector<32x256xf32>
    tpu.vector_store %arg9[%c224_320, %c0_321], %346 {strides = array<i32>} : memref<288x256xf32, #tpu.memory_space<vmem>>, vector<32x256xf32>,
    %c239_i32_322 = arith.constant 239 : i32
    %348 = tpu.dynamic_rotate %304 by %c239_i32_322 dim 1 : vector<32x256xf32>, i32 -> vector<32x256xf32>
    %c8_323 = arith.constant 8 : index
    %c0_324 = arith.constant 0 : index
    %c0_325 = arith.constant 0 : index
    %349 = vector.load %arg6[%c8_323, %c0_324, %c0_325] : memref<9x1x256xf32, #tpu.memory_space<vmem>>, vector<1x1x256xf32>
    %350 = vector.shape_cast %349 : vector<1x1x256xf32> to vector<1x256xf32>
    %351 = vector.broadcast %350 : vector<1x256xf32> to vector<32x256xf32>
    %352 = arith.mulf %348, %351 : vector<32x256xf32>
    %c256_326 = arith.constant 256 : index
    %c0_327 = arith.constant 0 : index
    %353 = vector.load %arg9[%c256_326, %c0_327] : memref<288x256xf32, #tpu.memory_space<vmem>>, vector<32x256xf32>
    tpu.vector_store %arg9[%c256_326, %c0_327], %352 {strides = array<i32>} : memref<288x256xf32, #tpu.memory_space<vmem>>, vector<32x256xf32>,
    %c0_328 = arith.constant 0 : index
    %c0_329 = arith.constant 0 : index
    %354 = vector.load %arg4[%c0_328, %c0_329] : memref<64x288xf32, #tpu.memory_space<vmem>>, vector<64x288xf32>
    %c0_330 = arith.constant 0 : index
    %c0_331 = arith.constant 0 : index
    %355 = vector.load %arg9[%c0_330, %c0_331] : memref<288x256xf32, #tpu.memory_space<vmem>>, vector<288x256xf32>
    %cst_332 = arith.constant dense<0.000000e+00> : vector<64x256xf32>
    %356 = tpu.matmul %354, %355, %cst_332 {dimension_numbers = #tpu.dot_dimension_numbers<[1], [0], [0], [1], [0, 0, 1, 1], [], []>} : vector<64x288xf32>, vector<288x256xf32>, vector<64x256xf32> -> vector<64x256xf32>
    %c0_333 = arith.constant 0 : index
    %c0_334 = arith.constant 0 : index
    %357 = vector.load %arg5[%c0_333, %c0_334] : memref<64x1xf32, #tpu.memory_space<vmem>>, vector<64x1xf32>
    %358 = vector.broadcast %357 : vector<64x1xf32> to vector<64x256xf32>
    %359 = arith.addf %356, %358 : vector<64x256xf32>
    %cst_335 = arith.constant 0.000000e+00 : f32
    %360 = vector.broadcast %cst_335 : f32 to vector<64x256xf32>
    %361 = arith.maximumf %359, %360 : vector<64x256xf32>
    %cst_336 = arith.constant dense<0.000000e+00> : vector<64xf32>
    %362 = vector.multi_reduction <add>, %361, %cst_336 [1] : vector<64x256xf32> to vector<64xf32>
    %363 = vector.shape_cast %362 : vector<64xf32> to vector<64x1xf32>
    %cst_337 = arith.constant 2.560000e+02 : f32
    %364 = vector.broadcast %cst_337 : f32 to vector<64x1xf32>
    %365 = arith.divf %363, %364 : vector<64x1xf32>
    %c2_338 = arith.constant 2 : index
    %c0_339 = arith.constant 0 : index
    %c0_340 = arith.constant 0 : index
    %366 = vector.load %arg7[%c2_338, %c0_339, %c0_340] : memref<4x64x1xf32, #tpu.memory_space<vmem>>, vector<1x64x1xf32>
    %367 = vector.shape_cast %366 : vector<1x64x1xf32> to vector<64x1xf32>
    %368 = vector.shape_cast %365 : vector<64x1xf32> to vector<1x64x1xf32>
    tpu.vector_store %arg7[%c2_338, %c0_339, %c0_340], %368 {strides = array<i32>} : memref<4x64x1xf32, #tpu.memory_space<vmem>>, vector<1x64x1xf32>,
    %c3_341 = arith.constant 3 : index
    %c0_342 = arith.constant 0 : index
    %c0_343 = arith.constant 0 : index
    %369 = vector.load %arg1[%c3_341, %c0_342, %c0_343] : memref<4x4x256xf32, #tpu.memory_space<vmem>>, vector<1x4x256xf32>
    %370 = vector.shape_cast %369 : vector<1x4x256xf32> to vector<4x256xf32>
    %c17_i32_344 = arith.constant 17 : i32
    %371 = tpu.dynamic_rotate %370 by %c17_i32_344 dim 1 : vector<4x256xf32>, i32 -> vector<4x256xf32>
    %c0_345 = arith.constant 0 : index
    %c0_346 = arith.constant 0 : index
    %c0_347 = arith.constant 0 : index
    %372 = vector.load %arg6[%c0_345, %c0_346, %c0_347] : memref<9x1x256xf32, #tpu.memory_space<vmem>>, vector<1x1x256xf32>
    %373 = vector.shape_cast %372 : vector<1x1x256xf32> to vector<1x256xf32>
    %374 = vector.broadcast %373 : vector<1x256xf32> to vector<4x256xf32>
    %375 = arith.mulf %371, %374 : vector<4x256xf32>
    %c0_348 = arith.constant 0 : index
    %c0_349 = arith.constant 0 : index
    %376 = vector.load %arg8[%c0_348, %c0_349] : memref<36x256xf32, #tpu.memory_space<vmem>>, vector<4x256xf32>
    tpu.vector_store %arg8[%c0_348, %c0_349], %375 {strides = array<i32>} : memref<36x256xf32, #tpu.memory_space<vmem>>, vector<4x256xf32>,
    %c16_i32_350 = arith.constant 16 : i32
    %377 = tpu.dynamic_rotate %370 by %c16_i32_350 dim 1 : vector<4x256xf32>, i32 -> vector<4x256xf32>
    %c1_351 = arith.constant 1 : index
    %c0_352 = arith.constant 0 : index
    %c0_353 = arith.constant 0 : index
    %378 = vector.load %arg6[%c1_351, %c0_352, %c0_353] : memref<9x1x256xf32, #tpu.memory_space<vmem>>, vector<1x1x256xf32>
    %379 = vector.shape_cast %378 : vector<1x1x256xf32> to vector<1x256xf32>
    %380 = vector.broadcast %379 : vector<1x256xf32> to vector<4x256xf32>
    %381 = arith.mulf %377, %380 : vector<4x256xf32>
    %c4_354 = arith.constant 4 : index
    %c0_355 = arith.constant 0 : index
    %382 = vector.load %arg8[%c4_354, %c0_355] : memref<36x256xf32, #tpu.memory_space<vmem>>, vector<4x256xf32>
    tpu.vector_store %arg8[%c4_354, %c0_355], %381 {strides = array<i32>} : memref<36x256xf32, #tpu.memory_space<vmem>>, vector<4x256xf32>,
    %c15_i32_356 = arith.constant 15 : i32
    %383 = tpu.dynamic_rotate %370 by %c15_i32_356 dim 1 : vector<4x256xf32>, i32 -> vector<4x256xf32>
    %c2_357 = arith.constant 2 : index
    %c0_358 = arith.constant 0 : index
    %c0_359 = arith.constant 0 : index
    %384 = vector.load %arg6[%c2_357, %c0_358, %c0_359] : memref<9x1x256xf32, #tpu.memory_space<vmem>>, vector<1x1x256xf32>
    %385 = vector.shape_cast %384 : vector<1x1x256xf32> to vector<1x256xf32>
    %386 = vector.broadcast %385 : vector<1x256xf32> to vector<4x256xf32>
    %387 = arith.mulf %383, %386 : vector<4x256xf32>
    %c8_360 = arith.constant 8 : index
    %c0_361 = arith.constant 0 : index
    %388 = vector.load %arg8[%c8_360, %c0_361] : memref<36x256xf32, #tpu.memory_space<vmem>>, vector<4x256xf32>
    tpu.vector_store %arg8[%c8_360, %c0_361], %387 {strides = array<i32>} : memref<36x256xf32, #tpu.memory_space<vmem>>, vector<4x256xf32>,
    %c1_i32_362 = arith.constant 1 : i32
    %389 = tpu.dynamic_rotate %370 by %c1_i32_362 dim 1 : vector<4x256xf32>, i32 -> vector<4x256xf32>
    %c3_363 = arith.constant 3 : index
    %c0_364 = arith.constant 0 : index
    %c0_365 = arith.constant 0 : index
    %390 = vector.load %arg6[%c3_363, %c0_364, %c0_365] : memref<9x1x256xf32, #tpu.memory_space<vmem>>, vector<1x1x256xf32>
    %391 = vector.shape_cast %390 : vector<1x1x256xf32> to vector<1x256xf32>
    %392 = vector.broadcast %391 : vector<1x256xf32> to vector<4x256xf32>
    %393 = arith.mulf %389, %392 : vector<4x256xf32>
    %c12_366 = arith.constant 12 : index
    %c0_367 = arith.constant 0 : index
    %394 = vector.load %arg8[%c12_366, %c0_367] : memref<36x256xf32, #tpu.memory_space<vmem>>, vector<4x256xf32>
    tpu.vector_store %arg8[%c12_366, %c0_367], %393 {strides = array<i32>} : memref<36x256xf32, #tpu.memory_space<vmem>>, vector<4x256xf32>,
    %c16_368 = arith.constant 16 : index
    %c0_369 = arith.constant 0 : index
    %395 = vector.load %arg8[%c16_368, %c0_369] : memref<36x256xf32, #tpu.memory_space<vmem>>, vector<4x256xf32>
    tpu.vector_store %arg8[%c16_368, %c0_369], %370 {strides = array<i32>} : memref<36x256xf32, #tpu.memory_space<vmem>>, vector<4x256xf32>,
    %c255_i32_370 = arith.constant 255 : i32
    %396 = tpu.dynamic_rotate %370 by %c255_i32_370 dim 1 : vector<4x256xf32>, i32 -> vector<4x256xf32>
    %c5_371 = arith.constant 5 : index
    %c0_372 = arith.constant 0 : index
    %c0_373 = arith.constant 0 : index
    %397 = vector.load %arg6[%c5_371, %c0_372, %c0_373] : memref<9x1x256xf32, #tpu.memory_space<vmem>>, vector<1x1x256xf32>
    %398 = vector.shape_cast %397 : vector<1x1x256xf32> to vector<1x256xf32>
    %399 = vector.broadcast %398 : vector<1x256xf32> to vector<4x256xf32>
    %400 = arith.mulf %396, %399 : vector<4x256xf32>
    %c20_374 = arith.constant 20 : index
    %c0_375 = arith.constant 0 : index
    %401 = vector.load %arg8[%c20_374, %c0_375] : memref<36x256xf32, #tpu.memory_space<vmem>>, vector<4x256xf32>
    tpu.vector_store %arg8[%c20_374, %c0_375], %400 {strides = array<i32>} : memref<36x256xf32, #tpu.memory_space<vmem>>, vector<4x256xf32>,
    %c241_i32_376 = arith.constant 241 : i32
    %402 = tpu.dynamic_rotate %370 by %c241_i32_376 dim 1 : vector<4x256xf32>, i32 -> vector<4x256xf32>
    %c6_377 = arith.constant 6 : index
    %c0_378 = arith.constant 0 : index
    %c0_379 = arith.constant 0 : index
    %403 = vector.load %arg6[%c6_377, %c0_378, %c0_379] : memref<9x1x256xf32, #tpu.memory_space<vmem>>, vector<1x1x256xf32>
    %404 = vector.shape_cast %403 : vector<1x1x256xf32> to vector<1x256xf32>
    %405 = vector.broadcast %404 : vector<1x256xf32> to vector<4x256xf32>
    %406 = arith.mulf %402, %405 : vector<4x256xf32>
    %c24_380 = arith.constant 24 : index
    %c0_381 = arith.constant 0 : index
    %407 = vector.load %arg8[%c24_380, %c0_381] : memref<36x256xf32, #tpu.memory_space<vmem>>, vector<4x256xf32>
    tpu.vector_store %arg8[%c24_380, %c0_381], %406 {strides = array<i32>} : memref<36x256xf32, #tpu.memory_space<vmem>>, vector<4x256xf32>,
    %c240_i32_382 = arith.constant 240 : i32
    %408 = tpu.dynamic_rotate %370 by %c240_i32_382 dim 1 : vector<4x256xf32>, i32 -> vector<4x256xf32>
    %c7_383 = arith.constant 7 : index
    %c0_384 = arith.constant 0 : index
    %c0_385 = arith.constant 0 : index
    %409 = vector.load %arg6[%c7_383, %c0_384, %c0_385] : memref<9x1x256xf32, #tpu.memory_space<vmem>>, vector<1x1x256xf32>
    %410 = vector.shape_cast %409 : vector<1x1x256xf32> to vector<1x256xf32>
    %411 = vector.broadcast %410 : vector<1x256xf32> to vector<4x256xf32>
    %412 = arith.mulf %408, %411 : vector<4x256xf32>
    %c28_386 = arith.constant 28 : index
    %c0_387 = arith.constant 0 : index
    %413 = vector.load %arg8[%c28_386, %c0_387] : memref<36x256xf32, #tpu.memory_space<vmem>>, vector<4x256xf32>
    tpu.vector_store %arg8[%c28_386, %c0_387], %412 {strides = array<i32>} : memref<36x256xf32, #tpu.memory_space<vmem>>, vector<4x256xf32>,
    %c239_i32_388 = arith.constant 239 : i32
    %414 = tpu.dynamic_rotate %370 by %c239_i32_388 dim 1 : vector<4x256xf32>, i32 -> vector<4x256xf32>
    %c8_389 = arith.constant 8 : index
    %c0_390 = arith.constant 0 : index
    %c0_391 = arith.constant 0 : index
    %415 = vector.load %arg6[%c8_389, %c0_390, %c0_391] : memref<9x1x256xf32, #tpu.memory_space<vmem>>, vector<1x1x256xf32>
    %416 = vector.shape_cast %415 : vector<1x1x256xf32> to vector<1x256xf32>
    %417 = vector.broadcast %416 : vector<1x256xf32> to vector<4x256xf32>
    %418 = arith.mulf %414, %417 : vector<4x256xf32>
    %c32_392 = arith.constant 32 : index
    %c0_393 = arith.constant 0 : index
    %419 = vector.load %arg8[%c32_392, %c0_393] : memref<36x256xf32, #tpu.memory_space<vmem>>, vector<4x256xf32>
    tpu.vector_store %arg8[%c32_392, %c0_393], %418 {strides = array<i32>} : memref<36x256xf32, #tpu.memory_space<vmem>>, vector<4x256xf32>,
    %c0_394 = arith.constant 0 : index
    %c0_395 = arith.constant 0 : index
    %420 = vector.load %arg2[%c0_394, %c0_395] : memref<32x36xf32, #tpu.memory_space<vmem>>, vector<32x36xf32>
    %c0_396 = arith.constant 0 : index
    %c0_397 = arith.constant 0 : index
    %421 = vector.load %arg8[%c0_396, %c0_397] : memref<36x256xf32, #tpu.memory_space<vmem>>, vector<36x256xf32>
    %cst_398 = arith.constant dense<0.000000e+00> : vector<32x256xf32>
    %422 = tpu.matmul %420, %421, %cst_398 {dimension_numbers = #tpu.dot_dimension_numbers<[1], [0], [0], [1], [0, 0, 1, 1], [], []>} : vector<32x36xf32>, vector<36x256xf32>, vector<32x256xf32> -> vector<32x256xf32>
    %c0_399 = arith.constant 0 : index
    %c0_400 = arith.constant 0 : index
    %423 = vector.load %arg3[%c0_399, %c0_400] : memref<32x1xf32, #tpu.memory_space<vmem>>, vector<32x1xf32>
    %424 = vector.broadcast %423 : vector<32x1xf32> to vector<32x256xf32>
    %425 = arith.addf %422, %424 : vector<32x256xf32>
    %cst_401 = arith.constant 0.000000e+00 : f32
    %426 = vector.broadcast %cst_401 : f32 to vector<32x256xf32>
    %427 = arith.maximumf %425, %426 : vector<32x256xf32>
    %c17_i32_402 = arith.constant 17 : i32
    %428 = tpu.dynamic_rotate %427 by %c17_i32_402 dim 1 : vector<32x256xf32>, i32 -> vector<32x256xf32>
    %c0_403 = arith.constant 0 : index
    %c0_404 = arith.constant 0 : index
    %c0_405 = arith.constant 0 : index
    %429 = vector.load %arg6[%c0_403, %c0_404, %c0_405] : memref<9x1x256xf32, #tpu.memory_space<vmem>>, vector<1x1x256xf32>
    %430 = vector.shape_cast %429 : vector<1x1x256xf32> to vector<1x256xf32>
    %431 = vector.broadcast %430 : vector<1x256xf32> to vector<32x256xf32>
    %432 = arith.mulf %428, %431 : vector<32x256xf32>
    %c0_406 = arith.constant 0 : index
    %c0_407 = arith.constant 0 : index
    %433 = vector.load %arg9[%c0_406, %c0_407] : memref<288x256xf32, #tpu.memory_space<vmem>>, vector<32x256xf32>
    tpu.vector_store %arg9[%c0_406, %c0_407], %432 {strides = array<i32>} : memref<288x256xf32, #tpu.memory_space<vmem>>, vector<32x256xf32>,
    %c16_i32_408 = arith.constant 16 : i32
    %434 = tpu.dynamic_rotate %427 by %c16_i32_408 dim 1 : vector<32x256xf32>, i32 -> vector<32x256xf32>
    %c1_409 = arith.constant 1 : index
    %c0_410 = arith.constant 0 : index
    %c0_411 = arith.constant 0 : index
    %435 = vector.load %arg6[%c1_409, %c0_410, %c0_411] : memref<9x1x256xf32, #tpu.memory_space<vmem>>, vector<1x1x256xf32>
    %436 = vector.shape_cast %435 : vector<1x1x256xf32> to vector<1x256xf32>
    %437 = vector.broadcast %436 : vector<1x256xf32> to vector<32x256xf32>
    %438 = arith.mulf %434, %437 : vector<32x256xf32>
    %c32_412 = arith.constant 32 : index
    %c0_413 = arith.constant 0 : index
    %439 = vector.load %arg9[%c32_412, %c0_413] : memref<288x256xf32, #tpu.memory_space<vmem>>, vector<32x256xf32>
    tpu.vector_store %arg9[%c32_412, %c0_413], %438 {strides = array<i32>} : memref<288x256xf32, #tpu.memory_space<vmem>>, vector<32x256xf32>,
    %c15_i32_414 = arith.constant 15 : i32
    %440 = tpu.dynamic_rotate %427 by %c15_i32_414 dim 1 : vector<32x256xf32>, i32 -> vector<32x256xf32>
    %c2_415 = arith.constant 2 : index
    %c0_416 = arith.constant 0 : index
    %c0_417 = arith.constant 0 : index
    %441 = vector.load %arg6[%c2_415, %c0_416, %c0_417] : memref<9x1x256xf32, #tpu.memory_space<vmem>>, vector<1x1x256xf32>
    %442 = vector.shape_cast %441 : vector<1x1x256xf32> to vector<1x256xf32>
    %443 = vector.broadcast %442 : vector<1x256xf32> to vector<32x256xf32>
    %444 = arith.mulf %440, %443 : vector<32x256xf32>
    %c64_418 = arith.constant 64 : index
    %c0_419 = arith.constant 0 : index
    %445 = vector.load %arg9[%c64_418, %c0_419] : memref<288x256xf32, #tpu.memory_space<vmem>>, vector<32x256xf32>
    tpu.vector_store %arg9[%c64_418, %c0_419], %444 {strides = array<i32>} : memref<288x256xf32, #tpu.memory_space<vmem>>, vector<32x256xf32>,
    %c1_i32_420 = arith.constant 1 : i32
    %446 = tpu.dynamic_rotate %427 by %c1_i32_420 dim 1 : vector<32x256xf32>, i32 -> vector<32x256xf32>
    %c3_421 = arith.constant 3 : index
    %c0_422 = arith.constant 0 : index
    %c0_423 = arith.constant 0 : index
    %447 = vector.load %arg6[%c3_421, %c0_422, %c0_423] : memref<9x1x256xf32, #tpu.memory_space<vmem>>, vector<1x1x256xf32>
    %448 = vector.shape_cast %447 : vector<1x1x256xf32> to vector<1x256xf32>
    %449 = vector.broadcast %448 : vector<1x256xf32> to vector<32x256xf32>
    %450 = arith.mulf %446, %449 : vector<32x256xf32>
    %c96_424 = arith.constant 96 : index
    %c0_425 = arith.constant 0 : index
    %451 = vector.load %arg9[%c96_424, %c0_425] : memref<288x256xf32, #tpu.memory_space<vmem>>, vector<32x256xf32>
    tpu.vector_store %arg9[%c96_424, %c0_425], %450 {strides = array<i32>} : memref<288x256xf32, #tpu.memory_space<vmem>>, vector<32x256xf32>,
    %c128_426 = arith.constant 128 : index
    %c0_427 = arith.constant 0 : index
    %452 = vector.load %arg9[%c128_426, %c0_427] : memref<288x256xf32, #tpu.memory_space<vmem>>, vector<32x256xf32>
    tpu.vector_store %arg9[%c128_426, %c0_427], %427 {strides = array<i32>} : memref<288x256xf32, #tpu.memory_space<vmem>>, vector<32x256xf32>,
    %c255_i32_428 = arith.constant 255 : i32
    %453 = tpu.dynamic_rotate %427 by %c255_i32_428 dim 1 : vector<32x256xf32>, i32 -> vector<32x256xf32>
    %c5_429 = arith.constant 5 : index
    %c0_430 = arith.constant 0 : index
    %c0_431 = arith.constant 0 : index
    %454 = vector.load %arg6[%c5_429, %c0_430, %c0_431] : memref<9x1x256xf32, #tpu.memory_space<vmem>>, vector<1x1x256xf32>
    %455 = vector.shape_cast %454 : vector<1x1x256xf32> to vector<1x256xf32>
    %456 = vector.broadcast %455 : vector<1x256xf32> to vector<32x256xf32>
    %457 = arith.mulf %453, %456 : vector<32x256xf32>
    %c160_432 = arith.constant 160 : index
    %c0_433 = arith.constant 0 : index
    %458 = vector.load %arg9[%c160_432, %c0_433] : memref<288x256xf32, #tpu.memory_space<vmem>>, vector<32x256xf32>
    tpu.vector_store %arg9[%c160_432, %c0_433], %457 {strides = array<i32>} : memref<288x256xf32, #tpu.memory_space<vmem>>, vector<32x256xf32>,
    %c241_i32_434 = arith.constant 241 : i32
    %459 = tpu.dynamic_rotate %427 by %c241_i32_434 dim 1 : vector<32x256xf32>, i32 -> vector<32x256xf32>
    %c6_435 = arith.constant 6 : index
    %c0_436 = arith.constant 0 : index
    %c0_437 = arith.constant 0 : index
    %460 = vector.load %arg6[%c6_435, %c0_436, %c0_437] : memref<9x1x256xf32, #tpu.memory_space<vmem>>, vector<1x1x256xf32>
    %461 = vector.shape_cast %460 : vector<1x1x256xf32> to vector<1x256xf32>
    %462 = vector.broadcast %461 : vector<1x256xf32> to vector<32x256xf32>
    %463 = arith.mulf %459, %462 : vector<32x256xf32>
    %c192_438 = arith.constant 192 : index
    %c0_439 = arith.constant 0 : index
    %464 = vector.load %arg9[%c192_438, %c0_439] : memref<288x256xf32, #tpu.memory_space<vmem>>, vector<32x256xf32>
    tpu.vector_store %arg9[%c192_438, %c0_439], %463 {strides = array<i32>} : memref<288x256xf32, #tpu.memory_space<vmem>>, vector<32x256xf32>,
    %c240_i32_440 = arith.constant 240 : i32
    %465 = tpu.dynamic_rotate %427 by %c240_i32_440 dim 1 : vector<32x256xf32>, i32 -> vector<32x256xf32>
    %c7_441 = arith.constant 7 : index
    %c0_442 = arith.constant 0 : index
    %c0_443 = arith.constant 0 : index
    %466 = vector.load %arg6[%c7_441, %c0_442, %c0_443] : memref<9x1x256xf32, #tpu.memory_space<vmem>>, vector<1x1x256xf32>
    %467 = vector.shape_cast %466 : vector<1x1x256xf32> to vector<1x256xf32>
    %468 = vector.broadcast %467 : vector<1x256xf32> to vector<32x256xf32>
    %469 = arith.mulf %465, %468 : vector<32x256xf32>
    %c224_444 = arith.constant 224 : index
    %c0_445 = arith.constant 0 : index
    %470 = vector.load %arg9[%c224_444, %c0_445] : memref<288x256xf32, #tpu.memory_space<vmem>>, vector<32x256xf32>
    tpu.vector_store %arg9[%c224_444, %c0_445], %469 {strides = array<i32>} : memref<288x256xf32, #tpu.memory_space<vmem>>, vector<32x256xf32>,
    %c239_i32_446 = arith.constant 239 : i32
    %471 = tpu.dynamic_rotate %427 by %c239_i32_446 dim 1 : vector<32x256xf32>, i32 -> vector<32x256xf32>
    %c8_447 = arith.constant 8 : index
    %c0_448 = arith.constant 0 : index
    %c0_449 = arith.constant 0 : index
    %472 = vector.load %arg6[%c8_447, %c0_448, %c0_449] : memref<9x1x256xf32, #tpu.memory_space<vmem>>, vector<1x1x256xf32>
    %473 = vector.shape_cast %472 : vector<1x1x256xf32> to vector<1x256xf32>
    %474 = vector.broadcast %473 : vector<1x256xf32> to vector<32x256xf32>
    %475 = arith.mulf %471, %474 : vector<32x256xf32>
    %c256_450 = arith.constant 256 : index
    %c0_451 = arith.constant 0 : index
    %476 = vector.load %arg9[%c256_450, %c0_451] : memref<288x256xf32, #tpu.memory_space<vmem>>, vector<32x256xf32>
    tpu.vector_store %arg9[%c256_450, %c0_451], %475 {strides = array<i32>} : memref<288x256xf32, #tpu.memory_space<vmem>>, vector<32x256xf32>,
    %c0_452 = arith.constant 0 : index
    %c0_453 = arith.constant 0 : index
    %477 = vector.load %arg4[%c0_452, %c0_453] : memref<64x288xf32, #tpu.memory_space<vmem>>, vector<64x288xf32>
    %c0_454 = arith.constant 0 : index
    %c0_455 = arith.constant 0 : index
    %478 = vector.load %arg9[%c0_454, %c0_455] : memref<288x256xf32, #tpu.memory_space<vmem>>, vector<288x256xf32>
    %cst_456 = arith.constant dense<0.000000e+00> : vector<64x256xf32>
    %479 = tpu.matmul %477, %478, %cst_456 {dimension_numbers = #tpu.dot_dimension_numbers<[1], [0], [0], [1], [0, 0, 1, 1], [], []>} : vector<64x288xf32>, vector<288x256xf32>, vector<64x256xf32> -> vector<64x256xf32>
    %c0_457 = arith.constant 0 : index
    %c0_458 = arith.constant 0 : index
    %480 = vector.load %arg5[%c0_457, %c0_458] : memref<64x1xf32, #tpu.memory_space<vmem>>, vector<64x1xf32>
    %481 = vector.broadcast %480 : vector<64x1xf32> to vector<64x256xf32>
    %482 = arith.addf %479, %481 : vector<64x256xf32>
    %cst_459 = arith.constant 0.000000e+00 : f32
    %483 = vector.broadcast %cst_459 : f32 to vector<64x256xf32>
    %484 = arith.maximumf %482, %483 : vector<64x256xf32>
    %cst_460 = arith.constant dense<0.000000e+00> : vector<64xf32>
    %485 = vector.multi_reduction <add>, %484, %cst_460 [1] : vector<64x256xf32> to vector<64xf32>
    %486 = vector.shape_cast %485 : vector<64xf32> to vector<64x1xf32>
    %cst_461 = arith.constant 2.560000e+02 : f32
    %487 = vector.broadcast %cst_461 : f32 to vector<64x1xf32>
    %488 = arith.divf %486, %487 : vector<64x1xf32>
    %c3_462 = arith.constant 3 : index
    %c0_463 = arith.constant 0 : index
    %c0_464 = arith.constant 0 : index
    %489 = vector.load %arg7[%c3_462, %c0_463, %c0_464] : memref<4x64x1xf32, #tpu.memory_space<vmem>>, vector<1x64x1xf32>
    %490 = vector.shape_cast %489 : vector<1x64x1xf32> to vector<64x1xf32>
    %491 = vector.shape_cast %488 : vector<64x1xf32> to vector<1x64x1xf32>
    tpu.vector_store %arg7[%c3_462, %c0_463, %c0_464], %491 {strides = array<i32>} : memref<4x64x1xf32, #tpu.memory_space<vmem>>, vector<1x64x1xf32>,
    return
  }
  func.func @transform_0(%arg0: i32) -> (i32, i32, i32) {
    %c0_i32 = arith.constant 0 : i32
    %c0_i32_0 = arith.constant 0 : i32
    %c0_i32_1 = arith.constant 0 : i32
    return %arg0, %c0_i32, %c0_i32_0 : i32, i32, i32
  }
  func.func @transform_1(%arg0: i32) -> (i32, i32) {
    %c0_i32 = arith.constant 0 : i32
    %c0_i32_0 = arith.constant 0 : i32
    %c0_i32_1 = arith.constant 0 : i32
    return %c0_i32, %c0_i32_0 : i32, i32
  }
  func.func @transform_2(%arg0: i32) -> (i32, i32) {
    %c0_i32 = arith.constant 0 : i32
    %c0_i32_0 = arith.constant 0 : i32
    %c0_i32_1 = arith.constant 0 : i32
    return %c0_i32, %c0_i32_0 : i32, i32
  }
  func.func @transform_3(%arg0: i32) -> (i32, i32) {
    %c0_i32 = arith.constant 0 : i32
    %c0_i32_0 = arith.constant 0 : i32
    %c0_i32_1 = arith.constant 0 : i32
    return %c0_i32, %c0_i32_0 : i32, i32
  }
  func.func @transform_4(%arg0: i32) -> (i32, i32) {
    %c0_i32 = arith.constant 0 : i32
    %c0_i32_0 = arith.constant 0 : i32
    %c0_i32_1 = arith.constant 0 : i32
    return %c0_i32, %c0_i32_0 : i32, i32
  }
  func.func @transform_5(%arg0: i32) -> (i32, i32, i32) {
    %c0_i32 = arith.constant 0 : i32
    %c0_i32_0 = arith.constant 0 : i32
    %c0_i32_1 = arith.constant 0 : i32
    %c0_i32_2 = arith.constant 0 : i32
    return %c0_i32, %c0_i32_0, %c0_i32_1 : i32, i32, i32
  }
  func.func @transform_6(%arg0: i32) -> (i32, i32, i32) {
    %c0_i32 = arith.constant 0 : i32
    %c0_i32_0 = arith.constant 0 : i32
    %c0_i32_1 = arith.constant 0 : i32
    return %arg0, %c0_i32, %c0_i32_0 : i32, i32, i32
  }
}

</mosaic_0001>

<bundles_post_ra>
// kernel: siamese_forward.1
= control target key start
LH: loop header
LB: loop body
LE: loop exit
PB: predicated region body
PF: predicated region fallthrough
CT: control target
= control target key end

     0   :  { %s4974_s23 = smov 16   ;;  %s4975_s24 = smov 15   ;;  %v34_v23 = vlaneseq  ;;  %vm292_vm8 = vcmask 1043456   ;;  %vm279_vm9 = vcmask 293888   ;;  %vm885_vm10 = vcmask 261120   ;;  %s9118_s0 = inlined_call_operand.vmem [shape: f32[4,4,256], index: 0, kind: input, shape index: {}]   ;;  %s9119_s5 = inlined_call_operand.vmem [shape: f32[9,1,256], index: 5, kind: input, shape index: {}]   ;;  %s9120_s2 = inlined_call_operand.vmem [shape: f32[32,1], index: 2, kind: input, shape index: {}]   ;;  %s9121_s1 = inlined_call_operand.vmem [shape: f32[32,36], index: 1, kind: input, shape index: {}]   ;;  %s9122_s4 = inlined_call_operand.vmem [shape: f32[64,1], index: 4, kind: input, shape index: {}]   ;;  %s9123_s3 = inlined_call_operand.vmem [shape: f32[64,288], index: 3, kind: input, shape index: {}]   ;;  %s9124_s6 = inlined_call_operand.vmem [shape: f32[4,64,1], index: 6, kind: output, shape index: {}]  }
   0x1   :  { %v23_v0 = vld [vmem:[%s9118_s0] sm:$0xff]  ;;  %s4976_s25 = smov 1   ;;  %s4977_s26 = smov 127   ;;  %v5036_v17 = vld [vmem:[%s9118_s0 + $0x8] sm:$0xff]  ;;  %vm1211_vm12 = vcmask 7168  }
   0x2   :  { %25 = vst [vmem:[#allocation1] ss:$2 sm:$0xff] %v23_v0  ;;  %s4978_s27 = smov 113   ;;  %s4979_s28 = smov 112   ;;  %v5049_v24 = vand.u32 127, %v34_v23 }
   0x3   :  { %s4980_s29 = smov 17   ;;  %s4981_s8 = smov 111   ;;  %v4737_v25 = vld [vmem:[%s9119_s5 + $0x2] sm:$0x3]  ;;  %v4739_v38 = vld [vmem:[%s9119_s5 + $0x6] sm:$0x3] }
   0x4   :  { %vm58_vm0 = vcmp.lt.s32.totalorder %v5049_v24, 16  ;;  %v64_v26 = vperm.slane %v4737_v25, 0  ;;  %v65_v27 = vperm.slane %v4737_v25, 1  ;;  %vm110_vm1 = vcmp.lt.s32.totalorder %v5049_v24, 1  ;;  %v4740_v46 = vld [vmem:[%s9119_s5 + $0xa] sm:$0x3] }
   0x5   :  { %v116_v39 = vperm.slane %v4739_v38, 0  ;;  %v117_v40 = vperm.slane %v4739_v38, 1  ;;  %vm146_vm2 = vcmp.lt.s32.totalorder %v5049_v24, 127  ;;  %v152_v47 = vperm.slane %v4740_v46, 0  ;;  %v4741_v58 = vld [vmem:[%s9119_s5 + $0xc] sm:$0x3] }
   0x6   :  { %v153_v48 = vperm.slane %v4740_v46, 1  ;;  %vm175_vm3 = vcmp.lt.s32.totalorder %v5049_v24, 113  ;;  %v181_v59 = vperm.slane %v4741_v58, 0  ;;  %v182_v60 = vperm.slane %v4741_v58, 1 }
   0x7   :  { %vm198_vm4 = vcmp.lt.s32.totalorder %v5049_v24, 112  ;;  %vm36_vm5 = vcmp.lt.s32.totalorder %v5049_v24, 17  ;;  %vm227_vm6 = vcmp.lt.s32.totalorder %v5049_v24, 111  ;;  %vm87_vm7 = vcmp.lt.s32.totalorder %v5049_v24, 15 }
   0x9   :  { %v26_v1 = vld.sshfl [vmem:[#allocation1] sm:$0xff pattern:$0x75316420]  ;;  %v27_v2 = vld.sshfl [vmem:[#allocation1 + $0x8] sm:$0xff pattern:$0x75316420] }
   0xa   :  { %49 = vst [vmem:[#allocation1] ss:$2 sm:$0xff] %v23_v0 }
  0x11   :  { %v50_v3 = vld.sshfl [vmem:[#allocation1] sm:$0xff pattern:$0x75316420]  ;;  %v51_v4 = vld.sshfl [vmem:[#allocation1 + $0x8] sm:$0xff pattern:$0x75316420] }
  0x12   :  { %78 = vst [vmem:[#allocation1] ss:$2 sm:$0xff] %v23_v0  ;;  %54 = vrot.lane.b32.xlu1 %v50_v3, %s4974_s23  ;;  %56 = vrot.lane.b32.xlu2 %v51_v4, %s4974_s23  ;;  %v4742_v4 = vld [vmem:[%s9119_s5 + $0xe] sm:$0x3] }
  0x19   :  { %v79_v5 = vld.sshfl [vmem:[#allocation1] sm:$0xff pattern:$0x75316420]  ;;  %v80_v6 = vld.sshfl [vmem:[#allocation1 + $0x8] sm:$0xff pattern:$0x75316420] }
  0x1a   :  { %83 = vrot.lane.b32.xlu0 %v79_v5, %s4975_s24  ;;  %101 = vst [vmem:[#allocation1] ss:$2 sm:$0xff] %v23_v0  ;;  %v204_v5 = vperm.slane %v4742_v4, 0 }
  0x21   :  { %v103_v7 = vld.sshfl [vmem:[#allocation1 + $0x8] sm:$0xff pattern:$0x75316420]  ;;  %v102_v8 = vld.sshfl [vmem:[#allocation1] sm:$0xff pattern:$0x75316420] }
  0x22   :  { %108 = vrot.lane.b32.xlu0 %v103_v7, %s4976_s25  ;;  %130 = vst [vmem:[#allocation1] ss:$2 sm:$0xff] %v23_v0  ;;  %106 = vrot.lane.b32.xlu2 %v102_v8, %s4976_s25 }
  0x29   :  { %v131_v9 = vld.sshfl [vmem:[#allocation1] sm:$0xff pattern:$0x75316420]  ;;  %v132_v10 = vld.sshfl [vmem:[#allocation1 + $0x8] sm:$0xff pattern:$0x75316420] }
  0x2a   :  { %135 = vst [vmem:[#allocation2 + $0x48] sm:$0xf] %v131_v9  ;;  %v5092_v9 = vld [vmem:[%s9120_s2] sm:$0xff] }
  0x2b   :  { %136 = vst [vmem:[#allocation2 + $0x28] sm:$0xf] %v132_v10 }
  0x2c   :  { %137 = vst [vmem:[#allocation1] ss:$2 sm:$0xff] %v23_v0 }
  0x33   :  { %v138_v11 = vld.sshfl [vmem:[#allocation1] sm:$0xff pattern:$0x75316420]  ;;  %v139_v12 = vld.sshfl [vmem:[#allocation1 + $0x8] sm:$0xff pattern:$0x75316420] }
  0x34   :  { %166 = vst [vmem:[#allocation1] ss:$2 sm:$0xff] %v23_v0  ;;  %142 = vrot.lane.b32.xlu2 %v138_v11, %s4977_s26 }
  0x3b   :  { %v167_v13 = vld.sshfl [vmem:[#allocation1] sm:$0xff pattern:$0x75316420]  ;;  %v168_v14 = vld.sshfl [vmem:[#allocation1 + $0x8] sm:$0xff pattern:$0x75316420] }
  0x3c   :  { %171 = vrot.lane.b32.xlu0 %v167_v13, %s4978_s27  ;;  %173 = vrot.lane.b32.xlu1 %v168_v14, %s4978_s27  ;;  %189 = vst [vmem:[#allocation1] ss:$2 sm:$0xff] %v23_v0 }
  0x3d   :  { %144 = vrot.lane.b32.xlu2 %v139_v12, %s4977_s26  ;;  %v4982_v12 = vmov 0  }
  0x3e   :  { %4966 = vset.pattern.permute.xlu1 %v4982_v12  ;;  %4968 = vset.pattern.permute.xlu0 %v4982_v12 }
  0x3f   :  { %4967 = vset.pattern.permute.xlu2 %v4982_v12 }
  0x43   :  { %v190_v15 = vld.sshfl [vmem:[#allocation1] sm:$0xff pattern:$0x75316420]  ;;  %v191_v16 = vld.sshfl [vmem:[#allocation1 + $0x8] sm:$0xff pattern:$0x75316420] }
  0x44   :  { %194 = vrot.lane.b32.xlu0 %v190_v15, %s4979_s28  ;;  %218 = vst [vmem:[#allocation1] ss:$2 sm:$0xff] %v23_v0  ;;  %v39_v15 = vld [vmem:[%s9119_s5] sm:$0x3] }
  0x45   :  { %30 = vrot.lane.b32.xlu2 %v26_v1, %s4980_s29  ;;  %v41_v23 = vperm.slane %v39_v15, 0  ;;  %v42_v25 = vperm.slane %v39_v15, 1 }
  0x4b   :  { %v219_v18 = vld.sshfl [vmem:[#allocation1] sm:$0xff pattern:$0x75316420]  ;;  %v220_v19 = vld.sshfl [vmem:[#allocation1 + $0x8] sm:$0xff pattern:$0x75316420] }
  0x4c   :  { %196 = vrot.lane.b32.xlu0 %v191_v16, %s4979_s28  ;;  %223 = vrot.lane.b32.xlu1 %v219_v18, %s4981_s8  ;;  %1223 = vst [vmem:[#allocation1] ss:$2 sm:$0xff] %v5036_v17  ;;  %v4743_v16 = vld [vmem:[%s9119_s5 + $0x10] sm:$0x3] }
  0x53   :  { %v5041_v20 = vld.sshfl [vmem:[#allocation1] sm:$0xff pattern:$0x75316420]  ;;  %v5043_v21 = vld.sshfl [vmem:[#allocation1 + $0x8] sm:$0xff pattern:$0x75316420] }
  0x54   :  { %1244 = vst [vmem:[#allocation1] ss:$2 sm:$0xff] %v5036_v17  ;;  %32 = vrot.lane.b32.xlu0 %v27_v2, %s4980_s29  ;;  %225 = vrot.lane.b32.xlu1 %v220_v19, %s4981_s8 }
  0x5c   :  { %85 = vrot.lane.b32.xlu1 %v80_v6, %s4975_s24  ;;  %v205_v6 = vperm.slane %v4742_v4, 1 }
  0x64   :  { %261 = vperm.xlu1 %4966, %v5092_v9  }
  0x6c   :  { %v57_v22 = vpop.permute.xlu2 %56 }
  0x7c   :  { %v107_v29 = vpop.permute.xlu2 %106 }
  0x84   :  { %v55_v28 = vpop.permute.xlu1 %54 }
  0x85   :  { %v59_v30 = vsel %vm58_vm0, %v55_v28, %v57_v22  ;;  %v60_v31 = vsel %vm58_vm0, %v57_v22, %v55_v28 }
  0x86   :  { %v68_v32 = vmul.f32 %v64_v26, %v60_v31  ;;  %v69_v33 = vmul.f32 %v65_v27, %v59_v30  ;;  %v233_v26 = vperm.slane %v4743_v16, 0  ;;  %v234_v27 = vperm.slane %v4743_v16, 1  ;;  %v5110_v30 = vld [vmem:[%s9120_s2 + $0x18] sm:$0xff] }
  0x87   :  { %276 = vperm.xlu1 %4966, %v5110_v30  }
  0x88   :  { %v72_v34 = vrot.slane %v68_v32, 4  ;;  %v73_v35 = vrot.slane %v69_v33, 4 }
  0x8a   :  { %76 = vst [vmem:[#allocation2 + $0x30] sm:$0xf0] %v72_v34 }
  0x8b   :  { %77 = vst [vmem:[#allocation2] sm:$0xf0] %v73_v35 }
  0x8c   :  { %v5059_v36 = vpop.permute.xlu0 %83 }
  0x8e   :  { %v143_v37 = vpop.permute.xlu2 %142 }
  0x94   :  { %v109_v41 = vpop.permute.xlu0 %108 }
  0x95   :  { %v111_v42 = vsel %vm110_vm1, %v107_v29, %v109_v41  ;;  %v112_v43 = vsel %vm110_vm1, %v109_v41, %v107_v29 }
  0x96   :  { %v120_v44 = vmul.f32 %v116_v39, %v112_v43  ;;  %v121_v45 = vmul.f32 %v117_v40, %v111_v42  ;;  %v4738_v40 = vld [vmem:[%s9119_s5 + $0x4] sm:$0x3] }
  0x97   :  { %v145_v49 = vpop.permute.xlu2 %144  ;;  %v93_v41 = vperm.slane %v4738_v40, 0  ;;  %v94_v42 = vperm.slane %v4738_v40, 1 }
  0x98   :  { %v124_v50 = vrot.slane %v120_v44, 4  ;;  %v125_v51 = vrot.slane %v121_v45, 4  ;;  %v147_v52 = vsel %vm146_vm2, %v143_v37, %v145_v49  ;;  %v148_v53 = vsel %vm146_vm2, %v145_v49, %v143_v37 }
  0x99   :  { %v156_v54 = vmul.f32 %v152_v47, %v147_v52  ;;  %v157_v55 = vmul.f32 %v153_v48, %v148_v53  ;;  %v5136_v52 = vld [vmem:[%s9120_s2 + $0x8] sm:$0xff] }
  0x9a   :  { %128 = vst [vmem:[#allocation2 + $0x18] sm:$0xf0] %v124_v50  ;;  %266 = vperm.xlu2 %4967, %v5136_v52  }
  0x9b   :  { %129 = vst [vmem:[#allocation2 + $0x10] sm:$0xf0] %v125_v51  ;;  %v160_v56 = vrot.slane %v156_v54, 4  ;;  %v161_v57 = vrot.slane %v157_v55, 4 }
  0x9d   :  { %164 = vst [vmem:[#allocation2 + $0x48] sm:$0xf0] %v160_v56 }
  0x9e   :  { %165 = vst [vmem:[#allocation2 + $0x28] sm:$0xf0] %v161_v57  ;;  %v241_v57 = vld [vmem:[%s9121_s1] sm:$0xff] }
  0x9f   :  { %v31_v22 = vpop.permute.xlu2 %30 }
  0xa4   :  { %v249_v53 = vld [vmem:[#allocation2 + $0x48] sm:$0xff] }
  0xa5   :  { %v250_v54 = vld [vmem:[#allocation2 + $0x28] sm:$0xff] }
  0xae   :  { %v172_v61 = vpop.permute.xlu0 %171  ;;  %v174_v62 = vpop.permute.xlu1 %173 }
  0xaf   :  { %v176_v63 = vsel %vm175_vm3, %v172_v61, %v174_v62  ;;  %v177_v0 = vsel %vm175_vm3, %v174_v62, %v172_v61  ;;  %v243_v61 = vld [vmem:[%s9121_s1 + $0x10] sm:$0xff]  ;;  %v244_v62 = vld [vmem:[%s9121_s1 + $0x18] sm:$0xff] }
  0xb0   :  { %v185_v1 = vmul.f32 %v181_v59, %v176_v63  ;;  %v186_v2 = vmul.f32 %v182_v60, %v177_v0  ;;  %v242_v60 = vld [vmem:[%s9121_s1 + $0x8] sm:$0xff] }
  0xb2   :  { %187 = vst [vmem:[#allocation2 + $0x8] sm:$0xf] %v185_v1 }
  0xb3   :  { %188 = vst [vmem:[#allocation2 + $0x20] sm:$0xf] %v186_v2 }
  0xb6   :  { %v195_v3 = vpop.permute.xlu0 %194 }
  0xbe   :  { %v197_v7 = vpop.permute.xlu0 %196  ;;  %v224_v8 = vpop.permute.xlu1 %223 }
  0xbf   :  { %v199_v10 = vsel %vm198_vm4, %v195_v3, %v197_v7  ;;  %v200_v11 = vsel %vm198_vm4, %v197_v7, %v195_v3 }
  0xc0   :  { %v208_v13 = vmul.f32 %v204_v5, %v199_v10  ;;  %v209_v14 = vmul.f32 %v205_v6, %v200_v11 }
  0xc2   :  { %v212_v18 = vrot.slane %v208_v13, 4  ;;  %v213_v19 = vrot.slane %v209_v14, 4 }
  0xc4   :  { %216 = vst [vmem:[#allocation2 + $0x8] sm:$0xf0] %v212_v18  ;;  %v5209_v18 = vld.sshfl [vmem:[#allocation1] sm:$0xff pattern:$0x75316420] }
  0xc5   :  { %217 = vst [vmem:[#allocation2 + $0x20] sm:$0xf0] %v213_v19  ;;  %v5211_v19 = vld.sshfl [vmem:[#allocation1 + $0x8] sm:$0xff pattern:$0x75316420] }
  0xc6   :  { %v33_v28 = vpop.permute.xlu0 %32  ;;  %v226_v29 = vpop.permute.xlu1 %225  ;;  %1271 = vst [vmem:[#allocation1] ss:$2 sm:$0xff] %v5036_v17 }
  0xc7   :  { %v37_v31 = vsel %vm36_vm5, %v31_v22, %v33_v28  ;;  %v38_v32 = vsel %vm36_vm5, %v33_v28, %v31_v22  ;;  %v228_v33 = vsel %vm227_vm6, %v224_v8, %v226_v29  ;;  %v229_v34 = vsel %vm227_vm6, %v226_v29, %v224_v8 }
  0xc8   :  { %v45_v35 = vmul.f32 %v41_v23, %v38_v32  ;;  %v46_v37 = vmul.f32 %v42_v25, %v37_v31  ;;  %v237_v38 = vmul.f32 %v233_v26, %v228_v33  ;;  %v238_v39 = vmul.f32 %v234_v27, %v229_v34 }
  0xca   :  { %47 = vst [vmem:[#allocation2 + $0x30] sm:$0xf] %v45_v35 }
  0xcb   :  { %48 = vst [vmem:[#allocation2] sm:$0xf] %v46_v37  ;;  %v251_v50 = vld [vmem:[#allocation2 + $0x8] sm:$0xff] }
  0xcc   :  { %239 = vst [vmem:[#allocation2 + $0x40] sm:$0xf] %v237_v38  ;;  %v252_v51 = vld [vmem:[#allocation2 + $0x20] sm:$0xff] }
  0xcd   :  { %240 = vst [vmem:[#allocation2 + $0x38] sm:$0xf] %v238_v39  ;;  %v5222_v23 = vld.sshfl [vmem:[#allocation1] sm:$0xff pattern:$0x75316420] }
  0xce   :  { %v86_v43 = vpop.permute.xlu1 %85  ;;  %v5224_v25 = vld.sshfl [vmem:[#allocation1 + $0x8] sm:$0xff pattern:$0x75316420] }
  0xcf   :  { %v88_v44 = vsel %vm87_vm7, %v5059_v36, %v86_v43  ;;  %v89_v45 = vsel %vm87_vm7, %v86_v43, %v5059_v36  ;;  %v5141_v36 = vld [vmem:[%s9120_s2 + $0x10] sm:$0xff]  ;;  %1292 = vst [vmem:[#allocation1] ss:$2 sm:$0xff] %v5036_v17 }
  0xd0   :  { %v97_v46 = vmul.f32 %v93_v41, %v89_v45  ;;  %v98_v47 = vmul.f32 %v94_v42, %v88_v44  ;;  %271 = vperm.xlu0 %4968, %v5141_v36  }
  0xd1   :  { %v245_v58 = vld [vmem:[#allocation2 + $0x30] sm:$0xff] }
  0xd2   :  { %99 = vst [vmem:[#allocation2 + $0x18] sm:$0xf] %v97_v46  ;;  %v246_v59 = vld [vmem:[#allocation2] sm:$0xff] }
  0xd3   :  { %100 = vst [vmem:[#allocation2 + $0x10] sm:$0xf] %v98_v47  ;;  %v253_v48 = vld [vmem:[#allocation2 + $0x40] sm:$0xf] }
  0xd4   :  { %4744 = vmatpush.msk.msra.mxu2 %vm292_vm8, %v253_v48  ;;  %v254_v49 = vld [vmem:[#allocation2 + $0x38] sm:$0xf] }
  0xd5   :  { %4749 = vmatpush.msk.msra.mxu1 %vm292_vm8, %v254_v49 }
  0xd6   :  { %311 = vmatpush.msra.mxu2 %v251_v50  ;;  %v262_v63 = vpop.permute.xlu1 %261  ;;  %v5233_v27 = vld.sshfl [vmem:[#allocation1] sm:$0xff pattern:$0x75316420]  ;;  %v5235_v28 = vld.sshfl [vmem:[#allocation1 + $0x8] sm:$0xff pattern:$0x75316420] }
  0xd7   :  { %340 = vmatpush.msra.mxu1 %v252_v51  ;;  %1319 = vst [vmem:[#allocation1] ss:$2 sm:$0xff] %v5036_v17  ;;  %v5295_v50 = vld [vmem:[%s9118_s0 + $0x10] sm:$0xff] }
  0xd8   :  { %312 = vmatpush.msra.mxu2 %v249_v53 }
  0xd9   :  { %341 = vmatpush.msra.mxu1 %v250_v54  ;;  %v247_v55 = vld [vmem:[#allocation2 + $0x18] sm:$0xff] }
  0xda   :  { %313 = vmatpush.msra.mxu2 %v247_v55  ;;  %v248_v56 = vld [vmem:[#allocation2 + $0x10] sm:$0xff] }
  0xdb   :  { %342 = vmatpush.msra.mxu1 %v248_v56 }
  0xdc   :  { %314 = vmatpush.msra.mxu2 %v245_v58 }
  0xdd   :  { %343 = vmatpush.msra.mxu1 %v246_v59  ;;  %4745 = vmatmul.msk.f32.vlgmr.msra.gmra.mxu2 %vm279_vm9, %v241_v57 }
  0xde   :  { %4750 = vmatmul.msk.f32.vlgmr.msra.gmra.mxu1 %vm279_vm9, %v241_v57  ;;  %v1320_v34 = vld.sshfl [vmem:[#allocation1] sm:$0xff pattern:$0x75316420]  ;;  %v1321_v35 = vld.sshfl [vmem:[#allocation1 + $0x8] sm:$0xff pattern:$0x75316420] }
  0xdf   :  { %1326 = vst [vmem:[#allocation1] ss:$2 sm:$0xff] %v5036_v17 }
  0xe0   :  { %1324 = vst [vmem:[#allocation2 + $0x48] sm:$0xf] %v1320_v34 }
  0xe1   :  { %1325 = vst [vmem:[#allocation2 + $0x28] sm:$0xf] %v1321_v35 }
  0xe5   :  { %4746 = vmatmul.msk.f32.gmra.mxu2 %vm279_vm9, %v242_v60 }
  0xe6   :  { %4751 = vmatmul.msk.f32.gmra.mxu1 %vm279_vm9, %v242_v60  ;;  %v1327_v39 = vld.sshfl [vmem:[#allocation1] sm:$0xff pattern:$0x75316420]  ;;  %v1328_v40 = vld.sshfl [vmem:[#allocation1 + $0x8] sm:$0xff pattern:$0x75316420] }
  0xe7   :  { %1353 = vst [vmem:[#allocation1] ss:$2 sm:$0xff] %v5036_v17 }
  0xed   :  { %4747 = vmatmul.msk.f32.gmra.mxu2 %vm279_vm9, %v243_v61 }
  0xee   :  { %4752 = vmatmul.msk.f32.gmra.mxu1 %vm279_vm9, %v243_v61  ;;  %v5262_v42 = vld.sshfl [vmem:[#allocation1] sm:$0xff pattern:$0x75316420]  ;;  %v1355_v43 = vld.sshfl [vmem:[#allocation1 + $0x8] sm:$0xff pattern:$0x75316420] }
  0xef   :  { %1374 = vst [vmem:[#allocation1] ss:$2 sm:$0xff] %v5036_v17 }
  0xf4   :  { %v267_v6 = vpop.permute.xlu2 %266 }
  0xf5   :  { %4748 = vmatmul.msk.f32.gmra.mxu2 %vm279_vm9, %v244_v62 }
  0xf6   :  { %4753 = vmatmul.msk.f32.gmra.mxu1 %vm279_vm9, %v244_v62  ;;  %v1375_v46 = vld.sshfl [vmem:[#allocation1] sm:$0xff pattern:$0x75316420]  ;;  %v1376_v47 = vld.sshfl [vmem:[#allocation1 + $0x8] sm:$0xff pattern:$0x75316420] }
  0xf7   :  { %1401 = vst [vmem:[#allocation1] ss:$2 sm:$0xff] %v5036_v17 }
  0xf9   :  { %v277_v33 = vpop.permute.xlu1 %276 }
  0xfe   :  { %v1402_v51 = vld.sshfl [vmem:[#allocation1] sm:$0xff pattern:$0x75316420]  ;;  %v1403_v53 = vld.sshfl [vmem:[#allocation1 + $0x8] sm:$0xff pattern:$0x75316420] }
  0xff   :  { %2394 = vst [vmem:[#allocation1] ss:$2 sm:$0xff] %v5295_v50 }
 0x106   :  { %v5316_v57 = vld.sshfl [vmem:[#allocation1] sm:$0xff pattern:$0x75316420]  ;;  %v5318_v58 = vld.sshfl [vmem:[#allocation1 + $0x8] sm:$0xff pattern:$0x75316420] }
 0x107   :  { %9208 = vst [vmem:[#allocation11_spill] sm:$0xff] %v5316_v57 }
 0x108   :  { %9209 = vst [vmem:[#allocation12_spill] sm:$0xff] %v5318_v58 }
 0x109   :  { %2415 = vst [vmem:[#allocation1] ss:$2 sm:$0xff] %v5295_v50 }
 0x110   :  { %v5331_v62 = vld.sshfl [vmem:[#allocation1] sm:$0xff pattern:$0x75316420] }
 0x142   :  { %v272_v14 = vpop.permute.xlu0 %271 }
 0x15b   :  { %v345_v0 = vpop.f32.mrf.mxu1 }
 0x15c   :  { %v346_v1 = vadd.f32 %v345_v0, %v262_v63 }
 0x15e   :  { %v5165_v2 = vmax.f32 %v346_v1, 0.0 }
 0x160   :  { %9201 = vst [vmem:[#allocation4_spill] sm:$0xff] %v5165_v2  ;;  %465 = vrot.lane.b32.xlu2 %v5165_v2, %s4975_s24  ;;  %419 = vrot.lane.b32.xlu0 %v5165_v2, %s4974_s23  ;;  %v316_v3 = vpop.f32.mrf.mxu2 }
 0x161   :  { %373 = vrot.lane.b32.xlu1 %v5165_v2, %s4980_s29  ;;  %v317_v4 = vadd.f32 %v316_v3, %v262_v63  ;;  %v5333_v63 = vld.sshfl [vmem:[#allocation1 + $0x8] sm:$0xff pattern:$0x75316420] }
 0x162   :  { %9211 = vst [vmem:[#allocation14_spill] sm:$0xff] %v5333_v63 }
 0x163   :  { %v5173_v5 = vmax.f32 %v317_v4, 0.0  ;;  %v348_v7 = vpop.f32.mrf.mxu1  ;;  %2442 = vst [vmem:[#allocation1] ss:$2 sm:$0xff] %v5295_v50 }
 0x164   :  { %v349_v8 = vadd.f32 %v348_v7, %v267_v6 }
 0x165   :  { %9202 = vst [vmem:[#allocation5_spill] sm:$0xff] %v5173_v5 }
 0x166   :  { %v5187_v10 = vmax.f32 %v349_v8, 0.0 }
 0x168   :  { %703 = vrot.lane.b32.xlu0 %v5165_v2, %s4981_s8  ;;  %365 = vrot.lane.b32.xlu2 %v5173_v5, %s4980_s29  ;;  %9203 = vst [vmem:[#allocation6_spill] sm:$0xff] %v5187_v10  ;;  %v319_v11 = vpop.f32.mrf.mxu2 }
 0x169   :  { %511 = vrot.lane.b32.xlu1 %v5165_v2, %s4976_s25  ;;  %v320_v12 = vadd.f32 %v319_v11, %v267_v6 }
 0x16a   :  { %v5345_v4 = vld.sshfl [vmem:[#allocation1] sm:$0xff pattern:$0x75316420]  ;;  %v5347_v6 = vld.sshfl [vmem:[#allocation1 + $0x8] sm:$0xff pattern:$0x75316420] }
 0x16b   :  { %v5195_v13 = vmax.f32 %v320_v12, 0.0  ;;  %v351_v15 = vpop.f32.mrf.mxu1  ;;  %9212 = vst [vmem:[#allocation15_spill] sm:$0xff] %v5345_v4 }
 0x16c   :  { %v352_v16 = vadd.f32 %v351_v15, %v272_v14  ;;  %2463 = vst [vmem:[#allocation1] ss:$2 sm:$0xff] %v5295_v50 }
 0x16d   :  { %9204 = vst [vmem:[#allocation7_spill] sm:$0xff] %v5195_v13 }
 0x16e   :  { %v5214_v22 = vmax.f32 %v352_v16, 0.0 }
 0x170   :  { %503 = vrot.lane.b32.xlu0 %v5173_v5, %s4976_s25  ;;  %411 = vrot.lane.b32.xlu2 %v5173_v5, %s4974_s23  ;;  %9205 = vst [vmem:[#allocation8_spill] sm:$0xff] %v5214_v22  ;;  %v322_v26 = vpop.f32.mrf.mxu2 }
 0x171   :  { %457 = vrot.lane.b32.xlu1 %v5173_v5, %s4975_s24  ;;  %v323_v29 = vadd.f32 %v322_v26, %v272_v14 }
 0x173   :  { %v5238_v31 = vmax.f32 %v323_v29, 0.0  ;;  %v354_v32 = vpop.f32.mrf.mxu1  ;;  %v5360_v12 = vld.sshfl [vmem:[#allocation1] sm:$0xff pattern:$0x75316420] }
 0x174   :  { %v355_v37 = vadd.f32 %v354_v32, %v277_v33  ;;  %v5362_v14 = vld.sshfl [vmem:[#allocation1 + $0x8] sm:$0xff pattern:$0x75316420] }
 0x175   :  { %9206 = vst [vmem:[#allocation9_spill] sm:$0xff] %v5238_v31 }
 0x176   :  { %v5247_v38 = vmax.f32 %v355_v37, 0.0  ;;  %9214 = vst [vmem:[#allocation17_spill] sm:$0xff] %v5362_v14 }
 0x177   :  { %2490 = vst [vmem:[#allocation1] ss:$2 sm:$0xff] %v5295_v50 }
 0x178   :  { %467 = vrot.lane.b32.xlu0 %v5187_v10, %s4975_s24  ;;  %695 = vrot.lane.b32.xlu2 %v5173_v5, %s4981_s8  ;;  %9207 = vst [vmem:[#allocation10_spill] sm:$0xff] %v5247_v38  ;;  %v325_v41 = vpop.f32.mrf.mxu2 }
 0x179   :  { %557 = vrot.lane.b32.xlu1 %v5173_v5, %s4977_s26  ;;  %v326_v44 = vadd.f32 %v325_v41, %v277_v33 }
 0x17b   :  { %v5265_v45 = vmax.f32 %v326_v44, 0.0 }
 0x17e   :  { %v5375_v29 = vld.sshfl [vmem:[#allocation1] sm:$0xff pattern:$0x75316420] }
 0x180   :  { %413 = vrot.lane.b32.xlu0 %v5195_v13, %s4974_s23  ;;  %375 = vrot.lane.b32.xlu2 %v5187_v10, %s4980_s29 }
 0x181   :  { %421 = vrot.lane.b32.xlu1 %v5187_v10, %s4974_s23 }
 0x188   :  { %697 = vrot.lane.b32.xlu0 %v5195_v13, %s4981_s8  ;;  %513 = vrot.lane.b32.xlu2 %v5187_v10, %s4976_s25 }
 0x189   :  { %705 = vrot.lane.b32.xlu1 %v5187_v10, %s4981_s8 }
 0x190   :  { %377 = vrot.lane.b32.xlu0 %v5214_v22, %s4980_s29  ;;  %459 = vrot.lane.b32.xlu2 %v5195_v13, %s4975_s24 }
 0x191   :  { %367 = vrot.lane.b32.xlu1 %v5195_v13, %s4980_s29 }
 0x198   :  { %515 = vrot.lane.b32.xlu0 %v5214_v22, %s4976_s25  ;;  %559 = vrot.lane.b32.xlu2 %v5195_v13, %s4977_s26 }
 0x199   :  { %505 = vrot.lane.b32.xlu1 %v5195_v13, %s4976_s25 }
 0x1a0   :  { %461 = vrot.lane.b32.xlu0 %v5238_v31, %s4975_s24  ;;  %423 = vrot.lane.b32.xlu2 %v5214_v22, %s4974_s23 }
 0x1a1   :  { %469 = vrot.lane.b32.xlu1 %v5214_v22, %s4975_s24 }
 0x1a8   :  { %425 = vrot.lane.b32.xlu0 %v5247_v38, %s4974_s23  ;;  %707 = vrot.lane.b32.xlu2 %v5214_v22, %s4981_s8 }
 0x1a9   :  { %415 = vrot.lane.b32.xlu1 %v5238_v31, %s4974_s23 }
 0x1b0   :  { %709 = vrot.lane.b32.xlu0 %v5247_v38, %s4981_s8  ;;  %369 = vrot.lane.b32.xlu2 %v5238_v31, %s4980_s29 }
 0x1b1   :  { %699 = vrot.lane.b32.xlu1 %v5238_v31, %s4981_s8 }
 0x1b8   :  { %371 = vrot.lane.b32.xlu0 %v5265_v45, %s4980_s29  ;;  %507 = vrot.lane.b32.xlu2 %v5238_v31, %s4976_s25 }
 0x1b9   :  { %379 = vrot.lane.b32.xlu1 %v5247_v38, %s4980_s29 }
 0x1ba   :  { %v5273_v48 = vpop.permute.xlu2 %465 }
 0x1c0   :  { %509 = vrot.lane.b32.xlu0 %v5265_v45, %s4976_s25  ;;  %471 = vrot.lane.b32.xlu2 %v5247_v38, %s4975_s24 }
 0x1c1   :  { %517 = vrot.lane.b32.xlu1 %v5247_v38, %s4976_s25 }
 0x1c2   :  { %v5282_v49 = vpop.permute.xlu2 %365 }
 0x1c8   :  { %561 = vrot.lane.b32.xlu0 %v5238_v31, %s4977_s26  ;;  %417 = vrot.lane.b32.xlu2 %v5265_v45, %s4974_s23 }
 0x1c9   :  { %463 = vrot.lane.b32.xlu1 %v5265_v45, %s4975_s24 }
 0x1ca   :  { %v5290_v17 = vpop.permute.xlu2 %411 }
 0x1d0   :  { %567 = vrot.lane.b32.xlu0 %v5187_v10, %s4977_s26  ;;  %565 = vrot.lane.b32.xlu2 %v5165_v2, %s4977_s26 }
 0x1d1   :  { %569 = vrot.lane.b32.xlu1 %v5214_v22, %s4977_s26 }
 0x1d2   :  { %v5303_v54 = vpop.permute.xlu0 %419  ;;  %v5305_v55 = vpop.permute.xlu2 %695 }
 0x1d3   :  { %v5308_v56 = vpop.permute.xlu1 %373 }
 0x1d8   :  { %603 = vrot.lane.b32.xlu0 %v5173_v5, %s4978_s27  ;;  %571 = vrot.lane.b32.xlu2 %v5247_v38, %s4977_s26 }
 0x1d9   :  { %605 = vrot.lane.b32.xlu1 %v5195_v13, %s4978_s27 }
 0x1da   :  { %v5320_v59 = vpop.permute.xlu0 %703  ;;  %v5322_v60 = vpop.permute.xlu2 %375 }
 0x1db   :  { %9210 = vst [vmem:[#allocation13_spill] sm:$0xff] %v5320_v59  ;;  %v5325_v61 = vpop.permute.xlu1 %511 }
 0x1e0   :  { %1381 = vrot.lane.b32.xlu0 %v1376_v47, %s4979_s28  ;;  %701 = vrot.lane.b32.xlu2 %v5265_v45, %s4981_s8 }
 0x1e1   :  { %1406 = vrot.lane.b32.xlu1 %v1402_v51, %s4981_s8 }
 0x1e2   :  { %v5335_v0 = vpop.permute.xlu0 %503  ;;  %v5337_v1 = vpop.permute.xlu2 %513 }
 0x1e3   :  { %v5340_v3 = vpop.permute.xlu1 %457 }
 0x1e8   :  { %1331 = vrot.lane.b32.xlu0 %v1327_v39, %s4977_s26  ;;  %1379 = vrot.lane.b32.xlu2 %v1375_v46, %s4979_s28 }
 0x1e9   :  { %1333 = vrot.lane.b32.xlu1 %v1328_v40, %s4977_s26 }
 0x1ea   :  { %v5349_v7 = vpop.permute.xlu0 %467  ;;  %v5351_v8 = vpop.permute.xlu2 %459 }
 0x1eb   :  { %v5354_v11 = vpop.permute.xlu1 %557 }
 0x1ec   :  { %9213 = vst [vmem:[#allocation16_spill] sm:$0xff] %v5354_v11 }
 0x1f0   :  { %1360 = vrot.lane.b32.xlu0 %v1355_v43, %s4978_s27  ;;  %1408 = vrot.lane.b32.xlu2 %v1403_v53, %s4981_s8 }
 0x1f1   :  { %1297 = vrot.lane.b32.xlu1 %v5233_v27, %s4976_s25  ;;  %v5377_v27 = vld.sshfl [vmem:[#allocation1 + $0x8] sm:$0xff pattern:$0x75316420] }
 0x1f2   :  { %v5365_v15 = vpop.permute.xlu0 %413  ;;  %v5367_v16 = vpop.permute.xlu2 %559  ;;  %2497 = vst [vmem:[#allocation1] ss:$2 sm:$0xff] %v5295_v50 }
 0x1f3   :  { %9215 = vst [vmem:[#allocation18_spill] sm:$0xff] %v5367_v16  ;;  %v5369_v26 = vpop.permute.xlu1 %421 }
 0x1f8   :  { %1249 = vrot.lane.b32.xlu0 %v5209_v18, %s4974_s23  ;;  %1358 = vrot.lane.b32.xlu2 %v5262_v42, %s4978_s27 }
 0x1f9   :  { %1251 = vrot.lane.b32.xlu1 %v5211_v19, %s4974_s23  ;;  %v5392_v18 = vld.sshfl [vmem:[#allocation1] sm:$0xff pattern:$0x75316420]  ;;  %v5394_v35 = vld.sshfl [vmem:[#allocation1 + $0x8] sm:$0xff pattern:$0x75316420] }
 0x1fa   :  { %v5382_v32 = vpop.permute.xlu0 %697  ;;  %v5384_v33 = vpop.permute.xlu2 %423  ;;  %2524 = vst [vmem:[#allocation1] ss:$2 sm:$0xff] %v5295_v50 }
 0x1fb   :  { %v5386_v34 = vpop.permute.xlu1 %705 }
 0x200   :  { %1278 = vrot.lane.b32.xlu0 %v5224_v25, %s4975_s24  ;;  %1299 = vrot.lane.b32.xlu2 %v5235_v28, %s4976_s25 }
 0x201   :  { %1228 = vrot.lane.b32.xlu1 %v5041_v20, %s4980_s29  ;;  %v5445_v47 = vld.sshfl [vmem:[#allocation1] sm:$0xff pattern:$0x75316420]  ;;  %v5447_v51 = vld.sshfl [vmem:[#allocation1 + $0x8] sm:$0xff pattern:$0x75316420] }
 0x202   :  { %v5399_v19 = vpop.permute.xlu0 %377  ;;  %v5401_v37 = vpop.permute.xlu2 %707  ;;  %9216 = vst [vmem:[#allocation19_spill] sm:$0xff] %v5445_v47 }
 0x203   :  { %v5403_v39 = vpop.permute.xlu1 %367  ;;  %2545 = vst [vmem:[#allocation1] ss:$2 sm:$0xff] %v5295_v50 }
 0x208   :  { %607 = vrot.lane.b32.xlu0 %v5238_v31, %s4978_s27  ;;  %1276 = vrot.lane.b32.xlu2 %v5222_v23, %s4975_s24 }
 0x209   :  { %615 = vrot.lane.b32.xlu1 %v5214_v22, %s4978_s27 }
 0x20a   :  { %v516_v25 = vpop.permute.xlu0 %515  ;;  %v5411_v28 = vpop.permute.xlu2 %369 }
 0x20b   :  { %v506_v20 = vpop.permute.xlu1 %505 }
 0x210   :  { %613 = vrot.lane.b32.xlu0 %v5187_v10, %s4978_s27  ;;  %1230 = vrot.lane.b32.xlu2 %v5043_v21, %s4980_s29 }
 0x211   :  { %653 = vrot.lane.b32.xlu1 %v5238_v31, %s4979_s28  ;;  %v5463_v31 = vld.sshfl [vmem:[#allocation1] sm:$0xff pattern:$0x75316420] }
 0x212   :  { %v5419_v40 = vpop.permute.xlu0 %461  ;;  %v508_v41 = vpop.permute.xlu2 %507 }
 0x213   :  { %v5421_v23 = vpop.permute.xlu1 %469 }
 0x218   :  { %663 = vrot.lane.b32.xlu0 %v5247_v38, %s4979_s28  ;;  %611 = vrot.lane.b32.xlu2 %v5165_v2, %s4978_s27 }
 0x219   :  { %659 = vrot.lane.b32.xlu1 %v5187_v10, %s4979_s28  ;;  %v839_v10 = vld [vmem:[%s9122_s4 + $0x10] sm:$0xff] }
 0x21a   :  { %v5429_v42 = vpop.permute.xlu0 %425  ;;  %v5431_v21 = vpop.permute.xlu2 %471 }
 0x21b   :  { %v5433_v43 = vpop.permute.xlu1 %415 }
 0x220   :  { %651 = vrot.lane.b32.xlu0 %v5195_v13, %s4979_s28  ;;  %661 = vrot.lane.b32.xlu2 %v5214_v22, %s4979_s28 }
 0x221   :  { %617 = vrot.lane.b32.xlu1 %v5247_v38, %s4978_s27  ;;  %v5465_v38 = vld.sshfl [vmem:[#allocation1 + $0x8] sm:$0xff pattern:$0x75316420] }
 0x222   :  { %v5441_v44 = vpop.permute.xlu0 %709  ;;  %v5443_v46 = vpop.permute.xlu2 %417  ;;  %2572 = vst [vmem:[#allocation1] ss:$2 sm:$0xff] %v5295_v50 }
 0x223   :  { %v5449_v53 = vpop.permute.xlu1 %699 }
 0x228   :  { %657 = vrot.lane.b32.xlu0 %v5165_v2, %s4979_s28  ;;  %649 = vrot.lane.b32.xlu2 %v5173_v5, %s4979_s28  ;;  %v838_v2 = vld [vmem:[%s9122_s4 + $0x8] sm:$0xff] }
 0x229   :  { %857 = vperm.xlu1 %4966, %v839_v10   ;;  %v837_v10 = vld [vmem:[%s9122_s4] sm:$0xff]  ;;  %v842_v5 = vld [vmem:[%s9122_s4 + $0x28] sm:$0xff] }
 0x22a   :  { %v5459_v13 = vpop.permute.xlu0 %371  ;;  %v5461_v22 = vpop.permute.xlu2 %565 }
 0x22b   :  { %9217 = vst [vmem:[#allocation20_spill] sm:$0xff] %v5461_v22  ;;  %v5467_v11 = vpop.permute.xlu1 %379  ;;  %v4756_v22 = vld [vmem:[%s9119_s5 + $0x6] sm:$0x3] }
 0x22c   :  { %v529_v4 = vperm.slane %v4756_v22, 0  ;;  %v530_v14 = vperm.slane %v4756_v22, 1  ;;  %v840_v22 = vld [vmem:[%s9122_s4 + $0x18] sm:$0xff] }
 0x230   :  { %852 = vperm.xlu0 %4968, %v838_v2   ;;  %847 = vperm.xlu2 %4967, %v837_v10   ;;  %v525_v2 = vsel %vm110_vm1, %v516_v25, %v508_v41 }
 0x231   :  { %872 = vperm.xlu1 %4966, %v842_v5   ;;  %v841_v5 = vld [vmem:[%s9122_s4 + $0x20] sm:$0xff] }
 0x232   :  { %v510_v50 = vpop.permute.xlu0 %509  ;;  %v5482_v16 = vpop.permute.xlu2 %571 }
 0x233   :  { %9218 = vst [vmem:[#allocation21_spill] sm:$0xff] %v5482_v16  ;;  %v518_v58 = vpop.permute.xlu1 %517  ;;  %v521_v16 = vsel %vm110_vm1, %v508_v41, %v516_v25  ;;  %v523_v41 = vsel %vm110_vm1, %v5325_v61, %v5335_v0 }
 0x234   :  { %v526_v47 = vsel %vm110_vm1, %v518_v58, %v510_v50  ;;  %v522_v57 = vsel %vm110_vm1, %v510_v50, %v518_v58  ;;  %v524_v58 = vsel %vm110_vm1, %v5337_v1, %v506_v20  ;;  %v5510_v50 = vld [vmem:[%s9119_s5 + $0x10] sm:$0x3]  ;;  %v5512_v25 = vmul.f32 %v530_v14, %v521_v16 }
 0x235   :  { %v539_v10 = vmul.f32 %v529_v4, %v526_v47  ;;  %v5490_v63 = vmul.f32 %v530_v14, %v522_v57  ;;  %v537_v57 = vmul.f32 %v529_v4, %v525_v2  ;;  %v520_v47 = vsel %vm110_vm1, %v506_v20, %v5337_v1  ;;  %v4755_v2 = vld [vmem:[%s9119_s5 + $0x4] sm:$0x3] }
 0x236   :  { %9220 = vst [vmem:[#allocation23_spill] sm:$0xff] %v5512_v25  ;;  %v535_v1 = vmul.f32 %v529_v4, %v524_v58  ;;  %v519_v20 = vsel %vm110_vm1, %v5335_v0, %v5325_v61  ;;  %v484_v61 = vperm.slane %v4755_v2, 1 }
 0x237   :  { %9219 = vst [vmem:[#allocation22_spill] sm:$0xff] %v5490_v63  ;;  %910 = vmatpush.msrb.mxu2 %v539_v10  ;;  %1033 = vmatpush.msrb.mxu1 %v5490_v63  ;;  %v5529_v10 = vmul.f32 %v530_v14, %v520_v47  ;;  %v5539_v0 = vmul.f32 %v530_v14, %v519_v20 }
 0x238   :  { %867 = vperm.xlu0 %4968, %v841_v5   ;;  %862 = vperm.xlu2 %4967, %v840_v22   ;;  %v721_v22 = vperm.slane %v5510_v50, 0  ;;  %v479_v14 = vsel %vm87_vm7, %v5421_v23, %v5419_v40  ;;  %v713_v20 = vsel %vm227_vm6, %v5449_v53, %v5401_v37 }
 0x239   :  { %1457 = vperm.xlu1 %4966, %v5110_v30   ;;  %911 = vmatpush.msrb.mxu2 %v537_v57  ;;  %v533_v30 = vmul.f32 %v529_v4, %v523_v41  ;;  %v483_v57 = vperm.slane %v4755_v2, 0  ;;  %v844_v2 = vld [vmem:[%s9122_s4 + $0x38] sm:$0xff] }
 0x23a   :  { %1034 = vmatpush.msrb.mxu1 %v5512_v25  ;;  %v5527_v16 = vpop.permute.xlu0 %561  ;;  %v5531_v5 = vpop.permute.xlu2 %701 }
 0x23b   :  { %v464_v63 = vpop.permute.xlu1 %463  ;;  %912 = vmatpush.msrb.mxu2 %v535_v1  ;;  %v714_v58 = vsel %vm227_vm6, %v5531_v5, %v5441_v44 }
 0x23c   :  { %1035 = vmatpush.msrb.mxu1 %v5529_v10  ;;  %v480_v47 = vsel %vm87_vm7, %v5431_v21, %v464_v63  ;;  %v731_v25 = vmul.f32 %v721_v22, %v714_v58  ;;  %v476_v4 = vsel %vm87_vm7, %v464_v63, %v5431_v21  ;;  %v843_v63 = vld [vmem:[%s9122_s4 + $0x30] sm:$0xff]  ;;  %v475_v21 = vsel %vm87_vm7, %v5419_v40, %v5421_v23  ;;  %v4754_v23 = vld [vmem:[%s9119_s5 + $0x2] sm:$0x3] }
 0x23d   :  { %913 = vmatpush.msrb.mxu2 %v533_v30  ;;  %v493_v41 = vmul.f32 %v483_v57, %v480_v47  ;;  %v5547_v1 = vmul.f32 %v484_v61, %v476_v4  ;;  %v478_v30 = vsel %vm87_vm7, %v5349_v7, %v5351_v8  ;;  %v491_v58 = vmul.f32 %v483_v57, %v479_v14 }
 0x23e   :  { %1036 = vmatpush.msrb.mxu1 %v5539_v0  ;;  %1004 = vmatpush.msra.mxu0 %v731_v25  ;;  %v712_v25 = vsel %vm227_vm6, %v5382_v32, %v5386_v34  ;;  %v729_v47 = vmul.f32 %v721_v22, %v713_v20  ;;  %v474_v40 = vsel %vm87_vm7, %v5351_v8, %v5349_v7 }
 0x23f   :  { %914 = vmatpush.msrb.mxu2 %v493_v41  ;;  %v5585_v4 = vmul.f32 %v484_v61, %v475_v21  ;;  %v477_v41 = vsel %vm87_vm7, %v5273_v48, %v5340_v3  ;;  %v489_v8 = vmul.f32 %v483_v57, %v478_v30  ;;  %v727_v14 = vmul.f32 %v721_v22, %v712_v25 }
 0x240   :  { %1037 = vmatpush.msrb.mxu1 %v5547_v1  ;;  %882 = vperm.xlu0 %4968, %v844_v2   ;;  %v711_v2 = vsel %vm227_vm6, %v5305_v55, %v5320_v59  ;;  %v473_v20 = vsel %vm87_vm7, %v5340_v3, %v5273_v48  ;;  %v5606_v21 = vmul.f32 %v484_v61, %v474_v40  ;;  %v437_v30 = vperm.slane %v4754_v23, 0  ;;  %v743_v48 = vld [vmem:[%s9123_s3 + $0x10] sm:$0xff] }
 0x241   :  { %1442 = vperm.xlu1 %4966, %v5092_v9   ;;  %877 = vperm.xlu2 %4967, %v843_v63   ;;  %v487_v25 = vmul.f32 %v483_v57, %v477_v41  ;;  %v430_v3 = vsel %vm58_vm0, %v5443_v46, %v5429_v42  ;;  %v5620_v40 = vmul.f32 %v484_v61, %v473_v20  ;;  %v438_v59 = vperm.slane %v4754_v23, 1 }
 0x242   :  { %915 = vmatpush.msrb.mxu2 %v491_v58  ;;  %1005 = vmatpush.msra.mxu0 %v729_v47  ;;  %v5595_v7 = vpop.permute.xlu0 %567  ;;  %v5597_v9 = vpop.permute.xlu2 %1379  ;;  %v434_v58 = vsel %vm58_vm0, %v5429_v42, %v5443_v46  ;;  %v725_v47 = vmul.f32 %v721_v22, %v711_v2  ;;  %v433_v22 = vsel %vm58_vm0, %v5384_v33, %v5433_v43 }
 0x243   :  { %1038 = vmatpush.msrb.mxu1 %v5585_v4  ;;  %v5604_v63 = vpop.permute.xlu1 %569  ;;  %v447_v57 = vmul.f32 %v437_v30, %v434_v58  ;;  %v429_v41 = vsel %vm58_vm0, %v5433_v43, %v5384_v33  ;;  %v5632_v42 = vmul.f32 %v438_v59, %v430_v3  ;;  %v432_v46 = vsel %vm58_vm0, %v5369_v26, %v5365_v15  ;;  %v746_v58 = vld [vmem:[%s9123_s3 + $0x28] sm:$0xff] }
 0x244   :  { %916 = vmatpush.msrb.mxu2 %v489_v8  ;;  %1006 = vmatpush.msra.mxu0 %v727_v14  ;;  %v445_v61 = vmul.f32 %v437_v30, %v433_v22  ;;  %v428_v33 = vsel %vm58_vm0, %v5365_v15, %v5369_v26  ;;  %v5646_v43 = vmul.f32 %v438_v59, %v429_v41  ;;  %v2573_v22 = vld.sshfl [vmem:[#allocation1] sm:$0xff pattern:$0x75316420] }
 0x245   :  { %1039 = vmatpush.msrb.mxu1 %v5606_v21  ;;  %v431_v23 = vsel %vm58_vm0, %v5303_v54, %v5290_v17  ;;  %v443_v26 = vmul.f32 %v437_v30, %v432_v46  ;;  %v5665_v14 = vmul.f32 %v438_v59, %v428_v33 }
 0x246   :  { %917 = vmatpush.msrb.mxu2 %v487_v25  ;;  %1007 = vmatpush.msra.mxu0 %v725_v47  ;;  %v441_v20 = vmul.f32 %v437_v30, %v431_v23  ;;  %v387_v30 = vsel %vm36_vm5, %v5399_v19, %v5411_v28 }
 0x247   :  { %1040 = vmatpush.msrb.mxu1 %v5620_v40  ;;  %4761 = vmatmul.msk.f32.vlgmr.msra.gmra.mxu0 %vm885_vm10, %v743_v48  ;;  %v4783_v48 = vld [vmem:[%s9119_s5 + $0xe] sm:$0x3] }
 0x248   :  { %918 = vmatpush.msrb.mxu2 %v447_v57  ;;  %1447 = vperm.xlu0 %4968, %v5136_v52   ;;  %v389_v52 = vld [vmem:[%s9119_s5] sm:$0x3]  ;;  %v386_v57 = vsel %vm36_vm5, %v5322_v60, %v5403_v39  ;;  %v1387_v41 = vperm.slane %v4783_v48, 0  ;;  %v1388_v46 = vperm.slane %v4783_v48, 1 }
 0x249   :  { %1041 = vmatpush.msrb.mxu1 %v5632_v42  ;;  %2550 = vrot.lane.b32.xlu1 %v5463_v31, %s4979_s28  ;;  %v427_v31 = vsel %vm58_vm0, %v5290_v17, %v5303_v54  ;;  %v391_v25 = vperm.slane %v389_v52, 0  ;;  %v384_v17 = vsel %vm36_vm5, %v5459_v13, %v5467_v11  ;;  %v392_v47 = vperm.slane %v389_v52, 1 }
 0x24a   :  { %1452 = vperm.xlu2 %4967, %v5141_v36   ;;  %919 = vmatpush.msrb.mxu2 %v445_v61  ;;  %v5656_v15 = vpop.permute.xlu0 %603  ;;  %v1409_v2 = vpop.permute.xlu2 %1408  ;;  %v388_v36 = vsel %vm36_vm5, %v5467_v11, %v5459_v13  ;;  %v5679_v54 = vmul.f32 %v438_v59, %v427_v31  ;;  %v383_v13 = vsel %vm36_vm5, %v5411_v28, %v5399_v19  ;;  %v4784_v59 = vld [vmem:[%s9119_s5 + $0x10] sm:$0x3] }
 0x24b   :  { %1042 = vmatpush.msrb.mxu1 %v5646_v43  ;;  %v5663_v8 = vpop.permute.xlu1 %605  ;;  %v401_v3 = vmul.f32 %v391_v25, %v388_v36  ;;  %v5697_v11 = vmul.f32 %v392_v47, %v384_v17  ;;  %v385_v19 = vsel %vm36_vm5, %v5308_v56, %v5282_v49  ;;  %v399_v28 = vmul.f32 %v391_v25, %v387_v30 }
 0x24c   :  { %920 = vmatpush.msrb.mxu2 %v443_v26  ;;  %v382_v61 = vsel %vm36_vm5, %v5403_v39, %v5322_v60  ;;  %v5716_v33 = vmul.f32 %v392_v47, %v383_v13  ;;  %v1414_v23 = vperm.slane %v4784_v59, 0  ;;  %v1415_v26 = vperm.slane %v4784_v59, 1 }
 0x24d   :  { %1043 = vmatpush.msrb.mxu1 %v5665_v14  ;;  %v397_v31 = vmul.f32 %v391_v25, %v386_v57  ;;  %v395_v17 = vmul.f32 %v391_v25, %v385_v19  ;;  %v749_v25 = vld [vmem:[%s9123_s3 + $0x40] sm:$0xff] }
 0x24e   :  { %921 = vmatpush.msrb.mxu2 %v441_v20 }
 0x24f   :  { %1044 = vmatpush.msrb.mxu1 %v5679_v54  ;;  %4762 = vmatmul.msk.f32.gmra.mxu0 %vm885_vm10, %v746_v58  ;;  %v5732_v58 = vmul.f32 %v392_v47, %v382_v61 }
 0x250   :  { %922 = vmatpush.msrb.mxu2 %v401_v3  ;;  %2552 = vrot.lane.b32.xlu0 %v5465_v38, %s4979_s28  ;;  %v381_v38 = vsel %vm36_vm5, %v5282_v49, %v5308_v56  ;;  %v741_v56 = vld [vmem:[%s9123_s3] sm:$0xff] }
 0x251   :  { %1045 = vmatpush.msrb.mxu1 %v5697_v11  ;;  %563 = vrot.lane.b32.xlu1 %v5265_v45, %s4977_s26 }
 0x252   :  { %2577 = vrot.lane.b32.xlu2 %v2573_v22, %s4981_s8  ;;  %923 = vmatpush.msrb.mxu2 %v399_v28  ;;  %v1382_v52 = vpop.permute.xlu0 %1381  ;;  %v5719_v36 = vpop.permute.xlu2 %1358 }
 0x253   :  { %1046 = vmatpush.msrb.mxu1 %v5716_v33  ;;  %v1383_v60 = vsel %vm198_vm4, %v5597_v9, %v1382_v52  ;;  %v1384_v39 = vsel %vm198_vm4, %v1382_v52, %v5597_v9  ;;  %v1407_v20 = vpop.permute.xlu1 %1406  ;;  %v5742_v9 = vmul.f32 %v392_v47, %v381_v38  ;;  %v744_v52 = vld [vmem:[%s9123_s3 + $0x18] sm:$0xff]  ;;  %v4782_v38 = vld [vmem:[%s9119_s5 + $0xc] sm:$0x3] }
 0x254   :  { %v1391_v30 = vmul.f32 %v1387_v41, %v1383_v60  ;;  %v1392_v48 = vmul.f32 %v1388_v46, %v1384_v39  ;;  %v1410_v3 = vsel %vm227_vm6, %v1407_v20, %v1409_v2  ;;  %v1411_v49 = vsel %vm227_vm6, %v1409_v2, %v1407_v20  ;;  %924 = vmatpush.msrb.mxu2 %v397_v31  ;;  %v4781_v2 = vld [vmem:[%s9119_s5 + $0xa] sm:$0x3]  ;;  %v4780_v60 = vld [vmem:[%s9119_s5 + $0x6] sm:$0x3] }
 0x255   :  { %v1418_v13 = vmul.f32 %v1414_v23, %v1410_v3  ;;  %1047 = vmatpush.msrb.mxu1 %v5732_v58  ;;  %v1419_v57 = vmul.f32 %v1415_v26, %v1411_v49  ;;  %v1339_v47 = vperm.slane %v4781_v2, 0  ;;  %v1340_v19 = vperm.slane %v4781_v2, 1 }
 0x256   :  { %v1395_v59 = vrot.slane %v1391_v30, 4  ;;  %v1396_v22 = vrot.slane %v1392_v48, 4  ;;  %925 = vmatpush.msrb.mxu2 %v395_v17  ;;  %v1366_v30 = vperm.slane %v4782_v38, 0  ;;  %v1367_v48 = vperm.slane %v4782_v38, 1 }
 0x257   :  { %1420 = vst [vmem:[#allocation2 + $0x40] sm:$0xf] %v1418_v13  ;;  %1048 = vmatpush.msrb.mxu1 %v5742_v9  ;;  %926 = vmatmul.f32.vlgmr.msrb.gmra.mxu2 %v741_v56  ;;  %v1305_v3 = vperm.slane %v4780_v60, 0  ;;  %v1306_v49 = vperm.slane %v4780_v60, 1 }
 0x258   :  { %1399 = vst [vmem:[#allocation2 + $0x8] sm:$0xf0] %v1395_v59  ;;  %4763 = vmatmul.msk.f32.gmra.mxu0 %vm885_vm10, %v749_v25  ;;  %1049 = vmatmul.f32.vlgmr.msrb.gmra.mxu1 %v741_v56 }
 0x259   :  { %1400 = vst [vmem:[#allocation2 + $0x20] sm:$0xf0] %v1396_v22  ;;  %609 = vrot.lane.b32.xlu1 %v5265_v45, %s4978_s27  ;;  %2502 = vrot.lane.b32.xlu0 %v5392_v18, %s4977_s26  ;;  %v5768_v18 = vld [vmem:[%s9123_s3 + $0x58] sm:$0xff] }
 0x25a   :  { %1421 = vst [vmem:[#allocation2 + $0x38] sm:$0xf] %v1419_v57  ;;  %655 = vrot.lane.b32.xlu2 %v5265_v45, %s4979_s28  ;;  %v1332_v28 = vpop.permute.xlu0 %1331  ;;  %v1300_v41 = vpop.permute.xlu2 %1299 }
 0x25b   :  { %v1334_v46 = vpop.permute.xlu1 %1333 }
 0x25c   :  { %v1335_v61 = vsel %vm146_vm2, %v1332_v28, %v1334_v46  ;;  %v1336_v23 = vsel %vm146_vm2, %v1334_v46, %v1332_v28 }
 0x25d   :  { %v1343_v26 = vmul.f32 %v1339_v47, %v1335_v61  ;;  %v1344_v31 = vmul.f32 %v1340_v19, %v1336_v23  ;;  %v5802_v61 = vld [vmem:[%s9123_s3 + $0x70] sm:$0xff] }
 0x25e   :  { %v1434_v39 = vld [vmem:[#allocation2 + $0x40] sm:$0xf] }
 0x25f   :  { %v1347_v20 = vrot.slane %v1343_v26, 4  ;;  %v1348_v17 = vrot.slane %v1344_v31, 4  ;;  %929 = vmatmul.f32.gmra.mxu2 %v744_v52  ;;  %4785 = vmatpush.msk.msrb.mxu0 %vm292_vm8, %v1434_v39 }
 0x260   :  { %4764 = vmatmul.msk.f32.gmra.mxu0 %vm885_vm10, %v5768_v18  ;;  %1052 = vmatmul.f32.gmra.mxu1 %v744_v52 }
 0x261   :  { %1351 = vst [vmem:[#allocation2 + $0x48] sm:$0xf0] %v1347_v20  ;;  %v1435_v56 = vld [vmem:[#allocation2 + $0x38] sm:$0xf]  ;;  %2531 = vrot.lane.b32.xlu0 %v5447_v51, %s4978_s27 }
 0x262   :  { %1352 = vst [vmem:[#allocation2 + $0x28] sm:$0xf0] %v1348_v17  ;;  %v1361_v13 = vpop.permute.xlu0 %1360  ;;  %v5781_v25 = vpop.permute.xlu2 %1276  ;;  %4790 = vmatpush.msk.msra.mxu1 %vm292_vm8, %v1435_v56  ;;  %2504 = vrot.lane.b32.xlu2 %v5394_v35, %s4977_s26  ;;  %v747_v35 = vld [vmem:[%s9123_s3 + $0x30] sm:$0xff] }
 0x263   :  { %v1362_v59 = vsel %vm175_vm3, %v5719_v36, %v1361_v13  ;;  %v1363_v22 = vsel %vm175_vm3, %v1361_v13, %v5719_v36  ;;  %v1298_v57 = vpop.permute.xlu1 %1297  ;;  %v4778_v36 = vld [vmem:[%s9119_s5 + $0x2] sm:$0x3]  ;;  %v1234_v13 = vld [vmem:[%s9119_s5] sm:$0x3] }
 0x264   :  { %v1370_v2 = vmul.f32 %v1366_v30, %v1362_v59  ;;  %v1371_v51 = vmul.f32 %v1367_v48, %v1363_v22  ;;  %v1301_v47 = vsel %vm110_vm1, %v1298_v57, %v1300_v41  ;;  %v1302_v19 = vsel %vm110_vm1, %v1300_v41, %v1298_v57 }
 0x265   :  { %v1309_v28 = vmul.f32 %v1305_v3, %v1302_v19  ;;  %v1310_v46 = vmul.f32 %v1306_v49, %v1301_v47  ;;  %v1257_v41 = vperm.slane %v4778_v36, 0  ;;  %v1258_v26 = vperm.slane %v4778_v36, 1  ;;  %v4779_v49 = vld [vmem:[%s9119_s5 + $0x4] sm:$0x3] }
 0x266   :  { %1372 = vst [vmem:[#allocation2 + $0x8] sm:$0xf] %v1370_v2  ;;  %v1284_v22 = vperm.slane %v4779_v49, 0  ;;  %v1285_v57 = vperm.slane %v4779_v49, 1  ;;  %v1236_v2 = vperm.slane %v1234_v13, 0 }
 0x267   :  { %1373 = vst [vmem:[#allocation2 + $0x20] sm:$0xf] %v1371_v51  ;;  %v1313_v23 = vrot.slane %v1309_v28, 4  ;;  %v1314_v52 = vrot.slane %v1310_v46, 4  ;;  %932 = vmatmul.f32.gmra.mxu2 %v747_v35  ;;  %v1237_v51 = vperm.slane %v1234_v13, 1 }
 0x268   :  { %4765 = vmatmul.msk.f32.gmra.mxu0 %vm885_vm10, %v5802_v61  ;;  %1055 = vmatmul.f32.gmra.mxu1 %v747_v35  ;;  %v1430_v60 = vld [vmem:[#allocation2 + $0x48] sm:$0xff]  ;;  %v9222_v35 = vld [vmem:[#allocation14_spill] sm:$0xff] }
 0x269   :  { %1317 = vst [vmem:[#allocation2 + $0x18] sm:$0xf0] %v1313_v23  ;;  %2420 = vrot.lane.b32.xlu0 %v5331_v62, %s4974_s23  ;;  %v1431_v20 = vld [vmem:[#allocation2 + $0x28] sm:$0xff]  ;;  %v750_v62 = vld [vmem:[%s9123_s3 + $0x48] sm:$0xff] }
 0x26a   :  { %1318 = vst [vmem:[#allocation2 + $0x10] sm:$0xf0] %v1314_v52  ;;  %v1250_v31 = vpop.permute.xlu0 %1249  ;;  %v1231_v38 = vpop.permute.xlu2 %1230  ;;  %2468 = vrot.lane.b32.xlu2 %v5360_v12, %s4976_s25  ;;  %v5825_v12 = vld [vmem:[%s9123_s3 + $0x88] sm:$0xff] }
 0x26b   :  { %v1252_v39 = vpop.permute.xlu1 %1251  ;;  %2495 = vst [vmem:[#allocation2 + $0x48] sm:$0xf] %v5375_v29 }
 0x26c   :  { %v1253_v17 = vsel %vm58_vm0, %v1250_v31, %v1252_v39  ;;  %v1254_v30 = vsel %vm58_vm0, %v1252_v39, %v1250_v31  ;;  %2496 = vst [vmem:[#allocation2 + $0x28] sm:$0xf] %v5377_v27  ;;  %v5857_v39 = vld [vmem:[%s9123_s3 + $0xa0] sm:$0xff] }
 0x26d   :  { %v1261_v48 = vmul.f32 %v1257_v41, %v1254_v30  ;;  %v1262_v3 = vmul.f32 %v1258_v26, %v1253_v17  ;;  %9221 = vst [vmem:[#allocation24_spill] sm:$0xff] %v5825_v12  ;;  %v1432_v29 = vld [vmem:[#allocation2 + $0x8] sm:$0xff]  ;;  %v753_v26 = vld [vmem:[%s9123_s3 + $0x60] sm:$0xff]  ;;  %v5870_v17 = vld [vmem:[%s9123_s3 + $0x78] sm:$0xff] }
 0x26e   :  { %1490 = vmatpush.msrb.mxu0 %v1432_v29  ;;  %v1433_v56 = vld [vmem:[#allocation2 + $0x20] sm:$0xff]  ;;  %9223 = vst [vmem:[#allocation14_spill] sm:$0xff] %v5857_v39  ;;  %v5875_v30 = vld [vmem:[%s9123_s3 + $0xb8] sm:$0xff] }
 0x26f   :  { %v1265_v59 = vrot.slane %v1261_v48, 4  ;;  %v1266_v27 = vrot.slane %v1262_v3, 4  ;;  %935 = vmatmul.f32.gmra.mxu2 %v750_v62  ;;  %1519 = vmatpush.msra.mxu1 %v1433_v56  ;;  %v1422_v3 = vld [vmem:[%s9121_s1] sm:$0xff] }
 0x270   :  { %4766 = vmatmul.msk.f32.gmra.mxu0 %vm885_vm10, %v5825_v12  ;;  %1058 = vmatmul.f32.gmra.mxu1 %v750_v62 }
 0x271   :  { %1269 = vst [vmem:[#allocation2 + $0x30] sm:$0xf0] %v1265_v59  ;;  %1491 = vmatpush.msrb.mxu0 %v1430_v60  ;;  %1520 = vmatpush.msra.mxu1 %v1431_v20  ;;  %v5889_v59 = vld [vmem:[%s9123_s3 + $0x90] sm:$0xff] }
 0x272   :  { %1270 = vst [vmem:[#allocation2] sm:$0xf0] %v1266_v27  ;;  %v1279_v47 = vpop.permute.xlu0 %1278  ;;  %v5835_v19 = vpop.permute.xlu2 %611  ;;  %2449 = vrot.lane.b32.xlu0 %v5347_v6, %s4975_s24  ;;  %2422 = vrot.lane.b32.xlu2 %v9222_v35, %s4974_s23  ;;  %v1423_v27 = vld [vmem:[%s9121_s1 + $0x8] sm:$0xff] }
 0x273   :  { %v1280_v28 = vsel %vm87_vm7, %v5781_v25, %v1279_v47  ;;  %v1281_v46 = vsel %vm87_vm7, %v1279_v47, %v5781_v25  ;;  %v1229_v36 = vpop.permute.xlu1 %1228  ;;  %v1424_v47 = vld [vmem:[%s9121_s1 + $0x10] sm:$0xff] }
 0x274   :  { %v1288_v23 = vmul.f32 %v1284_v22, %v1281_v46  ;;  %v1289_v52 = vmul.f32 %v1285_v57, %v1280_v28  ;;  %v1232_v41 = vsel %vm36_vm5, %v1229_v36, %v1231_v38  ;;  %v1233_v6 = vsel %vm36_vm5, %v1231_v38, %v1229_v36  ;;  %v9224_v38 = vld [vmem:[#allocation11_spill] sm:$0xff]  ;;  %v1425_v46 = vld [vmem:[%s9121_s1 + $0x18] sm:$0xff] }
 0x275   :  { %v1240_v31 = vmul.f32 %v1236_v2, %v1233_v6  ;;  %v1241_v60 = vmul.f32 %v1237_v51, %v1232_v41  ;;  %9225 = vst [vmem:[#allocation11_spill] sm:$0xff] %v5875_v30  ;;  %v5902_v2 = vld [vmem:[%s9123_s3 + $0xa8] sm:$0xff]  ;;  %v5930_v41 = vld [vmem:[%s9118_s0 + $0x18] sm:$0xff] }
 0x276   :  { %1290 = vst [vmem:[#allocation2 + $0x18] sm:$0xf] %v1288_v23  ;;  %v2574_v6 = vld.sshfl [vmem:[#allocation1 + $0x8] sm:$0xff pattern:$0x75316420] }
 0x277   :  { %1291 = vst [vmem:[#allocation2 + $0x10] sm:$0xf] %v1289_v52  ;;  %938 = vmatmul.f32.gmra.mxu2 %v753_v26  ;;  %2579 = vrot.lane.b32.xlu1 %v2574_v6, %s4981_s8  ;;  %v4759_v6 = vld [vmem:[%s9119_s5 + $0xe] sm:$0x3] }
 0x278   :  { %1242 = vst [vmem:[#allocation2 + $0x30] sm:$0xf] %v1240_v31  ;;  %4767 = vmatmul.msk.f32.gmra.mxu0 %vm885_vm10, %v5857_v39  ;;  %1061 = vmatmul.f32.gmra.mxu1 %v753_v26 }
 0x279   :  { %1243 = vst [vmem:[#allocation2] sm:$0xf] %v1241_v60 }
 0x27a   :  { %v5861_v25 = vpop.permute.xlu2 %661  ;;  %2399 = vrot.lane.b32.xlu2 %v9224_v38, %s4980_s29  ;;  %v5904_v51 = vpop.permute.xlu0 %607  ;;  %3565 = vst [vmem:[#allocation1] ss:$2 sm:$0xff] %v5930_v41 }
 0x27b   :  { %v5865_v20 = vpop.permute.xlu1 %615 }
 0x27d   :  { %v1428_v62 = vld [vmem:[#allocation2 + $0x18] sm:$0xff] }
 0x27e   :  { %1492 = vmatpush.msrb.mxu0 %v1428_v62  ;;  %v1429_v48 = vld [vmem:[#allocation2 + $0x10] sm:$0xff] }
 0x27f   :  { %941 = vmatmul.f32.gmra.mxu2 %v5870_v17  ;;  %1521 = vmatpush.msra.mxu1 %v1429_v48  ;;  %v1426_v29 = vld [vmem:[#allocation2 + $0x30] sm:$0xff]  ;;  %v9233_v48 = vld [vmem:[#allocation19_spill] sm:$0xff] }
 0x280   :  { %4768 = vmatmul.msk.f32.gmra.mxu0 %vm885_vm10, %v5875_v30  ;;  %v1427_v49 = vld [vmem:[#allocation2] sm:$0xff]  ;;  %2529 = vrot.lane.b32.xlu1 %v9233_v48, %s4978_s27  ;;  %v676_v48 = vperm.slane %v4759_v6, 1 }
 0x281   :  { %1493 = vmatpush.msrb.mxu0 %v1426_v29  ;;  %1522 = vmatpush.msra.mxu1 %v1427_v49  ;;  %v5939_v38 = vld.sshfl [vmem:[#allocation1] sm:$0xff pattern:$0x75316420]  ;;  %v5941_v62 = vld.sshfl [vmem:[#allocation1 + $0x8] sm:$0xff pattern:$0x75316420] }
 0x282   :  { %4791 = vmatmul.msk.f32.vlgmr.msra.gmra.mxu1 %vm279_vm9, %v1422_v3  ;;  %v5884_v56 = vpop.permute.xlu2 %649  ;;  %v5919_v36 = vpop.permute.xlu0 %613  ;;  %9231 = vst [vmem:[#allocation30_spill] sm:$0xff] %v5939_v38 }
 0x283   :  { %v654_v13 = vpop.permute.xlu1 %653  ;;  %9232 = vst [vmem:[#allocation31_spill] sm:$0xff] %v5941_v62 }
 0x284   :  { %3586 = vst [vmem:[#allocation1] ss:$2 sm:$0xff] %v5930_v41 }
 0x287   :  { %944 = vmatmul.f32.gmra.mxu2 %v5889_v59 }
 0x288   :  { %4786 = vmatmul.msk.f32.vlgmr.msrb.gmra.mxu0 %vm279_vm9, %v1422_v3 }
 0x28a   :  { %4792 = vmatmul.msk.f32.gmra.mxu1 %vm279_vm9, %v1423_v27  ;;  %v5897_v22 = vpop.permute.xlu2 %847  ;;  %v664_v26 = vpop.permute.xlu0 %663 }
 0x28b   :  { %9226 = vst [vmem:[#allocation25_spill] sm:$0xff] %v5897_v22  ;;  %v660_v57 = vpop.permute.xlu1 %659 }
 0x28f   :  { %947 = vmatmul.f32.gmra.mxu2 %v5902_v2 }
 0x290   :  { %4787 = vmatmul.msk.f32.gmra.mxu0 %vm279_vm9, %v1423_v27  ;;  %v5950_v27 = vld.sshfl [vmem:[#allocation1] sm:$0xff pattern:$0x75316420] }
 0x291   :  { %9234 = vst [vmem:[#allocation19_spill] sm:$0xff] %v5950_v27  ;;  %v671_v27 = vsel %vm198_vm4, %v5861_v25, %v654_v13 }
 0x292   :  { %4793 = vmatmul.msk.f32.gmra.mxu1 %vm279_vm9, %v1424_v47  ;;  %v5912_v35 = vpop.permute.xlu2 %862  ;;  %v652_v29 = vpop.permute.xlu0 %651 }
 0x293   :  { %9227 = vst [vmem:[#allocation26_spill] sm:$0xff] %v5912_v35  ;;  %v5914_v28 = vpop.permute.xlu1 %617  ;;  %v670_v39 = vsel %vm198_vm4, %v660_v57, %v652_v29  ;;  %v666_v12 = vsel %vm198_vm4, %v652_v29, %v660_v57 }
 0x294   :  { %v682_v29 = vmul.f32 %v676_v48, %v670_v39  ;;  %v4758_v39 = vld [vmem:[%s9119_s5 + $0xc] sm:$0x3] }
 0x298   :  { %4788 = vmatmul.msk.f32.gmra.mxu0 %vm279_vm9, %v1424_v47  ;;  %v5952_v47 = vld.sshfl [vmem:[#allocation1 + $0x8] sm:$0xff pattern:$0x75316420] }
 0x299   :  { %9235 = vst [vmem:[#allocation32_spill] sm:$0xff] %v5952_v47 }
 0x29a   :  { %4794 = vmatmul.msk.f32.gmra.mxu1 %vm279_vm9, %v1425_v46  ;;  %3613 = vst [vmem:[#allocation1] ss:$2 sm:$0xff] %v5930_v41 }
 0x29b   :  { %v5923_v23 = vpop.permute.xlu1 %857  ;;  %v5925_v52 = vpop.permute.xlu2 %877 }
 0x29c   :  { %9228 = vst [vmem:[#allocation27_spill] sm:$0xff] %v5923_v23 }
 0x29d   :  { %9229 = vst [vmem:[#allocation28_spill] sm:$0xff] %v5925_v52  ;;  %v658_v52 = vpop.permute.xlu0 %657 }
 0x2a0   :  { %4789 = vmatmul.msk.f32.gmra.mxu0 %vm279_vm9, %v1425_v46  ;;  %v9236_v46 = vld [vmem:[#allocation17_spill] sm:$0xff] }
 0x2a1   :  { %2470 = vrot.lane.b32.xlu1 %v9236_v46, %s4976_s25  ;;  %v667_v46 = vsel %vm198_vm4, %v654_v13, %v5861_v25  ;;  %v5972_v30 = vld.sshfl [vmem:[#allocation1] sm:$0xff pattern:$0x75316420]  ;;  %v684_v13 = vmul.f32 %v676_v48, %v671_v27 }
 0x2a2   :  { %9237 = vst [vmem:[#allocation17_spill] sm:$0xff] %v5972_v30 }
 0x2a3   :  { %v5935_v31 = vpop.permute.xlu1 %872 }
 0x2a4   :  { %9230 = vst [vmem:[#allocation29_spill] sm:$0xff] %v5935_v31  ;;  %v5937_v60 = vpop.permute.xlu2 %1452  ;;  %v675_v31 = vperm.slane %v4759_v6, 0  ;;  %v5974_v6 = vld.sshfl [vmem:[#allocation1 + $0x8] sm:$0xff pattern:$0x75316420] }
 0x2a5   :  { %9238 = vst [vmem:[#allocation33_spill] sm:$0xff] %v5974_v6 }
 0x2a6   :  { %3634 = vst [vmem:[#allocation1] ss:$2 sm:$0xff] %v5930_v41  ;;  %v683_v25 = vmul.f32 %v675_v31, %v667_v46  ;;  %v681_v57 = vmul.f32 %v675_v31, %v666_v12 }
 0x2ab   :  { %v5946_v3 = vpop.permute.xlu1 %1457 }
 0x2ac   :  { %v5948_v49 = vpop.permute.xlu2 %2577 }
 0x2ad   :  { %v5991_v27 = vld.sshfl [vmem:[#allocation1] sm:$0xff pattern:$0x75316420]  ;;  %v5993_v46 = vld.sshfl [vmem:[#allocation1 + $0x8] sm:$0xff pattern:$0x75316420] }
 0x2ae   :  { %9241 = vst [vmem:[#allocation34_spill] sm:$0xff] %v5993_v46 }
 0x2af   :  { %3661 = vst [vmem:[#allocation1] ss:$2 sm:$0xff] %v5930_v41 }
 0x2b3   :  { %v5960_v38 = vpop.permute.xlu1 %1442 }
 0x2b4   :  { %v656_v62 = vpop.permute.xlu2 %655 }
 0x2b5   :  { %v672_v47 = vsel %vm198_vm4, %v664_v26, %v656_v62  ;;  %v668_v35 = vsel %vm198_vm4, %v656_v62, %v664_v26  ;;  %v9239_v26 = vld [vmem:[#allocation15_spill] sm:$0xff]  ;;  %v665_v62 = vsel %vm198_vm4, %v5884_v56, %v658_v52 }
 0x2b6   :  { %v686_v22 = vmul.f32 %v676_v48, %v672_v47  ;;  %v685_v23 = vmul.f32 %v675_v31, %v668_v35  ;;  %2447 = vrot.lane.b32.xlu1 %v9239_v26, %s4975_s24  ;;  %v669_v35 = vsel %vm198_vm4, %v658_v52, %v5884_v56  ;;  %9240 = vst [vmem:[#allocation15_spill] sm:$0xff] %v5991_v27  ;;  %v9242_v56 = vld [vmem:[#allocation12_spill] sm:$0xff]  ;;  %v630_v26 = vperm.slane %v4758_v39, 1 }
 0x2b7   :  { %v2610_v27 = vld [vmem:[%s9120_s2 + $0x18] sm:$0xff] }
 0x2b8   :  { %951 = vmatpush.msra.mxu3 %v685_v23  ;;  %1074 = vmatpush.msra.mxu2 %v686_v22  ;;  %v679_v23 = vmul.f32 %v675_v31, %v665_v62  ;;  %v680_v22 = vmul.f32 %v676_v48, %v669_v35  ;;  %v629_v48 = vperm.slane %v4758_v39, 0 }
 0x2ba   :  { %952 = vmatpush.msra.mxu3 %v683_v25  ;;  %1075 = vmatpush.msra.mxu2 %v684_v13  ;;  %v625_v25 = vsel %vm175_vm3, %v5865_v20, %v5904_v51 }
 0x2bb   :  { %v5989_v47 = vpop.permute.xlu1 %2550  ;;  %v638_v39 = vmul.f32 %v630_v26, %v625_v25 }
 0x2bc   :  { %953 = vmatpush.msra.mxu3 %v681_v57  ;;  %1076 = vmatpush.msra.mxu2 %v682_v29  ;;  %v621_v57 = vsel %vm175_vm3, %v5904_v51, %v5865_v20  ;;  %v623_v20 = vsel %vm175_vm3, %v5835_v19, %v5656_v15  ;;  %v619_v51 = vsel %vm175_vm3, %v5656_v15, %v5835_v19 }
 0x2bd   :  { %v634_v15 = vmul.f32 %v630_v26, %v623_v20 }
 0x2be   :  { %954 = vmatpush.msra.mxu3 %v679_v23  ;;  %1077 = vmatpush.msra.mxu2 %v680_v22  ;;  %v624_v22 = vsel %vm175_vm3, %v5919_v36, %v5663_v8 }
 0x2bf   :  { %2401 = vrot.lane.b32.xlu1 %v9242_v56, %s4980_s29  ;;  %v620_v56 = vsel %vm175_vm3, %v5663_v8, %v5919_v36  ;;  %v636_v36 = vmul.f32 %v630_v26, %v624_v22  ;;  %v575_v22 = vsel %vm146_vm2, %v5527_v16, %v5604_v63 }
 0x2c0   :  { %v635_v8 = vmul.f32 %v629_v48, %v620_v56 }
 0x2c3   :  { %v564_v52 = vpop.permute.xlu1 %563 }
 0x2c4   :  { %v5998_v12 = vpop.f32.mrf.mxu0 }
 0x2cb   :  { %v610_v31 = vpop.permute.xlu1 %609 }
 0x2cc   :  { %v626_v13 = vsel %vm175_vm3, %v5914_v28, %v610_v31  ;;  %v6010_v35 = vpop.f32.mrf.mxu0  ;;  %v622_v62 = vsel %vm175_vm3, %v610_v31, %v5914_v28  ;;  %v637_v28 = vmul.f32 %v629_v48, %v621_v57  ;;  %v4757_v31 = vld [vmem:[%s9119_s5 + $0xa] sm:$0x3]  ;;  %v633_v57 = vmul.f32 %v629_v48, %v619_v51  ;;  %v9246_v51 = vld [vmem:[#allocation16_spill] sm:$0xff] }
 0x2cd   :  { %9243 = vst [vmem:[#allocation12_spill] sm:$0xff] %v6010_v35  ;;  %v639_v29 = vmul.f32 %v629_v48, %v622_v62  ;;  %v640_v23 = vmul.f32 %v630_v26, %v626_v13  ;;  %v9244_v13 = vld [vmem:[#allocation21_spill] sm:$0xff]  ;;  %v583_v19 = vperm.slane %v4757_v31, 0  ;;  %v9245_v26 = vld [vmem:[#allocation18_spill] sm:$0xff] }
 0x2ce   :  { %v580_v25 = vsel %vm146_vm2, %v9244_v13, %v564_v52  ;;  %v576_v62 = vsel %vm146_vm2, %v564_v52, %v9244_v13  ;;  %v574_v20 = vsel %vm146_vm2, %v9245_v26, %v5595_v7 }
 0x2cf   :  { %955 = vmatpush.msra.mxu3 %v639_v29  ;;  %1078 = vmatpush.msra.mxu2 %v640_v23  ;;  %v584_v29 = vperm.slane %v4757_v31, 1  ;;  %v579_v23 = vsel %vm146_vm2, %v5604_v63, %v5527_v16  ;;  %v593_v52 = vmul.f32 %v583_v19, %v576_v62  ;;  %v591_v16 = vmul.f32 %v583_v19, %v575_v22  ;;  %v9247_v31 = vld [vmem:[#allocation20_spill] sm:$0xff]  ;;  %v9251_v22 = vld [vmem:[#allocation9_spill] sm:$0xff] }
 0x2d0   :  { %v589_v13 = vmul.f32 %v583_v19, %v574_v20 }
 0x2d1   :  { %956 = vmatpush.msra.mxu3 %v637_v28  ;;  %1079 = vmatpush.msra.mxu2 %v638_v39  ;;  %v594_v48 = vmul.f32 %v584_v29, %v580_v25  ;;  %v578_v39 = vsel %vm146_vm2, %v5595_v7, %v9245_v26  ;;  %v592_v63 = vmul.f32 %v584_v29, %v579_v23  ;;  %v9250_v23 = vld [vmem:[#allocation10_spill] sm:$0xff] }
 0x2d2   :  { %v590_v25 = vmul.f32 %v584_v29, %v578_v39  ;;  %v9254_v26 = vld [vmem:[#allocation6_spill] sm:$0xff] }
 0x2d3   :  { %957 = vmatpush.msra.mxu3 %v635_v8  ;;  %1080 = vmatpush.msra.mxu2 %v636_v36  ;;  %v577_v8 = vsel %vm146_vm2, %v9247_v31, %v9246_v51  ;;  %v573_v36 = vsel %vm146_vm2, %v9246_v51, %v9247_v31  ;;  %v9260_v51 = vld [vmem:[#allocation23_spill] sm:$0xff]  ;;  %v745_v31 = vld [vmem:[%s9123_s3 + $0x20] sm:$0xff] }
 0x2d4   :  { %v587_v7 = vmul.f32 %v583_v19, %v573_v36  ;;  %v588_v62 = vmul.f32 %v584_v29, %v577_v8  ;;  %v742_v19 = vld [vmem:[%s9123_s3 + $0x8] sm:$0xff]  ;;  %v6085_v29 = vpop.permute.xlu0 %852 }
 0x2d5   :  { %v6052_v56 = vpop.f32.mrf.mxu0  ;;  %v6054_v28 = vpop.f32.mrf.mxu1  ;;  %958 = vmatpush.msra.mxu3 %v633_v57  ;;  %1081 = vmatpush.msra.mxu2 %v634_v15  ;;  %9255 = vst [vmem:[#allocation16_spill] sm:$0xff] %v6085_v29 }
 0x2d7   :  { %959 = vmatpush.msra.mxu3 %v593_v52  ;;  %1082 = vmatpush.msra.mxu2 %v594_v48  ;;  %v9252_v52 = vld [vmem:[#allocation8_spill] sm:$0xff]  ;;  %v9253_v48 = vld [vmem:[#allocation7_spill] sm:$0xff] }
 0x2d9   :  { %960 = vmatpush.msra.mxu3 %v591_v16  ;;  %1083 = vmatpush.msra.mxu2 %v592_v63  ;;  %v9258_v16 = vld [vmem:[#allocation4_spill] sm:$0xff]  ;;  %v9259_v63 = vld [vmem:[#allocation22_spill] sm:$0xff] }
 0x2db   :  { %961 = vmatpush.msra.mxu3 %v589_v13  ;;  %1084 = vmatpush.msra.mxu2 %v590_v25 }
 0x2dc   :  { %v6104_v13 = vpop.permute.xlu0 %867 }
 0x2dd   :  { %v6072_v57 = vpop.f32.mrf.mxu0  ;;  %v6074_v15 = vpop.f32.mrf.mxu1  ;;  %962 = vmatpush.msra.mxu3 %v587_v7  ;;  %1085 = vmatpush.msra.mxu2 %v588_v62 }
 0x2de   :  { %9248 = vst [vmem:[#allocation21_spill] sm:$0xff] %v6072_v57 }
 0x2df   :  { %9249 = vst [vmem:[#allocation18_spill] sm:$0xff] %v6074_v15  ;;  %963 = vmatpush.msra.mxu3 %v5265_v45  ;;  %1086 = vmatpush.msra.mxu2 %v9250_v23  ;;  %v9257_v45 = vld [vmem:[#allocation5_spill] sm:$0xff] }
 0x2e1   :  { %964 = vmatpush.msra.mxu3 %v9251_v22  ;;  %1087 = vmatpush.msra.mxu2 %v9252_v52 }
 0x2e3   :  { %965 = vmatpush.msra.mxu3 %v9253_v48  ;;  %1088 = vmatpush.msra.mxu2 %v9254_v26  ;;  %v757_v48 = vld [vmem:[%s9123_s3 + $0x80] sm:$0xff] }
 0x2e4   :  { %v6118_v7 = vpop.permute.xlu0 %882 }
 0x2e5   :  { %v6087_v39 = vpop.f32.mrf.mxu0  ;;  %v6089_v20 = vpop.f32.mrf.mxu1  ;;  %966 = vmatpush.msra.mxu3 %v9257_v45  ;;  %1089 = vmatpush.msra.mxu2 %v9258_v16  ;;  %9263 = vst [vmem:[#allocation8_spill] sm:$0xff] %v6118_v7 }
 0x2e6   :  { %9256 = vst [vmem:[#allocation20_spill] sm:$0xff] %v6087_v39  ;;  %967 = vmatmul.f32.vlgmr.msra.gmra.mxu3 %v742_v19  ;;  %1090 = vmatmul.f32.vlgmr.msra.gmra.mxu2 %v742_v19 }
 0x2e7   :  { %4924 = vmatpush.msrb.mxu3 %v9259_v63 }
 0x2e9   :  { %4925 = vmatpush.msrb.mxu3 %v9260_v51  ;;  %v4833_v51 = vld [vmem:[%s9119_s5 + $0x10] sm:$0x3] }
 0x2eb   :  { %4926 = vmatpush.msrb.mxu3 %v5529_v10  ;;  %v748_v10 = vld [vmem:[%s9123_s3 + $0x38] sm:$0xff] }
 0x2ed   :  { %v6099_v8 = vpop.f32.mrf.mxu0  ;;  %v6101_v36 = vpop.f32.mrf.mxu1  ;;  %4927 = vmatpush.msrb.mxu3 %v5539_v0 }
 0x2ee   :  { %9261 = vst [vmem:[#allocation10_spill] sm:$0xff] %v6099_v8  ;;  %970 = vmatmul.f32.gmra.mxu3 %v745_v31  ;;  %1093 = vmatmul.f32.gmra.mxu2 %v745_v31  ;;  %v2580_v31 = vpop.permute.xlu1 %2579 }
 0x2ef   :  { %9262 = vst [vmem:[#allocation9_spill] sm:$0xff] %v6101_v36  ;;  %4928 = vmatpush.msrb.mxu3 %v5547_v1  ;;  %v751_v1 = vld [vmem:[%s9123_s3 + $0x50] sm:$0xff] }
 0x2f1   :  { %4929 = vmatpush.msrb.mxu3 %v5585_v4 }
 0x2f3   :  { %4930 = vmatpush.msrb.mxu3 %v5606_v21 }
 0x2f5   :  { %v6112_v25 = vpop.f32.mrf.mxu0  ;;  %4931 = vmatpush.msrb.mxu3 %v5620_v40  ;;  %v6115_v0 = vpop.f32.mrf.mxu1 }
 0x2f6   :  { %973 = vmatmul.f32.gmra.mxu3 %v748_v10  ;;  %1096 = vmatmul.f32.gmra.mxu2 %v748_v10  ;;  %v2585_v10 = vperm.slane %v4833_v51, 0 }
 0x2f7   :  { %4932 = vmatpush.msrb.mxu3 %v5632_v42  ;;  %v718_v42 = vsel %vm227_vm6, %v5441_v44, %v5531_v5 }
 0x2f9   :  { %4933 = vmatpush.msrb.mxu3 %v5646_v43  ;;  %v722_v43 = vperm.slane %v5510_v50, 1  ;;  %v716_v50 = vsel %vm227_vm6, %v5386_v34, %v5382_v32  ;;  %v4832_v34 = vld [vmem:[%s9119_s5 + $0xe] sm:$0x3] }
 0x2fa   :  { %v2559_v52 = vperm.slane %v4832_v34, 1 }
 0x2fb   :  { %4934 = vmatpush.msrb.mxu3 %v5665_v14  ;;  %v6136_v14 = vpop.permute.xlu0 %1447  ;;  %v732_v44 = vmul.f32 %v722_v43, %v718_v42  ;;  %v728_v22 = vmul.f32 %v722_v43, %v716_v50  ;;  %v760_v42 = vld [vmem:[%s9123_s3 + $0x98] sm:$0xff] }
 0x2fd   :  { %v6125_v4 = vpop.f32.mrf.mxu0  ;;  %4935 = vmatpush.msrb.mxu3 %v5679_v54  ;;  %v717_v54 = vsel %vm227_vm6, %v5401_v37, %v5449_v53 }
 0x2fe   :  { %9264 = vst [vmem:[#allocation7_spill] sm:$0xff] %v6125_v4  ;;  %976 = vmatmul.f32.gmra.mxu3 %v751_v1  ;;  %1099 = vmatmul.f32.gmra.mxu2 %v751_v1  ;;  %v730_v53 = vmul.f32 %v722_v43, %v717_v54  ;;  %v2586_v1 = vperm.slane %v4833_v51, 1 }
 0x2ff   :  { %4936 = vmatpush.msrb.mxu3 %v5697_v11  ;;  %v1524_v21 = vpop.f32.mrf.mxu1  ;;  %v754_v11 = vld [vmem:[%s9123_s3 + $0x68] sm:$0xff] }
 0x300   :  { %v1525_v40 = vadd.f32 %v1524_v21, %v5960_v38  ;;  %v2581_v21 = vsel %vm227_vm6, %v5948_v49, %v2580_v31 }
 0x301   :  { %4937 = vmatpush.msrb.mxu3 %v5716_v33  ;;  %v9266_v33 = vld [vmem:[#allocation13_spill] sm:$0xff]  ;;  %v2589_v54 = vmul.f32 %v2585_v10, %v2581_v21 }
 0x302   :  { %v6138_v62 = vmax.f32 %v1525_v40, 0.0 }
 0x303   :  { %4938 = vmatpush.msrb.mxu3 %v5732_v58  ;;  %v715_v58 = vsel %vm227_vm6, %v9266_v33, %v5305_v55  ;;  %2591 = vst [vmem:[#allocation2 + $0x40] sm:$0xf] %v2589_v54 }
 0x304   :  { %9265 = vst [vmem:[#allocation6_spill] sm:$0xff] %v6138_v62  ;;  %1598 = vrot.lane.b32.xlu0 %v6138_v62, %s4974_s23  ;;  %1690 = vrot.lane.b32.xlu1 %v6138_v62, %s4976_s25  ;;  %v726_v32 = vmul.f32 %v722_v43, %v715_v58  ;;  %v2582_v43 = vsel %vm227_vm6, %v2580_v31, %v5948_v49  ;;  %v4831_v49 = vld [vmem:[%s9119_s5 + $0xc] sm:$0x3] }
 0x305   :  { %v1495_v5 = vpop.f32.mrf.mxu0  ;;  %4939 = vmatpush.msrb.mxu3 %v5742_v9  ;;  %v2553_v9 = vpop.permute.xlu0 %2552  ;;  %v2538_v33 = vperm.slane %v4831_v49, 1 }
 0x306   :  { %v1496_v37 = vadd.f32 %v1495_v5, %v5960_v38  ;;  %1102 = vmatmul.f32.gmra.mxu2 %v754_v11  ;;  %979 = vmatmul.f32.gmra.mxu3 %v754_v11  ;;  %v2558_v38 = vperm.slane %v4832_v34, 0  ;;  %v2554_v55 = vsel %vm198_vm4, %v5989_v47, %v2553_v9  ;;  %v2555_v26 = vsel %vm198_vm4, %v2553_v9, %v5989_v47  ;;  %v2530_v5 = vpop.permute.xlu1 %2529 }
 0x307   :  { %1127 = vmatpush.msra.mxu3 %v732_v44  ;;  %v2563_v45 = vmul.f32 %v2559_v52, %v2555_v26  ;;  %v2590_v11 = vmul.f32 %v2586_v1, %v2582_v43  ;;  %v1527_v58 = vpop.f32.mrf.mxu1  ;;  %v4830_v52 = vld [vmem:[%s9119_s5 + $0xa] sm:$0x3] }
 0x308   :  { %v6162_v23 = vmax.f32 %v1496_v37, 0.0  ;;  %v2562_v19 = vmul.f32 %v2558_v38, %v2554_v55  ;;  %v2505_v55 = vpop.permute.xlu2 %2504  ;;  %v2511_v26 = vperm.slane %v4830_v52, 1 }
 0x309   :  { %1128 = vmatpush.msra.mxu3 %v730_v53  ;;  %v2567_v63 = vrot.slane %v2563_v45, 4  ;;  %2592 = vst [vmem:[#allocation2 + $0x38] sm:$0xf] %v2590_v11  ;;  %v2537_v53 = vperm.slane %v4831_v49, 0  ;;  %v1528_v45 = vadd.f32 %v1527_v58, %v6136_v14 }
 0x30a   :  { %9267 = vst [vmem:[#allocation5_spill] sm:$0xff] %v6162_v23  ;;  %1682 = vrot.lane.b32.xlu2 %v6162_v23, %s4976_s25  ;;  %v2566_v16 = vrot.slane %v2562_v19, 4 }
 0x30b   :  { %1129 = vmatpush.msra.mxu3 %v728_v22  ;;  %2571 = vst [vmem:[#allocation2 + $0x20] sm:$0xf0] %v2567_v63  ;;  %v763_v22 = vld [vmem:[%s9123_s3 + $0xb0] sm:$0xff]  ;;  %v6229_v1 = vmax.f32 %v1528_v45, 0.0 }
 0x30c   :  { %1874 = vrot.lane.b32.xlu0 %v6162_v23, %s4981_s8  ;;  %1636 = vrot.lane.b32.xlu1 %v6162_v23, %s4975_s24  ;;  %2570 = vst [vmem:[#allocation2 + $0x8] sm:$0xf0] %v2566_v16 }
 0x30d   :  { %1130 = vmatpush.msra.mxu3 %v726_v32  ;;  %v1498_v47 = vpop.f32.mrf.mxu0  ;;  %v2503_v40 = vpop.permute.xlu0 %2502  ;;  %9269 = vst [vmem:[#allocation22_spill] sm:$0xff] %v6229_v1 }
 0x30e   :  { %1105 = vmatmul.f32.gmra.mxu2 %v757_v48  ;;  %982 = vmatmul.f32.gmra.mxu3 %v757_v48  ;;  %v1499_v44 = vadd.f32 %v1498_v47, %v6136_v14  ;;  %v2510_v48 = vperm.slane %v4830_v52, 0  ;;  %v2506_v19 = vsel %vm146_vm2, %v2503_v40, %v2505_v55  ;;  %v2507_v16 = vsel %vm146_vm2, %v2505_v55, %v2503_v40  ;;  %v4829_v14 = vld [vmem:[%s9119_s5 + $0x6] sm:$0x3] }
 0x30f   :  { %v2515_v51 = vmul.f32 %v2511_v26, %v2507_v16  ;;  %v2477_v43 = vperm.slane %v4829_v14, 1 }
 0x310   :  { %v6201_v50 = vmax.f32 %v1499_v44, 0.0  ;;  %v2514_v63 = vmul.f32 %v2510_v48, %v2506_v19  ;;  %v2469_v40 = vpop.permute.xlu2 %2468  ;;  %v4827_v48 = vld [vmem:[%s9119_s5 + $0x2] sm:$0x3] }
 0x311   :  { %v2519_v47 = vrot.slane %v2515_v51, 4  ;;  %v2428_v19 = vperm.slane %v4827_v48, 0  ;;  %v2429_v45 = vperm.slane %v4827_v48, 1  ;;  %v9274_v48 = vld [vmem:[#allocation14_spill] sm:$0xff] }
 0x312   :  { %1644 = vrot.lane.b32.xlu2 %v6138_v62, %s4975_s24  ;;  %9268 = vst [vmem:[#allocation4_spill] sm:$0xff] %v6201_v50  ;;  %v2518_v31 = vrot.slane %v2514_v63, 4 }
 0x313   :  { %v2471_v10 = vpop.permute.xlu1 %2470  ;;  %2523 = vst [vmem:[#allocation2 + $0x28] sm:$0xf0] %v2519_v47  ;;  %v1530_v47 = vpop.f32.mrf.mxu1 }
 0x314   :  { %1736 = vrot.lane.b32.xlu0 %v6162_v23, %s4977_s26  ;;  %1590 = vrot.lane.b32.xlu1 %v6162_v23, %s4974_s23  ;;  %2522 = vst [vmem:[#allocation2 + $0x48] sm:$0xf0] %v2518_v31  ;;  %v2472_v54 = vsel %vm110_vm1, %v2469_v40, %v2471_v10  ;;  %v2473_v11 = vsel %vm110_vm1, %v2471_v10, %v2469_v40 }
 0x315   :  { %v2532_v37 = vpop.permute.xlu0 %2531  ;;  %v2481_v49 = vmul.f32 %v2477_v43, %v2472_v54 }
 0x316   :  { %1108 = vmatmul.f32.gmra.mxu2 %v760_v42  ;;  %985 = vmatmul.f32.gmra.mxu3 %v760_v42  ;;  %v2533_v32 = vsel %vm175_vm3, %v2530_v5, %v2532_v37  ;;  %v2534_v34 = vsel %vm175_vm3, %v2532_v37, %v2530_v5  ;;  %v2476_v42 = vperm.slane %v4829_v14, 0  ;;  %v1501_v5 = vpop.f32.mrf.mxu0 }
 0x317   :  { %v2541_v9 = vmul.f32 %v2537_v53, %v2533_v32  ;;  %v2542_v38 = vmul.f32 %v2538_v33, %v2534_v34  ;;  %v2485_v53 = vrot.slane %v2481_v49, 4  ;;  %v4828_v33 = vld [vmem:[%s9119_s5 + $0x4] sm:$0x3] }
 0x318   :  { %v2480_v44 = vmul.f32 %v2476_v42, %v2473_v11  ;;  %v2455_v32 = vperm.slane %v4828_v33, 0  ;;  %v2456_v34 = vperm.slane %v4828_v33, 1  ;;  %v2423_v26 = vpop.permute.xlu2 %2422 }
 0x319   :  { %2543 = vst [vmem:[#allocation2 + $0x8] sm:$0xf] %v2541_v9 }
 0x31a   :  { %1544 = vrot.lane.b32.xlu2 %v6162_v23, %s4980_s29  ;;  %2544 = vst [vmem:[#allocation2 + $0x20] sm:$0xf] %v2542_v38  ;;  %v2484_v37 = vrot.slane %v2480_v44, 4  ;;  %v1502_v38 = vadd.f32 %v1501_v5, %v5937_v60 }
 0x31b   :  { %2489 = vst [vmem:[#allocation2 + $0x10] sm:$0xf0] %v2485_v53  ;;  %v1533_v53 = vpop.f32.mrf.mxu1 }
 0x31c   :  { %1592 = vrot.lane.b32.xlu0 %v6201_v50, %s4974_s23  ;;  %1552 = vrot.lane.b32.xlu1 %v6138_v62, %s4980_s29  ;;  %2488 = vst [vmem:[#allocation2 + $0x18] sm:$0xf0] %v2484_v37  ;;  %v6265_v10 = vmax.f32 %v1502_v38, 0.0  ;;  %v1534_v33 = vadd.f32 %v1533_v53, %v5946_v3 }
 0x31d   :  { %v2421_v21 = vpop.permute.xlu0 %2420 }
 0x31e   :  { %1111 = vmatmul.f32.gmra.mxu2 %v763_v22  ;;  %988 = vmatmul.f32.gmra.mxu3 %v763_v22  ;;  %v2424_v16 = vsel %vm58_vm0, %v2421_v21, %v2423_v26  ;;  %v2425_v63 = vsel %vm58_vm0, %v2423_v26, %v2421_v21  ;;  %9270 = vst [vmem:[#allocation23_spill] sm:$0xff] %v6265_v10 }
 0x31f   :  { %v2432_v51 = vmul.f32 %v2428_v19, %v2425_v63  ;;  %v2433_v31 = vmul.f32 %v2429_v45, %v2424_v16  ;;  %v1531_v21 = vadd.f32 %v1530_v47, %v5937_v60  ;;  %v9276_v16 = vld [vmem:[#allocation11_spill] sm:$0xff] }
 0x320   :  { %v2400_v43 = vpop.permute.xlu2 %2399 }
 0x321   :  { %v2436_v14 = vrot.slane %v2432_v51, 4  ;;  %v2437_v40 = vrot.slane %v2433_v31, 4  ;;  %v6282_v37 = vmax.f32 %v1531_v21, 0.0  ;;  %v2016_v31 = vld [vmem:[%s9122_s4] sm:$0xff] }
 0x322   :  { %1882 = vrot.lane.b32.xlu2 %v6138_v62, %s4981_s8 }
 0x323   :  { %2440 = vst [vmem:[#allocation2 + $0x30] sm:$0xf0] %v2436_v14 }
 0x324   :  { %1546 = vrot.lane.b32.xlu0 %v6201_v50, %s4980_s29  ;;  %1692 = vrot.lane.b32.xlu1 %v6229_v1, %s4976_s25  ;;  %2441 = vst [vmem:[#allocation2] sm:$0xf0] %v2437_v40 }
 0x325   :  { %v2450_v22 = vpop.permute.xlu0 %2449  ;;  %9271 = vst [vmem:[#allocation13_spill] sm:$0xff] %v6282_v37 }
 0x326   :  { %1064 = vmatmul.f32.vlgmr.msrb.gmra.mxu3 %v5870_v17 }
 0x328   :  { %v2448_v58 = vpop.permute.xlu1 %2447 }
 0x329   :  { %v2451_v17 = vsel %vm87_vm7, %v2448_v58, %v2450_v22  ;;  %v2452_v9 = vsel %vm87_vm7, %v2450_v22, %v2448_v58  ;;  %v6295_v58 = vmax.f32 %v1534_v33, 0.0  ;;  %v1504_v22 = vpop.f32.mrf.mxu0 }
 0x32a   :  { %1684 = vrot.lane.b32.xlu2 %v6201_v50, %s4976_s25  ;;  %v2459_v52 = vmul.f32 %v2455_v32, %v2452_v9  ;;  %v2460_v55 = vmul.f32 %v2456_v34, %v2451_v17  ;;  %v1505_v32 = vadd.f32 %v1504_v22, %v5946_v3  ;;  %v4972_v34 = vld [vmem:[%s9123_s3 + $0x28] sm:$0xff]  ;;  %v4973_v3 = vld [vmem:[%s9123_s3 + $0x40] sm:$0xff]  ;;  %v6338_v9 = vpop.f32.mrf.mxu2 }
 0x32c   :  { %1884 = vrot.lane.b32.xlu0 %v6229_v1, %s4981_s8  ;;  %1638 = vrot.lane.b32.xlu1 %v6201_v50, %s4975_s24  ;;  %2461 = vst [vmem:[#allocation2 + $0x18] sm:$0xf] %v2459_v52  ;;  %v6308_v17 = vmax.f32 %v1505_v32, 0.0 }
 0x32d   :  { %2462 = vst [vmem:[#allocation2 + $0x10] sm:$0xf] %v2460_v55 }
 0x32e   :  { %1067 = vmatmul.f32.gmra.mxu3 %v5889_v59  ;;  %v2405_v59 = vld [vmem:[%s9119_s5] sm:$0x3] }
 0x32f   :  { %v2407_v54 = vperm.slane %v2405_v59, 0  ;;  %v2408_v11 = vperm.slane %v2405_v59, 1 }
 0x331   :  { %v2402_v42 = vpop.permute.xlu1 %2401 }
 0x332   :  { %1646 = vrot.lane.b32.xlu2 %v6229_v1, %s4975_s24  ;;  %v2403_v44 = vsel %vm36_vm5, %v2400_v43, %v2402_v42  ;;  %v2404_v49 = vsel %vm36_vm5, %v2402_v42, %v2400_v43  ;;  %v6358_v55 = vpop.f32.mrf.mxu2  ;;  %v2609_v42 = vld [vmem:[%s9120_s2 + $0x10] sm:$0xff] }
 0x333   :  { %v2411_v60 = vmul.f32 %v2407_v54, %v2404_v49  ;;  %v2412_v5 = vmul.f32 %v2408_v11, %v2403_v44 }
 0x334   :  { %1640 = vrot.lane.b32.xlu0 %v6265_v10, %s4975_s24  ;;  %1876 = vrot.lane.b32.xlu1 %v6201_v50, %s4981_s8 }
 0x335   :  { %2413 = vst [vmem:[#allocation2 + $0x30] sm:$0xf] %v2411_v60 }
 0x336   :  { %1070 = vmatmul.f32.gmra.mxu3 %v5902_v2  ;;  %2414 = vst [vmem:[#allocation2] sm:$0xf] %v2412_v5  ;;  %v4971_v2 = vld [vmem:[%s9123_s3 + $0x10] sm:$0xff] }
 0x33a   :  { %1600 = vrot.lane.b32.xlu2 %v6229_v1, %s4974_s23  ;;  %v6376_v63 = vpop.f32.mrf.mxu2 }
 0x33c   :  { %1556 = vrot.lane.b32.xlu0 %v6282_v37, %s4980_s29  ;;  %1694 = vrot.lane.b32.xlu1 %v6282_v37, %s4976_s25 }
 0x33e   :  { %4769 = vmatmul.msk.f32.vlgmr.msra.gmra.mxu3 %vm885_vm10, %v4971_v2 }
 0x342   :  { %1554 = vrot.lane.b32.xlu2 %v6229_v1, %s4980_s29  ;;  %v6396_v21 = vpop.f32.mrf.mxu2 }
 0x343   :  { %9278 = vst [vmem:[#allocation35_spill] sm:$0xff] %v6396_v21 }
 0x344   :  { %1604 = vrot.lane.b32.xlu0 %v6295_v58, %s4974_s23  ;;  %1602 = vrot.lane.b32.xlu1 %v6282_v37, %s4974_s23 }
 0x346   :  { %4770 = vmatmul.msk.f32.gmra.mxu3 %vm885_vm10, %v4972_v34 }
 0x34a   :  { %1686 = vrot.lane.b32.xlu2 %v6265_v10, %s4976_s25  ;;  %v6410_v11 = vpop.f32.mrf.mxu2 }
 0x34c   :  { %1880 = vrot.lane.b32.xlu0 %v6308_v17, %s4981_s8  ;;  %1548 = vrot.lane.b32.xlu1 %v6265_v10, %s4980_s29 }
 0x34e   :  { %4771 = vmatmul.msk.f32.gmra.mxu3 %vm885_vm10, %v4973_v3 }
 0x352   :  { %1648 = vrot.lane.b32.xlu2 %v6282_v37, %s4975_s24  ;;  %v6432_v33 = vpop.f32.mrf.mxu2 }
 0x353   :  { %9281 = vst [vmem:[#allocation38_spill] sm:$0xff] %v6432_v33 }
 0x354   :  { %1832 = vrot.lane.b32.xlu0 %v6265_v10, %s4979_s28  ;;  %1886 = vrot.lane.b32.xlu1 %v6282_v37, %s4981_s8 }
 0x356   :  { %4772 = vmatmul.msk.f32.gmra.mxu3 %vm885_vm10, %v5768_v18  ;;  %v9272_v18 = vld [vmem:[#allocation24_spill] sm:$0xff] }
 0x357   :  { %9273 = vst [vmem:[#allocation24_spill] sm:$0xff] %v6358_v55 }
 0x35a   :  { %1594 = vrot.lane.b32.xlu2 %v6265_v10, %s4974_s23 }
 0x35c   :  { %1838 = vrot.lane.b32.xlu0 %v6229_v1, %s4979_s28  ;;  %1696 = vrot.lane.b32.xlu1 %v6295_v58, %s4976_s25 }
 0x35e   :  { %4773 = vmatmul.msk.f32.gmra.mxu3 %vm885_vm10, %v5802_v61 }
 0x362   :  { %1878 = vrot.lane.b32.xlu2 %v6265_v10, %s4981_s8 }
 0x364   :  { %v6340_v38 = vpop.permute.xlu2 %1682  ;;  %1794 = vrot.lane.b32.xlu0 %v6282_v37, %s4978_s27  ;;  %1650 = vrot.lane.b32.xlu1 %v6295_v58, %s4975_s24 }
 0x366   :  { %4774 = vmatmul.msk.f32.gmra.mxu3 %vm885_vm10, %v9272_v18  ;;  %v6448_v18 = vpop.f32.mrf.mxu2 }
 0x369   :  { %v6348_v52 = vpop.f32.mrf.mxu3 }
 0x36a   :  { %1688 = vrot.lane.b32.xlu2 %v6308_v17, %s4976_s25 }
 0x36c   :  { %v6352_v61 = vpop.permute.xlu2 %1644  ;;  %1782 = vrot.lane.b32.xlu0 %v6162_v23, %s4978_s27  ;;  %1596 = vrot.lane.b32.xlu1 %v6308_v17, %s4974_s23 }
 0x36e   :  { %4775 = vmatmul.msk.f32.gmra.mxu3 %vm885_vm10, %v9274_v48  ;;  %v6460_v30 = vpop.f32.mrf.mxu2 }
 0x36f   :  { %9284 = vst [vmem:[#allocation41_spill] sm:$0xff] %v6460_v30 }
 0x371   :  { %v6362_v26 = vpop.f32.mrf.mxu3 }
 0x372   :  { %9275 = vst [vmem:[#allocation14_spill] sm:$0xff] %v6362_v26  ;;  %1642 = vrot.lane.b32.xlu2 %v6308_v17, %s4975_s24 }
 0x374   :  { %v6366_v19 = vpop.permute.xlu2 %1544  ;;  %1738 = vrot.lane.b32.xlu0 %v6201_v50, %s4977_s26  ;;  %1558 = vrot.lane.b32.xlu1 %v6295_v58, %s4980_s29 }
 0x376   :  { %v6372_v45 = vpop.permute.xlu1 %1690  ;;  %4776 = vmatmul.msk.f32.gmra.mxu3 %vm885_vm10, %v9276_v16  ;;  %v6418_v49 = vpop.permute.xlu0 %1598 }
 0x379   :  { %v6378_v51 = vpop.f32.mrf.mxu3 }
 0x37a   :  { %1550 = vrot.lane.b32.xlu2 %v6308_v17, %s4980_s29 }
 0x37c   :  { %v6385_v47 = vpop.permute.xlu2 %1882  ;;  %2026 = vperm.xlu0 %4968, %v2016_v31   ;;  %1830 = vrot.lane.b32.xlu1 %v6201_v50, %s4979_s28 }
 0x37e   :  { %v6389_v14 = vpop.permute.xlu1 %1636  ;;  %v6436_v22 = vpop.permute.xlu0 %1874 }
 0x381   :  { %v6391_v40 = vpop.f32.mrf.mxu3 }
 0x382   :  { %9277 = vst [vmem:[#allocation11_spill] sm:$0xff] %v6391_v40  ;;  %1840 = vrot.lane.b32.xlu2 %v6282_v37, %s4979_s28  ;;  %v2608_v40 = vld [vmem:[%s9120_s2 + $0x8] sm:$0xff] }
 0x384   :  { %v6400_v59 = vpop.permute.xlu2 %1684  ;;  %2623 = vperm.xlu0 %4968, %v2609_v42   ;;  %1836 = vrot.lane.b32.xlu1 %v6138_v62, %s4979_s28 }
 0x386   :  { %v6404_v43 = vpop.permute.xlu1 %1590  ;;  %v6454_v16 = vpop.permute.xlu0 %1736 }
 0x387   :  { %9283 = vst [vmem:[#allocation40_spill] sm:$0xff] %v6454_v16 }
 0x389   :  { %v6408_v54 = vpop.f32.mrf.mxu3 }
 0x38a   :  { %1828 = vrot.lane.b32.xlu2 %v6162_v23, %s4979_s28  ;;  %9279 = vst [vmem:[#allocation36_spill] sm:$0xff] %v6408_v54 }
 0x38c   :  { %v6412_v44 = vpop.permute.xlu2 %1646  ;;  %1788 = vrot.lane.b32.xlu0 %v6308_v17, %s4978_s27  ;;  %1786 = vrot.lane.b32.xlu1 %v6265_v10, %s4978_s27 }
 0x38e   :  { %v6420_v60 = vpop.permute.xlu1 %1552  ;;  %v6471_v23 = vpop.permute.xlu0 %1592 }
 0x391   :  { %v6424_v5 = vpop.f32.mrf.mxu3 }
 0x392   :  { %1888 = vrot.lane.b32.xlu2 %v6295_v58, %s4981_s8  ;;  %9280 = vst [vmem:[#allocation37_spill] sm:$0xff] %v6424_v5 }
 0x394   :  { %v6426_v53 = vpop.permute.xlu2 %1600  ;;  %1750 = vrot.lane.b32.xlu0 %v6295_v58, %s4977_s26  ;;  %1792 = vrot.lane.b32.xlu1 %v6229_v1, %s4978_s27 }
 0x396   :  { %v6434_v2 = vpop.permute.xlu1 %1692  ;;  %v6484_v8 = vpop.permute.xlu0 %1546 }
 0x399   :  { %v6440_v32 = vpop.f32.mrf.mxu3 }
 0x39a   :  { %1784 = vrot.lane.b32.xlu2 %v6201_v50, %s4978_s27 }
 0x39c   :  { %v6442_v34 = vpop.permute.xlu2 %1554  ;;  %1748 = vrot.lane.b32.xlu1 %v6282_v37, %s4977_s26 }
 0x39e   :  { %v6446_v3 = vpop.permute.xlu1 %1638  ;;  %v6505_v21 = vpop.permute.xlu0 %1884 }
 0x3a1   :  { %v6452_v48 = vpop.f32.mrf.mxu3 }
 0x3a2   :  { %1790 = vrot.lane.b32.xlu2 %v6138_v62, %s4978_s27  ;;  %9282 = vst [vmem:[#allocation39_spill] sm:$0xff] %v6452_v48  ;;  %v4797_v48 = vld [vmem:[%s9119_s5 + $0x6] sm:$0x3] }
 0x3a3   :  { %v1709_v30 = vperm.slane %v4797_v48, 1 }
 0x3a4   :  { %v1687_v31 = vpop.permute.xlu2 %1686  ;;  %1744 = vrot.lane.b32.xlu1 %v6138_v62, %s4977_s26  ;;  %v6473_v62 = vpop.f32.mrf.mxu2 }
 0x3a6   :  { %v6458_v42 = vpop.permute.xlu1 %1876 }
 0x3a9   :  { %v6464_v6 = vpop.f32.mrf.mxu3 }
 0x3aa   :  { %1740 = vrot.lane.b32.xlu2 %v6265_v10, %s4977_s26  ;;  %9285 = vst [vmem:[#allocation42_spill] sm:$0xff] %v6464_v6  ;;  %v2607_v10 = vld [vmem:[%s9120_s2] sm:$0xff] }
 0x3ac   :  { %v6469_v46 = vpop.permute.xlu2 %1648  ;;  %2628 = vperm.xlu1 %4966, %v2610_v27   ;;  %v2017_v27 = vld [vmem:[%s9122_s4 + $0x8] sm:$0xff]  ;;  %v6496_v6 = vpop.f32.mrf.mxu2 }
 0x3ad   :  { %9287 = vst [vmem:[#allocation44_spill] sm:$0xff] %v6496_v6  ;;  %v9289_v6 = vld [vmem:[#allocation27_spill] sm:$0xff] }
 0x3ae   :  { %v1695_v50 = vpop.permute.xlu1 %1694  ;;  %v934_v26 = vadd.f32 %v6376_v63, %v9289_v6  ;;  %v1057_v54 = vadd.f32 %v6089_v20, %v9289_v6 }
 0x3af   :  { %v1700_v63 = vsel %vm110_vm1, %v1687_v31, %v1695_v50  ;;  %v1704_v15 = vsel %vm110_vm1, %v1695_v50, %v1687_v31  ;;  %v1703_v50 = vsel %vm110_vm1, %v6434_v2, %v6400_v59 }
 0x3b0   :  { %v975_v55 = vadd.f32 %v6378_v51, %v934_v26 }
 0x3b1   :  { %v6477_v37 = vpop.f32.mrf.mxu3 }
 0x3b2   :  { %1746 = vrot.lane.b32.xlu2 %v6229_v1, %s4977_s26  ;;  %v2020_v1 = vld [vmem:[%s9122_s4 + $0x20] sm:$0xff]  ;;  %v1016_v29 = vadd.f32 %v6052_v56, %v975_v55  ;;  %v1717_v56 = vmul.f32 %v1709_v30, %v1700_v63  ;;  %v1702_v55 = vsel %vm110_vm1, %v6372_v45, %v6340_v38 }
 0x3b4   :  { %v6482_v16 = vpop.permute.xlu2 %1594  ;;  %2613 = vperm.xlu1 %4966, %v2607_v10   ;;  %v1097_v35 = vpop.f32.mrf.mxu2 }
 0x3b5   :  { %v1098_v6 = vadd.f32 %v1097_v35, %v1057_v54  ;;  %v4796_v54 = vld [vmem:[%s9119_s5 + $0x4] sm:$0x3] }
 0x3b6   :  { %v6486_v5 = vpop.permute.xlu1 %1602 }
 0x3b9   :  { %v6491_v33 = vpop.f32.mrf.mxu3 }
 0x3ba   :  { %2031 = vperm.xlu2 %4967, %v2017_v27   ;;  %9286 = vst [vmem:[#allocation43_spill] sm:$0xff] %v6491_v33 }
 0x3bc   :  { %v6498_v57 = vpop.permute.xlu2 %1878  ;;  %2046 = vperm.xlu1 %4966, %v2020_v1   ;;  %v2019_v1 = vld [vmem:[%s9122_s4 + $0x18] sm:$0xff]  ;;  %v6528_v7 = vpop.f32.mrf.mxu2 }
 0x3bd   :  { %9290 = vst [vmem:[#allocation27_spill] sm:$0xff] %v6528_v7  ;;  %v1699_v7 = vsel %vm110_vm1, %v6400_v59, %v6434_v2  ;;  %v1160_v2 = vmax.f32 %v1016_v29, 0.0 }
 0x3be   :  { %v6500_v10 = vpop.permute.xlu1 %1548 }
 0x3c1   :  { %v6507_v27 = vpop.f32.mrf.mxu3 }
 0x3c2   :  { %2618 = vperm.xlu2 %4967, %v2608_v40   ;;  %v1641_v40 = vpop.permute.xlu0 %1640 }
 0x3c4   :  { %v1689_v36 = vpop.permute.xlu2 %1688  ;;  %1842 = vrot.lane.b32.xlu1 %v6295_v58, %s4979_s28 }
 0x3c6   :  { %v6511_v4 = vpop.permute.xlu1 %1886 }
 0x3c9   :  { %v6516_v39 = vpop.f32.mrf.mxu3 }
 0x3ca   :  { %2041 = vperm.xlu2 %4967, %v2019_v1   ;;  %9288 = vst [vmem:[#allocation45_spill] sm:$0xff] %v6516_v39  ;;  %v1708_v1 = vperm.slane %v4797_v48, 0 }
 0x3cc   :  { %v1643_v33 = vpop.permute.xlu2 %1642  ;;  %1742 = vrot.lane.b32.xlu1 %v6308_v17, %s4977_s26  ;;  %v1716_v35 = vmul.f32 %v1708_v1, %v1704_v15  ;;  %v1714_v63 = vmul.f32 %v1708_v1, %v1703_v50  ;;  %v6571_v50 = vld [vmem:[#allocation2 + $0x28] sm:$0xff] }
 0x3ce   :  { %v1697_v39 = vpop.permute.xlu1 %1696 }
 0x3cf   :  { %v1701_v26 = vsel %vm110_vm1, %v1689_v36, %v1697_v39  ;;  %v1705_v51 = vsel %vm110_vm1, %v1697_v39, %v1689_v36  ;;  %v1698_v36 = vsel %vm110_vm1, %v6340_v38, %v6372_v45  ;;  %v1662_v38 = vperm.slane %v4796_v54, 0 }
 0x3d0   :  { %v1718_v20 = vmul.f32 %v1708_v1, %v1705_v51  ;;  %v1719_v48 = vmul.f32 %v1709_v30, %v1701_v26  ;;  %v6562_v26 = vpop.permute.xlu0 %1556  ;;  %v1715_v51 = vmul.f32 %v1709_v30, %v1699_v7  ;;  %v1663_v45 = vperm.slane %v4796_v54, 1  ;;  %v3663_v7 = vld.sshfl [vmem:[#allocation1 + $0x8] sm:$0xff pattern:$0x75316420]  ;;  %v6576_v54 = vpop.f32.mrf.mxu2 }
 0x3d1   :  { %v1138_v31 = vpop.f32.mrf.mxu3  ;;  %3667 = vst [vmem:[#allocation2 + $0x28] sm:$0xf] %v3663_v7 }
 0x3d2   :  { %1834 = vrot.lane.b32.xlu2 %v6308_v17, %s4979_s28  ;;  %v1139_v39 = vadd.f32 %v1138_v31, %v1098_v6  ;;  %2088 = vmatpush.msra.mxu0 %v1718_v20  ;;  %v1658_v31 = vsel %vm87_vm7, %v6469_v46, %v1641_v40 }
 0x3d3   :  { %2211 = vmatpush.msrb.mxu3 %v1719_v48  ;;  %v1712_v48 = vmul.f32 %v1708_v1, %v1702_v55  ;;  %v1654_v1 = vsel %vm87_vm7, %v1641_v40, %v6469_v46  ;;  %v1653_v46 = vsel %vm87_vm7, %v6446_v3, %v6412_v44  ;;  %v1670_v40 = vmul.f32 %v1662_v38, %v1658_v31 }
 0x3d4   :  { %v6557_v59 = vpop.permute.xlu2 %1550  ;;  %v1161_v15 = vmax.f32 %v1139_v39, 0.0  ;;  %2089 = vmatpush.msra.mxu0 %v1716_v35  ;;  %v1713_v35 = vmul.f32 %v1709_v30, %v1698_v36  ;;  %v1656_v36 = vsel %vm87_vm7, %v6352_v61, %v6389_v14 }
 0x3d5   :  { %2212 = vmatpush.msrb.mxu3 %v1717_v56 }
 0x3d6   :  { %v1651_v6 = vpop.permute.xlu1 %1650  ;;  %2090 = vmatpush.msra.mxu0 %v1714_v63  ;;  %v1178_v20 = vadd.f32 %v1161_v15, %v1160_v2  ;;  %v1671_v15 = vmul.f32 %v1663_v45, %v1654_v1  ;;  %v4795_v63 = vld [vmem:[%s9119_s5 + $0x2] sm:$0x3] }
 0x3d7   :  { %2213 = vmatpush.msrb.mxu3 %v1715_v51  ;;  %v1655_v29 = vsel %vm87_vm7, %v1643_v33, %v1651_v6  ;;  %v1659_v39 = vsel %vm87_vm7, %v1651_v6, %v1643_v33  ;;  %v1657_v33 = vsel %vm87_vm7, %v6412_v44, %v6446_v3  ;;  %v1652_v44 = vsel %vm87_vm7, %v6389_v14, %v6352_v61  ;;  %v6603_v51 = vld [vmem:[#allocation2 + $0x48] sm:$0xff]  ;;  %v3662_v6 = vld.sshfl [vmem:[#allocation1] sm:$0xff pattern:$0x75316420] }
 0x3d8   :  { %1179 = vadd.xlane.f32.xlu0 %v1178_v20  ;;  %2091 = vmatpush.msra.mxu0 %v1712_v48  ;;  %v1672_v56 = vmul.f32 %v1662_v38, %v1659_v39  ;;  %v1673_v55 = vmul.f32 %v1663_v45, %v1655_v29  ;;  %v1668_v3 = vmul.f32 %v1662_v38, %v1657_v33  ;;  %v1605_v48 = vpop.permute.xlu0 %1604  ;;  %v1616_v39 = vperm.slane %v4795_v63, 0 }
 0x3d9   :  { %2214 = vmatpush.msrb.mxu3 %v1713_v35  ;;  %v6584_v30 = vpop.f32.mrf.mxu3  ;;  %v1669_v20 = vmul.f32 %v1663_v45, %v1653_v46  ;;  %3666 = vst [vmem:[#allocation2 + $0x48] sm:$0xf] %v3662_v6  ;;  %v1666_v29 = vmul.f32 %v1662_v38, %v1656_v36  ;;  %v1617_v35 = vperm.slane %v4795_v63, 1  ;;  %v1612_v61 = vsel %vm58_vm0, %v6486_v5, %v6482_v16  ;;  %v6622_v46 = vpop.f32.mrf.mxu2  ;;  %v1568_v63 = vld [vmem:[%s9119_s5] sm:$0x3] }
 0x3da   :  { %1796 = vrot.lane.b32.xlu2 %v6295_v58, %s4978_s27  ;;  %2092 = vmatpush.msra.mxu0 %v1672_v56  ;;  %3668 = vst [vmem:[#allocation1] ss:$2 sm:$0xff] %v5930_v41  ;;  %v1667_v1 = vmul.f32 %v1663_v45, %v1652_v44  ;;  %v1608_v38 = vsel %vm58_vm0, %v6482_v16, %v6486_v5  ;;  %v9291_v44 = vld [vmem:[#allocation25_spill] sm:$0xff] }
 0x3db   :  { %2215 = vmatpush.msrb.mxu3 %v1673_v55  ;;  %v1611_v33 = vsel %vm58_vm0, %v6426_v53, %v6471_v23  ;;  %v1607_v45 = vsel %vm58_vm0, %v6471_v23, %v6426_v53  ;;  %v1624_v5 = vmul.f32 %v1616_v39, %v1612_v61  ;;  %v1610_v16 = vsel %vm58_vm0, %v6418_v49, %v6404_v43 }
 0x3dc   :  { %v6594_v2 = vpop.permute.xlu2 %1840  ;;  %2093 = vmatpush.msra.mxu0 %v1670_v40  ;;  %v1606_v23 = vsel %vm58_vm0, %v6404_v43, %v6418_v49  ;;  %v1622_v53 = vmul.f32 %v1616_v39, %v1611_v33  ;;  %v1623_v6 = vmul.f32 %v1617_v35, %v1607_v45  ;;  %v1620_v61 = vmul.f32 %v1616_v39, %v1610_v16  ;;  %v6654_v43 = vld [vmem:[%s9119_s5 + $0x10] sm:$0x3]  ;;  %v9292_v33 = vld [vmem:[#allocation28_spill] sm:$0xff] }
 0x3dd   :  { %2216 = vmatpush.msrb.mxu3 %v1671_v15  ;;  %v1625_v15 = vmul.f32 %v1617_v35, %v1608_v38  ;;  %v1562_v38 = vsel %vm36_vm5, %v6500_v10, %v6562_v26  ;;  %v946_v45 = vadd.f32 %v6448_v18, %v9292_v33  ;;  %v1900_v16 = vperm.slane %v6654_v43, 0 }
 0x3de   :  { %v1597_v31 = vpop.permute.xlu1 %1596  ;;  %2094 = vmatpush.msra.mxu0 %v1668_v3  ;;  %v1051_v3 = vadd.f32 %v6054_v28, %v9291_v44  ;;  %v1566_v28 = vsel %vm36_vm5, %v6562_v26, %v6500_v10  ;;  %v1560_v10 = vsel %vm36_vm5, %v6366_v19, %v6420_v60  ;;  %v1561_v18 = vsel %vm36_vm5, %v6484_v8, %v6442_v34 }
 0x3df   :  { %v1609_v14 = vsel %vm58_vm0, %v1597_v31, %v1605_v48  ;;  %v1613_v7 = vsel %vm58_vm0, %v1605_v48, %v1597_v31  ;;  %2217 = vmatpush.msrb.mxu3 %v1669_v20  ;;  %v928_v31 = vadd.f32 %v6338_v9, %v9291_v44  ;;  %v1564_v26 = vsel %vm36_vm5, %v6420_v60, %v6366_v19 }
 0x3e0   :  { %2095 = vmatpush.msra.mxu0 %v1666_v29  ;;  %v1626_v56 = vmul.f32 %v1616_v39, %v1613_v7  ;;  %v1627_v55 = vmul.f32 %v1617_v35, %v1609_v14  ;;  %v1570_v14 = vperm.slane %v1568_v63, 0  ;;  %v1571_v7 = vperm.slane %v1568_v63, 1 }
 0x3e1   :  { %2218 = vmatpush.msrb.mxu3 %v1667_v1  ;;  %v6624_v40 = vpop.f32.mrf.mxu3  ;;  %v6645_v20 = vld.sshfl [vmem:[#allocation1] sm:$0xff pattern:$0x75316420]  ;;  %v6647_v48 = vld.sshfl [vmem:[#allocation1 + $0x8] sm:$0xff pattern:$0x75316420]  ;;  %v1621_v39 = vmul.f32 %v1617_v35, %v1606_v23  ;;  %v1565_v1 = vsel %vm36_vm5, %v6442_v34, %v6484_v8  ;;  %v987_v63 = vadd.f32 %v6440_v32, %v946_v45  ;;  %v1892_v34 = vsel %vm227_vm6, %v6498_v57, %v6511_v4 }
 0x3e2   :  { %2096 = vmatpush.msra.mxu0 %v1626_v56  ;;  %3695 = vst [vmem:[#allocation1] ss:$2 sm:$0xff] %v5930_v41  ;;  %v1576_v44 = vmul.f32 %v1570_v14, %v1565_v1  ;;  %v1063_v60 = vadd.f32 %v6115_v0, %v6104_v13 }
 0x3e3   :  { %2219 = vmatpush.msrb.mxu3 %v1627_v55  ;;  %v1028_v0 = vadd.f32 %v6112_v25, %v987_v63  ;;  %v9293_v25 = vld [vmem:[#allocation16_spill] sm:$0xff] }
 0x3e4   :  { %v6634_v36 = vpop.permute.xlu2 %1828  ;;  %2097 = vmatpush.msra.mxu0 %v1624_v5  ;;  %v6678_v5 = vpop.permute.xlu0 %1880  ;;  %v9298_v63 = vld [vmem:[#allocation24_spill] sm:$0xff] }
 0x3e5   :  { %2220 = vmatpush.msrb.mxu3 %v1625_v15  ;;  %v1092_v15 = vadd.f32 %v6473_v62, %v1051_v3  ;;  %v1109_v62 = vpop.f32.mrf.mxu2  ;;  %v1069_v3 = vadd.f32 %v6477_v37, %v9292_v33  ;;  %v9295_v33 = vld [vmem:[#allocation8_spill] sm:$0xff] }
 0x3e6   :  { %v1559_v29 = vpop.permute.xlu1 %1558  ;;  %2098 = vmatpush.msra.mxu0 %v1622_v53  ;;  %v1579_v53 = vmul.f32 %v1571_v7, %v1562_v38 }
 0x3e7   :  { %v1563_v9 = vsel %vm36_vm5, %v6557_v59, %v1559_v29  ;;  %v1567_v49 = vsel %vm36_vm5, %v1559_v29, %v6557_v59  ;;  %2221 = vmatpush.msrb.mxu3 %v1623_v6  ;;  %v969_v59 = vadd.f32 %v6348_v52, %v928_v31  ;;  %v1578_v52 = vmul.f32 %v1570_v14, %v1566_v28 }
 0x3e8   :  { %2099 = vmatpush.msra.mxu0 %v1620_v61  ;;  %v1580_v56 = vmul.f32 %v1570_v14, %v1567_v49  ;;  %v1581_v55 = vmul.f32 %v1571_v7, %v1563_v9  ;;  %v1133_v8 = vadd.f32 %v6507_v27, %v1092_v15  ;;  %v1577_v6 = vmul.f32 %v1571_v7, %v1561_v18 }
 0x3e9   :  { %2222 = vmatpush.msrb.mxu3 %v1621_v39  ;;  %v6680_v35 = vpop.f32.mrf.mxu3  ;;  %v6712_v37 = vld.sshfl [vmem:[#allocation1] sm:$0xff pattern:$0x75316420]  ;;  %v6714_v27 = vld.sshfl [vmem:[#allocation1 + $0x8] sm:$0xff pattern:$0x75316420]  ;;  %v1010_v31 = vadd.f32 %v5998_v12, %v969_v59  ;;  %v1891_v29 = vsel %vm227_vm6, %v6458_v42, %v6505_v21  ;;  %v1574_v28 = vmul.f32 %v1570_v14, %v1564_v26  ;;  %v1908_v9 = vmul.f32 %v1900_v16, %v1892_v34 }
 0x3ea   :  { %2100 = vmatpush.msra.mxu0 %v1580_v56  ;;  %3716 = vst [vmem:[#allocation1] ss:$2 sm:$0xff] %v5930_v41  ;;  %v1575_v49 = vmul.f32 %v1571_v7, %v1560_v10  ;;  %v1920_v12 = vld [vmem:[%s9123_s3] sm:$0xff]  ;;  %v940_v39 = vadd.f32 %v6410_v11, %v6104_v13  ;;  %v1890_v14 = vsel %vm227_vm6, %v6436_v22, %v6385_v47  ;;  %v1157_v38 = vmax.f32 %v1133_v8, 0.0  ;;  %v9294_v56 = vld [vmem:[#allocation18_spill] sm:$0xff]  ;;  %v9297_v13 = vld [vmem:[#allocation36_spill] sm:$0xff] }
 0x3eb   :  { %2223 = vmatpush.msrb.mxu3 %v1581_v55  ;;  %v1110_v1 = vadd.f32 %v1109_v62, %v1069_v3  ;;  %v1054_v55 = vadd.f32 %v9294_v56, %v9293_v25  ;;  %v9296_v7 = vld [vmem:[#allocation41_spill] sm:$0xff]  ;;  %v1906_v15 = vmul.f32 %v1900_v16, %v1891_v29  ;;  %v1156_v10 = vmax.f32 %v1010_v31, 0.0  ;;  %v2604_v29 = vld [vmem:[#allocation2 + $0x20] sm:$0xff]  ;;  %v9304_v56 = vld [vmem:[#allocation7_spill] sm:$0xff] }
 0x3ec   :  { %v6697_v23 = vpop.permute.xlu2 %1888  ;;  %2101 = vmatpush.msra.mxu0 %v1578_v52  ;;  %v949_v45 = vadd.f32 %v9296_v7, %v9295_v33  ;;  %v981_v11 = vadd.f32 %v9297_v13, %v940_v39  ;;  %v1104_v18 = vadd.f32 %v6576_v54, %v1063_v60  ;;  %v2606_v26 = vld [vmem:[#allocation2 + $0x38] sm:$0xf]  ;;  %v931_v62 = vadd.f32 %v9298_v63, %v9293_v25  ;;  %v6743_v8 = vpop.permute.xlu0 %1832  ;;  %v6751_v54 = vld [vmem:[%s9123_s3 + $0x10] sm:$0xff]  ;;  %v9303_v39 = vld [vmem:[#allocation20_spill] sm:$0xff] }
 0x3ed   :  { %v1893_v19 = vsel %vm227_vm6, %v6678_v5, %v6697_v23  ;;  %2224 = vmatpush.msrb.mxu3 %v1579_v53  ;;  %v1168_v53 = vmax.f32 %v1028_v0, 0.0  ;;  %v9300_v60 = vld [vmem:[#allocation43_spill] sm:$0xff]  ;;  %v9301_v0 = vld [vmem:[#allocation14_spill] sm:$0xff]  ;;  %v9305_v7 = vld [vmem:[#allocation45_spill] sm:$0xff] }
 0x3ee   :  { %v1910_v32 = vmul.f32 %v1900_v16, %v1893_v19  ;;  %v6721_v61 = vpop.permute.xlu1 %1830  ;;  %2102 = vmatpush.msra.mxu0 %v1576_v44  ;;  %v9299_v44 = vld [vmem:[#allocation39_spill] sm:$0xff]  ;;  %v1904_v19 = vmul.f32 %v1900_v16, %v1890_v14  ;;  %v1022_v14 = vadd.f32 %v9303_v39, %v981_v11  ;;  %v9306_v11 = vld [vmem:[#allocation12_spill] sm:$0xff]  ;;  %v9307_v63 = vld [vmem:[#allocation26_spill] sm:$0xff] }
 0x3ef   :  { %2225 = vmatpush.msrb.mxu3 %v1577_v6  ;;  %v990_v3 = vadd.f32 %v9299_v44, %v949_v45  ;;  %v1145_v6 = vadd.f32 %v6624_v40, %v1104_v18  ;;  %v9309_v44 = vld [vmem:[#allocation35_spill] sm:$0xff]  ;;  %v2597_v39 = vld [vmem:[#allocation2 + $0x30] sm:$0xff] }
 0x3f0   :  { %2182 = vmatpush.msrb.mxu2 %v1910_v32  ;;  %2103 = vmatpush.msra.mxu0 %v1574_v28  ;;  %v1072_v32 = vadd.f32 %v9300_v60, %v9295_v33  ;;  %v1172_v28 = vadd.f32 %v1157_v38, %v1156_v10  ;;  %v1923_v38 = vld [vmem:[%s9123_s3 + $0x18] sm:$0xff]  ;;  %v6781_v60 = vld [vmem:[%s9123_s3 + $0x28] sm:$0xff] }
 0x3f1   :  { %2226 = vmatpush.msrb.mxu3 %v1575_v49  ;;  %v1150_v59 = vpop.f32.mrf.mxu3  ;;  %2104 = vmatmul.f32.vlgmr.msra.gmra.mxu0 %v1920_v12  ;;  %v1112_v49 = vpop.f32.mrf.mxu2  ;;  %v2600_v10 = vld [vmem:[#allocation2 + $0x10] sm:$0xff] }
 0x3f2   :  { %2183 = vmatpush.msrb.mxu2 %v1908_v9  ;;  %v1151_v52 = vadd.f32 %v1150_v59, %v1110_v1  ;;  %2227 = vmatmul.f32.vlgmr.msrb.gmra.mxu3 %v1920_v12  ;;  %v972_v9 = vadd.f32 %v9301_v0, %v931_v62  ;;  %v9302_v12 = vld [vmem:[#allocation44_spill] sm:$0xff]  ;;  %v2605_v1 = vld [vmem:[#allocation2 + $0x40] sm:$0xf]  ;;  %v1113_v33 = vadd.f32 %v1112_v49, %v1072_v32  ;;  %v1165_v59 = vmax.f32 %v1145_v6, 0.0  ;;  %v9308_v62 = vld [vmem:[#allocation9_spill] sm:$0xff] }
 0x3f3   :  { %4839 = vmatpush.msk.msra.mxu3 %vm292_vm8, %v2606_v26  ;;  %v1095_v16 = vadd.f32 %v9302_v12, %v1054_v55  ;;  %v1031_v55 = vadd.f32 %v9304_v56, %v990_v3  ;;  %v2598_v26 = vld [vmem:[#allocation2] sm:$0xff]  ;;  %v937_v3 = vadd.f32 %v9309_v44, %v9307_v63  ;;  %v9310_v49 = vld [vmem:[#allocation11_spill] sm:$0xff] }
 0x3f4   :  { %2184 = vmatpush.msrb.mxu2 %v1906_v15  ;;  %v6746_v34 = vpop.permute.xlu2 %1784  ;;  %v1169_v31 = vmax.f32 %v1151_v52, 0.0  ;;  %v2603_v15 = vld [vmem:[#allocation2 + $0x8] sm:$0xff]  ;;  %v1013_v18 = vadd.f32 %v9306_v11, %v972_v9  ;;  %v1164_v52 = vmax.f32 %v1022_v14, 0.0  ;;  %v6783_v0 = vpop.permute.xlu0 %1838 }
 0x3f5   :  { %2690 = vmatpush.msra.mxu3 %v2604_v29  ;;  %v1136_v45 = vadd.f32 %v9305_v7, %v1095_v16  ;;  %v1170_v32 = vmax.f32 %v1031_v55, 0.0  ;;  %v2599_v29 = vld [vmem:[#allocation2 + $0x18] sm:$0xff]  ;;  %v978_v12 = vadd.f32 %v9310_v49, %v937_v3 }
 0x3f6   :  { %2185 = vmatpush.msrb.mxu2 %v1904_v19  ;;  %v6761_v25 = vpop.permute.xlu1 %1836  ;;  %1173 = vadd.xlane.f32.xlu1 %v1172_v28  ;;  %v1190_v40 = vadd.f32 %v1169_v31, %v1168_v53  ;;  %v1060_v53 = vadd.f32 %v9308_v62, %v9307_v63  ;;  %v1184_v28 = vadd.f32 %v1165_v59, %v1164_v52  ;;  %v1158_v9 = vmax.f32 %v1013_v18, 0.0  ;;  %v9312_v55 = vld [vmem:[#allocation21_spill] sm:$0xff] }
 0x3f7   :  { %4802 = vmatmul.msk.f32.vlgmr.msrb.gmra.mxu2 %vm885_vm10, %v6751_v54  ;;  %2691 = vmatpush.msra.mxu3 %v6571_v50  ;;  %v1159_v6 = vmax.f32 %v1136_v45, 0.0  ;;  %v9313_v7 = vld [vmem:[#allocation29_spill] sm:$0xff]  ;;  %v9314_v45 = vld [vmem:[#allocation42_spill] sm:$0xff] }
 0x3f8   :  { %4834 = vmatpush.msk.msra.mxu2 %vm292_vm8, %v2605_v1  ;;  %1191 = vadd.xlane.f32.xlu0 %v1190_v40  ;;  %v1926_v40 = vld [vmem:[%s9123_s3 + $0x30] sm:$0xff]  ;;  %v1066_v59 = vadd.f32 %v9314_v45, %v9313_v7  ;;  %v9316_v52 = vld [vmem:[#allocation37_spill] sm:$0xff] }
 0x3f9   :  { %2692 = vmatpush.msra.mxu3 %v2600_v10  ;;  %v1153_v13 = vpop.f32.mrf.mxu3  ;;  %2107 = vmatmul.f32.gmra.mxu0 %v1923_v38  ;;  %v1175_v56 = vadd.f32 %v1159_v6, %v1158_v9  ;;  %v6803_v10 = vld [vmem:[%s9123_s3 + $0x40] sm:$0xff] }
 0x3fa   :  { %2661 = vmatpush.msra.mxu2 %v2603_v15  ;;  %v1154_v50 = vadd.f32 %v1153_v13, %v1113_v33  ;;  %2230 = vmatmul.f32.gmra.mxu3 %v1923_v38  ;;  %v1019_v33 = vadd.f32 %v9312_v55, %v978_v12  ;;  %v9315_v13 = vld [vmem:[#allocation38_spill] sm:$0xff] }
 0x3fb   :  { %2693 = vmatpush.msra.mxu3 %v2598_v26  ;;  %v1107_v26 = vadd.f32 %v6622_v46, %v1066_v59 }
 0x3fc   :  { %2662 = vmatpush.msra.mxu2 %v6603_v51  ;;  %v6776_v19 = vpop.permute.xlu2 %1790  ;;  %v1171_v31 = vmax.f32 %v1154_v50, 0.0  ;;  %v9311_v51 = vld [vmem:[#allocation27_spill] sm:$0xff]  ;;  %v1162_v18 = vmax.f32 %v1019_v33, 0.0  ;;  %v6813_v62 = vpop.permute.xlu0 %1794 }
 0x3fd   :  { %v1101_v16 = vadd.f32 %v9311_v51, %v1060_v53  ;;  %v1929_v53 = vld [vmem:[%s9123_s3 + $0x48] sm:$0xff]  ;;  %v1148_v44 = vadd.f32 %v6680_v35, %v1107_v26  ;;  %v1932_v35 = vld [vmem:[%s9123_s3 + $0x60] sm:$0xff]  ;;  %v1938_v33 = vld [vmem:[%s9123_s3 + $0x90] sm:$0xff] }
 0x3fe   :  { %2663 = vmatpush.msra.mxu2 %v2599_v29  ;;  %v6789_v14 = vpop.permute.xlu1 %1786  ;;  %1185 = vadd.xlane.f32.xlu1 %v1184_v28  ;;  %v1193_v1 = vadd.f32 %v1171_v31, %v1170_v32  ;;  %v9317_v32 = vld [vmem:[#allocation10_spill] sm:$0xff]  ;;  %v6825_v31 = vld [vmem:[%s9123_s3 + $0x58] sm:$0xff]  ;;  %v2593_v26 = vld [vmem:[%s9121_s1] sm:$0xff] }
 0x3ff   :  { %4803 = vmatmul.msk.f32.gmra.mxu2 %vm885_vm10, %v6781_v60  ;;  %v1142_v38 = vadd.f32 %v6584_v30, %v1101_v16  ;;  %v943_v30 = vadd.f32 %v9315_v13, %v9313_v7  ;;  %v1167_v29 = vmax.f32 %v1148_v44, 0.0  ;;  %v6841_v16 = vld [vmem:[%s9123_s3 + $0x70] sm:$0xff]  ;;  %v6869_v7 = vld [vmem:[%s9123_s3 + $0xa0] sm:$0xff]  ;;  %v4800_v44 = vld [vmem:[%s9119_s5 + $0xe] sm:$0x3] }
 0x400   :  { %2664 = vmatpush.msra.mxu2 %v2597_v39  ;;  %1194 = vadd.xlane.f32.xlu0 %v1193_v1  ;;  %v1935_v1 = vld [vmem:[%s9123_s3 + $0x78] sm:$0xff] }
 0x401   :  { %2110 = vmatmul.f32.gmra.mxu0 %v1926_v40  ;;  %v1163_v11 = vmax.f32 %v1142_v38, 0.0  ;;  %v984_v50 = vadd.f32 %v9316_v52, %v943_v30  ;;  %v6855_v38 = vld [vmem:[%s9123_s3 + $0x88] sm:$0xff] }
 0x402   :  { %2233 = vmatmul.f32.gmra.mxu3 %v1926_v40  ;;  %v1941_v30 = vld [vmem:[%s9123_s3 + $0xa8] sm:$0xff] }
 0x403   :  { %1176 = vadd.xlane.f32.xlu2 %v1175_v56  ;;  %v1181_v3 = vadd.f32 %v1163_v11, %v1162_v18  ;;  %v1025_v6 = vadd.f32 %v9317_v32, %v984_v50  ;;  %v6885_v11 = vld [vmem:[%s9123_s3 + $0xb8] sm:$0xff]  ;;  %v1854_v32 = vperm.slane %v4800_v44, 0 }
 0x404   :  { %v6798_v15 = vpop.permute.xlu2 %1740  ;;  %v6834_v12 = vpop.permute.xlu0 %1782 }
 0x405   :  { %v1166_v28 = vmax.f32 %v1025_v6, 0.0  ;;  %v1855_v6 = vperm.slane %v4800_v44, 1 }
 0x406   :  { %v6811_v63 = vpop.permute.xlu1 %1792 }
 0x407   :  { %4804 = vmatmul.msk.f32.gmra.mxu2 %vm885_vm10, %v6803_v10  ;;  %v1187_v49 = vadd.f32 %v1167_v29, %v1166_v28  ;;  %v1846_v28 = vsel %vm198_vm4, %v6743_v8, %v6594_v2 }
 0x409   :  { %2113 = vmatmul.f32.gmra.mxu0 %v1929_v53 }
 0x40a   :  { %2236 = vmatmul.f32.gmra.mxu3 %v1929_v53  ;;  %v4983_v53 = vmov 256.0  }
 0x40b   :  { %1182 = vadd.xlane.f32.xlu2 %v1181_v3  ;;  %4969 = vrcp.f32 %v4983_v53  ;;  %v1845_v53 = vsel %vm198_vm4, %v6721_v61, %v6783_v0 }
 0x40c   :  { %v6820_v46 = vpop.permute.xlu2 %1746  ;;  %v6850_v40 = vpop.permute.xlu0 %1738 }
 0x40e   :  { %v6829_v9 = vpop.permute.xlu1 %1748 }
 0x40f   :  { %4805 = vmatmul.msk.f32.gmra.mxu2 %vm885_vm10, %v6825_v31 }
 0x411   :  { %2116 = vmatmul.f32.gmra.mxu0 %v1932_v35  ;;  %v6900_v3 = vpop.eup %4969 }
 0x412   :  { %2239 = vmatmul.f32.gmra.mxu3 %v1932_v35  ;;  %v1850_v35 = vsel %vm198_vm4, %v6594_v2, %v6743_v8  ;;  %v1197_v2 = vmul.f32 256.0, %v6900_v3  ;;  %v1849_v8 = vsel %vm198_vm4, %v6783_v0, %v6721_v61  ;;  %v1848_v61 = vsel %vm198_vm4, %v6761_v25, %v6634_v36 }
 0x413   :  { %1188 = vadd.xlane.f32.xlu2 %v1187_v49  ;;  %v1860_v0 = vmul.f32 %v1854_v32, %v1845_v53  ;;  %vm1201_vm11 = vweird.f32 %v6900_v3 }
 0x414   :  { %v6836_v51 = vpop.permute.xlu2 %2031  ;;  %v6871_v45 = vpop.permute.xlu0 %2026 }
 0x415   :  { %9318 = vst [vmem:[#allocation25_spill] sm:$0xff] %v6836_v51 }
 0x416   :  { %v6845_v39 = vpop.permute.xlu1 %1744 }
 0x417   :  { %4806 = vmatmul.msk.f32.gmra.mxu2 %vm885_vm10, %v6841_v16 }
 0x419   :  { %2119 = vmatmul.f32.gmra.mxu0 %v1935_v1 }
 0x41a   :  { %2242 = vmatmul.f32.gmra.mxu3 %v1935_v1 }
 0x41c   :  { %v6857_v56 = vpop.permute.xlu2 %2618  ;;  %v6891_v52 = vpop.permute.xlu0 %2623 }
 0x41e   :  { %v6861_v55 = vpop.permute.xlu1 %2628 }
 0x41f   :  { %4807 = vmatmul.msk.f32.gmra.mxu2 %vm885_vm10, %v6855_v38 }
 0x421   :  { %2122 = vmatmul.f32.gmra.mxu0 %v1938_v33 }
 0x422   :  { %2245 = vmatmul.f32.gmra.mxu3 %v1938_v33 }
 0x424   :  { %v6873_v59 = vpop.permute.xlu2 %2041  ;;  %v1789_v44 = vpop.permute.xlu0 %1788 }
 0x425   :  { %9319 = vst [vmem:[#allocation28_spill] sm:$0xff] %v6873_v59  ;;  %v4799_v59 = vld [vmem:[%s9119_s5 + $0xc] sm:$0x3] }
 0x426   :  { %v6877_v13 = vpop.permute.xlu1 %2613  ;;  %v1808_v51 = vperm.slane %v4799_v59, 0  ;;  %v1809_v53 = vperm.slane %v4799_v59, 1 }
 0x427   :  { %4808 = vmatmul.msk.f32.gmra.mxu2 %vm885_vm10, %v6869_v7 }
 0x429   :  { %2125 = vmatmul.f32.gmra.mxu0 %v1941_v30 }
 0x42a   :  { %2248 = vmatmul.f32.gmra.mxu3 %v1941_v30 }
 0x42c   :  { %v1835_v50 = vpop.permute.xlu2 %1834 }
 0x42e   :  { %v6889_v18 = vpop.permute.xlu1 %2046 }
 0x42f   :  { %4809 = vmatmul.msk.f32.gmra.mxu2 %vm885_vm10, %v6885_v11  ;;  %9320 = vst [vmem:[#allocation16_spill] sm:$0xff] %v6889_v18 }
 0x432   :  { %4840 = vmatmul.msk.f32.vlgmr.msra.gmra.mxu3 %vm279_vm9, %v2593_v26 }
 0x436   :  { %v1843_v29 = vpop.permute.xlu1 %1842 }
 0x437   :  { %4835 = vmatmul.msk.f32.vlgmr.msra.gmra.mxu2 %vm279_vm9, %v2593_v26  ;;  %v1847_v49 = vsel %vm198_vm4, %v1835_v50, %v1843_v29  ;;  %v1851_v1 = vsel %vm198_vm4, %v1843_v29, %v1835_v50  ;;  %v2594_v26 = vld [vmem:[%s9121_s1 + $0x8] sm:$0xff]  ;;  %v1797_v50 = vpop.permute.xlu2 %1796  ;;  %v1862_v29 = vmul.f32 %v1854_v32, %v1846_v28 }
 0x438   :  { %v1864_v33 = vmul.f32 %v1854_v32, %v1847_v49  ;;  %v1865_v30 = vmul.f32 %v1855_v6, %v1851_v1  ;;  %v1863_v49 = vmul.f32 %v1855_v6, %v1850_v35  ;;  %v1844_v1 = vsel %vm198_vm4, %v6634_v36, %v6761_v25 }
 0x439   :  { %v1801_v28 = vsel %vm175_vm3, %v1789_v44, %v1797_v50  ;;  %v1861_v35 = vmul.f32 %v1855_v6, %v1849_v8  ;;  %v1858_v18 = vmul.f32 %v1854_v32, %v1844_v1  ;;  %v1800_v36 = vsel %vm175_vm3, %v6789_v14, %v6813_v62 }
 0x43a   :  { %2129 = vmatpush.msrb.mxu1 %v1864_v33  ;;  %2252 = vmatpush.msrb.mxu0 %v1865_v30  ;;  %v1198_v33 = vsub.f32 1.0, %v1197_v2  ;;  %v1805_v30 = vsel %vm175_vm3, %v1797_v50, %v1789_v44  ;;  %v1859_v25 = vmul.f32 %v1855_v6, %v1848_v61  ;;  %v1804_v2 = vsel %vm175_vm3, %v6813_v62, %v6789_v14  ;;  %v1751_v50 = vpop.permute.xlu0 %1750 }
 0x43b   :  { %4841 = vmatmul.msk.f32.gmra.mxu3 %vm279_vm9, %v2594_v26  ;;  %v1818_v32 = vmul.f32 %v1808_v51, %v1801_v28  ;;  %v1799_v44 = vsel %vm175_vm3, %v6746_v34, %v6811_v63  ;;  %v1819_v8 = vmul.f32 %v1809_v53, %v1805_v30  ;;  %v1803_v14 = vsel %vm175_vm3, %v6811_v63, %v6746_v34 }
 0x43c   :  { %2130 = vmatpush.msrb.mxu1 %v1862_v29  ;;  %2253 = vmatpush.msrb.mxu0 %v1863_v49  ;;  %v1199_v59 = vmul.f32 %v6900_v3, %v1198_v33  ;;  %v1798_v6 = vsel %vm175_vm3, %v6834_v12, %v6776_v19  ;;  %v1817_v29 = vmul.f32 %v1809_v53, %v1804_v2  ;;  %v4798_v49 = vld [vmem:[%s9119_s5 + $0xa] sm:$0x3] }
 0x43d   :  { %v1802_v34 = vsel %vm175_vm3, %v6776_v19, %v6834_v12  ;;  %v1814_v63 = vmul.f32 %v1808_v51, %v1799_v44  ;;  %v1815_v61 = vmul.f32 %v1809_v53, %v1803_v14  ;;  %v1762_v33 = vperm.slane %v4798_v49, 0 }
 0x43e   :  { %2131 = vmatpush.msrb.mxu1 %v1860_v0  ;;  %2254 = vmatpush.msrb.mxu0 %v1861_v35  ;;  %v1743_v62 = vpop.permute.xlu1 %1742  ;;  %v1200_v0 = vadd.f32 %v6900_v3, %v1199_v59  ;;  %v1812_v35 = vmul.f32 %v1808_v51, %v1798_v6  ;;  %v1754_v19 = vsel %vm146_vm2, %v6798_v15, %v6829_v9  ;;  %v1763_v30 = vperm.slane %v4798_v49, 1  ;;  %v9325_v49 = vld [vmem:[#allocation4_spill] sm:$0xff] }
 0x43f   :  { %4836 = vmatmul.msk.f32.gmra.mxu2 %vm279_vm9, %v2594_v26  ;;  %v2595_v26 = vld [vmem:[%s9121_s1 + $0x10] sm:$0xff]  ;;  %v1755_v1 = vsel %vm146_vm2, %v1743_v62, %v1751_v50  ;;  %v1759_v28 = vsel %vm146_vm2, %v1751_v50, %v1743_v62  ;;  %v1813_v12 = vmul.f32 %v1809_v53, %v1802_v34  ;;  %v1753_v2 = vsel %vm146_vm2, %v6850_v40, %v6820_v46  ;;  %v9324_v50 = vld [vmem:[#allocation13_spill] sm:$0xff]  ;;  %v1921_v34 = vld [vmem:[%s9123_s3 + $0x8] sm:$0xff] }
 0x440   :  { %2132 = vmatpush.msrb.mxu1 %v1858_v18  ;;  %2255 = vmatpush.msrb.mxu0 %v1859_v25  ;;  %v1816_v18 = vmul.f32 %v1808_v51, %v1800_v36  ;;  %v1758_v36 = vsel %vm146_vm2, %v6829_v9, %v6798_v15  ;;  %v2596_v51 = vld [vmem:[%s9121_s1 + $0x18] sm:$0xff]  ;;  %v1772_v25 = vmul.f32 %v1762_v33, %v1755_v1  ;;  %v9327_v1 = vld [vmem:[#allocation5_spill] sm:$0xff] }
 0x441   :  { %v6999_v53 = vsel %vm1201_vm11, %v6900_v3, %v1200_v0  ;;  %v1757_v15 = vsel %vm146_vm2, %v6820_v46, %v6850_v40  ;;  %v1770_v9 = vmul.f32 %v1762_v33, %v1754_v19  ;;  %v1771_v59 = vmul.f32 %v1763_v30, %v1758_v36  ;;  %v1924_v0 = vld [vmem:[%s9123_s3 + $0x20] sm:$0xff] }
 0x442   :  { %2133 = vmatpush.msrb.mxu1 %v1818_v32  ;;  %2256 = vmatpush.msrb.mxu0 %v1819_v8  ;;  %9321 = vst [vmem:[#allocation18_spill] sm:$0xff] %v6999_v53  ;;  %v9322_v32 = vld [vmem:[#allocation40_spill] sm:$0xff]  ;;  %v1768_v40 = vmul.f32 %v1762_v33, %v1753_v2  ;;  %v1769_v14 = vmul.f32 %v1763_v30, %v1757_v15 }
 0x443   :  { %4842 = vmatmul.msk.f32.gmra.mxu3 %vm279_vm9, %v2595_v26  ;;  %v1752_v44 = vsel %vm146_vm2, %v9322_v32, %v6845_v39  ;;  %v1756_v3 = vsel %vm146_vm2, %v6845_v39, %v9322_v32  ;;  %v9323_v39 = vld [vmem:[#allocation23_spill] sm:$0xff]  ;;  %v1897_v6 = vsel %vm227_vm6, %v6697_v23, %v6678_v5  ;;  %v9328_v5 = vld [vmem:[#allocation6_spill] sm:$0xff] }
 0x444   :  { %2134 = vmatpush.msrb.mxu1 %v1816_v18  ;;  %2257 = vmatpush.msrb.mxu0 %v1817_v29  ;;  %v1766_v62 = vmul.f32 %v1762_v33, %v1752_v44  ;;  %v1767_v18 = vmul.f32 %v1763_v30, %v1756_v3  ;;  %v1901_v29 = vperm.slane %v6654_v43, 1  ;;  %v1895_v43 = vsel %vm227_vm6, %v6505_v21, %v6458_v42  ;;  %v1927_v21 = vld [vmem:[%s9123_s3 + $0x38] sm:$0xff] }
 0x446   :  { %2135 = vmatpush.msrb.mxu1 %v1814_v63  ;;  %2258 = vmatpush.msrb.mxu0 %v1815_v61  ;;  %v1911_v63 = vmul.f32 %v1901_v29, %v1897_v6 }
 0x447   :  { %4837 = vmatmul.msk.f32.gmra.mxu2 %vm279_vm9, %v2595_v26  ;;  %v1773_v26 = vmul.f32 %v1763_v30, %v1759_v28 }
 0x448   :  { %2136 = vmatpush.msrb.mxu1 %v1812_v35  ;;  %2259 = vmatpush.msrb.mxu0 %v1813_v12  ;;  %v1930_v35 = vld [vmem:[%s9123_s3 + $0x50] sm:$0xff] }
 0x44a   :  { %2137 = vmatpush.msrb.mxu1 %v1772_v25  ;;  %2260 = vmatpush.msrb.mxu0 %v1773_v26  ;;  %v1933_v25 = vld [vmem:[%s9123_s3 + $0x68] sm:$0xff] }
 0x44b   :  { %4843 = vmatmul.msk.f32.gmra.mxu3 %vm279_vm9, %v2596_v51  ;;  %v1180_v8 = vpop.xlane.xlu0 %1179 }
 0x44c   :  { %v1205_v46 = vmul.f32 %v6999_v53, %v1180_v8  ;;  %2138 = vmatpush.msrb.mxu1 %v1770_v9  ;;  %2261 = vmatpush.msrb.mxu0 %v1771_v59  ;;  %v1936_v9 = vld [vmem:[%s9123_s3 + $0x80] sm:$0xff]  ;;  %v1939_v59 = vld [vmem:[%s9123_s3 + $0x98] sm:$0xff] }
 0x44e   :  { %1214 = vst.msk [vmem:[%s9124_s6 + $0x10] sm:$0xff] %vm1211_vm12, %v1205_v46  ;;  %2139 = vmatpush.msrb.mxu1 %v1768_v40  ;;  %2262 = vmatpush.msrb.mxu0 %v1769_v14  ;;  %v1942_v46 = vld [vmem:[%s9123_s3 + $0xb0] sm:$0xff] }
 0x44f   :  { %4838 = vmatmul.msk.f32.gmra.mxu2 %vm279_vm9, %v2596_v51 }
 0x450   :  { %2140 = vmatpush.msrb.mxu1 %v1766_v62  ;;  %2263 = vmatpush.msrb.mxu0 %v1767_v18 }
 0x452   :  { %2141 = vmatpush.msrb.mxu1 %v6308_v17  ;;  %2264 = vmatpush.msrb.mxu0 %v6295_v58  ;;  %v1896_v58 = vsel %vm227_vm6, %v6511_v4, %v6498_v57  ;;  %v9326_v17 = vld [vmem:[#allocation22_spill] sm:$0xff]  ;;  %v1894_v57 = vsel %vm227_vm6, %v6385_v47, %v6436_v22  ;;  %v1907_v4 = vmul.f32 %v1901_v29, %v1895_v43 }
 0x453   :  { %v1909_v23 = vmul.f32 %v1901_v29, %v1896_v58  ;;  %v1905_v61 = vmul.f32 %v1901_v29, %v1894_v57 }
 0x454   :  { %2142 = vmatpush.msrb.mxu1 %v9323_v39  ;;  %2265 = vmatpush.msrb.mxu0 %v9324_v50 }
 0x456   :  { %2143 = vmatpush.msrb.mxu1 %v9325_v49  ;;  %2266 = vmatpush.msrb.mxu0 %v9326_v17 }
 0x458   :  { %2144 = vmatpush.msrb.mxu1 %v9327_v1  ;;  %2267 = vmatpush.msrb.mxu0 %v9328_v5 }
 0x459   :  { %2145 = vmatmul.f32.vlgmr.msrb.gmra.mxu1 %v1921_v34  ;;  %2268 = vmatmul.f32.vlgmr.msrb.gmra.mxu0 %v1921_v34 }
 0x45a   :  { %2305 = vmatpush.msra.mxu1 %v1911_v63 }
 0x45c   :  { %2306 = vmatpush.msra.mxu1 %v1909_v23 }
 0x45e   :  { %2307 = vmatpush.msra.mxu1 %v1907_v4 }
 0x460   :  { %2308 = vmatpush.msra.mxu1 %v1905_v61 }
 0x461   :  { %2148 = vmatmul.f32.gmra.mxu1 %v1924_v0  ;;  %2271 = vmatmul.f32.gmra.mxu0 %v1924_v0 }
 0x469   :  { %v1174_v42 = vpop.xlane.xlu1 %1173  ;;  %2151 = vmatmul.f32.gmra.mxu1 %v1927_v21  ;;  %2274 = vmatmul.f32.gmra.mxu0 %v1927_v21 }
 0x46a   :  { %v1203_v28 = vmul.f32 %v6999_v53, %v1174_v42 }
 0x46b   :  { %v1192_v47 = vpop.xlane.xlu0 %1191 }
 0x46c   :  { %1212 = vst.msk [vmem:[%s9124_s6] sm:$0xff] %vm1211_vm12, %v1203_v28  ;;  %v1209_v22 = vmul.f32 %v6999_v53, %v1192_v47 }
 0x46e   :  { %1218 = vst.msk [vmem:[%s9124_s6 + $0x30] sm:$0xff] %vm1211_vm12, %v1209_v22 }
 0x471   :  { %v1186_v33 = vpop.xlane.xlu1 %1185  ;;  %2154 = vmatmul.f32.gmra.mxu1 %v1930_v35  ;;  %2277 = vmatmul.f32.gmra.mxu0 %v1930_v35 }
 0x472   :  { %v1207_v19 = vmul.f32 %v6999_v53, %v1186_v33 }
 0x473   :  { %v1195_v12 = vpop.xlane.xlu0 %1194 }
 0x474   :  { %1216 = vst.msk [vmem:[%s9124_s6 + $0x20] sm:$0xff] %vm1211_vm12, %v1207_v19  ;;  %v1210_v30 = vmul.f32 %v6999_v53, %v1195_v12 }
 0x475   :  { %v7116_v62 = vpop.f32.mrf.mxu3 }
 0x476   :  { %v1177_v36 = vpop.xlane.xlu2 %1176  ;;  %1219 = vst.msk [vmem:[%s9124_s6 + $0x38] sm:$0xff] %vm1211_vm12, %v1210_v30 }
 0x477   :  { %v1204_v51 = vmul.f32 %v6999_v53, %v1177_v36 }
 0x479   :  { %1213 = vst.msk [vmem:[%s9124_s6 + $0x8] sm:$0xff] %vm1211_vm12, %v1204_v51  ;;  %2157 = vmatmul.f32.gmra.mxu1 %v1933_v25  ;;  %2280 = vmatmul.f32.gmra.mxu0 %v1933_v25 }
 0x47a   :  { %v7085_v2 = vpop.f32.mrf.mxu2 }
 0x47d   :  { %v7122_v39 = vpop.f32.mrf.mxu3 }
 0x47e   :  { %v1183_v26 = vpop.xlane.xlu2 %1182  ;;  %9334 = vst [vmem:[#allocation43_spill] sm:$0xff] %v7122_v39 }
 0x47f   :  { %v1206_v15 = vmul.f32 %v6999_v53, %v1183_v26 }
 0x481   :  { %1215 = vst.msk [vmem:[%s9124_s6 + $0x18] sm:$0xff] %vm1211_vm12, %v1206_v15  ;;  %2160 = vmatmul.f32.gmra.mxu1 %v1936_v9  ;;  %2283 = vmatmul.f32.gmra.mxu0 %v1936_v9 }
 0x482   :  { %v7095_v32 = vpop.f32.mrf.mxu2 }
 0x483   :  { %9329 = vst [vmem:[#allocation8_spill] sm:$0xff] %v7095_v32 }
 0x485   :  { %v7128_v50 = vpop.f32.mrf.mxu3 }
 0x486   :  { %v1189_v44 = vpop.xlane.xlu2 %1188  ;;  %9336 = vst [vmem:[#allocation44_spill] sm:$0xff] %v7128_v50 }
 0x487   :  { %v1208_v8 = vmul.f32 %v6999_v53, %v1189_v44  ;;  %v3718_v44 = vld.sshfl [vmem:[#allocation1 + $0x8] sm:$0xff pattern:$0x75316420] }
 0x489   :  { %1217 = vst.msk [vmem:[%s9124_s6 + $0x28] sm:$0xff] %vm1211_vm12, %v1208_v8  ;;  %2163 = vmatmul.f32.gmra.mxu1 %v1939_v59  ;;  %2286 = vmatmul.f32.gmra.mxu0 %v1939_v59  ;;  %v3717_v8 = vld.sshfl [vmem:[#allocation1] sm:$0xff pattern:$0x75316420] }
 0x48a   :  { %v7105_v3 = vpop.f32.mrf.mxu2  ;;  %3743 = vst [vmem:[#allocation1] ss:$2 sm:$0xff] %v5930_v41 }
 0x48b   :  { %9330 = vst [vmem:[#allocation41_spill] sm:$0xff] %v7105_v3  ;;  %v9360_v3 = vld [vmem:[#allocation19_spill] sm:$0xff] }
 0x48d   :  { %v7137_v49 = vpop.f32.mrf.mxu3 }
 0x48e   :  { %9338 = vst [vmem:[#allocation7_spill] sm:$0xff] %v7137_v49 }
 0x491   :  { %2166 = vmatmul.f32.gmra.mxu1 %v1942_v46  ;;  %2289 = vmatmul.f32.gmra.mxu0 %v1942_v46 }
 0x492   :  { %v7110_v40 = vpop.f32.mrf.mxu2 }
 0x493   :  { %9331 = vst [vmem:[#allocation36_spill] sm:$0xff] %v7110_v40 }
 0x499   :  { %4810 = vmatmul.msk.f32.vlgmr.msra.gmra.mxu1 %vm885_vm10, %v6751_v54 }
 0x49a   :  { %v7112_v14 = vpop.f32.mrf.mxu2 }
 0x49b   :  { %9332 = vst [vmem:[#allocation24_spill] sm:$0xff] %v7112_v14 }
 0x4a1   :  { %4811 = vmatmul.msk.f32.gmra.mxu1 %vm885_vm10, %v6781_v60 }
 0x4a2   :  { %v7118_v18 = vpop.f32.mrf.mxu2 }
 0x4a3   :  { %9333 = vst [vmem:[#allocation39_spill] sm:$0xff] %v7118_v18 }
 0x4a9   :  { %4812 = vmatmul.msk.f32.gmra.mxu1 %vm885_vm10, %v6803_v10 }
 0x4aa   :  { %v7124_v6 = vpop.f32.mrf.mxu2 }
 0x4ab   :  { %9335 = vst [vmem:[#allocation14_spill] sm:$0xff] %v7124_v6 }
 0x4b1   :  { %4813 = vmatmul.msk.f32.gmra.mxu1 %vm885_vm10, %v6825_v31  ;;  %v7149_v31 = vpop.f32.mrf.mxu3 }
 0x4b2   :  { %v7130_v29 = vpop.f32.mrf.mxu2  ;;  %9340 = vst [vmem:[#allocation12_spill] sm:$0xff] %v7149_v31  ;;  %v2021_v31 = vld [vmem:[%s9122_s4 + $0x28] sm:$0xff] }
 0x4b3   :  { %9337 = vst [vmem:[#allocation20_spill] sm:$0xff] %v7130_v29  ;;  %v3745_v29 = vld.sshfl [vmem:[#allocation1 + $0x8] sm:$0xff pattern:$0x75316420] }
 0x4b9   :  { %4814 = vmatmul.msk.f32.gmra.mxu1 %vm885_vm10, %v6841_v16  ;;  %v7166_v17 = vpop.f32.mrf.mxu3 }
 0x4ba   :  { %v2666_v54 = vpop.f32.mrf.mxu2  ;;  %9342 = vst [vmem:[#allocation9_spill] sm:$0xff] %v7166_v17 }
 0x4bb   :  { %v2667_v60 = vadd.f32 %v2666_v54, %v6877_v13 }
 0x4bd   :  { %v7139_v34 = vmax.f32 %v2667_v60, 0.0 }
 0x4bf   :  { %9339 = vst [vmem:[#allocation45_spill] sm:$0xff] %v7139_v34  ;;  %2953 = vrot.lane.b32.xlu2 %v7139_v34, %s4978_s27  ;;  %2853 = vrot.lane.b32.xlu1 %v7139_v34, %s4976_s25 }
 0x4c0   :  { %2999 = vrot.lane.b32.xlu0 %v7139_v34, %s4979_s28 }
 0x4c1   :  { %4815 = vmatmul.msk.f32.gmra.mxu1 %vm885_vm10, %v6855_v38  ;;  %v7181_v1 = vpop.f32.mrf.mxu3 }
 0x4c2   :  { %v2669_v10 = vpop.f32.mrf.mxu2  ;;  %9343 = vst [vmem:[#allocation35_spill] sm:$0xff] %v7181_v1 }
 0x4c3   :  { %v2670_v16 = vadd.f32 %v2669_v10, %v6857_v56 }
 0x4c5   :  { %v7160_v58 = vmax.f32 %v2670_v16, 0.0 }
 0x4c7   :  { %2761 = vrot.lane.b32.xlu2 %v7139_v34, %s4974_s23  ;;  %2907 = vrot.lane.b32.xlu1 %v7139_v34, %s4977_s26  ;;  %9341 = vst [vmem:[#allocation26_spill] sm:$0xff] %v7160_v58 }
 0x4c8   :  { %2807 = vrot.lane.b32.xlu0 %v7139_v34, %s4975_s24 }
 0x4c9   :  { %4816 = vmatmul.msk.f32.gmra.mxu1 %vm885_vm10, %v6869_v7 }
 0x4ca   :  { %v2672_v38 = vpop.f32.mrf.mxu2 }
 0x4cb   :  { %v2673_v63 = vadd.f32 %v2672_v38, %v6891_v52 }
 0x4cd   :  { %v7173_v7 = vmax.f32 %v2673_v63, 0.0 }
 0x4cf   :  { %2809 = vrot.lane.b32.xlu1 %v7160_v58, %s4975_s24  ;;  %3001 = vrot.lane.b32.xlu2 %v7160_v58, %s4979_s28 }
 0x4d0   :  { %2955 = vrot.lane.b32.xlu0 %v7160_v58, %s4978_s27 }
 0x4d1   :  { %4817 = vmatmul.msk.f32.gmra.mxu1 %vm885_vm10, %v6885_v11  ;;  %v7189_v11 = vpop.f32.mrf.mxu3 }
 0x4d2   :  { %9344 = vst [vmem:[#allocation11_spill] sm:$0xff] %v7189_v11  ;;  %v2675_v43 = vpop.f32.mrf.mxu2  ;;  %v3744_v11 = vld.sshfl [vmem:[#allocation1] sm:$0xff pattern:$0x75316420] }
 0x4d3   :  { %v2676_v5 = vadd.f32 %v2675_v43, %v6861_v55  ;;  %v7339_v43 = vpop.f32.mrf.mxu0 }
 0x4d5   :  { %v7198_v23 = vmax.f32 %v2676_v5, 0.0 }
 0x4d6   :  { %v7341_v5 = vpop.f32.mrf.mxu1 }
 0x4d7   :  { %2763 = vrot.lane.b32.xlu1 %v7160_v58, %s4974_s23  ;;  %2855 = vrot.lane.b32.xlu2 %v7160_v58, %s4976_s25 }
 0x4d8   :  { %2857 = vrot.lane.b32.xlu0 %v7173_v7, %s4976_s25 }
 0x4d9   :  { %v2695_v57 = vpop.f32.mrf.mxu3 }
 0x4da   :  { %v2696_v4 = vadd.f32 %v2695_v57, %v6877_v13 }
 0x4dc   :  { %v7207_v61 = vmax.f32 %v2696_v4, 0.0 }
 0x4de   :  { %9345 = vst [vmem:[#allocation27_spill] sm:$0xff] %v7207_v61 }
 0x4df   :  { %3003 = vrot.lane.b32.xlu1 %v7173_v7, %s4979_s28  ;;  %2909 = vrot.lane.b32.xlu2 %v7160_v58, %s4977_s26 }
 0x4e0   :  { %2911 = vrot.lane.b32.xlu0 %v7173_v7, %s4977_s26 }
 0x4e1   :  { %v2698_v13 = vpop.f32.mrf.mxu3 }
 0x4e2   :  { %v2699_v0 = vadd.f32 %v2698_v13, %v6857_v56 }
 0x4e4   :  { %v7234_v21 = vmax.f32 %v2699_v0, 0.0  ;;  %v7355_v0 = vpop.f32.mrf.mxu0 }
 0x4e5   :  { %9354 = vst [vmem:[#allocation13_spill] sm:$0xff] %v7355_v0 }
 0x4e6   :  { %9346 = vst [vmem:[#allocation21_spill] sm:$0xff] %v7234_v21 }
 0x4e7   :  { %2957 = vrot.lane.b32.xlu1 %v7173_v7, %s4978_s27  ;;  %2811 = vrot.lane.b32.xlu2 %v7173_v7, %s4975_s24 }
 0x4e8   :  { %2765 = vrot.lane.b32.xlu0 %v7173_v7, %s4974_s23 }
 0x4e9   :  { %v2701_v42 = vpop.f32.mrf.mxu3 }
 0x4ea   :  { %v2702_v28 = vadd.f32 %v2701_v42, %v6891_v52  ;;  %v7357_v42 = vpop.f32.mrf.mxu1 }
 0x4eb   :  { %9355 = vst [vmem:[#allocation4_spill] sm:$0xff] %v7357_v42 }
 0x4ec   :  { %v7245_v22 = vmax.f32 %v2702_v28, 0.0  ;;  %v7372_v6 = vpop.f32.mrf.mxu0 }
 0x4ed   :  { %9356 = vst [vmem:[#allocation22_spill] sm:$0xff] %v7372_v6 }
 0x4ee   :  { %9347 = vst [vmem:[#allocation29_spill] sm:$0xff] %v7245_v22 }
 0x4ef   :  { %2859 = vrot.lane.b32.xlu1 %v7198_v23, %s4976_s25  ;;  %2719 = vrot.lane.b32.xlu2 %v7173_v7, %s4980_s29 }
 0x4f0   :  { %3049 = vrot.lane.b32.xlu0 %v7173_v7, %s4981_s8 }
 0x4f1   :  { %v2704_v35 = vpop.f32.mrf.mxu3 }
 0x4f2   :  { %v2705_v33 = vadd.f32 %v2704_v35, %v6861_v55 }
 0x4f4   :  { %v7276_v36 = vmax.f32 %v2705_v33, 0.0  ;;  %v7395_v18 = vpop.f32.mrf.mxu0 }
 0x4f5   :  { %9358 = vst [vmem:[#allocation6_spill] sm:$0xff] %v7395_v18 }
 0x4f6   :  { %9349 = vst [vmem:[#allocation38_spill] sm:$0xff] %v7276_v36 }
 0x4f7   :  { %2961 = vrot.lane.b32.xlu1 %v7207_v61, %s4978_s27  ;;  %3007 = vrot.lane.b32.xlu2 %v7207_v61, %s4979_s28 }
 0x4f8   :  { %3005 = vrot.lane.b32.xlu0 %v7198_v23, %s4979_s28 }
 0x4fc   :  { %v7411_v50 = vpop.f32.mrf.mxu0 }
 0x4fd   :  { %9363 = vst [vmem:[#allocation19_spill] sm:$0xff] %v7411_v50  ;;  %v9371_v50 = vld [vmem:[#allocation30_spill] sm:$0xff] }
 0x4ff   :  { %2913 = vrot.lane.b32.xlu1 %v7198_v23, %s4977_s26  ;;  %2959 = vrot.lane.b32.xlu2 %v7198_v23, %s4978_s27 }
 0x500   :  { %2861 = vrot.lane.b32.xlu0 %v7207_v61, %s4976_s25 }
 0x507   :  { %2769 = vrot.lane.b32.xlu1 %v7207_v61, %s4974_s23  ;;  %2815 = vrot.lane.b32.xlu2 %v7207_v61, %s4975_s24 }
 0x508   :  { %2813 = vrot.lane.b32.xlu0 %v7198_v23, %s4975_s24 }
 0x50f   :  { %3051 = vrot.lane.b32.xlu1 %v7198_v23, %s4981_s8  ;;  %2767 = vrot.lane.b32.xlu2 %v7198_v23, %s4974_s23 }
 0x510   :  { %2915 = vrot.lane.b32.xlu0 %v7207_v61, %s4977_s26 }
 0x517   :  { %3009 = vrot.lane.b32.xlu1 %v7234_v21, %s4979_s28  ;;  %2963 = vrot.lane.b32.xlu2 %v7234_v21, %s4978_s27 }
 0x518   :  { %2721 = vrot.lane.b32.xlu0 %v7198_v23, %s4980_s29 }
 0x519   :  { %v7243_v47 = vpop.permute.xlu2 %2953 }
 0x51f   :  { %2863 = vrot.lane.b32.xlu1 %v7234_v21, %s4976_s25  ;;  %2865 = vrot.lane.b32.xlu2 %v7245_v22, %s4976_s25 }
 0x520   :  { %2817 = vrot.lane.b32.xlu0 %v7234_v21, %s4975_s24 }
 0x521   :  { %v7253_v56 = vpop.permute.xlu2 %2761 }
 0x527   :  { %2917 = vrot.lane.b32.xlu1 %v7234_v21, %s4977_s26  ;;  %2919 = vrot.lane.b32.xlu2 %v7245_v22, %s4977_s26 }
 0x528   :  { %2771 = vrot.lane.b32.xlu0 %v7234_v21, %s4974_s23 }
 0x529   :  { %v7261_v52 = vpop.permute.xlu2 %3001 }
 0x52f   :  { %2819 = vrot.lane.b32.xlu1 %v7245_v22, %s4975_s24  ;;  %2773 = vrot.lane.b32.xlu2 %v7245_v22, %s4974_s23 }
 0x530   :  { %3011 = vrot.lane.b32.xlu0 %v7245_v22, %s4979_s28 }
 0x531   :  { %v7270_v19 = vpop.permute.xlu1 %2853  ;;  %v7272_v12 = vpop.permute.xlu2 %2855 }
 0x532   :  { %v7274_v30 = vpop.permute.xlu0 %2999 }
 0x533   :  { %9348 = vst [vmem:[#allocation42_spill] sm:$0xff] %v7274_v30 }
 0x537   :  { %2727 = vrot.lane.b32.xlu1 %v7245_v22, %s4980_s29  ;;  %3013 = vrot.lane.b32.xlu2 %v7276_v36, %s4979_s28 }
 0x538   :  { %2965 = vrot.lane.b32.xlu0 %v7245_v22, %s4978_s27 }
 0x539   :  { %v7284_v51 = vpop.permute.xlu1 %2907  ;;  %v7286_v55 = vpop.permute.xlu2 %2909 }
 0x53a   :  { %v7288_v25 = vpop.permute.xlu0 %2807 }
 0x53f   :  { %2967 = vrot.lane.b32.xlu1 %v7276_v36, %s4978_s27  ;;  %3057 = vrot.lane.b32.xlu2 %v7245_v22, %s4981_s8 }
 0x540   :  { %2867 = vrot.lane.b32.xlu0 %v7276_v36, %s4976_s25 }
 0x541   :  { %v7296_v26 = vpop.permute.xlu1 %2809  ;;  %v7298_v15 = vpop.permute.xlu2 %2811 }
 0x542   :  { %v7300_v9 = vpop.permute.xlu0 %2955 }
 0x547   :  { %2717 = vrot.lane.b32.xlu1 %v7160_v58, %s4980_s29  ;;  %2821 = vrot.lane.b32.xlu2 %v7276_v36, %s4975_s24 }
 0x548   :  { %2725 = vrot.lane.b32.xlu0 %v7234_v21, %s4980_s29 }
 0x549   :  { %v7309_v59 = vpop.permute.xlu1 %2763  ;;  %v7311_v46 = vpop.permute.xlu2 %2719 }
 0x54a   :  { %v7313_v54 = vpop.permute.xlu0 %2857 }
 0x54f   :  { %2775 = vrot.lane.b32.xlu1 %v7276_v36, %s4974_s23  ;;  %3047 = vrot.lane.b32.xlu2 %v7160_v58, %s4981_s8 }
 0x550   :  { %2921 = vrot.lane.b32.xlu0 %v7276_v36, %s4977_s26 }
 0x551   :  { %v7321_v60 = vpop.permute.xlu1 %3003  ;;  %v7323_v10 = vpop.permute.xlu2 %3007 }
 0x552   :  { %9350 = vst [vmem:[#allocation37_spill] sm:$0xff] %v7321_v60  ;;  %v7325_v41 = vpop.permute.xlu0 %2911 }
 0x553   :  { %9351 = vst [vmem:[#allocation10_spill] sm:$0xff] %v7323_v10 }
 0x557   :  { %3055 = vrot.lane.b32.xlu1 %v7234_v21, %s4981_s8  ;;  %2729 = vrot.lane.b32.xlu2 %v7276_v36, %s4980_s29 }
 0x558   :  { %2715 = vrot.lane.b32.xlu0 %v7139_v34, %s4980_s29 }
 0x559   :  { %v7333_v16 = vpop.permute.xlu1 %2957  ;;  %v7335_v38 = vpop.permute.xlu2 %2959 }
 0x55a   :  { %9352 = vst [vmem:[#allocation40_spill] sm:$0xff] %v7333_v16  ;;  %v7337_v63 = vpop.permute.xlu0 %2765 }
 0x55f   :  { %3045 = vrot.lane.b32.xlu1 %v7139_v34, %s4981_s8  ;;  %2723 = vrot.lane.b32.xlu2 %v7207_v61, %s4980_s29 }
 0x560   :  { %3059 = vrot.lane.b32.xlu0 %v7276_v36, %s4981_s8 }
 0x561   :  { %v7349_v57 = vpop.permute.xlu1 %2859  ;;  %v7351_v4 = vpop.permute.xlu2 %2815 }
 0x562   :  { %v7353_v13 = vpop.permute.xlu0 %3049 }
 0x563   :  { %9353 = vst [vmem:[#allocation23_spill] sm:$0xff] %v7353_v13 }
 0x567   :  { %3723 = vrot.lane.b32.xlu1 %v3718_v44, %s4979_s28  ;;  %3721 = vrot.lane.b32.xlu2 %v3717_v8, %s4979_s28  ;;  %v7374_v44 = vpop.f32.mrf.mxu1 }
 0x568   :  { %3053 = vrot.lane.b32.xlu0 %v7207_v61, %s4981_s8  ;;  %9357 = vst [vmem:[#allocation5_spill] sm:$0xff] %v7374_v44 }
 0x569   :  { %v7363_v28 = vpop.permute.xlu1 %2961  ;;  %v7365_v35 = vpop.permute.xlu2 %2767 }
 0x56a   :  { %v7367_v33 = vpop.permute.xlu0 %3005 }
 0x56f   :  { %3673 = vrot.lane.b32.xlu1 %v6645_v20, %s4977_s26  ;;  %3750 = vrot.lane.b32.xlu2 %v3745_v29, %s4981_s8  ;;  %v7397_v49 = vpop.f32.mrf.mxu1 }
 0x570   :  { %3748 = vrot.lane.b32.xlu0 %v3744_v11, %s4981_s8  ;;  %9359 = vst [vmem:[#allocation46_spill] sm:$0xff] %v7397_v49  ;;  %v9365_v49 = vld [vmem:[#allocation33_spill] sm:$0xff] }
 0x571   :  { %v7377_v8 = vpop.permute.xlu1 %2913  ;;  %v7379_v40 = vpop.permute.xlu2 %2963 }
 0x572   :  { %v7381_v1 = vpop.permute.xlu0 %2861 }
 0x577   :  { %3702 = vrot.lane.b32.xlu1 %v6714_v27, %s4978_s27  ;;  %3700 = vrot.lane.b32.xlu2 %v6712_v37, %s4978_s27  ;;  %v9361_v27 = vld [vmem:[#allocation34_spill] sm:$0xff]  ;;  %v9362_v37 = vld [vmem:[#allocation15_spill] sm:$0xff]  ;;  %v7413_v18 = vpop.f32.mrf.mxu1 }
 0x578   :  { %3675 = vrot.lane.b32.xlu0 %v6647_v48, %s4977_s26  ;;  %9364 = vst [vmem:[#allocation34_spill] sm:$0xff] %v7413_v18  ;;  %v7430_v18 = vpop.f32.mrf.mxu0 }
 0x579   :  { %v7389_v20 = vpop.permute.xlu1 %2769  ;;  %v7391_v29 = vpop.permute.xlu2 %2865  ;;  %9368 = vst [vmem:[#allocation15_spill] sm:$0xff] %v7430_v18 }
 0x57a   :  { %v7393_v11 = vpop.permute.xlu0 %2813 }
 0x57f   :  { %3591 = vrot.lane.b32.xlu1 %v9360_v3, %s4974_s23  ;;  %3641 = vrot.lane.b32.xlu2 %v9361_v27, %s4976_s25  ;;  %v9366_v3 = vld [vmem:[#allocation17_spill] sm:$0xff]  ;;  %v9367_v27 = vld [vmem:[#allocation32_spill] sm:$0xff] }
 0x580   :  { %3639 = vrot.lane.b32.xlu0 %v9362_v37, %s4976_s25  ;;  %v7460_v0 = vpop.f32.mrf.mxu0 }
 0x581   :  { %v7405_v48 = vpop.permute.xlu1 %3051  ;;  %v7407_v17 = vpop.permute.xlu2 %2919  ;;  %9372 = vst [vmem:[#allocation17_spill] sm:$0xff] %v7460_v0 }
 0x582   :  { %v7409_v44 = vpop.permute.xlu0 %2915 }
 0x587   :  { %3620 = vrot.lane.b32.xlu1 %v9365_v49, %s4975_s24  ;;  %3618 = vrot.lane.b32.xlu2 %v9366_v3, %s4975_s24  ;;  %v7435_v49 = vld [vmem:[%s9119_s5 + $0xe] sm:$0x3]  ;;  %v7437_v3 = vpop.f32.mrf.mxu1 }
 0x588   :  { %3593 = vrot.lane.b32.xlu0 %v9367_v27, %s4974_s23  ;;  %9369 = vst [vmem:[#allocation33_spill] sm:$0xff] %v7437_v3  ;;  %v9370_v27 = vld [vmem:[#allocation31_spill] sm:$0xff]  ;;  %v3025_v42 = vperm.slane %v7435_v49, 0  ;;  %v7473_v36 = vpop.f32.mrf.mxu0 }
 0x589   :  { %v7421_v37 = vpop.permute.xlu1 %3009  ;;  %v7423_v6 = vpop.permute.xlu2 %2773  ;;  %9375 = vst [vmem:[#allocation30_spill] sm:$0xff] %v7473_v36 }
 0x58a   :  { %v7425_v14 = vpop.permute.xlu0 %2721 }
 0x58f   :  { %2051 = vperm.xlu1 %4966, %v2021_v31   ;;  %3572 = vrot.lane.b32.xlu2 %v9370_v27, %s4980_s29  ;;  %v3780_v27 = vld [vmem:[%s9120_s2 + $0x10] sm:$0xff]  ;;  %v7462_v53 = vpop.f32.mrf.mxu1 }
 0x590   :  { %3570 = vrot.lane.b32.xlu0 %v9371_v50, %s4980_s29  ;;  %v3781_v50 = vld [vmem:[%s9120_s2 + $0x18] sm:$0xff]  ;;  %9373 = vst [vmem:[#allocation32_spill] sm:$0xff] %v7462_v53 }
 0x591   :  { %v7443_v32 = vpop.permute.xlu1 %2863  ;;  %v7446_v39 = vpop.permute.xlu2 %3013 }
 0x592   :  { %v7448_v18 = vpop.permute.xlu0 %2817  ;;  %v3018_v3 = vsel %vm198_vm4, %v7367_v33, %v7446_v39 }
 0x593   :  { %v3035_v31 = vmul.f32 %v3025_v42, %v3018_v3  ;;  %v3778_v3 = vld [vmem:[%s9120_s2] sm:$0xff] }
 0x595   :  { %3300 = vmatpush.msra.mxu0 %v3035_v31  ;;  %4940 = vmatpush.msrb.mxu3 %v3035_v31 }
 0x597   :  { %3794 = vperm.xlu1 %4966, %v3780_v27   ;;  %3799 = vperm.xlu2 %4967, %v3781_v50   ;;  %v7479_v27 = vpop.f32.mrf.mxu1  ;;  %v3016_v50 = vsel %vm198_vm4, %v7261_v52, %v7421_v37 }
 0x598   :  { %9377 = vst [vmem:[#allocation48_spill] sm:$0xff] %v7479_v27  ;;  %v3031_v36 = vmul.f32 %v3025_v42, %v3016_v50 }
 0x599   :  { %v7464_v61 = vpop.permute.xlu1 %2917  ;;  %v7471_v22 = vpop.permute.xlu2 %3057 }
 0x59a   :  { %v7466_v21 = vpop.permute.xlu0 %2771  ;;  %9374 = vst [vmem:[#allocation31_spill] sm:$0xff] %v7471_v22 }
 0x59f   :  { %3784 = vperm.xlu2 %4967, %v3778_v3   ;;  %v3015_v3 = vsel %vm198_vm4, %v7274_v30, %v7323_v10  ;;  %v2229_v10 = vadd.f32 %v7116_v62, %v6871_v45  ;;  %v2310_v50 = vpop.f32.mrf.mxu1  ;;  %v2871_v62 = vsel %vm110_vm1, %v7313_v54, %v7391_v29 }
 0x5a0   :  { %v3029_v13 = vmul.f32 %v3025_v42, %v3015_v3 }
 0x5a1   :  { %v7475_v31 = vpop.permute.xlu1 %2819  ;;  %v7493_v27 = vpop.permute.xlu2 %2821 }
 0x5a2   :  { %v7477_v0 = vpop.permute.xlu0 %3011 }
 0x5a3   :  { %9376 = vst [vmem:[#allocation47_spill] sm:$0xff] %v7477_v0  ;;  %v3017_v53 = vsel %vm198_vm4, %v7321_v60, %v7477_v0  ;;  %v2269_v0 = vpop.f32.mrf.mxu0 }
 0x5a4   :  { %v3033_v34 = vmul.f32 %v3025_v42, %v3017_v53  ;;  %v2106_v53 = vadd.f32 %v7339_v43, %v6871_v45  ;;  %v2270_v30 = vadd.f32 %v2269_v0, %v2229_v10 }
 0x5a6   :  { %3301 = vmatpush.msra.mxu0 %v3033_v34  ;;  %4941 = vmatpush.msrb.mxu3 %v3033_v34  ;;  %v2147_v34 = vadd.f32 %v7341_v5, %v2106_v53  ;;  %v2311_v42 = vadd.f32 %v2310_v50, %v2270_v30  ;;  %v2875_v53 = vsel %vm110_vm1, %v7391_v29, %v7313_v54 }
 0x5a7   :  { %v2969_v54 = vsel %vm175_vm3, %v7243_v47, %v7363_v28  ;;  %v2874_v29 = vsel %vm110_vm1, %v7443_v32, %v7272_v12 }
 0x5a8   :  { %3302 = vmatpush.msra.mxu0 %v3031_v36  ;;  %4942 = vmatpush.msrb.mxu3 %v3031_v36  ;;  %v7507_v36 = vld [vmem:[%s9119_s5 + $0xc] sm:$0x3]  ;;  %v2188_v43 = vadd.f32 %v7085_v2, %v2147_v34 }
 0x5a9   :  { %v7495_v22 = vpop.permute.xlu1 %2727  ;;  %9379 = vst [vmem:[#allocation50_spill] sm:$0xff] %v7507_v36  ;;  %v2979_v3 = vperm.slane %v7507_v36, 0  ;;  %v7524_v5 = vpop.permute.xlu2 %3047 }
 0x5aa   :  { %v7497_v58 = vpop.permute.xlu0 %2965  ;;  %3303 = vmatpush.msra.mxu0 %v3029_v13  ;;  %4943 = vmatpush.msrb.mxu3 %v3029_v13  ;;  %v4846_v13 = vld [vmem:[%s9119_s5 + $0x6] sm:$0x3] }
 0x5ab   :  { %9378 = vst [vmem:[#allocation49_spill] sm:$0xff] %v7497_v58  ;;  %v2879_v45 = vperm.slane %v4846_v13, 0  ;;  %v2971_v10 = vsel %vm175_vm3, %v7333_v16, %v7497_v58  ;;  %v2880_v30 = vperm.slane %v4846_v13, 1  ;;  %v2335_v16 = vmax.f32 %v2311_v42, 0.0 }
 0x5ac   :  { %v2970_v13 = vsel %vm175_vm3, %v7300_v9, %v7379_v40 }
 0x5ad   :  { %v2887_v42 = vmul.f32 %v2879_v45, %v2875_v53 }
 0x5b1   :  { %v7514_v60 = vpop.permute.xlu1 %2967 }
 0x5b2   :  { %9380 = vst [vmem:[#allocation51_spill] sm:$0xff] %v7514_v60  ;;  %v2972_v2 = vsel %vm175_vm3, %v7335_v38, %v7514_v60  ;;  %v2868_v0 = vpop.permute.xlu0 %2867 }
 0x5b3   :  { %v2989_v34 = vmul.f32 %v2979_v3, %v2972_v2  ;;  %v2872_v50 = vsel %vm110_vm1, %v7349_v57, %v2868_v0  ;;  %v2876_v58 = vsel %vm110_vm1, %v2868_v0, %v7349_v57  ;;  %v2987_v2 = vmul.f32 %v2979_v3, %v2971_v10  ;;  %v4845_v10 = vld [vmem:[%s9119_s5 + $0x4] sm:$0x3] }
 0x5b4   :  { %v2889_v36 = vmul.f32 %v2879_v45, %v2876_v58  ;;  %v2890_v60 = vmul.f32 %v2880_v30, %v2872_v50  ;;  %v2334_v57 = vmax.f32 %v2188_v43, 0.0  ;;  %v2870_v58 = vsel %vm110_vm1, %v7272_v12, %v7443_v32 }
 0x5b5   :  { %3304 = vmatpush.msra.mxu0 %v2989_v34  ;;  %4944 = vmatpush.msrb.mxu3 %v2989_v34  ;;  %v2888_v0 = vmul.f32 %v2880_v30, %v2871_v62  ;;  %v2873_v50 = vsel %vm110_vm1, %v7381_v1, %v7270_v19  ;;  %v2985_v43 = vmul.f32 %v2979_v3, %v2970_v13  ;;  %v2833_v13 = vperm.slane %v4845_v10, 0 }
 0x5b6   :  { %3259 = vmatpush.msrb.mxu2 %v2889_v36  ;;  %3382 = vmatpush.msrb.mxu1 %v2890_v60  ;;  %v2869_v32 = vsel %vm110_vm1, %v7270_v19, %v7381_v1  ;;  %v2350_v12 = vadd.f32 %v2335_v16, %v2334_v57  ;;  %v2885_v60 = vmul.f32 %v2879_v45, %v2874_v29  ;;  %v4844_v57 = vld [vmem:[%s9119_s5 + $0x2] sm:$0x3] }
 0x5b7   :  { %3305 = vmatpush.msra.mxu0 %v2987_v2  ;;  %4945 = vmatpush.msrb.mxu3 %v2987_v2  ;;  %v2830_v36 = vsel %vm87_vm7, %v7493_v27, %v7393_v11  ;;  %v2886_v53 = vmul.f32 %v2880_v30, %v2870_v58  ;;  %v2983_v34 = vmul.f32 %v2979_v3, %v2969_v54  ;;  %v2834_v2 = vperm.slane %v4845_v10, 1 }
 0x5b8   :  { %3260 = vmatpush.msrb.mxu2 %v2887_v42  ;;  %3383 = vmatpush.msrb.mxu1 %v2888_v0  ;;  %v2826_v1 = vsel %vm87_vm7, %v7393_v11, %v7493_v27  ;;  %v2883_v16 = vmul.f32 %v2879_v45, %v2873_v50  ;;  %v2829_v29 = vsel %vm87_vm7, %v7475_v31, %v7298_v15  ;;  %v7587_v27 = vpop.permute.xlu2 %2729  ;;  %v7607_v42 = vld [vmem:[%s9119_s5 + $0xa] sm:$0x3]  ;;  %v2787_v10 = vperm.slane %v4844_v57, 0 }
 0x5b9   :  { %v7571_v62 = vpop.permute.xlu1 %2717  ;;  %3306 = vmatpush.msra.mxu0 %v2985_v43  ;;  %4946 = vmatpush.msrb.mxu3 %v2985_v43  ;;  %v2884_v3 = vmul.f32 %v2880_v30, %v2869_v32  ;;  %v2825_v54 = vsel %vm87_vm7, %v7298_v15, %v7475_v31  ;;  %v2843_v11 = vmul.f32 %v2833_v13, %v2830_v36  ;;  %v2788_v32 = vperm.slane %v4844_v57, 1 }
 0x5ba   :  { %v7577_v19 = vpop.permute.xlu0 %2725  ;;  %2351 = vadd.xlane.f32.xlu0 %v2350_v12  ;;  %3261 = vmatpush.msrb.mxu2 %v2885_v60  ;;  %v2828_v45 = vsel %vm87_vm7, %v7448_v18, %v7296_v26  ;;  %v2844_v30 = vmul.f32 %v2834_v2, %v2826_v1  ;;  %v2827_v15 = vsel %vm87_vm7, %v7351_v4, %v7288_v25 }
 0x5bb   :  { %3384 = vmatpush.msrb.mxu1 %v2886_v53  ;;  %3307 = vmatpush.msra.mxu0 %v2983_v34  ;;  %v2824_v31 = vsel %vm87_vm7, %v7296_v26, %v7448_v18  ;;  %v2841_v58 = vmul.f32 %v2833_v13, %v2829_v29  ;;  %v2823_v0 = vsel %vm87_vm7, %v7288_v25, %v7351_v4  ;;  %v2933_v26 = vperm.slane %v7607_v42, 0 }
 0x5bc   :  { %3262 = vmatpush.msrb.mxu2 %v2883_v16  ;;  %4947 = vmatpush.msrb.mxu3 %v2983_v34  ;;  %v2842_v50 = vmul.f32 %v2834_v2, %v2825_v54  ;;  %v2839_v43 = vmul.f32 %v2833_v13, %v2828_v45  ;;  %v2840_v12 = vmul.f32 %v2834_v2, %v2824_v31 }
 0x5bd   :  { %3385 = vmatpush.msrb.mxu1 %v2884_v3  ;;  %v2837_v60 = vmul.f32 %v2833_v13, %v2827_v15  ;;  %v2925_v36 = vsel %vm146_vm2, %v7325_v41, %v7407_v17  ;;  %v2838_v34 = vmul.f32 %v2834_v2, %v2823_v0  ;;  %v2783_v13 = vsel %vm58_vm0, %v7423_v6, %v7337_v63 }
 0x5be   :  { %3263 = vmatpush.msrb.mxu2 %v2843_v11  ;;  %v2924_v2 = vsel %vm146_vm2, %v7286_v55, %v7464_v61  ;;  %v2782_v54 = vsel %vm58_vm0, %v7466_v21, %v7309_v59  ;;  %v2795_v45 = vmul.f32 %v2787_v10, %v2783_v13  ;;  %v2941_v57 = vmul.f32 %v2933_v26, %v2925_v36  ;;  %v2018_v36 = vld [vmem:[%s9122_s4 + $0x10] sm:$0xff] }
 0x5bf   :  { %3386 = vmatpush.msrb.mxu1 %v2844_v30  ;;  %v2923_v15 = vsel %vm146_vm2, %v7284_v51, %v7409_v44  ;;  %v2793_v31 = vmul.f32 %v2787_v10, %v2782_v54  ;;  %v2939_v0 = vmul.f32 %v2933_v26, %v2924_v2 }
 0x5c0   :  { %3264 = vmatpush.msrb.mxu2 %v2841_v58  ;;  %v2724_v11 = vpop.permute.xlu2 %2723  ;;  %v2739_v58 = vld [vmem:[%s9119_s5] sm:$0x3] }
 0x5c1   :  { %3387 = vmatpush.msrb.mxu1 %v2842_v50  ;;  %v2776_v18 = vpop.permute.xlu1 %2775 }
 0x5c2   :  { %v2780_v25 = vsel %vm58_vm0, %v7365_v35, %v2776_v18  ;;  %v2784_v4 = vsel %vm58_vm0, %v2776_v18, %v7365_v35  ;;  %v7624_v53 = vpop.permute.xlu0 %2921  ;;  %3265 = vmatpush.msrb.mxu2 %v2839_v43  ;;  %v2779_v35 = vsel %vm58_vm0, %v7337_v63, %v7423_v6  ;;  %v2781_v6 = vsel %vm58_vm0, %v7389_v20, %v7253_v56 }
 0x5c3   :  { %v2797_v1 = vmul.f32 %v2787_v10, %v2784_v4  ;;  %v2798_v16 = vmul.f32 %v2788_v32, %v2780_v25  ;;  %v2926_v29 = vsel %vm146_vm2, %v7377_v8, %v7624_v53  ;;  %3388 = vmatpush.msrb.mxu1 %v2840_v12  ;;  %v2778_v63 = vsel %vm58_vm0, %v7309_v59, %v7466_v21 }
 0x5c4   :  { %v2943_v3 = vmul.f32 %v2933_v26, %v2926_v29  ;;  %3266 = vmatpush.msrb.mxu2 %v2837_v60  ;;  %v2796_v30 = vmul.f32 %v2788_v32, %v2779_v35  ;;  %v2777_v21 = vsel %vm58_vm0, %v7253_v56, %v7389_v20  ;;  %v2794_v50 = vmul.f32 %v2788_v32, %v2778_v63  ;;  %v4881_v63 = vld [vmem:[%s9119_s5 + $0xe] sm:$0x3] }
 0x5c5   :  { %3389 = vmatpush.msrb.mxu1 %v2838_v34  ;;  %v2738_v43 = vsel %vm36_vm5, %v7587_v27, %v7425_v14  ;;  %v2791_v12 = vmul.f32 %v2787_v10, %v2781_v6  ;;  %v2741_v60 = vperm.slane %v2739_v58, 0  ;;  %v2734_v56 = vsel %vm36_vm5, %v7425_v14, %v7587_v27 }
 0x5c6   :  { %3267 = vmatpush.msrb.mxu2 %v2797_v1  ;;  %3308 = vmatpush.msra.mxu0 %v2943_v3  ;;  %v2937_v20 = vmul.f32 %v2933_v26, %v2923_v15  ;;  %v2737_v25 = vsel %vm36_vm5, %v7495_v22, %v7311_v46  ;;  %v2742_v4 = vperm.slane %v2739_v58, 1  ;;  %v2792_v10 = vmul.f32 %v2788_v32, %v2777_v21  ;;  %v4850_v32 = vld [vmem:[%s9119_s5 + $0x10] sm:$0x3] }
 0x5c7   :  { %4948 = vmatpush.msrb.mxu3 %v2943_v3  ;;  %3390 = vmatpush.msrb.mxu1 %v2798_v16  ;;  %v2733_v14 = vsel %vm36_vm5, %v7311_v46, %v7495_v22  ;;  %v2751_v27 = vmul.f32 %v2741_v60, %v2738_v43  ;;  %v2736_v34 = vsel %vm36_vm5, %v7577_v19, %v7571_v62  ;;  %v7715_v3 = vperm.slane %v7435_v49, 1  ;;  %v9385_v58 = vld [vmem:[#allocation47_spill] sm:$0xff] }
 0x5c8   :  { %3268 = vmatpush.msrb.mxu2 %v2795_v45  ;;  %3309 = vmatpush.msra.mxu0 %v2941_v57  ;;  %v2752_v26 = vmul.f32 %v2742_v4, %v2734_v56  ;;  %v2732_v22 = vsel %vm36_vm5, %v7571_v62, %v7577_v19  ;;  %v2749_v46 = vmul.f32 %v2741_v60, %v2737_v25  ;;  %v7698_v13 = vpop.permute.xlu2 %3721  ;;  %v3071_v2 = vperm.slane %v4850_v32, 0  ;;  %v2022_v43 = vld [vmem:[%s9122_s4 + $0x30] sm:$0xff]  ;;  %v9387_v56 = vld [vmem:[#allocation42_spill] sm:$0xff] }
 0x5c9   :  { %4949 = vmatpush.msrb.mxu3 %v2941_v57  ;;  %3391 = vmatpush.msrb.mxu1 %v2796_v30  ;;  %v7665_v59 = vpop.permute.xlu1 %3055  ;;  %v2750_v16 = vmul.f32 %v2742_v4, %v2733_v14  ;;  %v3022_v29 = vsel %vm198_vm4, %v7446_v39, %v7367_v33  ;;  %v2747_v35 = vmul.f32 %v2741_v60, %v2736_v34  ;;  %v3072_v33 = vperm.slane %v4850_v32, 1  ;;  %v9382_v30 = vld [vmem:[#allocation31_spill] sm:$0xff] }
 0x5ca   :  { %v2716_v18 = vpop.permute.xlu0 %2715  ;;  %3269 = vmatpush.msrb.mxu2 %v2793_v31  ;;  %3310 = vmatpush.msra.mxu0 %v2939_v0  ;;  %v2748_v54 = vmul.f32 %v2742_v4, %v2732_v22  ;;  %v9384_v31 = vld [vmem:[#allocation37_spill] sm:$0xff]  ;;  %v3066_v25 = vsel %vm227_vm6, %v7665_v59, %v7524_v5  ;;  %v9389_v32 = vld [vmem:[#allocation51_spill] sm:$0xff] }
 0x5cb   :  { %4950 = vmatpush.msrb.mxu3 %v2939_v0  ;;  %3392 = vmatpush.msrb.mxu1 %v2794_v50  ;;  %v2735_v1 = vsel %vm36_vm5, %v2724_v11, %v2716_v18  ;;  %v2731_v62 = vsel %vm36_vm5, %v2716_v18, %v2724_v11  ;;  %v3021_v0 = vsel %vm198_vm4, %v9385_v58, %v9384_v31  ;;  %v9386_v50 = vld [vmem:[#allocation45_spill] sm:$0xff] }
 0x5cc   :  { %3270 = vmatpush.msrb.mxu2 %v2791_v12  ;;  %3311 = vmatpush.msra.mxu0 %v2937_v20  ;;  %v2745_v11 = vmul.f32 %v2741_v60, %v2735_v1  ;;  %v2746_v49 = vmul.f32 %v2742_v4, %v2731_v62  ;;  %v3062_v12 = vsel %vm227_vm6, %v7524_v5, %v7665_v59  ;;  %v7757_v60 = vld [vmem:[%s9123_s3 + $0x8] sm:$0xff]  ;;  %v3729_v4 = vperm.slane %v4881_v63, 0 }
 0x5cd   :  { %4951 = vmatpush.msrb.mxu3 %v2937_v20  ;;  %3393 = vmatpush.msrb.mxu1 %v2792_v10  ;;  %v9388_v20 = vld [vmem:[#allocation10_spill] sm:$0xff]  ;;  %v3730_v10 = vperm.slane %v4881_v63, 1  ;;  %v2976_v22 = vsel %vm175_vm3, %v9389_v32, %v7335_v38  ;;  %v3078_v59 = vmul.f32 %v3072_v33, %v3066_v25  ;;  %v2973_v58 = vsel %vm175_vm3, %v7363_v28, %v7243_v47 }
 0x5ce   :  { %2036 = vperm.xlu0 %4968, %v2018_v36   ;;  %3271 = vmatpush.msrb.mxu2 %v2751_v27  ;;  %v3019_v36 = vsel %vm198_vm4, %v9388_v20, %v9387_v56  ;;  %v3034_v27 = vmul.f32 %v7715_v3, %v3021_v0  ;;  %v2934_v47 = vperm.slane %v7607_v42, 1  ;;  %v4879_v42 = vld [vmem:[%s9119_s5 + $0xa] sm:$0x3] }
 0x5cf   :  { %3312 = vmatpush.msra.mxu0 %v7198_v23  ;;  %4952 = vmatpush.msrb.mxu3 %v7198_v23  ;;  %v3020_v23 = vsel %vm198_vm4, %v7421_v37, %v7261_v52  ;;  %v9381_v52 = vld [vmem:[#allocation26_spill] sm:$0xff]  ;;  %v3036_v37 = vmul.f32 %v7715_v3, %v3022_v29 }
 0x5d0   :  { %3394 = vmatpush.msrb.mxu1 %v2752_v26  ;;  %3272 = vmatpush.msrb.mxu2 %v2749_v46  ;;  %v3032_v26 = vmul.f32 %v7715_v3, %v3020_v23  ;;  %v3077_v46 = vmul.f32 %v3071_v2, %v3062_v12  ;;  %v3751_v1 = vpop.permute.xlu2 %3750  ;;  %v3097_v12 = vld [vmem:[%s9123_s3 + $0x30] sm:$0xff]  ;;  %v7839_v25 = vld [vmem:[%s9123_s3 + $0x28] sm:$0xff] }
 0x5d1   :  { %3313 = vmatpush.msra.mxu0 %v7173_v7  ;;  %v3046_v19 = vpop.permute.xlu1 %3045  ;;  %4953 = vmatpush.msrb.mxu3 %v7173_v7  ;;  %v3091_v7 = vld [vmem:[%s9123_s3] sm:$0xff] }
 0x5d2   :  { %3395 = vmatpush.msrb.mxu1 %v2750_v16  ;;  %v3060_v39 = vpop.permute.xlu0 %3059  ;;  %3273 = vmatpush.msrb.mxu2 %v2747_v35 }
 0x5d3   :  { %v3064_v45 = vsel %vm227_vm6, %v7405_v48, %v3060_v39  ;;  %v3068_v57 = vsel %vm227_vm6, %v3060_v39, %v7405_v48  ;;  %3314 = vmatpush.msra.mxu0 %v9381_v52  ;;  %4954 = vmatpush.msrb.mxu3 %v9381_v52  ;;  %v9383_v48 = vld [vmem:[#allocation23_spill] sm:$0xff]  ;;  %v9390_v39 = vld [vmem:[#allocation50_spill] sm:$0xff]  ;;  %v3030_v52 = vmul.f32 %v7715_v3, %v3019_v36 }
 0x5d4   :  { %v3081_v6 = vmul.f32 %v3071_v2, %v3064_v45  ;;  %3396 = vmatpush.msrb.mxu1 %v2748_v54  ;;  %v3063_v15 = vsel %vm227_vm6, %v9383_v48, %v9382_v30  ;;  %v3082_v21 = vmul.f32 %v3072_v33, %v3068_v57  ;;  %3274 = vmatpush.msrb.mxu2 %v2745_v11  ;;  %v2980_v11 = vperm.slane %v9390_v39, 1  ;;  %v4882_v3 = vld [vmem:[%s9119_s5 + $0x10] sm:$0x3] }
 0x5d5   :  { %3315 = vmatpush.msra.mxu0 %v9386_v50  ;;  %v3067_v18 = vsel %vm227_vm6, %v9382_v30, %v9383_v48  ;;  %4955 = vmatpush.msrb.mxu3 %v9386_v50  ;;  %v3079_v14 = vmul.f32 %v3071_v2, %v3063_v15  ;;  %v2974_v48 = vsel %vm175_vm3, %v7379_v40, %v7300_v9  ;;  %v3757_v31 = vperm.slane %v4882_v3, 1 }
 0x5d6   :  { %3397 = vmatpush.msrb.mxu1 %v2746_v49  ;;  %3423 = vmatpush.msra.mxu2 %v3036_v37  ;;  %v3080_v34 = vmul.f32 %v3072_v33, %v3067_v18  ;;  %v9391_v37 = vld [vmem:[#allocation40_spill] sm:$0xff]  ;;  %v9392_v49 = vld [vmem:[#allocation49_spill] sm:$0xff]  ;;  %v2986_v40 = vmul.f32 %v2980_v11, %v2974_v48  ;;  %v2984_v18 = vmul.f32 %v2980_v11, %v2973_v58  ;;  %v9396_v58 = vld [vmem:[#allocation27_spill] sm:$0xff] }
 0x5d7   :  { %3398 = vmatmul.f32.vlgmr.msrb.gmra.mxu1 %v3091_v7  ;;  %2056 = vperm.xlu0 %4968, %v2022_v43   ;;  %v4877_v48 = vld [vmem:[%s9119_s5 + $0x4] sm:$0x3] }
 0x5d8   :  { %3353 = vmatpush.msrb.mxu0 %v3081_v6  ;;  %3476 = vmatpush.msra.mxu3 %v3082_v21  ;;  %v2975_v6 = vsel %vm175_vm3, %v9392_v49, %v9391_v37  ;;  %v2930_v21 = vsel %vm146_vm2, %v7624_v53, %v7377_v8  ;;  %v3701_v28 = vpop.permute.xlu2 %3700  ;;  %v4880_v8 = vld [vmem:[%s9119_s5 + $0xc] sm:$0x3]  ;;  %v2929_v53 = vsel %vm146_vm2, %v7407_v17, %v7325_v41  ;;  %v9394_v37 = vld [vmem:[#allocation29_spill] sm:$0xff] }
 0x5d9   :  { %3316 = vmatmul.f32.vlgmr.msra.gmra.mxu0 %v7757_v60  ;;  %v3724_v5 = vpop.permute.xlu1 %3723  ;;  %3424 = vmatpush.msra.mxu2 %v3034_v27  ;;  %v2988_v15 = vmul.f32 %v2980_v11, %v2975_v6  ;;  %v2944_v36 = vmul.f32 %v2934_v47, %v2930_v21  ;;  %v3708_v17 = vperm.slane %v4880_v8, 0  ;;  %v3709_v41 = vperm.slane %v4880_v8, 1 }
 0x5da   :  { %3354 = vmatpush.msrb.mxu0 %v3079_v14  ;;  %v3725_v16 = vsel %vm198_vm4, %v7698_v13, %v3724_v5  ;;  %v3726_v29 = vsel %vm198_vm4, %v3724_v5, %v7698_v13  ;;  %v3054_v35 = vpop.permute.xlu0 %3053  ;;  %3477 = vmatpush.msra.mxu3 %v3080_v34  ;;  %v3094_v13 = vld [vmem:[%s9123_s3 + $0x18] sm:$0xff]  ;;  %v3681_v14 = vperm.slane %v4879_v42, 0  ;;  %v3682_v27 = vperm.slane %v4879_v42, 1 }
 0x5db   :  { %v3733_v38 = vmul.f32 %v3729_v4, %v3725_v16  ;;  %v3734_v62 = vmul.f32 %v3730_v10, %v3726_v29  ;;  %v3061_v23 = vsel %vm227_vm6, %v3046_v19, %v3054_v35  ;;  %v3065_v54 = vsel %vm227_vm6, %v3054_v35, %v3046_v19  ;;  %3425 = vmatpush.msra.mxu2 %v3032_v26  ;;  %v3779_v19 = vld [vmem:[%s9120_s2 + $0x8] sm:$0xff]  ;;  %v7865_v16 = vld [vmem:[%s9123_s3 + $0x40] sm:$0xff] }
 0x5dc   :  { %v3075_v45 = vmul.f32 %v3071_v2, %v3061_v23  ;;  %v3076_v57 = vmul.f32 %v3072_v33, %v3065_v54  ;;  %3355 = vmatpush.msrb.mxu0 %v3077_v46  ;;  %3478 = vmatpush.msra.mxu3 %v3078_v59  ;;  %v2990_v2 = vmul.f32 %v2980_v11, %v2976_v22  ;;  %v7802_v33 = vld [vmem:[%s9123_s3 + $0x10] sm:$0xff]  ;;  %v3626_v21 = vperm.slane %v4877_v48, 0 }
 0x5dd   :  { %v3737_v63 = vrot.slane %v3733_v38, 4  ;;  %v3738_v30 = vrot.slane %v3734_v62, 4  ;;  %3275 = vmatmul.f32.vlgmr.msrb.gmra.mxu2 %v3091_v7  ;;  %v3756_v7 = vperm.slane %v4882_v3, 0  ;;  %v2928_v4 = vsel %vm146_vm2, %v7464_v61, %v7286_v55  ;;  %v4878_v38 = vld [vmem:[%s9119_s5 + $0x6] sm:$0x3] }
 0x5de   :  { %3426 = vmatpush.msra.mxu2 %v3030_v52  ;;  %3356 = vmatpush.msrb.mxu0 %v3075_v45  ;;  %v2942_v10 = vmul.f32 %v2934_v47, %v2929_v53  ;;  %v2927_v26 = vsel %vm146_vm2, %v7409_v44, %v7284_v51  ;;  %v2940_v32 = vmul.f32 %v2934_v47, %v2928_v4  ;;  %v9393_v45 = vld [vmem:[#allocation38_spill] sm:$0xff]  ;;  %v3648_v52 = vperm.slane %v4878_v38, 1 }
 0x5df   :  { %3741 = vst [vmem:[#allocation2 + $0x8] sm:$0xf0] %v3737_v63  ;;  %3401 = vmatmul.f32.gmra.mxu1 %v3094_v13  ;;  %3479 = vmatpush.msra.mxu3 %v3076_v57  ;;  %v2938_v44 = vmul.f32 %v2934_v47, %v2927_v26  ;;  %v3647_v57 = vperm.slane %v4878_v38, 0  ;;  %v7915_v26 = vld [vmem:[%s9123_s3 + $0x70] sm:$0xff]  ;;  %v7929_v38 = vld [vmem:[%s9123_s3 + $0x88] sm:$0xff] }
 0x5e0   :  { %3742 = vst [vmem:[#allocation2 + $0x20] sm:$0xf0] %v3738_v30  ;;  %3427 = vmatpush.msra.mxu2 %v2990_v2  ;;  %3789 = vperm.xlu0 %4968, %v3779_v19   ;;  %v3642_v23 = vpop.permute.xlu2 %3641  ;;  %v9395_v30 = vld [vmem:[#allocation21_spill] sm:$0xff] }
 0x5e1   :  { %4851 = vmatmul.msk.f32.vlgmr.msrb.gmra.mxu0 %vm885_vm10, %v7802_v33  ;;  %v3674_v0 = vpop.permute.xlu1 %3673  ;;  %v3103_v19 = vld [vmem:[%s9123_s3 + $0x60] sm:$0xff] }
 0x5e2   :  { %3428 = vmatpush.msra.mxu2 %v2988_v15  ;;  %v3749_v9 = vpop.permute.xlu0 %3748 }
 0x5e3   :  { %v3752_v50 = vsel %vm227_vm6, %v3749_v9, %v3751_v1  ;;  %v3753_v43 = vsel %vm227_vm6, %v3751_v1, %v3749_v9  ;;  %v3100_v1 = vld [vmem:[%s9123_s3 + $0x48] sm:$0xff] }
 0x5e4   :  { %3429 = vmatpush.msra.mxu2 %v2986_v40  ;;  %v3760_v56 = vmul.f32 %v3756_v7, %v3752_v50  ;;  %v3761_v20 = vmul.f32 %v3757_v31, %v3753_v43  ;;  %v4876_v7 = vld [vmem:[%s9119_s5 + $0x2] sm:$0x3]  ;;  %v3627_v50 = vperm.slane %v4877_v48, 1 }
 0x5e5   :  { %3278 = vmatmul.f32.gmra.mxu2 %v3094_v13 }
 0x5e6   :  { %3430 = vmatpush.msra.mxu2 %v2984_v18  ;;  %3762 = vst [vmem:[#allocation2 + $0x40] sm:$0xf] %v3760_v56  ;;  %v3600_v18 = vperm.slane %v4876_v7, 1 }
 0x5e7   :  { %3404 = vmatmul.f32.gmra.mxu1 %v3097_v12  ;;  %3763 = vst [vmem:[#allocation2 + $0x38] sm:$0xf] %v3761_v20 }
 0x5e8   :  { %3431 = vmatpush.msra.mxu2 %v2944_v36  ;;  %v3619_v47 = vpop.permute.xlu2 %3618 }
 0x5e9   :  { %4852 = vmatmul.msk.f32.gmra.mxu0 %vm885_vm10, %v7839_v25  ;;  %v3703_v34 = vpop.permute.xlu1 %3702 }
 0x5ea   :  { %3432 = vmatpush.msra.mxu2 %v2942_v10  ;;  %v3704_v61 = vsel %vm175_vm3, %v3701_v28, %v3703_v34  ;;  %v3705_v55 = vsel %vm175_vm3, %v3703_v34, %v3701_v28  ;;  %v3676_v22 = vpop.permute.xlu0 %3675  ;;  %v3599_v28 = vperm.slane %v4876_v7, 0 }
 0x5eb   :  { %v3712_v46 = vmul.f32 %v3708_v17, %v3704_v61  ;;  %v3713_v5 = vmul.f32 %v3709_v41, %v3705_v55  ;;  %v3677_v59 = vsel %vm146_vm2, %v3674_v0, %v3676_v22  ;;  %v3678_v51 = vsel %vm146_vm2, %v3676_v22, %v3674_v0  ;;  %v7894_v0 = vld [vmem:[%s9123_s3 + $0x58] sm:$0xff] }
 0x5ec   :  { %3433 = vmatpush.msra.mxu2 %v2940_v32  ;;  %v3685_v29 = vmul.f32 %v3681_v14, %v3677_v59  ;;  %v3686_v35 = vmul.f32 %v3682_v27, %v3678_v51  ;;  %v3106_v41 = vld [vmem:[%s9123_s3 + $0x78] sm:$0xff]  ;;  %v3576_v27 = vld [vmem:[%s9119_s5] sm:$0x3]  ;;  %v3109_v51 = vld [vmem:[%s9123_s3 + $0x90] sm:$0xff] }
 0x5ed   :  { %3714 = vst [vmem:[#allocation2 + $0x8] sm:$0xf] %v3712_v46  ;;  %v3776_v62 = vld [vmem:[#allocation2 + $0x40] sm:$0xf]  ;;  %3281 = vmatmul.f32.gmra.mxu2 %v3097_v12  ;;  %v3578_v61 = vperm.slane %v3576_v27, 0  ;;  %v3579_v55 = vperm.slane %v3576_v27, 1 }
 0x5ee   :  { %3715 = vst [vmem:[#allocation2 + $0x20] sm:$0xf] %v3713_v5  ;;  %3434 = vmatpush.msra.mxu2 %v2938_v44  ;;  %v3689_v54 = vrot.slane %v3685_v29, 4  ;;  %v3690_v39 = vrot.slane %v3686_v35, 4  ;;  %4883 = vmatpush.msk.msra.mxu0 %vm292_vm8, %v3776_v62  ;;  %v3777_v11 = vld [vmem:[#allocation2 + $0x38] sm:$0xf] }
 0x5ef   :  { %3407 = vmatmul.f32.gmra.mxu1 %v3100_v1  ;;  %v3112_v62 = vld [vmem:[%s9123_s3 + $0xa8] sm:$0xff] }
 0x5f0   :  { %3435 = vmatpush.msra.mxu2 %v9393_v45  ;;  %3693 = vst [vmem:[#allocation2 + $0x48] sm:$0xf0] %v3689_v54  ;;  %4888 = vmatpush.msk.msra.mxu1 %vm292_vm8, %v3777_v11  ;;  %v3573_v22 = vpop.permute.xlu2 %3572  ;;  %v7939_v54 = vld [vmem:[%s9123_s3 + $0xa0] sm:$0xff]  ;;  %v7943_v11 = vpop.f32.mrf.mxu1 }
 0x5f1   :  { %4853 = vmatmul.msk.f32.gmra.mxu0 %vm885_vm10, %v7865_v16  ;;  %3694 = vst [vmem:[#allocation2 + $0x28] sm:$0xf0] %v3690_v39  ;;  %v3592_v13 = vpop.permute.xlu1 %3591  ;;  %v7945_v45 = vpop.f32.mrf.mxu0 }
 0x5f2   :  { %3436 = vmatpush.msra.mxu2 %v9394_v37  ;;  %v3640_v49 = vpop.permute.xlu0 %3639  ;;  %v3765_v37 = vld [vmem:[%s9121_s1 + $0x8] sm:$0xff] }
 0x5f3   :  { %v3643_v6 = vsel %vm110_vm1, %v3640_v49, %v3642_v23  ;;  %v3644_v63 = vsel %vm110_vm1, %v3642_v23, %v3640_v49 }
 0x5f4   :  { %3437 = vmatpush.msra.mxu2 %v9395_v30  ;;  %v3651_v3 = vmul.f32 %v3647_v57, %v3644_v63  ;;  %v3652_v2 = vmul.f32 %v3648_v52, %v3643_v6  ;;  %v3774_v15 = vld [vmem:[#allocation2 + $0x8] sm:$0xff]  ;;  %v3764_v57 = vld [vmem:[%s9121_s1] sm:$0xff]  ;;  %v7953_v52 = vld [vmem:[%s9123_s3 + $0xb8] sm:$0xff] }
 0x5f5   :  { %3832 = vmatpush.msra.mxu0 %v3774_v15  ;;  %v3775_v31 = vld [vmem:[#allocation2 + $0x20] sm:$0xff]  ;;  %3284 = vmatmul.f32.gmra.mxu2 %v3100_v1  ;;  %v3766_v6 = vld [vmem:[%s9121_s1 + $0x10] sm:$0xff] }
 0x5f6   :  { %3438 = vmatpush.msra.mxu2 %v9396_v58  ;;  %v3655_v40 = vrot.slane %v3651_v3, 4  ;;  %v3656_v9 = vrot.slane %v3652_v2, 4  ;;  %3861 = vmatpush.msra.mxu1 %v3775_v31  ;;  %v9397_v3 = vld [vmem:[#allocation18_spill] sm:$0xff] }
 0x5f7   :  { %3410 = vmatmul.f32.gmra.mxu1 %v3103_v19  ;;  %v3772_v43 = vld [vmem:[#allocation2 + $0x48] sm:$0xff] }
 0x5f8   :  { %3659 = vst [vmem:[#allocation2 + $0x18] sm:$0xf0] %v3655_v40  ;;  %v3773_v12 = vld [vmem:[#allocation2 + $0x28] sm:$0xff]  ;;  %3833 = vmatpush.msra.mxu0 %v3772_v43 }
 0x5f9   :  { %4854 = vmatmul.msk.f32.gmra.mxu0 %vm885_vm10, %v7894_v0  ;;  %3660 = vst [vmem:[#allocation2 + $0x10] sm:$0xf0] %v3656_v9  ;;  %v3621_v56 = vpop.permute.xlu1 %3620  ;;  %3862 = vmatpush.msra.mxu1 %v3773_v12  ;;  %v7964_v49 = vpop.f32.mrf.mxu0 }
 0x5fa   :  { %v3622_v20 = vsel %vm87_vm7, %v3619_v47, %v3621_v56  ;;  %v3623_v8 = vsel %vm87_vm7, %v3621_v56, %v3619_v47  ;;  %v3594_v53 = vpop.permute.xlu0 %3593 }
 0x5fb   :  { %v3630_v42 = vmul.f32 %v3626_v21, %v3623_v8  ;;  %v3631_v36 = vmul.f32 %v3627_v50, %v3622_v20  ;;  %v3595_v4 = vsel %vm58_vm0, %v3592_v13, %v3594_v53  ;;  %v3596_v17 = vsel %vm58_vm0, %v3594_v53, %v3592_v13  ;;  %v7958_v13 = vpop.f32.mrf.mxu1 }
 0x5fc   :  { %v3603_v10 = vmul.f32 %v3599_v28, %v3596_v17  ;;  %v3604_v14 = vmul.f32 %v3600_v18, %v3595_v4 }
 0x5fd   :  { %3632 = vst [vmem:[#allocation2 + $0x18] sm:$0xf] %v3630_v42  ;;  %3287 = vmatmul.f32.gmra.mxu2 %v3103_v19 }
 0x5fe   :  { %3633 = vst [vmem:[#allocation2 + $0x10] sm:$0xf] %v3631_v36  ;;  %v3607_v34 = vrot.slane %v3603_v10, 4  ;;  %v3608_v32 = vrot.slane %v3604_v14, 4  ;;  %v8034_v10 = vpop.permute.xlu2 %3799 }
 0x5ff   :  { %3413 = vmatmul.f32.gmra.mxu1 %v3106_v41 }
 0x600   :  { %3611 = vst [vmem:[#allocation2 + $0x30] sm:$0xf0] %v3607_v34 }
 0x601   :  { %4855 = vmatmul.msk.f32.gmra.mxu0 %vm885_vm10, %v7915_v26  ;;  %3612 = vst [vmem:[#allocation2] sm:$0xf0] %v3608_v32  ;;  %v7974_v30 = vpop.f32.mrf.mxu0 }
 0x602   :  { %v3571_v46 = vpop.permute.xlu0 %3570 }
 0x603   :  { %v3574_v5 = vsel %vm36_vm5, %v3571_v46, %v3573_v22  ;;  %v3575_v59 = vsel %vm36_vm5, %v3573_v22, %v3571_v46  ;;  %v7971_v63 = vpop.f32.mrf.mxu1 }
 0x604   :  { %v3582_v44 = vmul.f32 %v3578_v61, %v3575_v59  ;;  %v3583_v1 = vmul.f32 %v3579_v55, %v3574_v5  ;;  %v3770_v29 = vld [vmem:[#allocation2 + $0x18] sm:$0xff] }
 0x605   :  { %v3771_v35 = vld [vmem:[#allocation2 + $0x10] sm:$0xff]  ;;  %3834 = vmatpush.msra.mxu0 %v3770_v29  ;;  %3290 = vmatmul.f32.gmra.mxu2 %v3106_v41 }
 0x606   :  { %3584 = vst [vmem:[#allocation2 + $0x30] sm:$0xf] %v3582_v44  ;;  %3863 = vmatpush.msra.mxu1 %v3771_v35  ;;  %v3785_v32 = vpop.permute.xlu2 %3784 }
 0x607   :  { %3416 = vmatmul.f32.gmra.mxu1 %v3109_v51  ;;  %3585 = vst [vmem:[#allocation2] sm:$0xf] %v3583_v1 }
 0x609   :  { %4856 = vmatmul.msk.f32.gmra.mxu0 %vm885_vm10, %v7929_v38  ;;  %v7989_v15 = vpop.f32.mrf.mxu0 }
 0x60b   :  { %v7982_v48 = vpop.f32.mrf.mxu1 }
 0x60d   :  { %v3768_v23 = vld [vmem:[#allocation2 + $0x30] sm:$0xff]  ;;  %3293 = vmatmul.f32.gmra.mxu2 %v3109_v51 }
 0x60e   :  { %v3769_v39 = vld [vmem:[#allocation2] sm:$0xff]  ;;  %3835 = vmatpush.msra.mxu0 %v3768_v23 }
 0x60f   :  { %3419 = vmatmul.f32.gmra.mxu1 %v3112_v62 }
 0x610   :  { %3864 = vmatpush.msra.mxu1 %v3769_v39 }
 0x611   :  { %4857 = vmatmul.msk.f32.gmra.mxu0 %vm885_vm10, %v7939_v54  ;;  %v7994_v31 = vpop.f32.mrf.mxu0 }
 0x613   :  { %v7991_v7 = vpop.f32.mrf.mxu1 }
 0x615   :  { %3296 = vmatmul.f32.gmra.mxu2 %v3112_v62  ;;  %v8058_v62 = vpop.permute.xlu1 %2051 }
 0x617   :  { %4889 = vmatmul.msk.f32.vlgmr.msra.gmra.mxu1 %vm279_vm9, %v3764_v57 }
 0x619   :  { %4858 = vmatmul.msk.f32.gmra.mxu0 %vm885_vm10, %v7953_v52  ;;  %v7998_v40 = vpop.f32.mrf.mxu0 }
 0x61b   :  { %v7996_v58 = vpop.f32.mrf.mxu1 }
 0x61d   :  { %3439 = vmatmul.f32.vlgmr.msra.gmra.mxu2 %v7757_v60  ;;  %v3767_v60 = vld [vmem:[%s9121_s1 + $0x18] sm:$0xff]  ;;  %v3795_v39 = vpop.permute.xlu1 %3794 }
 0x61f   :  { %4890 = vmatmul.msk.f32.gmra.mxu1 %vm279_vm9, %v3765_v37 }
 0x621   :  { %4884 = vmatmul.msk.f32.vlgmr.msra.gmra.mxu0 %vm279_vm9, %v3764_v57  ;;  %v8002_v21 = vpop.f32.mrf.mxu0 }
 0x622   :  { %9399 = vst [vmem:[#allocation31_spill] sm:$0xff] %v8002_v21 }
 0x623   :  { %v8000_v9 = vpop.f32.mrf.mxu1 }
 0x624   :  { %9398 = vst [vmem:[#allocation26_spill] sm:$0xff] %v8000_v9 }
 0x627   :  { %4891 = vmatmul.msk.f32.gmra.mxu1 %vm279_vm9, %v3766_v6 }
 0x629   :  { %4885 = vmatmul.msk.f32.gmra.mxu0 %vm279_vm9, %v3765_v37 }
 0x62d   :  { %v2352_v19 = vpop.xlane.xlu0 %2351 }
 0x62e   :  { %v2374_v2 = vmul.f32 %v2352_v19, %v9397_v3 }
 0x62f   :  { %4892 = vmatmul.msk.f32.gmra.mxu1 %vm279_vm9, %v3767_v60 }
 0x630   :  { %4818 = vst.msk [vmem:[%s9124_s6 + $0x40] sm:$0xff] %vm1211_vm12, %v2374_v2 }
 0x631   :  { %4886 = vmatmul.msk.f32.gmra.mxu0 %vm279_vm9, %v3766_v6 }
 0x639   :  { %4887 = vmatmul.msk.f32.gmra.mxu0 %vm279_vm9, %v3767_v60 }
 0x640   :  { %v8032_v41 = vpop.permute.xlu0 %2036 }
 0x649   :  { %v8040_v34 = vpop.permute.xlu0 %2056 }
 0x652   :  { %v3790_v5 = vpop.permute.xlu0 %3789 }
 0x654   :  { %v8004_v50 = vpop.f32.mrf.mxu1 }
 0x655   :  { %9400 = vst [vmem:[#allocation23_spill] sm:$0xff] %v8004_v50 }
 0x656   :  { %v8006_v43 = vpop.f32.mrf.mxu0 }
 0x657   :  { %9401 = vst [vmem:[#allocation37_spill] sm:$0xff] %v8006_v43  ;;  %v8262_v43 = vld [vmem:[%s9123_s3 + $0x98] sm:$0xff] }
 0x658   :  { %9431 = vst [vmem:[#allocation69_spill] sm:$0xff] %v8262_v43 }
 0x65c   :  { %v8008_v47 = vpop.f32.mrf.mxu1 }
 0x65d   :  { %9402 = vst [vmem:[#allocation47_spill] sm:$0xff] %v8008_v47  ;;  %v9434_v47 = vld [vmem:[#allocation25_spill] sm:$0xff] }
 0x65e   :  { %v8010_v28 = vpop.f32.mrf.mxu0 }
 0x65f   :  { %9403 = vst [vmem:[#allocation45_spill] sm:$0xff] %v8010_v28 }
 0x664   :  { %v8012_v18 = vpop.f32.mrf.mxu1 }
 0x665   :  { %9404 = vst [vmem:[#allocation42_spill] sm:$0xff] %v8012_v18 }
 0x666   :  { %v8014_v12 = vpop.f32.mrf.mxu0 }
 0x667   :  { %9405 = vst [vmem:[#allocation10_spill] sm:$0xff] %v8014_v12  ;;  %v8285_v12 = vld [vmem:[%s9123_s3 + $0xb0] sm:$0xff] }
 0x668   :  { %9433 = vst [vmem:[#allocation71_spill] sm:$0xff] %v8285_v12 }
 0x66c   :  { %v8016_v56 = vpop.f32.mrf.mxu1 }
 0x66d   :  { %9406 = vst [vmem:[#allocation51_spill] sm:$0xff] %v8016_v56  ;;  %v8245_v56 = vld [vmem:[%s9123_s3 + $0x80] sm:$0xff] }
 0x66e   :  { %v8018_v20 = vpop.f32.mrf.mxu0  ;;  %9430 = vst [vmem:[#allocation68_spill] sm:$0xff] %v8245_v56 }
 0x66f   :  { %9407 = vst [vmem:[#allocation50_spill] sm:$0xff] %v8018_v20 }
 0x674   :  { %v8020_v8 = vpop.f32.mrf.mxu1 }
 0x675   :  { %9408 = vst [vmem:[#allocation40_spill] sm:$0xff] %v8020_v8 }
 0x676   :  { %v8022_v53 = vpop.f32.mrf.mxu0 }
 0x677   :  { %9409 = vst [vmem:[#allocation49_spill] sm:$0xff] %v8022_v53 }
 0x67c   :  { %v8024_v42 = vpop.f32.mrf.mxu1 }
 0x67d   :  { %9410 = vst [vmem:[#allocation38_spill] sm:$0xff] %v8024_v42 }
 0x67e   :  { %v8026_v36 = vpop.f32.mrf.mxu0 }
 0x67f   :  { %9411 = vst [vmem:[#allocation29_spill] sm:$0xff] %v8026_v36 }
 0x684   :  { %v8028_v4 = vpop.f32.mrf.mxu1 }
 0x685   :  { %9412 = vst [vmem:[#allocation21_spill] sm:$0xff] %v8028_v4  ;;  %v8222_v4 = vld [vmem:[%s9123_s3 + $0x68] sm:$0xff] }
 0x686   :  { %v8030_v17 = vpop.f32.mrf.mxu0  ;;  %9429 = vst [vmem:[#allocation67_spill] sm:$0xff] %v8222_v4 }
 0x687   :  { %9413 = vst [vmem:[#allocation27_spill] sm:$0xff] %v8030_v17 }
 0x68c   :  { %v8036_v14 = vpop.f32.mrf.mxu1 }
 0x68d   :  { %9414 = vst [vmem:[#allocation52_spill] sm:$0xff] %v8036_v14 }
 0x68e   :  { %v8038_v27 = vpop.f32.mrf.mxu0 }
 0x68f   :  { %9415 = vst [vmem:[#allocation53_spill] sm:$0xff] %v8038_v27 }
 0x694   :  { %v3866_v61 = vpop.f32.mrf.mxu1 }
 0x695   :  { %v3867_v55 = vadd.f32 %v3866_v61, %v3785_v32 }
 0x696   :  { %v8042_v22 = vpop.f32.mrf.mxu0 }
 0x697   :  { %9416 = vst [vmem:[#allocation54_spill] sm:$0xff] %v8042_v22  ;;  %v8044_v46 = vmax.f32 %v3867_v55, 0.0 }
 0x699   :  { %9417 = vst [vmem:[#allocation55_spill] sm:$0xff] %v8044_v46  ;;  %3940 = vrot.lane.b32.xlu0 %v8044_v46, %s4974_s23  ;;  %4178 = vrot.lane.b32.xlu1 %v8044_v46, %s4979_s28 }
 0x69a   :  { %4032 = vrot.lane.b32.xlu2 %v8044_v46, %s4976_s25 }
 0x69c   :  { %v3869_v59 = vpop.f32.mrf.mxu1 }
 0x69d   :  { %v3870_v51 = vadd.f32 %v3869_v59, %v3790_v5 }
 0x69e   :  { %v3837_v44 = vpop.f32.mrf.mxu0 }
 0x69f   :  { %v8052_v1 = vmax.f32 %v3870_v51, 0.0  ;;  %v3838_v29 = vadd.f32 %v3837_v44, %v3785_v32 }
 0x6a1   :  { %9418 = vst [vmem:[#allocation56_spill] sm:$0xff] %v8052_v1  ;;  %v8054_v35 = vmax.f32 %v3838_v29, 0.0  ;;  %4034 = vrot.lane.b32.xlu1 %v8052_v1, %s4976_s25 }
 0x6a2   :  { %3986 = vrot.lane.b32.xlu2 %v8044_v46, %s4975_s24 }
 0x6a3   :  { %9419 = vst [vmem:[#allocation57_spill] sm:$0xff] %v8054_v35  ;;  %4024 = vrot.lane.b32.xlu0 %v8054_v35, %s4976_s25 }
 0x6a4   :  { %v3872_v23 = vpop.f32.mrf.mxu1 }
 0x6a5   :  { %v3873_v57 = vadd.f32 %v3872_v23, %v3795_v39 }
 0x6a6   :  { %v3840_v6 = vpop.f32.mrf.mxu0 }
 0x6a7   :  { %v8070_v37 = vmax.f32 %v3873_v57, 0.0  ;;  %v3841_v60 = vadd.f32 %v3840_v6, %v3790_v5  ;;  %v8151_v6 = vld [vmem:[%s9123_s3 + $0x20] sm:$0xff] }
 0x6a8   :  { %9425 = vst [vmem:[#allocation63_spill] sm:$0xff] %v8151_v6  ;;  %3319 = vmatmul.f32.vlgmr.msrb.gmra.mxu3 %v8151_v6  ;;  %3442 = vmatmul.f32.gmra.mxu2 %v8151_v6 }
 0x6a9   :  { %3988 = vrot.lane.b32.xlu1 %v8052_v1, %s4975_s24  ;;  %9420 = vst [vmem:[#allocation58_spill] sm:$0xff] %v8070_v37  ;;  %v8078_v19 = vmax.f32 %v3841_v60, 0.0 }
 0x6aa   :  { %4132 = vrot.lane.b32.xlu2 %v8044_v46, %s4978_s27 }
 0x6ab   :  { %4170 = vrot.lane.b32.xlu0 %v8054_v35, %s4979_s28  ;;  %9421 = vst [vmem:[#allocation59_spill] sm:$0xff] %v8078_v19 }
 0x6ac   :  { %v3875_v2 = vpop.f32.mrf.mxu1 }
 0x6ad   :  { %v3876_v32 = vadd.f32 %v3875_v2, %v8034_v10 }
 0x6ae   :  { %v3843_v55 = vpop.f32.mrf.mxu0 }
 0x6af   :  { %v8099_v61 = vmax.f32 %v3876_v32, 0.0  ;;  %v3844_v5 = vadd.f32 %v3843_v55, %v3795_v39  ;;  %v8166_v32 = vld [vmem:[%s9123_s3 + $0x38] sm:$0xff] }
 0x6b0   :  { %9426 = vst [vmem:[#allocation64_spill] sm:$0xff] %v8166_v32  ;;  %3322 = vmatmul.f32.gmra.mxu3 %v8166_v32  ;;  %3445 = vmatmul.f32.gmra.mxu2 %v8166_v32 }
 0x6b1   :  { %3978 = vrot.lane.b32.xlu1 %v8054_v35, %s4975_s24  ;;  %9422 = vst [vmem:[#allocation60_spill] sm:$0xff] %v8099_v61  ;;  %v8107_v59 = vmax.f32 %v3844_v5, 0.0 }
 0x6b2   :  { %4180 = vrot.lane.b32.xlu2 %v8052_v1, %s4979_s28 }
 0x6b3   :  { %3990 = vrot.lane.b32.xlu0 %v8070_v37, %s4975_s24  ;;  %9423 = vst [vmem:[#allocation61_spill] sm:$0xff] %v8107_v59 }
 0x6b6   :  { %v3846_v44 = vpop.f32.mrf.mxu0 }
 0x6b7   :  { %v3847_v23 = vadd.f32 %v3846_v44, %v8034_v10 }
 0x6b9   :  { %4134 = vrot.lane.b32.xlu1 %v8052_v1, %s4978_s27  ;;  %v8140_v39 = vmax.f32 %v3847_v23, 0.0  ;;  %v8183_v23 = vld [vmem:[%s9123_s3 + $0x50] sm:$0xff] }
 0x6ba   :  { %3942 = vrot.lane.b32.xlu2 %v8052_v1, %s4974_s23  ;;  %9427 = vst [vmem:[#allocation65_spill] sm:$0xff] %v8183_v23  ;;  %3325 = vmatmul.f32.gmra.mxu3 %v8183_v23 }
 0x6bb   :  { %3980 = vrot.lane.b32.xlu0 %v8078_v19, %s4975_s24  ;;  %9424 = vst [vmem:[#allocation62_spill] sm:$0xff] %v8140_v39  ;;  %3448 = vmatmul.f32.gmra.mxu2 %v8183_v23  ;;  %v9437_v23 = vld [vmem:[#allocation4_spill] sm:$0xff] }
 0x6c1   :  { %4124 = vrot.lane.b32.xlu1 %v8054_v35, %s4978_s27 }
 0x6c2   :  { %3932 = vrot.lane.b32.xlu2 %v8054_v35, %s4974_s23  ;;  %3328 = vmatmul.f32.gmra.mxu3 %v8222_v4 }
 0x6c3   :  { %4136 = vrot.lane.b32.xlu0 %v8070_v37, %s4978_s27  ;;  %3451 = vmatmul.f32.gmra.mxu2 %v8222_v4  ;;  %v9436_v4 = vld [vmem:[#allocation43_spill] sm:$0xff] }
 0x6c9   :  { %4036 = vrot.lane.b32.xlu1 %v8070_v37, %s4976_s25 }
 0x6ca   :  { %4088 = vrot.lane.b32.xlu2 %v8052_v1, %s4977_s26  ;;  %3331 = vmatmul.f32.gmra.mxu3 %v8245_v56 }
 0x6cb   :  { %4126 = vrot.lane.b32.xlu0 %v8078_v19, %s4978_s27  ;;  %3454 = vmatmul.f32.gmra.mxu2 %v8245_v56 }
 0x6d1   :  { %4182 = vrot.lane.b32.xlu1 %v8070_v37, %s4979_s28 }
 0x6d2   :  { %4026 = vrot.lane.b32.xlu2 %v8078_v19, %s4976_s25  ;;  %3334 = vmatmul.f32.gmra.mxu3 %v8262_v43 }
 0x6d3   :  { %3946 = vrot.lane.b32.xlu0 %v8099_v61, %s4974_s23  ;;  %3457 = vmatmul.f32.gmra.mxu2 %v8262_v43  ;;  %v9435_v43 = vld [vmem:[#allocation13_spill] sm:$0xff] }
 0x6d4   :  { %v2109_v56 = vadd.f32 %v9435_v43, %v9434_v47 }
 0x6d9   :  { %4172 = vrot.lane.b32.xlu1 %v8078_v19, %s4979_s28 }
 0x6da   :  { %4028 = vrot.lane.b32.xlu2 %v8107_v59, %s4976_s25  ;;  %3337 = vmatmul.f32.gmra.mxu3 %v8285_v12 }
 0x6db   :  { %3936 = vrot.lane.b32.xlu0 %v8107_v59, %s4974_s23  ;;  %3460 = vmatmul.f32.gmra.mxu2 %v8285_v12  ;;  %v9442_v12 = vld [vmem:[#allocation12_spill] sm:$0xff] }
 0x6e1   :  { %3944 = vrot.lane.b32.xlu1 %v8070_v37, %s4974_s23 }
 0x6e2   :  { %4174 = vrot.lane.b32.xlu2 %v8107_v59, %s4979_s28  ;;  %4859 = vmatmul.msk.f32.vlgmr.msra.gmra.mxu3 %vm885_vm10, %v7802_v33 }
 0x6e3   :  { %4092 = vrot.lane.b32.xlu0 %v8099_v61, %s4977_s26 }
 0x6e9   :  { %3934 = vrot.lane.b32.xlu1 %v8078_v19, %s4974_s23 }
 0x6ea   :  { %3992 = vrot.lane.b32.xlu2 %v8099_v61, %s4975_s24  ;;  %4860 = vmatmul.msk.f32.gmra.mxu3 %vm885_vm10, %v7839_v25 }
 0x6eb   :  { %4082 = vrot.lane.b32.xlu0 %v8107_v59, %s4977_s26 }
 0x6f1   :  { %4090 = vrot.lane.b32.xlu1 %v8070_v37, %s4977_s26 }
 0x6f2   :  { %3982 = vrot.lane.b32.xlu2 %v8107_v59, %s4975_s24  ;;  %4861 = vmatmul.msk.f32.gmra.mxu3 %vm885_vm10, %v7865_v16 }
 0x6f3   :  { %4086 = vrot.lane.b32.xlu0 %v8044_v46, %s4977_s26 }
 0x6f4   :  { %v4033_v51 = vpop.permute.xlu2 %4032 }
 0x6f9   :  { %4080 = vrot.lane.b32.xlu1 %v8078_v19, %s4977_s26 }
 0x6fa   :  { %4138 = vrot.lane.b32.xlu2 %v8099_v61, %s4978_s27  ;;  %4862 = vmatmul.msk.f32.gmra.mxu3 %vm885_vm10, %v7894_v0  ;;  %v9449_v0 = vld [vmem:[#allocation44_spill] sm:$0xff] }
 0x6fb   :  { %3888 = vrot.lane.b32.xlu0 %v8078_v19, %s4980_s29 }
 0x6fc   :  { %v3987_v29 = vpop.permute.xlu2 %3986 }
 0x701   :  { %4038 = vrot.lane.b32.xlu1 %v8099_v61, %s4976_s25 }
 0x702   :  { %4128 = vrot.lane.b32.xlu2 %v8107_v59, %s4978_s27  ;;  %4863 = vmatmul.msk.f32.gmra.mxu3 %vm885_vm10, %v7915_v26  ;;  %v9452_v26 = vld [vmem:[#allocation9_spill] sm:$0xff] }
 0x703   :  { %3892 = vrot.lane.b32.xlu0 %v8140_v39, %s4980_s29 }
 0x704   :  { %v4133_v57 = vpop.permute.xlu2 %4132 }
 0x709   :  { %4184 = vrot.lane.b32.xlu1 %v8099_v61, %s4979_s28 }
 0x70a   :  { %4030 = vrot.lane.b32.xlu2 %v8140_v39, %s4976_s25  ;;  %4864 = vmatmul.msk.f32.gmra.mxu3 %vm885_vm10, %v7929_v38 }
 0x70b   :  { %v4179_v10 = vpop.permute.xlu1 %4178  ;;  %3894 = vrot.lane.b32.xlu0 %v8044_v46, %s4980_s29  ;;  %v3941_v2 = vpop.permute.xlu0 %3940 }
 0x70c   :  { %v8161_v60 = vpop.permute.xlu2 %4180 }
 0x711   :  { %3984 = vrot.lane.b32.xlu1 %v8140_v39, %s4975_s24 }
 0x712   :  { %4176 = vrot.lane.b32.xlu2 %v8140_v39, %s4979_s28  ;;  %4865 = vmatmul.msk.f32.gmra.mxu3 %vm885_vm10, %v7939_v54 }
 0x713   :  { %v8174_v55 = vpop.permute.xlu1 %4034  ;;  %4220 = vrot.lane.b32.xlu0 %v8107_v59, %s4981_s8 }
 0x714   :  { %v8178_v5 = vpop.permute.xlu2 %3942 }
 0x715   :  { %v4025_v44 = vpop.permute.xlu0 %4024 }
 0x716   :  { %v8187_v22 = vsel %vm110_vm1, %v4025_v44, %v4033_v51  ;;  %v8191_v14 = vsel %vm110_vm1, %v4033_v51, %v4025_v44 }
 0x719   :  { %4130 = vrot.lane.b32.xlu1 %v8140_v39, %s4978_s27 }
 0x71a   :  { %4078 = vrot.lane.b32.xlu2 %v8054_v35, %s4977_s26  ;;  %4866 = vmatmul.msk.f32.gmra.mxu3 %vm885_vm10, %v7953_v52 }
 0x71b   :  { %v8199_v36 = vpop.permute.xlu1 %3988  ;;  %4226 = vrot.lane.b32.xlu0 %v8052_v1, %s4981_s8 }
 0x71c   :  { %v3933_v8 = vpop.permute.xlu2 %3932 }
 0x71d   :  { %v8205_v51 = vsel %vm58_vm0, %v3933_v8, %v3941_v2  ;;  %v8209_v44 = vsel %vm58_vm0, %v3941_v2, %v3933_v8  ;;  %v4171_v20 = vpop.permute.xlu0 %4170 }
 0x71e   :  { %v8213_v18 = vsel %vm198_vm4, %v4171_v20, %v4179_v10  ;;  %v8217_v27 = vsel %vm198_vm4, %v4179_v10, %v4171_v20 }
 0x71f   :  { %9428 = vst [vmem:[#allocation66_spill] sm:$0xff] %v8217_v27 }
 0x721   :  { %3900 = vrot.lane.b32.xlu1 %v8099_v61, %s4980_s29 }
 0x722   :  { %3938 = vrot.lane.b32.xlu2 %v8140_v39, %s4974_s23 }
 0x723   :  { %v3979_v8 = vpop.permute.xlu1 %3978 }
 0x724   :  { %v8230_v2 = vpop.permute.xlu2 %4088  ;;  %v8234_v20 = vsel %vm87_vm7, %v3979_v8, %v3987_v29  ;;  %v8238_v10 = vsel %vm87_vm7, %v3987_v29, %v3979_v8 }
 0x725   :  { %v8240_v53 = vpop.permute.xlu0 %3990 }
 0x729   :  { %3890 = vrot.lane.b32.xlu1 %v8107_v59, %s4980_s29 }
 0x72a   :  { %4084 = vrot.lane.b32.xlu2 %v8140_v39, %s4977_s26 }
 0x72b   :  { %v8253_v28 = vpop.permute.xlu1 %4134 }
 0x72c   :  { %v8255_v29 = vpop.permute.xlu2 %4026 }
 0x72d   :  { %v8257_v8 = vpop.permute.xlu0 %3980 }
 0x731   :  { %3896 = vrot.lane.b32.xlu1 %v8052_v1, %s4980_s29  ;;  %v2232_v1 = vadd.f32 %v9436_v4, %v9434_v47  ;;  %v9438_v47 = vld [vmem:[#allocation8_spill] sm:$0xff] }
 0x732   :  { %3898 = vrot.lane.b32.xlu2 %v8070_v37, %s4980_s29 }
 0x733   :  { %v4125_v50 = vpop.permute.xlu1 %4124 }
 0x734   :  { %v8270_v17 = vpop.permute.xlu2 %4028  ;;  %v8274_v9 = vsel %vm175_vm3, %v4125_v50, %v4133_v57  ;;  %v8278_v21 = vsel %vm175_vm3, %v4133_v57, %v4125_v50  ;;  %v2150_v50 = vadd.f32 %v9437_v23, %v2109_v56  ;;  %v2273_v57 = vadd.f32 %v7945_v45, %v2232_v1  ;;  %v9440_v56 = vld [vmem:[#allocation16_spill] sm:$0xff]  ;;  %v9441_v1 = vld [vmem:[#allocation19_spill] sm:$0xff] }
 0x735   :  { %9432 = vst [vmem:[#allocation70_spill] sm:$0xff] %v8278_v21  ;;  %v8280_v42 = vpop.permute.xlu0 %4136  ;;  %v2118_v23 = vadd.f32 %v9441_v1, %v9440_v56 }
 0x736   :  { %v2314_v32 = vadd.f32 %v7943_v11, %v2273_v57  ;;  %v2191_v4 = vadd.f32 %v9438_v47, %v2150_v50  ;;  %v2241_v11 = vadd.f32 %v9442_v12, %v9440_v56  ;;  %v9443_v50 = vld [vmem:[#allocation34_spill] sm:$0xff] }
 0x737   :  { %v2159_v47 = vadd.f32 %v9443_v50, %v2118_v23 }
 0x738   :  { %v2337_v57 = vmax.f32 %v2314_v32, 0.0  ;;  %v2282_v6 = vadd.f32 %v7989_v15, %v2241_v11  ;;  %v9445_v15 = vld [vmem:[#allocation24_spill] sm:$0xff] }
 0x739   :  { %4228 = vrot.lane.b32.xlu1 %v8070_v37, %s4981_s8  ;;  %v2336_v37 = vmax.f32 %v2191_v4, 0.0  ;;  %v2200_v4 = vadd.f32 %v9445_v15, %v2159_v47  ;;  %v9448_v15 = vld [vmem:[#allocation22_spill] sm:$0xff] }
 0x73a   :  { %3886 = vrot.lane.b32.xlu2 %v8054_v35, %s4980_s29  ;;  %v2323_v1 = vadd.f32 %v7982_v48, %v2282_v6 }
 0x73b   :  { %v8300_v43 = vpop.permute.xlu1 %4036  ;;  %v2353_v12 = vadd.f32 %v2337_v57, %v2336_v37  ;;  %v2342_v23 = vmax.f32 %v2200_v4, 0.0  ;;  %v2112_v4 = vadd.f32 %v9448_v15, %v8032_v41  ;;  %v9453_v15 = vld [vmem:[#allocation41_spill] sm:$0xff] }
 0x73c   :  { %v8302_v3 = vpop.permute.xlu2 %4174  ;;  %v2343_v56 = vmax.f32 %v2323_v1, 0.0 }
 0x73d   :  { %v8305_v21 = vpop.permute.xlu0 %4126 }
 0x73e   :  { %v8311_v45 = vsel %vm175_vm3, %v8253_v28, %v8305_v21  ;;  %v2362_v37 = vadd.f32 %v2343_v56, %v2342_v23  ;;  %v2235_v56 = vadd.f32 %v9449_v0, %v8032_v41  ;;  %v9454_v0 = vld [vmem:[#allocation28_spill] sm:$0xff] }
 0x73f   :  { %9439 = vst [vmem:[#allocation25_spill] sm:$0xff] %v8311_v45 }
 0x740   :  { %v2276_v27 = vadd.f32 %v7964_v49, %v2235_v56 }
 0x741   :  { %4222 = vrot.lane.b32.xlu1 %v8140_v39, %s4981_s8 }
 0x742   :  { %4230 = vrot.lane.b32.xlu2 %v8099_v61, %s4981_s8  ;;  %v2317_v41 = vadd.f32 %v7958_v13, %v2276_v27 }
 0x743   :  { %v8326_v45 = vpop.permute.xlu1 %4182 }
 0x744   :  { %v8328_v32 = vpop.permute.xlu2 %3992  ;;  %v8334_v33 = vsel %vm198_vm4, %v8326_v45, %v8302_v3  ;;  %v4188_v52 = vsel %vm198_vm4, %v8302_v3, %v8326_v45 }
 0x745   :  { %9444 = vst [vmem:[#allocation13_spill] sm:$0xff] %v8334_v33  ;;  %2354 = vadd.xlane.f32.xlu0 %v2353_v12  ;;  %v8361_v50 = vpop.permute.xlu0 %3946  ;;  %v2244_v33 = vadd.f32 %v9452_v26, %v8058_v62 }
 0x749   :  { %4216 = vrot.lane.b32.xlu1 %v8054_v35, %s4981_s8 }
 0x74a   :  { %4218 = vrot.lane.b32.xlu2 %v8078_v19, %s4981_s8  ;;  %v9455_v19 = vld [vmem:[#allocation7_spill] sm:$0xff] }
 0x74b   :  { %v8343_v48 = vpop.permute.xlu1 %4172  ;;  %v2238_v59 = vadd.f32 %v9455_v19, %v9454_v0  ;;  %v2339_v19 = vmax.f32 %v2317_v41, 0.0 }
 0x74c   :  { %v8345_v6 = vpop.permute.xlu2 %3982  ;;  %v8351_v11 = vsel %vm198_vm4, %v8161_v60, %v8343_v48 }
 0x74d   :  { %9446 = vst [vmem:[#allocation43_spill] sm:$0xff] %v8351_v11  ;;  %2363 = vadd.xlane.f32.xlu0 %v2362_v37  ;;  %v8377_v12 = vpop.permute.xlu0 %3936  ;;  %v2279_v38 = vadd.f32 %v7974_v30, %v2238_v59  ;;  %v4895_v30 = vld [vmem:[%s9119_s5 + $0x6] sm:$0x3] }
 0x74e   :  { %v9460_v59 = vld [vmem:[#allocation17_spill] sm:$0xff] }
 0x752   :  { %4224 = vrot.lane.b32.xlu2 %v8044_v46, %s4981_s8  ;;  %v9450_v46 = vld [vmem:[#allocation5_spill] sm:$0xff] }
 0x753   :  { %v8357_v25 = vpop.permute.xlu1 %3944  ;;  %v2153_v61 = vadd.f32 %v9450_v46, %v2112_v4  ;;  %v9456_v46 = vld [vmem:[#allocation33_spill] sm:$0xff]  ;;  %v2285_v4 = vadd.f32 %v7994_v31, %v2244_v33  ;;  %v2320_v31 = vadd.f32 %v7971_v63, %v2279_v38  ;;  %v9459_v33 = vld [vmem:[#allocation39_spill] sm:$0xff] }
 0x754   :  { %v8359_v57 = vpop.permute.xlu2 %4138 }
 0x755   :  { %v2194_v35 = vadd.f32 %v9453_v15, %v2153_v61  ;;  %v8397_v39 = vpop.permute.xlu0 %4092  ;;  %v9458_v61 = vld [vmem:[#allocation46_spill] sm:$0xff]  ;;  %v2341_v38 = vmax.f32 %v2320_v31, 0.0  ;;  %v9463_v31 = vld [vmem:[#allocation32_spill] sm:$0xff] }
 0x757   :  { %v2338_v27 = vmax.f32 %v2194_v35, 0.0  ;;  %v9461_v35 = vld [vmem:[#allocation35_spill] sm:$0xff] }
 0x758   :  { %v2247_v41 = vadd.f32 %v9461_v35, %v8040_v34 }
 0x75b   :  { %v8365_v47 = vpop.permute.xlu1 %3934 }
 0x75c   :  { %v8367_v1 = vpop.permute.xlu2 %4128 }
 0x75d   :  { %v8373_v16 = vsel %vm175_vm3, %v8280_v42, %v8367_v1 }
 0x75e   :  { %9447 = vst [vmem:[#allocation4_spill] sm:$0xff] %v8373_v16  ;;  %v9451_v16 = vld [vmem:[#allocation15_spill] sm:$0xff] }
 0x75f   :  { %v2121_v11 = vadd.f32 %v9451_v16, %v8058_v62  ;;  %v9457_v62 = vld [vmem:[#allocation6_spill] sm:$0xff] }
 0x760   :  { %v2115_v56 = vadd.f32 %v9457_v62, %v9454_v0  ;;  %v2326_v0 = vadd.f32 %v7991_v7, %v2285_v4  ;;  %v2356_v62 = vadd.f32 %v2339_v19, %v2338_v27  ;;  %v4051_v7 = vperm.slane %v4895_v30, 1  ;;  %v8436_v27 = vpop.permute.xlu0 %4082 }
 0x761   :  { %v2162_v49 = vadd.f32 %v9456_v46, %v2121_v11  ;;  %v2124_v46 = vadd.f32 %v9460_v59, %v8040_v34  ;;  %v4046_v34 = vsel %vm110_vm1, %v8300_v43, %v8270_v17 }
 0x762   :  { %v2156_v11 = vadd.f32 %v9458_v61, %v2115_v56  ;;  %v9462_v56 = vld [vmem:[#allocation36_spill] sm:$0xff]  ;;  %v4050_v61 = vperm.slane %v4895_v30, 0 }
 0x763   :  { %v8383_v23 = vpop.permute.xlu1 %4090  ;;  %v2203_v15 = vadd.f32 %v9459_v33, %v2162_v49  ;;  %v2345_v49 = vmax.f32 %v2326_v0, 0.0  ;;  %v4042_v33 = vsel %vm110_vm1, %v8270_v17, %v8300_v43  ;;  %v2288_v0 = vadd.f32 %v7998_v40, %v2247_v41  ;;  %v8457_v40 = vld [vmem:[%s9119_s5 + $0xe] sm:$0x3] }
 0x764   :  { %v4031_v37 = vpop.permute.xlu2 %4030  ;;  %v2197_v63 = vadd.f32 %v9462_v56, %v2156_v11  ;;  %v4041_v17 = vsel %vm110_vm1, %v8255_v29, %v8174_v55  ;;  %v4045_v43 = vsel %vm110_vm1, %v8174_v55, %v8255_v29  ;;  %v4059_v56 = vmul.f32 %v4051_v7, %v4042_v33  ;;  %v9464_v41 = vld [vmem:[#allocation14_spill] sm:$0xff] }
 0x765   :  { %v2344_v54 = vmax.f32 %v2203_v15, 0.0  ;;  %v2165_v15 = vadd.f32 %v9463_v31, %v2124_v46  ;;  %v4056_v29 = vmul.f32 %v4050_v61, %v4045_v43  ;;  %v4057_v33 = vmul.f32 %v4051_v7, %v4041_v17 }
 0x766   :  { %v4000_v17 = vsel %vm87_vm7, %v8240_v53, %v8345_v6 }
 0x767   :  { %v2365_v55 = vadd.f32 %v2345_v49, %v2344_v54  ;;  %v4894_v54 = vld [vmem:[%s9119_s5 + $0x4] sm:$0x3] }
 0x76b   :  { %v8401_v16 = vpop.permute.xlu1 %4080 }
 0x76c   :  { %v8406_v26 = vpop.permute.xlu2 %4176  ;;  %v8412_v13 = vsel %vm146_vm2, %v8230_v2, %v8401_v16 }
 0x773   :  { %2357 = vadd.xlane.f32.xlu1 %v2356_v62  ;;  %v4039_v4 = vpop.permute.xlu1 %4038  ;;  %v2340_v62 = vmax.f32 %v2197_v63, 0.0  ;;  %v2206_v63 = vadd.f32 %v9464_v41, %v2165_v15 }
 0x774   :  { %v4043_v19 = vsel %vm110_vm1, %v4031_v37, %v4039_v4  ;;  %v4047_v11 = vsel %vm110_vm1, %v4039_v4, %v4031_v37  ;;  %v8444_v30 = vpop.permute.xlu2 %4078  ;;  %v4058_v37 = vmul.f32 %v4050_v61, %v4046_v34  ;;  %v2329_v4 = vadd.f32 %v7996_v58, %v2288_v0 }
 0x775   :  { %v4060_v59 = vmul.f32 %v4050_v61, %v4047_v11  ;;  %v4061_v35 = vmul.f32 %v4051_v7, %v4043_v19  ;;  %v2359_v46 = vadd.f32 %v2341_v38, %v2340_v62  ;;  %v4054_v34 = vmul.f32 %v4050_v61, %v8191_v14 }
 0x776   :  { %v4196_v19 = vperm.slane %v8457_v40, 0  ;;  %v4055_v38 = vmul.f32 %v4051_v7, %v8187_v22  ;;  %v2346_v49 = vmax.f32 %v2206_v63, 0.0  ;;  %v2347_v61 = vmax.f32 %v2329_v4, 0.0  ;;  %v8480_v7 = vpop.permute.xlu0 %4086 }
 0x777   :  { %4430 = vmatpush.msrb.mxu0 %v4060_v59  ;;  %4553 = vmatpush.msrb.mxu3 %v4061_v35  ;;  %v4187_v22 = vsel %vm198_vm4, %v8343_v48, %v8161_v60  ;;  %v4004_v59 = vperm.slane %v4894_v54, 0  ;;  %v4005_v35 = vperm.slane %v4894_v54, 1  ;;  %v8486_v48 = vpop.f32.mrf.mxu2  ;;  %v3996_v62 = vsel %vm87_vm7, %v8345_v6, %v8240_v53  ;;  %v4893_v6 = vld [vmem:[%s9119_s5 + $0x2] sm:$0x3] }
 0x778   :  { %v4204_v3 = vmul.f32 %v4196_v19, %v4188_v52  ;;  %v4202_v31 = vmul.f32 %v4196_v19, %v4187_v22  ;;  %v2368_v15 = vadd.f32 %v2347_v61, %v2346_v49  ;;  %v4200_v0 = vmul.f32 %v4196_v19, %v8213_v18 }
 0x779   :  { %4431 = vmatpush.msrb.mxu0 %v4058_v37  ;;  %4554 = vmatpush.msrb.mxu3 %v4059_v56  ;;  %v3999_v53 = vsel %vm87_vm7, %v8199_v36, %v8257_v8  ;;  %v4012_v41 = vmul.f32 %v4004_v59, %v4000_v17  ;;  %v4013_v63 = vmul.f32 %v4005_v35, %v3996_v62 }
 0x77a   :  { %v3954_v49 = vsel %vm58_vm0, %v8357_v25, %v8377_v12 }
 0x77b   :  { %2360 = vadd.xlane.f32.xlu2 %v2359_v46  ;;  %2366 = vadd.xlane.f32.xlu1 %v2365_v55  ;;  %v8465_v11 = vpop.permute.xlu1 %4184  ;;  %v3995_v46 = vsel %vm87_vm7, %v8257_v8, %v8199_v36  ;;  %v4010_v55 = vmul.f32 %v4004_v59, %v3999_v53  ;;  %v3958_v36 = vperm.slane %v4893_v6, 0 }
 0x77c   :  { %4432 = vmatpush.msrb.mxu0 %v4056_v29  ;;  %4555 = vmatpush.msrb.mxu3 %v4057_v33  ;;  %v4189_v58 = vsel %vm198_vm4, %v8406_v26, %v8465_v11  ;;  %v3939_v45 = vpop.permute.xlu2 %3938  ;;  %v4011_v29 = vmul.f32 %v4005_v35, %v3995_v46 }
 0x77d   :  { %v4206_v14 = vmul.f32 %v4196_v19, %v4189_v58  ;;  %v3955_v8 = vsel %vm58_vm0, %v8361_v50, %v3939_v45  ;;  %v4009_v19 = vmul.f32 %v4005_v35, %v8234_v20  ;;  %v3951_v52 = vsel %vm58_vm0, %v3939_v45, %v8361_v50 }
 0x77e   :  { %4433 = vmatpush.msrb.mxu0 %v4054_v34  ;;  %4556 = vmatpush.msrb.mxu3 %v4055_v38  ;;  %v8518_v4 = vpop.permute.xlu0 %3888  ;;  %v4008_v34 = vmul.f32 %v4004_v59, %v8238_v10  ;;  %v4142_v20 = vsel %vm175_vm3, %v8367_v1, %v8280_v42  ;;  %v3950_v50 = vsel %vm58_vm0, %v8377_v12, %v8357_v25  ;;  %v3910_v25 = vld [vmem:[%s9119_s5] sm:$0x3] }
 0x77f   :  { %4471 = vmatpush.msrb.mxu1 %v4206_v14  ;;  %v3959_v14 = vperm.slane %v4893_v6, 1  ;;  %v3968_v61 = vmul.f32 %v3958_v36, %v3955_v8  ;;  %v4141_v42 = vsel %vm175_vm3, %v8305_v21, %v8253_v28  ;;  %v3953_v1 = vsel %vm58_vm0, %v8178_v5, %v8365_v47  ;;  %v8566_v28 = vpop.f32.mrf.mxu3  ;;  %v8610_v8 = vld [vmem:[%s9122_s4 + $0x8] sm:$0xff] }
 0x780   :  { %v3966_v12 = vmul.f32 %v3958_v36, %v3954_v49  ;;  %v3962_v17 = vmul.f32 %v3958_v36, %v8209_v44 }
 0x781   :  { %4472 = vmatpush.msrb.mxu1 %v4204_v3  ;;  %v8549_v3 = vpop.f32.mrf.mxu2  ;;  %v3969_v45 = vmul.f32 %v3959_v14, %v3951_v52  ;;  %v3967_v21 = vmul.f32 %v3959_v14, %v3950_v50 }
 0x783   :  { %2369 = vadd.xlane.f32.xlu2 %v2368_v15  ;;  %4473 = vmatpush.msrb.mxu1 %v4202_v31  ;;  %v3985_v60 = vpop.permute.xlu1 %3984  ;;  %v3949_v31 = vsel %vm58_vm0, %v8365_v47, %v8178_v5  ;;  %v8580_v5 = vld [vmem:[%s9122_s4 + $0x38] sm:$0xff] }
 0x784   :  { %v3997_v18 = vsel %vm87_vm7, %v3985_v60, %v8328_v32  ;;  %v4001_v43 = vsel %vm87_vm7, %v8328_v32, %v3985_v60  ;;  %v8516_v32 = vld [vmem:[%s9119_s5 + $0xc] sm:$0x3]  ;;  %v8520_v33 = vpop.permute.xlu2 %4084  ;;  %v8575_v60 = vperm.slane %v3910_v25, 1  ;;  %v3965_v47 = vmul.f32 %v3959_v14, %v3949_v31 }
 0x785   :  { %v4014_v37 = vmul.f32 %v4004_v59, %v4001_v43  ;;  %v4015_v56 = vmul.f32 %v4005_v35, %v3997_v18  ;;  %4474 = vmatpush.msrb.mxu1 %v4200_v0  ;;  %v4150_v38 = vperm.slane %v8516_v32, 0  ;;  %v3964_v0 = vmul.f32 %v3958_v36, %v3953_v1  ;;  %v8571_v59 = vld [vmem:[%s9119_s5 + $0xa] sm:$0x3]  ;;  %v3190_v1 = vld [vmem:[%s9122_s4 + $0x18] sm:$0xff] }
 0x786   :  { %v8573_v35 = vperm.slane %v3910_v25, 0  ;;  %v3893_v62 = vpop.permute.xlu0 %3892  ;;  %v3963_v18 = vmul.f32 %v3959_v14, %v8205_v51  ;;  %v4097_v43 = vsel %vm146_vm2, %v8520_v33, %v8397_v39  ;;  %v4104_v53 = vperm.slane %v8571_v59, 0  ;;  %v9466_v25 = vld [vmem:[#allocation61_spill] sm:$0xff] }
 0x787   :  { %4434 = vmatpush.msrb.mxu0 %v4014_v37  ;;  %4557 = vmatpush.msrb.mxu3 %v4015_v56  ;;  %v4158_v54 = vmul.f32 %v4150_v38, %v4142_v20  ;;  %v4156_v15 = vmul.f32 %v4150_v38, %v4141_v42  ;;  %v4154_v46 = vmul.f32 %v4150_v38, %v8274_v9  ;;  %v8632_v42 = vld [vmem:[%s9122_s4 + $0x28] sm:$0xff] }
 0x788   :  { %v4096_v51 = vsel %vm146_vm2, %v8436_v27, %v8383_v23 }
 0x789   :  { %4435 = vmatpush.msrb.mxu0 %v4012_v41  ;;  %4558 = vmatpush.msrb.mxu3 %v4013_v63  ;;  %v4114_v63 = vmul.f32 %v4104_v53, %v4097_v43  ;;  %v4112_v36 = vmul.f32 %v4104_v53, %v4096_v51  ;;  %v4193_v43 = vsel %vm198_vm4, %v8465_v11, %v8406_v26  ;;  %v8676_v26 = vld [vmem:[%s9122_s4 + $0x30] sm:$0xff] }
 0x78b   :  { %v8531_v58 = vpop.permute.xlu1 %4130  ;;  %4436 = vmatpush.msrb.mxu0 %v4010_v55  ;;  %4559 = vmatpush.msrb.mxu3 %v4011_v29  ;;  %v4095_v55 = vsel %vm146_vm2, %v8401_v16, %v8230_v2  ;;  %v8605_v29 = vpop.f32.mrf.mxu2  ;;  %v3187_v2 = vld [vmem:[%s9122_s4] sm:$0xff] }
 0x78c   :  { %v4143_v10 = vsel %vm175_vm3, %v8531_v58, %v8359_v57  ;;  %v3899_v37 = vpop.permute.xlu2 %3898  ;;  %v4110_v16 = vmul.f32 %v4104_v53, %v4095_v55 }
 0x78d   :  { %v4160_v22 = vmul.f32 %v4150_v38, %v4143_v10  ;;  %4437 = vmatpush.msrb.mxu0 %v4008_v34  ;;  %4560 = vmatpush.msrb.mxu3 %v4009_v19  ;;  %v4094_v34 = vsel %vm146_vm2, %v8444_v30, %v8480_v7  ;;  %v8619_v19 = vpop.f32.mrf.mxu3 }
 0x78e   :  { %v4108_v52 = vmul.f32 %v4104_v53, %v4094_v34  ;;  %v3895_v14 = vpop.permute.xlu0 %3894 }
 0x78f   :  { %4438 = vmatpush.msrb.mxu0 %v3968_v61  ;;  %4475 = vmatpush.msrb.mxu1 %v4160_v22  ;;  %v9465_v22 = vld [vmem:[#allocation62_spill] sm:$0xff] }
 0x790   :  { %4561 = vmatpush.msrb.mxu3 %v3969_v45 }
 0x791   :  { %4439 = vmatpush.msrb.mxu0 %v3966_v12  ;;  %4476 = vmatpush.msrb.mxu1 %v4158_v54 }
 0x792   :  { %4562 = vmatpush.msrb.mxu3 %v3967_v21 }
 0x793   :  { %v3901_v56 = vpop.permute.xlu1 %3900  ;;  %4440 = vmatpush.msrb.mxu0 %v3964_v0  ;;  %4477 = vmatpush.msrb.mxu1 %v4156_v15  ;;  %v8637_v45 = vpop.f32.mrf.mxu2  ;;  %v9467_v0 = vld [vmem:[#allocation59_spill] sm:$0xff] }
 0x794   :  { %v3905_v6 = vsel %vm36_vm5, %v3893_v62, %v3901_v56  ;;  %v3909_v44 = vsel %vm36_vm5, %v3901_v56, %v3893_v62  ;;  %4563 = vmatpush.msrb.mxu3 %v3965_v47  ;;  %2061 = vperm.xlu1 %4966, %v8580_v5   ;;  %v3887_v10 = vpop.permute.xlu2 %3886  ;;  %v4197_v56 = vperm.slane %v8457_v40, 1  ;;  %v9469_v40 = vld [vmem:[#allocation13_spill] sm:$0xff] }
 0x795   :  { %v3922_v41 = vmul.f32 %v8573_v35, %v3909_v44  ;;  %v3923_v9 = vmul.f32 %v8575_v60, %v3905_v6  ;;  %4441 = vmatpush.msrb.mxu0 %v3962_v17  ;;  %4478 = vmatpush.msrb.mxu1 %v4154_v46  ;;  %v3902_v12 = vsel %vm36_vm5, %v3887_v10, %v3895_v14  ;;  %v8652_v47 = vpop.f32.mrf.mxu3  ;;  %v4262_v44 = vld [vmem:[%s9123_s3] sm:$0xff] }
 0x796   :  { %4564 = vmatpush.msrb.mxu3 %v3963_v18  ;;  %v3906_v31 = vsel %vm36_vm5, %v3895_v14, %v3887_v10  ;;  %v8659_v18 = vld [vmem:[%s9123_s3 + $0x8] sm:$0xff]  ;;  %v3917_v53 = vmul.f32 %v8575_v60, %v3902_v12  ;;  %v4207_v51 = vmul.f32 %v4197_v56, %v4193_v43  ;;  %v4205_v11 = vmul.f32 %v4197_v56, %v9469_v40  ;;  %v9472_v14 = vld [vmem:[#allocation63_spill] sm:$0xff]  ;;  %v9474_v12 = vld [vmem:[#allocation25_spill] sm:$0xff] }
 0x797   :  { %4442 = vmatpush.msrb.mxu0 %v3922_v41  ;;  %4479 = vmatpush.msrb.mxu1 %v4114_v63  ;;  %v3916_v46 = vmul.f32 %v8573_v35, %v3906_v31  ;;  %v9470_v41 = vld [vmem:[#allocation43_spill] sm:$0xff]  ;;  %v4147_v63 = vsel %vm175_vm3, %v8359_v57, %v8531_v58  ;;  %v9473_v58 = vld [vmem:[#allocation4_spill] sm:$0xff] }
 0x798   :  { %4565 = vmatpush.msrb.mxu3 %v3923_v9  ;;  %v4203_v9 = vmul.f32 %v4197_v56, %v9470_v41 }
 0x799   :  { %4480 = vmatpush.msrb.mxu1 %v4112_v36  ;;  %v9471_v36 = vld [vmem:[#allocation66_spill] sm:$0xff] }
 0x79a   :  { %v4201_v34 = vmul.f32 %v4197_v56, %v9471_v36 }
 0x79b   :  { %3202 = vperm.xlu2 %4967, %v8610_v8   ;;  %v3891_v38 = vpop.permute.xlu1 %3890  ;;  %4481 = vmatpush.msrb.mxu1 %v4110_v16  ;;  %v4265_v16 = vld [vmem:[%s9123_s3 + $0x18] sm:$0xff] }
 0x79c   :  { %v3904_v49 = vsel %vm36_vm5, %v3891_v38, %v3899_v37  ;;  %v3908_v20 = vsel %vm36_vm5, %v3899_v37, %v3891_v38  ;;  %3197 = vperm.xlu1 %4966, %v3187_v2   ;;  %v9468_v37 = vld [vmem:[#allocation57_spill] sm:$0xff]  ;;  %v4231_v6 = vpop.permute.xlu2 %4230 }
 0x79d   :  { %v3920_v50 = vmul.f32 %v8573_v35, %v3908_v20  ;;  %v3921_v61 = vmul.f32 %v8575_v60, %v3904_v49  ;;  %4482 = vmatpush.msrb.mxu1 %v4108_v52  ;;  %v8687_v55 = vpop.f32.mrf.mxu3  ;;  %v4899_v52 = vld [vmem:[%s9119_s5 + $0x10] sm:$0x3] }
 0x79e   :  { %v4243_v10 = vperm.slane %v4899_v52, 1 }
 0x79f   :  { %4443 = vmatpush.msrb.mxu0 %v3920_v50  ;;  %4566 = vmatpush.msrb.mxu3 %v3921_v61 }
 0x7a0   :  { %4483 = vmatpush.msrb.mxu1 %v9465_v22 }
 0x7a2   :  { %4484 = vmatpush.msrb.mxu1 %v9466_v25 }
 0x7a3   :  { %3222 = vperm.xlu2 %4967, %v8632_v42   ;;  %v3897_v54 = vpop.permute.xlu1 %3896 }
 0x7a4   :  { %v3903_v21 = vsel %vm36_vm5, %v8518_v4, %v3897_v54  ;;  %v3907_v15 = vsel %vm36_vm5, %v3897_v54, %v8518_v4  ;;  %4485 = vmatpush.msrb.mxu1 %v9467_v0  ;;  %3212 = vperm.xlu1 %4966, %v3190_v1   ;;  %v4221_v4 = vpop.permute.xlu0 %4220  ;;  %v4219_v57 = vpop.permute.xlu2 %4218  ;;  %v9475_v0 = vld [vmem:[#allocation70_spill] sm:$0xff] }
 0x7a5   :  { %v3918_v62 = vmul.f32 %v8573_v35, %v3907_v15  ;;  %v3919_v17 = vmul.f32 %v8575_v60, %v3903_v21  ;;  %v8679_v60 = vpop.f32.mrf.mxu2 }
 0x7a6   :  { %4486 = vmatpush.msrb.mxu1 %v9468_v37  ;;  %v4105_v37 = vperm.slane %v8571_v59, 1  ;;  %v8734_v59 = vld [vmem:[%s9122_s4 + $0x20] sm:$0xff] }
 0x7a7   :  { %4444 = vmatpush.msrb.mxu0 %v3918_v62  ;;  %4567 = vmatpush.msrb.mxu3 %v3919_v17  ;;  %v4101_v17 = vsel %vm146_vm2, %v8397_v39, %v8520_v33  ;;  %v4100_v39 = vsel %vm146_vm2, %v8383_v23, %v8436_v27  ;;  %v9476_v33 = vld [vmem:[#allocation18_spill] sm:$0xff] }
 0x7a8   :  { %4487 = vmatmul.f32.vlgmr.msrb.gmra.mxu1 %v8659_v18  ;;  %v4113_v27 = vmul.f32 %v4105_v37, %v4100_v39 }
 0x7a9   :  { %4445 = vmatpush.msrb.mxu0 %v3916_v46  ;;  %4568 = vmatpush.msrb.mxu3 %v3917_v53 }
 0x7aa   :  { %4446 = vmatmul.f32.vlgmr.msrb.gmra.mxu0 %v4262_v44  ;;  %4569 = vmatmul.f32.vlgmr.msrb.gmra.mxu3 %v4262_v44 }
 0x7ab   :  { %4368 = vperm.xlu2 %4967, %v3187_v2   ;;  %4594 = vmatpush.msra.mxu0 %v4207_v51  ;;  %v4229_v35 = vpop.permute.xlu1 %4228  ;;  %v4151_v2 = vperm.slane %v8516_v32, 1  ;;  %v4242_v32 = vperm.slane %v4899_v52, 0  ;;  %v4115_v51 = vmul.f32 %v4105_v37, %v4101_v17  ;;  %v8811_v17 = vld [vmem:[%s9123_s3 + $0x70] sm:$0xff] }
 0x7ac   :  { %3227 = vperm.xlu1 %4966, %v8676_v26   ;;  %v4227_v38 = vpop.permute.xlu0 %4226  ;;  %v4234_v61 = vsel %vm227_vm6, %v4221_v4, %v4229_v35  ;;  %v4238_v31 = vsel %vm227_vm6, %v4229_v35, %v4221_v4  ;;  %v4268_v4 = vld [vmem:[%s9123_s3 + $0x30] sm:$0xff]  ;;  %v4225_v35 = vpop.permute.xlu2 %4224 }
 0x7ad   :  { %4595 = vmatpush.msra.mxu0 %v4205_v11  ;;  %v4161_v49 = vmul.f32 %v4151_v2, %v4147_v63  ;;  %v4159_v20 = vmul.f32 %v4151_v2, %v9473_v58  ;;  %v4157_v54 = vmul.f32 %v4151_v2, %v9474_v12  ;;  %v8709_v15 = vpop.f32.mrf.mxu2  ;;  %v4155_v62 = vmul.f32 %v4151_v2, %v9475_v0  ;;  %v9479_v58 = vld [vmem:[#allocation65_spill] sm:$0xff]  ;;  %v9483_v12 = vld [vmem:[#allocation67_spill] sm:$0xff] }
 0x7ae   :  { %v4250_v43 = vmul.f32 %v4242_v32, %v4234_v61  ;;  %v4237_v56 = vsel %vm227_vm6, %v4227_v38, %v4219_v57  ;;  %v4251_v46 = vmul.f32 %v4243_v10, %v4238_v31  ;;  %v4098_v63 = vsel %vm146_vm2, %v8480_v7, %v8444_v30  ;;  %v4271_v7 = vld [vmem:[%s9123_s3 + $0x48] sm:$0xff]  ;;  %v9482_v61 = vld [vmem:[#allocation55_spill] sm:$0xff] }
 0x7af   :  { %4596 = vmatpush.msra.mxu0 %v4203_v9  ;;  %v4249_v11 = vmul.f32 %v4243_v10, %v4237_v56  ;;  %v4111_v2 = vmul.f32 %v4105_v37, %v8412_v13  ;;  %v4109_v24 = vmul.f32 %v4105_v37, %v4098_v63  ;;  %v8822_v56 = vld [vmem:[%s9123_s3 + $0x88] sm:$0xff] }
 0x7b0   :  { %4490 = vmatmul.f32.gmra.mxu1 %v9472_v14 }
 0x7b1   :  { %4597 = vmatpush.msra.mxu0 %v4201_v34 }
 0x7b2   :  { %4449 = vmatmul.f32.gmra.mxu0 %v4265_v16  ;;  %4572 = vmatmul.f32.gmra.mxu3 %v4265_v16  ;;  %v9477_v16 = vld [vmem:[#allocation64_spill] sm:$0xff] }
 0x7b3   :  { %4383 = vperm.xlu2 %4967, %v3190_v1   ;;  %4598 = vmatpush.msra.mxu0 %v4161_v49  ;;  %v4223_v50 = vpop.permute.xlu1 %4222  ;;  %v9478_v49 = vld [vmem:[#allocation60_spill] sm:$0xff] }
 0x7b4   :  { %v4235_v22 = vsel %vm227_vm6, %v4223_v50, %v4231_v6  ;;  %v4239_v25 = vsel %vm227_vm6, %v4231_v6, %v4223_v50  ;;  %4373 = vperm.xlu1 %4966, %v8610_v8   ;;  %v4233_v8 = vsel %vm227_vm6, %v4219_v57, %v4227_v38  ;;  %v8724_v6 = vpop.f32.mrf.mxu3  ;;  %v4267_v57 = vld [vmem:[%s9123_s3 + $0x28] sm:$0xff] }
 0x7b5   :  { %v4252_v21 = vmul.f32 %v4242_v32, %v4235_v22  ;;  %v4253_v1 = vmul.f32 %v4243_v10, %v4239_v25  ;;  %4599 = vmatpush.msra.mxu0 %v4159_v20  ;;  %v4248_v40 = vmul.f32 %v4242_v32, %v4233_v8  ;;  %v8757_v38 = vpop.f32.mrf.mxu2  ;;  %v9480_v20 = vld [vmem:[#allocation58_spill] sm:$0xff]  ;;  %v4270_v25 = vld [vmem:[%s9123_s3 + $0x40] sm:$0xff] }
 0x7b7   :  { %4600 = vmatpush.msra.mxu0 %v4157_v54  ;;  %4524 = vmatpush.msrb.mxu2 %v4252_v21  ;;  %v4277_v54 = vld [vmem:[%s9123_s3 + $0x78] sm:$0xff] }
 0x7b8   :  { %4647 = vmatpush.msra.mxu1 %v4253_v1  ;;  %v2355_v53 = vpop.xlane.xlu0 %2354  ;;  %v4273_v21 = vld [vmem:[%s9123_s3 + $0x58] sm:$0xff] }
 0x7b9   :  { %4601 = vmatpush.msra.mxu0 %v4155_v62  ;;  %v2375_v44 = vmul.f32 %v2355_v53, %v9476_v33  ;;  %4525 = vmatpush.msrb.mxu2 %v4250_v43  ;;  %v9484_v1 = vld [vmem:[#allocation68_spill] sm:$0xff]  ;;  %v4280_v62 = vld [vmem:[%s9123_s3 + $0x90] sm:$0xff]  ;;  %v9485_v43 = vld [vmem:[#allocation69_spill] sm:$0xff] }
 0x7ba   :  { %4648 = vmatpush.msra.mxu1 %v4251_v46  ;;  %4452 = vmatmul.f32.gmra.mxu0 %v4268_v4  ;;  %v9486_v46 = vld [vmem:[#allocation71_spill] sm:$0xff] }
 0x7bb   :  { %4819 = vst.msk [vmem:[%s9124_s6 + $0x48] sm:$0xff] %vm1211_vm12, %v2375_v44  ;;  %4398 = vperm.xlu2 %4967, %v8676_v26   ;;  %4575 = vmatmul.f32.gmra.mxu3 %v4268_v4  ;;  %v4217_v23 = vpop.permute.xlu1 %4216  ;;  %v8753_v26 = vld [vmem:[%s9123_s3 + $0x10] sm:$0xff]  ;;  %v4283_v4 = vld [vmem:[%s9123_s3 + $0xa8] sm:$0xff] }
 0x7bc   :  { %4602 = vmatpush.msra.mxu0 %v4115_v51  ;;  %v4232_v41 = vsel %vm227_vm6, %v4217_v23, %v4225_v35  ;;  %v4236_v9 = vsel %vm227_vm6, %v4225_v35, %v4217_v23  ;;  %4526 = vmatpush.msrb.mxu2 %v4248_v40  ;;  %v8765_v13 = vpop.f32.mrf.mxu3  ;;  %v8840_v40 = vld [vmem:[%s9123_s3 + $0xa0] sm:$0xff] }
 0x7bd   :  { %v4246_v36 = vmul.f32 %v4242_v32, %v4232_v41  ;;  %v4247_v34 = vmul.f32 %v4243_v10, %v4236_v9  ;;  %4649 = vmatpush.msra.mxu1 %v4249_v11  ;;  %4388 = vperm.xlu1 %4966, %v8734_v59   ;;  %v9481_v32 = vld [vmem:[#allocation56_spill] sm:$0xff]  ;;  %v4274_v10 = vld [vmem:[%s9123_s3 + $0x60] sm:$0xff]  ;;  %v8783_v50 = vpop.f32.mrf.mxu2 }
 0x7be   :  { %4493 = vmatmul.f32.gmra.mxu1 %v9477_v16  ;;  %4603 = vmatpush.msra.mxu0 %v4113_v27  ;;  %v4285_v9 = vld [vmem:[%s9123_s3 + $0xb8] sm:$0xff] }
 0x7bf   :  { %4527 = vmatpush.msrb.mxu2 %v4246_v36  ;;  %4650 = vmatpush.msra.mxu1 %v4247_v34 }
 0x7c0   :  { %4604 = vmatpush.msra.mxu0 %v4111_v2  ;;  %4900 = vmatmul.msk.f32.vlgmr.msrb.gmra.mxu2 %vm885_vm10, %v8753_v26  ;;  %v2364_v30 = vpop.xlane.xlu0 %2363 }
 0x7c1   :  { %v2378_v52 = vmul.f32 %v2364_v30, %v9476_v33 }
 0x7c2   :  { %4605 = vmatpush.msra.mxu0 %v4109_v24  ;;  %v9487_v24 = vld [vmem:[#allocation47_spill] sm:$0xff] }
 0x7c3   :  { %4822 = vst.msk [vmem:[%s9124_s6 + $0x60] sm:$0xff] %vm1211_vm12, %v2378_v52  ;;  %4455 = vmatmul.f32.gmra.mxu0 %v4271_v7  ;;  %4578 = vmatmul.f32.gmra.mxu3 %v4271_v7 }
 0x7c4   :  { %4606 = vmatpush.msra.mxu0 %v9478_v49  ;;  %v8786_v22 = vpop.f32.mrf.mxu3  ;;  %v9488_v49 = vld [vmem:[#allocation10_spill] sm:$0xff] }
 0x7c5   :  { %4403 = vperm.xlu1 %4966, %v8580_v5   ;;  %v8796_v31 = vpop.f32.mrf.mxu2 }
 0x7c6   :  { %4496 = vmatmul.f32.gmra.mxu1 %v9479_v58  ;;  %4607 = vmatpush.msra.mxu0 %v9480_v20 }
 0x7c8   :  { %4608 = vmatpush.msra.mxu0 %v9481_v32  ;;  %4901 = vmatmul.msk.f32.gmra.mxu2 %vm885_vm10, %v4267_v57 }
 0x7ca   :  { %4609 = vmatpush.msra.mxu0 %v9482_v61 }
 0x7cb   :  { %4458 = vmatmul.f32.gmra.mxu0 %v4274_v10  ;;  %4581 = vmatmul.f32.gmra.mxu3 %v4274_v10 }
 0x7cc   :  { %v8802_v0 = vpop.f32.mrf.mxu3 }
 0x7cd   :  { %v3443_v8 = vpop.f32.mrf.mxu2 }
 0x7ce   :  { %4499 = vmatmul.f32.gmra.mxu1 %v9483_v12 }
 0x7d0   :  { %4902 = vmatmul.msk.f32.gmra.mxu2 %vm885_vm10, %v4270_v25 }
 0x7d3   :  { %4461 = vmatmul.f32.gmra.mxu0 %v4277_v54  ;;  %4584 = vmatmul.f32.gmra.mxu3 %v4277_v54 }
 0x7d4   :  { %v3484_v37 = vpop.f32.mrf.mxu3 }
 0x7d5   :  { %v8826_v44 = vpop.f32.mrf.mxu2 }
 0x7d6   :  { %4502 = vmatmul.f32.gmra.mxu1 %v9484_v1 }
 0x7d8   :  { %4903 = vmatmul.msk.f32.gmra.mxu2 %vm885_vm10, %v4273_v21 }
 0x7db   :  { %4464 = vmatmul.f32.gmra.mxu0 %v4280_v62  ;;  %4587 = vmatmul.f32.gmra.mxu3 %v4280_v62 }
 0x7dc   :  { %v8834_v51 = vpop.f32.mrf.mxu3 }
 0x7de   :  { %4505 = vmatmul.f32.gmra.mxu1 %v9485_v43 }
 0x7e0   :  { %4904 = vmatmul.msk.f32.gmra.mxu2 %vm885_vm10, %v8811_v17 }
 0x7e3   :  { %4467 = vmatmul.f32.gmra.mxu0 %v4283_v4  ;;  %4590 = vmatmul.f32.gmra.mxu3 %v4283_v4  ;;  %v9490_v4 = vld [vmem:[#allocation30_spill] sm:$0xff] }
 0x7e4   :  { %v8859_v41 = vpop.f32.mrf.mxu3 }
 0x7e6   :  { %4508 = vmatmul.f32.gmra.mxu1 %v9486_v46  ;;  %v2358_v53 = vpop.xlane.xlu1 %2357 }
 0x7e7   :  { %v2376_v39 = vmul.f32 %v2358_v53, %v9476_v33 }
 0x7e8   :  { %4905 = vmatmul.msk.f32.gmra.mxu2 %vm885_vm10, %v8822_v56 }
 0x7e9   :  { %4820 = vst.msk [vmem:[%s9124_s6 + $0x50] sm:$0xff] %vm1211_vm12, %v2376_v39 }
 0x7eb   :  { %4610 = vmatmul.f32.vlgmr.msra.gmra.mxu0 %v8659_v18  ;;  %v8852_v18 = vpop.f32.mrf.mxu2 }
 0x7ee   :  { %4908 = vmatmul.msk.f32.vlgmr.msra.gmra.mxu1 %vm885_vm10, %v8753_v26  ;;  %v2361_v11 = vpop.xlane.xlu2 %2360  ;;  %v2367_v35 = vpop.xlane.xlu1 %2366 }
 0x7ef   :  { %v2377_v23 = vmul.f32 %v2361_v11, %v9476_v33  ;;  %v2379_v27 = vmul.f32 %v2367_v35, %v9476_v33  ;;  %v8875_v26 = vpop.f32.mrf.mxu3 }
 0x7f0   :  { %4906 = vmatmul.msk.f32.gmra.mxu2 %vm885_vm10, %v8840_v40 }
 0x7f1   :  { %4821 = vst.msk [vmem:[%s9124_s6 + $0x58] sm:$0xff] %vm1211_vm12, %v2377_v23  ;;  %v9493_v23 = vld [vmem:[#allocation31_spill] sm:$0xff] }
 0x7f2   :  { %4823 = vst.msk [vmem:[%s9124_s6 + $0x68] sm:$0xff] %vm1211_vm12, %v2379_v27 }
 0x7f3   :  { %4613 = vmatmul.f32.gmra.mxu0 %v9472_v14  ;;  %v8872_v14 = vpop.f32.mrf.mxu2 }
 0x7f6   :  { %4909 = vmatmul.msk.f32.gmra.mxu1 %vm885_vm10, %v4267_v57  ;;  %v2370_v63 = vpop.xlane.xlu2 %2369 }
 0x7f7   :  { %v2380_v36 = vmul.f32 %v2370_v63, %v9476_v33  ;;  %v3496_v11 = vpop.f32.mrf.mxu3 }
 0x7f8   :  { %4907 = vmatmul.msk.f32.gmra.mxu2 %vm885_vm10, %v4285_v9 }
 0x7f9   :  { %4824 = vst.msk [vmem:[%s9124_s6 + $0x70] sm:$0xff] %vm1211_vm12, %v2380_v36 }
 0x7fb   :  { %4616 = vmatmul.f32.gmra.mxu0 %v9477_v16  ;;  %v3455_v16 = vpop.f32.mrf.mxu2 }
 0x7fe   :  { %4910 = vmatmul.msk.f32.gmra.mxu1 %vm885_vm10, %v4270_v25  ;;  %v3203_v34 = vpop.permute.xlu2 %3202 }
 0x7ff   :  { %v3280_v2 = vadd.f32 %v8549_v3, %v3203_v34  ;;  %v3403_v30 = vadd.f32 %v9487_v24, %v3203_v34  ;;  %v9489_v3 = vld [vmem:[#allocation38_spill] sm:$0xff] }
 0x800   :  { %v9495_v34 = vld [vmem:[#allocation26_spill] sm:$0xff] }
 0x801   :  { %v3321_v7 = vadd.f32 %v8566_v28, %v3280_v2  ;;  %v3444_v52 = vadd.f32 %v3443_v8, %v3403_v30  ;;  %v9491_v28 = vld [vmem:[#allocation11_spill] sm:$0xff] }
 0x802   :  { %v9496_v2 = vld [vmem:[#allocation27_spill] sm:$0xff] }
 0x803   :  { %v3362_v57 = vadd.f32 %v9488_v49, %v3321_v7  ;;  %v3485_v20 = vadd.f32 %v3484_v37, %v3444_v52  ;;  %4619 = vmatmul.f32.gmra.mxu0 %v9479_v58  ;;  %v9492_v58 = vld [vmem:[#allocation48_spill] sm:$0xff] }
 0x805   :  { %v3507_v32 = vmax.f32 %v3362_v57, 0.0  ;;  %v3508_v10 = vmax.f32 %v3485_v20, 0.0 }
 0x806   :  { %4911 = vmatmul.msk.f32.gmra.mxu1 %vm885_vm10, %v4273_v21  ;;  %v3223_v61 = vpop.permute.xlu2 %3222  ;;  %v2062_v25 = vpop.permute.xlu1 %2061  ;;  %v9494_v21 = vld [vmem:[#allocation20_spill] sm:$0xff] }
 0x807   :  { %v3292_v54 = vadd.f32 %v8709_v15, %v3223_v61  ;;  %v3415_v62 = vadd.f32 %v9489_v3, %v3223_v61  ;;  %v2127_v53 = vadd.f32 %v9490_v4, %v2062_v25  ;;  %v2250_v8 = vadd.f32 %v9491_v28, %v2062_v25  ;;  %v3458_v28 = vpop.f32.mrf.mxu2 }
 0x808   :  { %v3524_v39 = vadd.f32 %v3508_v10, %v3507_v32  ;;  %v8901_v32 = vpop.f32.mrf.mxu3 }
 0x809   :  { %v3333_v37 = vadd.f32 %v8724_v6, %v3292_v54  ;;  %v2168_v35 = vadd.f32 %v9492_v58, %v2127_v53  ;;  %v2291_v27 = vadd.f32 %v9493_v23, %v2250_v8  ;;  %v3456_v63 = vadd.f32 %v3455_v16, %v3415_v62 }
 0x80a   :  { %3525 = vadd.xlane.f32.xlu2 %v3524_v39 }
 0x80b   :  { %v2209_v36 = vadd.f32 %v9494_v21, %v2168_v35  ;;  %v2332_v15 = vadd.f32 %v9495_v34, %v2291_v27  ;;  %v3374_v24 = vadd.f32 %v9496_v2, %v3333_v37  ;;  %v3497_v30 = vadd.f32 %v3496_v11, %v3456_v63  ;;  %4622 = vmatmul.f32.gmra.mxu0 %v9483_v12 }
 0x80d   :  { %v3515_v7 = vmax.f32 %v3374_v24, 0.0  ;;  %v3516_v52 = vmax.f32 %v3497_v30, 0.0  ;;  %v2348_v49 = vmax.f32 %v2209_v36, 0.0  ;;  %v2349_v57 = vmax.f32 %v2332_v15, 0.0 }
 0x80e   :  { %4912 = vmatmul.msk.f32.gmra.mxu1 %vm885_vm10, %v8811_v17  ;;  %v3198_v16 = vpop.permute.xlu1 %3197  ;;  %v3189_v17 = vld [vmem:[%s9122_s4 + $0x10] sm:$0xff]  ;;  %v4369_v61 = vpop.permute.xlu2 %4368 }
 0x80f   :  { %v8896_v6 = vadd.f32 %v3516_v52, %v3515_v7  ;;  %v2371_v20 = vadd.f32 %v2349_v57, %v2348_v49  ;;  %v8924_v39 = vpop.f32.mrf.mxu2  ;;  %v3277_v7 = vadd.f32 %v8486_v48, %v3198_v16  ;;  %v9497_v52 = vld [vmem:[#allocation23_spill] sm:$0xff] }
 0x810   :  { %v8910_v10 = vpop.f32.mrf.mxu3  ;;  %v3400_v49 = vadd.f32 %v9497_v52, %v3198_v16  ;;  %v9501_v52 = vld [vmem:[#allocation49_spill] sm:$0xff] }
 0x811   :  { %2372 = vadd.xlane.f32.xlu0 %v2371_v20 }
 0x813   :  { %4625 = vmatmul.f32.gmra.mxu0 %v9484_v1 }
 0x816   :  { %4913 = vmatmul.msk.f32.gmra.mxu1 %vm885_vm10, %v8822_v56  ;;  %v3213_v12 = vpop.permute.xlu1 %3212 }
 0x817   :  { %v3286_v48 = vadd.f32 %v8637_v45, %v3213_v12 }
 0x81b   :  { %4628 = vmatmul.f32.gmra.mxu0 %v9485_v43 }
 0x81e   :  { %4914 = vmatmul.msk.f32.gmra.mxu1 %vm885_vm10, %v8840_v40  ;;  %v8912_v1 = vpop.permute.xlu1 %3227 }
 0x81f   :  { %v3295_v45 = vadd.f32 %v8757_v38, %v8912_v1 }
 0x823   :  { %4631 = vmatmul.f32.gmra.mxu0 %v9486_v46 }
 0x825   :  { %3207 = vperm.xlu0 %4968, %v3189_v17   ;;  %v4488_v56 = vpop.f32.mrf.mxu1 }
 0x826   :  { %4915 = vmatmul.msk.f32.gmra.mxu1 %vm885_vm10, %v4285_v9  ;;  %v8916_v3 = vpop.permute.xlu1 %4373 }
 0x827   :  { %v4447_v25 = vpop.f32.mrf.mxu0 }
 0x828   :  { %v4448_v43 = vadd.f32 %v4447_v25, %v4369_v61 }
 0x82a   :  { %v4489_v54 = vadd.f32 %v4488_v56, %v4448_v43 }
 0x82d   :  { %3217 = vperm.xlu0 %4968, %v8734_v59   ;;  %v4570_v40 = vpop.f32.mrf.mxu3  ;;  %v4491_v46 = vpop.f32.mrf.mxu1 }
 0x82e   :  { %v4571_v62 = vadd.f32 %v4570_v40, %v4369_v61  ;;  %v8928_v59 = vpop.permute.xlu2 %4383 }
 0x82f   :  { %v4450_v4 = vpop.f32.mrf.mxu0 }
 0x830   :  { %v4451_v53 = vadd.f32 %v4450_v4, %v8916_v3 }
 0x832   :  { %v8919_v8 = vadd.f32 %v4491_v46, %v4451_v53  ;;  %v9500_v46 = vld [vmem:[#allocation51_spill] sm:$0xff] }
 0x833   :  { %v3409_v16 = vadd.f32 %v9500_v46, %v3213_v12  ;;  %v9502_v12 = vld [vmem:[#allocation21_spill] sm:$0xff] }
 0x835   :  { %3232 = vperm.xlu0 %4968, %v8580_v5   ;;  %v4573_v56 = vpop.f32.mrf.mxu3 }
 0x836   :  { %v8942_v15 = vpop.permute.xlu2 %4398 }
 0x837   :  { %v8922_v9 = vpop.f32.mrf.mxu0 }
 0x83b   :  { %v8926_v11 = vpop.f32.mrf.mxu1 }
 0x83d   :  { %4378 = vperm.xlu0 %4968, %v3189_v17   ;;  %v3441_v17 = vadd.f32 %v8796_v31, %v3400_v49  ;;  %v3450_v31 = vadd.f32 %v8852_v18, %v3409_v16  ;;  %v9503_v16 = vld [vmem:[#allocation53_spill] sm:$0xff] }
 0x83f   :  { %v3482_v4 = vadd.f32 %v8802_v0, %v3441_v17  ;;  %v3491_v0 = vadd.f32 %v8859_v41, %v3450_v31 }
 0x840   :  { %v4456_v37 = vpop.f32.mrf.mxu0 }
 0x841   :  { %v4457_v58 = vadd.f32 %v4456_v37, %v8928_v59 }
 0x843   :  { %v4497_v35 = vpop.f32.mrf.mxu1  ;;  %v4529_v23 = vpop.f32.mrf.mxu2 }
 0x844   :  { %v8931_v27 = vadd.f32 %v4497_v35, %v4457_v58  ;;  %v4530_v63 = vadd.f32 %v4529_v23, %v4489_v54  ;;  %v9499_v54 = vld [vmem:[#allocation45_spill] sm:$0xff]  ;;  %v3506_v58 = vmax.f32 %v3482_v4, 0.0  ;;  %v3327_v35 = vadd.f32 %v8652_v47, %v3286_v48 }
 0x845   :  { %4393 = vperm.xlu0 %4968, %v8632_v42   ;;  %v9498_v42 = vld [vmem:[#allocation37_spill] sm:$0xff]  ;;  %v3512_v48 = vmax.f32 %v3491_v0, 0.0 }
 0x846   :  { %v3318_v20 = vadd.f32 %v9498_v42, %v3277_v7  ;;  %v3368_v49 = vadd.f32 %v9501_v52, %v3327_v35  ;;  %v3418_v42 = vadd.f32 %v9502_v12, %v8912_v1  ;;  %v4676_v47 = vmax.f32 %v4530_v63, 0.0 }
 0x848   :  { %v8934_v5 = vpop.f32.mrf.mxu0  ;;  %v3359_v40 = vadd.f32 %v9499_v54, %v3318_v20  ;;  %v3336_v54 = vadd.f32 %v8765_v13, %v3295_v45  ;;  %v3511_v4 = vmax.f32 %v3368_v49, 0.0 }
 0x84a   :  { %v3505_v37 = vmax.f32 %v3359_v40, 0.0  ;;  %v3459_v40 = vadd.f32 %v3458_v28, %v3418_v42  ;;  %v3377_v38 = vadd.f32 %v9503_v16, %v3336_v54  ;;  %v3530_v1 = vadd.f32 %v3512_v48, %v3511_v4  ;;  %v4389_v42 = vpop.permute.xlu1 %4388 }
 0x84b   :  { %v8936_v21 = vpop.f32.mrf.mxu1  ;;  %v4532_v25 = vpop.f32.mrf.mxu2 }
 0x84c   :  { %v3521_v7 = vadd.f32 %v3506_v58, %v3505_v37  ;;  %v4574_v37 = vadd.f32 %v4573_v56, %v8916_v3  ;;  %v4533_v49 = vadd.f32 %v4532_v25, %v8919_v8 }
 0x850   :  { %v8938_v36 = vpop.f32.mrf.mxu0 }
 0x853   :  { %v8940_v34 = vpop.f32.mrf.mxu1  ;;  %v8969_v20 = vpop.f32.mrf.mxu2 }
 0x858   :  { %v4465_v2 = vpop.f32.mrf.mxu0 }
 0x859   :  { %v4466_v24 = vadd.f32 %v4465_v2, %v8942_v15  ;;  %v8961_v2 = vpop.f32.mrf.mxu3 }
 0x85b   :  { %v4506_v30 = vpop.f32.mrf.mxu1  ;;  %v4538_v63 = vpop.f32.mrf.mxu2 }
 0x85c   :  { %v8947_v57 = vadd.f32 %v4506_v30, %v4466_v24  ;;  %v4539_v12 = vadd.f32 %v4538_v63, %v8931_v27 }
 0x860   :  { %v8951_v61 = vpop.f32.mrf.mxu0 }
 0x861   :  { %v4579_v46 = vpop.f32.mrf.mxu3 }
 0x863   :  { %v8953_v43 = vpop.f32.mrf.mxu1  ;;  %v4541_v56 = vpop.f32.mrf.mxu2 }
 0x868   :  { %v4611_v53 = vpop.f32.mrf.mxu0 }
 0x869   :  { %v4612_v23 = vadd.f32 %v4611_v53, %v4571_v62  ;;  %v3500_v53 = vadd.f32 %v8901_v32, %v3459_v40  ;;  %v4580_v32 = vadd.f32 %v4579_v46, %v8928_v59  ;;  %v4682_v40 = vmax.f32 %v4539_v12, 0.0 }
 0x86b   :  { %v4652_v24 = vpop.f32.mrf.mxu1  ;;  %v3518_v35 = vmax.f32 %v3500_v53, 0.0  ;;  %v9000_v53 = vpop.f32.mrf.mxu2 }
 0x86c   :  { %v4653_v30 = vadd.f32 %v4652_v24, %v4612_v23  ;;  %v3517_v23 = vmax.f32 %v3377_v38, 0.0 }
 0x86e   :  { %v4677_v18 = vmax.f32 %v4653_v30, 0.0  ;;  %v3539_v30 = vadd.f32 %v3518_v35, %v3517_v23 }
 0x86f   :  { %3522 = vadd.xlane.f32.xlu0 %v3521_v7  ;;  %v4582_v7 = vpop.f32.mrf.mxu3 }
 0x870   :  { %v8971_v62 = vadd.f32 %v4677_v18, %v4676_v47  ;;  %v4614_v17 = vpop.f32.mrf.mxu0  ;;  %v4678_v47 = vmax.f32 %v4533_v49, 0.0  ;;  %v4583_v48 = vadd.f32 %v4582_v7, %v4389_v42  ;;  %v9504_v49 = vld [vmem:[#allocation42_spill] sm:$0xff] }
 0x871   :  { %v4615_v31 = vadd.f32 %v4614_v17, %v4574_v37  ;;  %v4460_v17 = vadd.f32 %v8934_v5, %v4389_v42 }
 0x873   :  { %v4655_v41 = vpop.f32.mrf.mxu1  ;;  %v4501_v27 = vadd.f32 %v8936_v21, %v4460_v17  ;;  %v4547_v21 = vpop.f32.mrf.mxu2 }
 0x874   :  { %v4656_v28 = vadd.f32 %v4655_v41, %v4615_v31 }
 0x875   :  { %v4542_v38 = vadd.f32 %v4541_v56, %v4501_v27 }
 0x876   :  { %v4679_v0 = vmax.f32 %v4656_v28, 0.0 }
 0x877   :  { %3531 = vadd.xlane.f32.xlu0 %v3530_v1  ;;  %v8996_v41 = vpop.f32.mrf.mxu3  ;;  %v4684_v63 = vmax.f32 %v4542_v38, 0.0 }
 0x878   :  { %v8977_v58 = vpop.f32.mrf.mxu0  ;;  %v4695_v8 = vadd.f32 %v4679_v0, %v4678_v47  ;;  %v4404_v0 = vpop.permute.xlu1 %4403 }
 0x879   :  { %v4469_v47 = vadd.f32 %v8951_v61, %v4404_v0 }
 0x87b   :  { %v8979_v13 = vpop.f32.mrf.mxu1  ;;  %v4550_v27 = vpop.f32.mrf.mxu2 }
 0x87d   :  { %v3526_v24 = vpop.xlane.xlu2 %3525 }
 0x87e   :  { %v3546_v52 = vmul.f32 %v3526_v24, %v9476_v33 }
 0x87f   :  { %3540 = vadd.xlane.f32.xlu0 %v3539_v30  ;;  %v4588_v28 = vpop.f32.mrf.mxu3 }
 0x880   :  { %4868 = vst.msk [vmem:[%s9124_s6 + $0x88] sm:$0xff] %vm1211_vm12, %v3546_v52  ;;  %v4620_v3 = vpop.f32.mrf.mxu0  ;;  %v4589_v30 = vadd.f32 %v4588_v28, %v8942_v15  ;;  %v9507_v28 = vld [vmem:[#allocation29_spill] sm:$0xff] }
 0x881   :  { %v4621_v45 = vadd.f32 %v4620_v3, %v4580_v32 }
 0x883   :  { %v4661_v18 = vpop.f32.mrf.mxu1 }
 0x884   :  { %v4662_v59 = vadd.f32 %v4661_v18, %v4621_v45  ;;  %v2373_v54 = vpop.xlane.xlu0 %2372  ;;  %v4548_v45 = vadd.f32 %v4547_v21, %v8947_v57 }
 0x885   :  { %v2381_v25 = vmul.f32 %v2373_v54, %v9476_v33 }
 0x886   :  { %v4683_v4 = vmax.f32 %v4662_v59, 0.0  ;;  %v9505_v59 = vld [vmem:[#allocation50_spill] sm:$0xff] }
 0x887   :  { %4825 = vst.msk [vmem:[%s9124_s6 + $0x78] sm:$0xff] %vm1211_vm12, %v2381_v25  ;;  %4696 = vadd.xlane.f32.xlu0 %v4695_v8  ;;  %v4591_v17 = vpop.f32.mrf.mxu3 }
 0x888   :  { %v8998_v46 = vadd.f32 %v4683_v4, %v4682_v40  ;;  %v4623_v5 = vpop.f32.mrf.mxu0  ;;  %v4592_v57 = vadd.f32 %v4591_v17, %v4404_v0  ;;  %v9508_v0 = vld [vmem:[#allocation52_spill] sm:$0xff] }
 0x889   :  { %v4624_v16 = vadd.f32 %v4623_v5, %v4583_v48  ;;  %v4510_v48 = vadd.f32 %v8953_v43, %v4469_v47 }
 0x88b   :  { %v4664_v1 = vpop.f32.mrf.mxu1 }
 0x88c   :  { %v4665_v37 = vadd.f32 %v4664_v1, %v4624_v16  ;;  %v9506_v16 = vld [vmem:[#allocation40_spill] sm:$0xff] }
 0x88e   :  { %v4685_v35 = vmax.f32 %v4665_v37, 0.0 }
 0x890   :  { %v4704_v31 = vadd.f32 %v4685_v35, %v4684_v63  ;;  %v9002_v23 = vpop.f32.mrf.mxu0  ;;  %v4551_v63 = vadd.f32 %v4550_v27, %v4510_v48 }
 0x892   :  { %4705 = vadd.xlane.f32.xlu0 %v4704_v31 }
 0x893   :  { %v9004_v24 = vpop.f32.mrf.mxu1 }
 0x897   :  { %v3208_v7 = vpop.permute.xlu0 %3207 }
 0x898   :  { %v4629_v52 = vpop.f32.mrf.mxu0  ;;  %v3283_v32 = vadd.f32 %v8605_v29, %v3208_v7  ;;  %v3406_v3 = vadd.f32 %v9504_v49, %v3208_v7  ;;  %v4688_v29 = vmax.f32 %v4548_v45, 0.0  ;;  %v4690_v7 = vmax.f32 %v4551_v63, 0.0 }
 0x899   :  { %v4630_v56 = vadd.f32 %v4629_v52, %v4589_v30 }
 0x89a   :  { %v3324_v12 = vadd.f32 %v8619_v19, %v3283_v32  ;;  %v3447_v42 = vadd.f32 %v8826_v44, %v3406_v3 }
 0x89b   :  { %v4670_v18 = vpop.f32.mrf.mxu1 }
 0x89c   :  { %v3365_v15 = vadd.f32 %v9505_v59, %v3324_v12  ;;  %v3488_v54 = vadd.f32 %v8834_v51, %v3447_v42  ;;  %v4671_v8 = vadd.f32 %v4670_v18, %v4630_v56 }
 0x89e   :  { %v4689_v25 = vmax.f32 %v4671_v8, 0.0  ;;  %v3509_v40 = vmax.f32 %v3365_v15, 0.0  ;;  %v3510_v4 = vmax.f32 %v3488_v54, 0.0 }
 0x89f   :  { %v3218_v19 = vpop.permute.xlu0 %3217 }
 0x8a0   :  { %v4710_v5 = vadd.f32 %v4689_v25, %v4688_v29  ;;  %v4632_v44 = vpop.f32.mrf.mxu0  ;;  %v3289_v61 = vadd.f32 %v8679_v60, %v3218_v19  ;;  %v3412_v38 = vadd.f32 %v9506_v16, %v3218_v19  ;;  %v3527_v1 = vadd.f32 %v3510_v4, %v3509_v40 }
 0x8a1   :  { %v4633_v37 = vadd.f32 %v4632_v44, %v4592_v57 }
 0x8a2   :  { %v3330_v51 = vadd.f32 %v8687_v55, %v3289_v61  ;;  %v3453_v35 = vadd.f32 %v8872_v14, %v3412_v38  ;;  %3528 = vadd.xlane.f32.xlu1 %v3527_v1 }
 0x8a3   :  { %v4673_v31 = vpop.f32.mrf.mxu1 }
 0x8a4   :  { %v3371_v43 = vadd.f32 %v9507_v28, %v3330_v51  ;;  %v3494_v21 = vadd.f32 %v8875_v26, %v3453_v35  ;;  %v4674_v30 = vadd.f32 %v4673_v31, %v4633_v37  ;;  %v9509_v26 = vld [vmem:[#allocation54_spill] sm:$0xff] }
 0x8a6   :  { %v4691_v52 = vmax.f32 %v4674_v30, 0.0  ;;  %v3513_v32 = vmax.f32 %v3371_v43, 0.0  ;;  %v3514_v60 = vmax.f32 %v3494_v21, 0.0 }
 0x8a7   :  { %v3233_v49 = vpop.permute.xlu0 %3232 }
 0x8a8   :  { %v4713_v3 = vadd.f32 %v4691_v52, %v4690_v7  ;;  %v3298_v56 = vadd.f32 %v8783_v50, %v3233_v49  ;;  %v3421_v45 = vadd.f32 %v9508_v0, %v3233_v49  ;;  %v3533_v55 = vadd.f32 %v3514_v60, %v3513_v32 }
 0x8aa   :  { %v3339_v14 = vadd.f32 %v8786_v22, %v3298_v56  ;;  %v3462_v12 = vadd.f32 %v8924_v39, %v3421_v45  ;;  %4714 = vadd.xlane.f32.xlu0 %v4713_v3  ;;  %3537 = vadd.xlane.f32.xlu1 %v8896_v6 }
 0x8ab   :  { %3534 = vadd.xlane.f32.xlu2 %v3533_v55 }
 0x8ac   :  { %v3380_v42 = vadd.f32 %v9509_v26, %v3339_v14  ;;  %v3503_v47 = vadd.f32 %v8910_v10, %v3462_v12 }
 0x8ae   :  { %v3519_v18 = vmax.f32 %v3380_v42, 0.0  ;;  %v3520_v17 = vmax.f32 %v3503_v47, 0.0 }
 0x8af   :  { %v4379_v59 = vpop.permute.xlu0 %4378 }
 0x8b0   :  { %v4454_v50 = vadd.f32 %v8922_v9, %v4379_v59  ;;  %v4577_v15 = vadd.f32 %v8961_v2, %v4379_v59  ;;  %v3542_v54 = vadd.f32 %v3520_v17, %v3519_v18 }
 0x8b2   :  { %v4495_v22 = vadd.f32 %v8926_v11, %v4454_v50  ;;  %v4618_v39 = vadd.f32 %v8977_v58, %v4577_v15  ;;  %4693 = vadd.xlane.f32.xlu1 %v8971_v62 }
 0x8b3   :  { %3543 = vadd.xlane.f32.xlu2 %v3542_v54 }
 0x8b4   :  { %v4536_v6 = vadd.f32 %v8969_v20, %v4495_v22  ;;  %v4659_v8 = vadd.f32 %v8979_v13, %v4618_v39 }
 0x8b6   :  { %v4680_v10 = vmax.f32 %v4536_v6, 0.0  ;;  %v4681_v29 = vmax.f32 %v4659_v8, 0.0 }
 0x8b7   :  { %v4394_v25 = vpop.permute.xlu0 %4393 }
 0x8b8   :  { %v4463_v40 = vadd.f32 %v8938_v36, %v4394_v25  ;;  %v4586_v9 = vadd.f32 %v8996_v41, %v4394_v25  ;;  %v4698_v2 = vadd.f32 %v4681_v29, %v4680_v10 }
 0x8ba   :  { %v4504_v4 = vadd.f32 %v8940_v34, %v4463_v40  ;;  %v4627_v11 = vadd.f32 %v9002_v23, %v4586_v9  ;;  %4702 = vadd.xlane.f32.xlu1 %v8998_v46 }
 0x8bb   :  { %4699 = vadd.xlane.f32.xlu2 %v4698_v2 }
 0x8bc   :  { %v4545_v62 = vadd.f32 %v9000_v53, %v4504_v4  ;;  %v4668_v20 = vadd.f32 %v9004_v24, %v4627_v11 }
 0x8be   :  { %v4686_v58 = vmax.f32 %v4545_v62, 0.0  ;;  %v4687_v13 = vmax.f32 %v4668_v20, 0.0 }
 0x8c0   :  { %v4707_v48 = vadd.f32 %v4687_v13, %v4686_v58 }
 0x8c2   :  { %4711 = vadd.xlane.f32.xlu1 %v4710_v5 }
 0x8c3   :  { %4708 = vadd.xlane.f32.xlu2 %v4707_v48 }
 0x8e2   :  { %v3523_v36 = vpop.xlane.xlu0 %3522 }
 0x8e3   :  { %v3545_v41 = vmul.f32 %v3523_v36, %v9476_v33 }
 0x8e5   :  { %4867 = vst.msk [vmem:[%s9124_s6 + $0x80] sm:$0xff] %vm1211_vm12, %v3545_v41 }
 0x8ea   :  { %v3532_v34 = vpop.xlane.xlu0 %3531 }
 0x8eb   :  { %v3548_v46 = vmul.f32 %v3532_v34, %v9476_v33 }
 0x8ed   :  { %4870 = vst.msk [vmem:[%s9124_s6 + $0x98] sm:$0xff] %vm1211_vm12, %v3548_v46 }
 0x8f2   :  { %v3541_v53 = vpop.xlane.xlu0 %3540 }
 0x8f3   :  { %v3551_v23 = vmul.f32 %v3541_v53, %v9476_v33 }
 0x8f5   :  { %4873 = vst.msk [vmem:[%s9124_s6 + $0xb0] sm:$0xff] %vm1211_vm12, %v3551_v23 }
 0x8fa   :  { %v4697_v24 = vpop.xlane.xlu0 %4696 }
 0x8fb   :  { %v4717_v57 = vmul.f32 %v4697_v24, %v9476_v33 }
 0x8fd   :  { %4917 = vst.msk [vmem:[%s9124_s6 + $0xc8] sm:$0xff] %vm1211_vm12, %v4717_v57 }
 0x905   :  { %v4706_v27 = vpop.xlane.xlu0 %4705 }
 0x906   :  { %v4720_v19 = vmul.f32 %v4706_v27, %v9476_v33 }
 0x908   :  { %4920 = vst.msk [vmem:[%s9124_s6 + $0xe0] sm:$0xff] %vm1211_vm12, %v4720_v19 }
 0x915   :  { %v3529_v5 = vpop.xlane.xlu1 %3528 }
 0x916   :  { %v3547_v44 = vmul.f32 %v3529_v5, %v9476_v33 }
 0x918   :  { %4869 = vst.msk [vmem:[%s9124_s6 + $0x90] sm:$0xff] %vm1211_vm12, %v3547_v44 }
 0x91d   :  { %v4715_v61 = vpop.xlane.xlu0 %4714  ;;  %v3538_v16 = vpop.xlane.xlu1 %3537 }
 0x91e   :  { %v4723_v38 = vmul.f32 %v4715_v61, %v9476_v33  ;;  %v3550_v1 = vmul.f32 %v3538_v16, %v9476_v33  ;;  %v3535_v37 = vpop.xlane.xlu2 %3534 }
 0x91f   :  { %v3549_v63 = vmul.f32 %v3535_v37, %v9476_v33 }
 0x920   :  { %4923 = vst.msk [vmem:[%s9124_s6 + $0xf8] sm:$0xff] %vm1211_vm12, %v4723_v38 }
 0x921   :  { %4872 = vst.msk [vmem:[%s9124_s6 + $0xa8] sm:$0xff] %vm1211_vm12, %v3550_v1 }
 0x922   :  { %4871 = vst.msk [vmem:[%s9124_s6 + $0xa0] sm:$0xff] %vm1211_vm12, %v3549_v63 }
 0x925   :  { %v4694_v51 = vpop.xlane.xlu1 %4693 }
 0x926   :  { %v4716_v35 = vmul.f32 %v4694_v51, %v9476_v33  ;;  %v3544_v31 = vpop.xlane.xlu2 %3543 }
 0x927   :  { %v3552_v28 = vmul.f32 %v3544_v31, %v9476_v33 }
 0x928   :  { %4916 = vst.msk [vmem:[%s9124_s6 + $0xc0] sm:$0xff] %vm1211_vm12, %v4716_v35 }
 0x929   :  { %4874 = vst.msk [vmem:[%s9124_s6 + $0xb8] sm:$0xff] %vm1211_vm12, %v3552_v28 }
 0x92d   :  { %v4703_v43 = vpop.xlane.xlu1 %4702 }
 0x92e   :  { %v4719_v21 = vmul.f32 %v4703_v43, %v9476_v33  ;;  %v4700_v30 = vpop.xlane.xlu2 %4699 }
 0x92f   :  { %v4718_v7 = vmul.f32 %v4700_v30, %v9476_v33 }
 0x930   :  { %4919 = vst.msk [vmem:[%s9124_s6 + $0xd8] sm:$0xff] %vm1211_vm12, %v4719_v21 }
 0x931   :  { %4918 = vst.msk [vmem:[%s9124_s6 + $0xd0] sm:$0xff] %vm1211_vm12, %v4718_v7 }
 0x935   :  { %v4712_v52 = vpop.xlane.xlu1 %4711 }
 0x936   :  { %v4722_v32 = vmul.f32 %v4712_v52, %v9476_v33  ;;  %v4709_v60 = vpop.xlane.xlu2 %4708 }
 0x937   :  { %v4721_v49 = vmul.f32 %v4709_v60, %v9476_v33 }
 0x938   :  { %4922 = vst.msk [vmem:[%s9124_s6 + $0xf0] sm:$0xff] %vm1211_vm12, %v4722_v32 }
 0x939   :  { %4921 = vst.msk [vmem:[%s9124_s6 + $0xe8] sm:$0xff] %vm1211_vm12, %v4721_v49 }

</bundles_post_ra>
